<compile_context>
chip_gen: v6e
topology: v6e:2x2x1
jax: 0.10.0
libtpu: 0.0.40
codegen_flags: <defaults>
</compile_context>

<pallas_src>
import math
import functools

import numpy as np
import jax
import jax.numpy as jnp
from jax import lax
from jax.experimental import pallas as pl
from jax.experimental.pallas import tpu as pltpu


# ----------------------------- configuration (small test sizes) -------------
IMG = 16          # img_size
PATCH = 8         # patch_size
CIN = 4           # in_chans
EMBED = 32        # embed_dim
DEPTH = 4         # depth
HEADS = 4         # num_heads
HEAD_DIM = EMBED // HEADS
MLP_RATIO = 4.0
HIDDEN = int(EMBED * MLP_RATIO)
NUM_FSM = 2
NUM_PREFIX = DEPTH - NUM_FSM
NUM_PATCHES = (IMG // PATCH) ** 2
MASK_NUM_IMGC = NUM_PATCHES + 1         # int((img/patch)^2) + 1
N_TOKENS = NUM_PATCHES + 2              # cls + patches + task token

_COMPILER_PARAMS = pltpu.CompilerParams(vmem_limit_bytes=32 * 1024 * 1024)


# ----------------------------- sinusoid positional table --------------------
def get_sinusoid_encoding_table(n_position, d_hid):
    def angle_vec(pos):
        return [pos / np.power(10000, 2 * (j // 2) / d_hid) for j in range(d_hid)]
    table = np.array([angle_vec(p) for p in range(n_position)], dtype=np.float64)
    table[:, 0::2] = np.sin(table[:, 0::2])
    table[:, 1::2] = np.cos(table[:, 1::2])
    return jnp.asarray(table, dtype=jnp.float32)[None]   # (1, n_position, d_hid)


# ----------------------------- in-kernel math helpers ------------------------
def _layernorm(x, g, b, eps=1e-5):
    mu = jnp.mean(x, axis=-1, keepdims=True)
    var = jnp.mean((x - mu) ** 2, axis=-1, keepdims=True)
    return (x - mu) * lax.rsqrt(var + eps) * g + b


def _gelu(x):                              # exact (erf) GELU == nn.GELU default
    return 0.5 * x * (1.0 + lax.erf(x * (1.0 / math.sqrt(2.0))))


def _block_apply(x2, *, B, N, C, H, HD,
                 ln1_g, ln1_b, wq, wk, wv, wproj, bproj,
                 ln2_g, ln2_b, wfc1, bfc1, wfc2, bfc2, policies=None):
    """One transformer Block applied to the flat (B*N, C) token slab.

    wq/wk/wv: (H, C, HD) pre-split per head (scale folded into wq);
    wproj   : (H, HD, C) pre-split per head so head outputs are recombined by
              accumulation instead of a lane-dim concat.
    policies: None (plain softmax) or list of B per-batch (N, N) attn policies.
    """
    xn = _layernorm(x2, ln1_g, ln1_b)
    outs = [jnp.zeros((N, C), jnp.float32) for _ in range(B)]
    for h in range(H):                      # static unroll (H=4)
        qf = jnp.dot(xn, wq[h], preferred_element_type=jnp.float32)   # (B*N, HD)
        kf = jnp.dot(xn, wk[h], preferred_element_type=jnp.float32)
        vf = jnp.dot(xn, wv[h], preferred_element_type=jnp.float32)
        for b in range(B):                  # static unroll (B=2)
            q = qf[b * N:(b + 1) * N, :]
            k = kf[b * N:(b + 1) * N, :]
            v = vf[b * N:(b + 1) * N, :]
            s = lax.dot_general(q, k, (((1,), (1,)), ((), ())),
                                preferred_element_type=jnp.float32)   # (N, N)
            m = jnp.max(s, axis=-1, keepdims=True)
            e = jnp.exp(s - m)
            if policies is not None:                                  # softmax_with_policy
                e = e * policies[b]
                a = (e + 1e-6 / N) / (jnp.sum(e, axis=-1, keepdims=True) + 1e-6)
            else:                                                     # plain softmax
                a = e / jnp.sum(e, axis=-1, keepdims=True)
            av = jnp.dot(a, v, preferred_element_type=jnp.float32)    # (N, HD)
            outs[b] = outs[b] + jnp.dot(av, wproj[h],
                                        preferred_element_type=jnp.float32)
    attn_out = jnp.concatenate(outs, axis=0)                          # (B*N, C)
    x2 = x2 + attn_out + bproj

    xn2 = _layernorm(x2, ln2_g, ln2_b)
    hmid = _gelu(jnp.dot(xn2, wfc1, preferred_element_type=jnp.float32) + bfc1)
    mlp = jnp.dot(hmid, wfc2, preferred_element_type=jnp.float32) + bfc2
    return x2 + mlp


# ----------------------------- kernel 1: patch-embed + prefix blocks ----------
def _prefix_kernel(patches_ref, wpat_ref, bpat_ref, cls_ref, task_ref, pos_ref,
                   ln1_g_ref, ln1_b_ref, wq_ref, wk_ref, wv_ref, wproj_ref,
                   bproj_ref, ln2_g_ref, ln2_b_ref, wfc1_ref, bfc1_ref,
                   wfc2_ref, bfc2_ref, x_out_ref, *, B, P, N, C, H, HD, L):
    # PatchEmbed (stride==kernel conv as a matmul on pre-extracted patches).
    emb = jnp.dot(patches_ref[...], wpat_ref[...],
                  preferred_element_type=jnp.float32) + bpat_ref[...]   # (B*P, C)

    pos = pos_ref[...]                      # (P+1, C)
    cls_tok = cls_ref[...] + pos[0:1, :]    # (1, C)
    pos_pat = pos[1:, :]                    # (P, C)
    task_tok = task_ref[...]                # (1, C)

    rows = []
    for b in range(B):
        rows.append(cls_tok)
        rows.append(emb[b * P:(b + 1) * P, :] + pos_pat)
        rows.append(task_tok)
    x2 = jnp.concatenate(rows, axis=0)      # (B*N, C)

    for l in range(L):                      # static unroll over fused layers
        x2 = _block_apply(
            x2, B=B, N=N, C=C, H=H, HD=HD,
            ln1_g=ln1_g_ref[l], ln1_b=ln1_b_ref[l],
            wq=wq_ref[l], wk=wk_ref[l], wv=wv_ref[l],
            wproj=wproj_ref[l], bproj=bproj_ref[l],
            ln2_g=ln2_g_ref[l], ln2_b=ln2_b_ref[l],
            wfc1=wfc1_ref[l], bfc1=bfc1_ref[l],
            wfc2=wfc2_ref[l], bfc2=bfc2_ref[l],
            policies=None)

    x_out_ref[...] = x2


def _run_prefix(prep, patches):
    B = patches.shape[0] // NUM_PATCHES
    s = prep['stack']
    kernel = functools.partial(_prefix_kernel, B=B, P=NUM_PATCHES, N=N_TOKENS,
                               C=EMBED, H=HEADS, HD=HEAD_DIM, L=NUM_PREFIX)
    return pl.pallas_call(
        kernel,
        out_shape=jax.ShapeDtypeStruct((B * N_TOKENS, EMBED), jnp.float32),
        compiler_params=_COMPILER_PARAMS,
    )(patches, prep['patch_w'], prep['patch_b'], prep['cls'], prep['task'],
      prep['pos'],
      s['ln1_g'], s['ln1_b'], s['wq'], s['wk'], s['wv'], s['wproj'], s['bproj'],
      s['ln2_g'], s['ln2_b'], s['wfc1'], s['bfc1'], s['wfc2'], s['bfc2'])


# ----------------------------- kernel 2: FSM step (mask_gen + policy block) ---
def _fsm_step_kernel(x_ref, prev_m_ref, noise_ref, gum_ref,
                     mg_ln_g, mg_ln_b, mg_in_w, mg_in_b,
                     mg_w1, mg_b1, mg_w2, mg_b2, mg_w3, mg_b3,
                     ln1_g, ln1_b, wq, wk, wv, wproj, bproj,
                     ln2_g, ln2_b, wfc1, bfc1, wfc2, bfc2,
                     norm_g, norm_b,
                     x_out_ref, m_out_ref,
                     *, B, N, C, H, HD, apply_final_norm):
    Nm = N - 1
    Ch = C // 2
    x2 = x_ref[...]                          # (B*N, C)
    noise = noise_ref[...]                   # (1, C//2)

    policies = []
    for b in range(B):                       # static unroll (B=2)
        # ---- mask_gen on tokens 1..N-1 of batch b ----
        xb = x2[b * N + 1:(b + 1) * N, :]                      # (Nm, C)
        pm = prev_m_ref[b]                                      # (Nm, 1)
        xn = _layernorm(xb, mg_ln_g[...], mg_ln_b[...])
        x1 = _gelu(jnp.dot(xn, mg_in_w[...],
                           preferred_element_type=jnp.float32) + mg_in_b[...])
        local_x = x1[:, :Ch]
        glob_in = x1[:, Ch:]
        # NOTE: matches PyTorch exactly; if every token is masked this divides
        # by zero just like the original (the result never reaches x).
        denom = jnp.sum(pm, axis=0, keepdims=True)              # (1, 1)
        global_x = jnp.sum(glob_in * pm, axis=0, keepdims=True) / denom  # (1, Ch)
        xc = jnp.concatenate(
            [local_x,
             jnp.broadcast_to(global_x, (Nm, Ch)),
             jnp.broadcast_to(noise, (Nm, Ch))], axis=-1)        # (Nm, C + C//2)
        h1 = _gelu(jnp.dot(xc, mg_w1[...],
                           preferred_element_type=jnp.float32) + mg_b1[...])
        h2 = _gelu(jnp.dot(h1, mg_w2[...],
                           preferred_element_type=jnp.float32) + mg_b2[...])
        logits = jnp.dot(h2, mg_w3[...],
                         preferred_element_type=jnp.float32) + mg_b3[...]  # (Nm, 2)
        lmax = jnp.max(logits, axis=-1, keepdims=True)
        lse = jnp.log(jnp.sum(jnp.exp(logits - lmax), axis=-1, keepdims=True))
        prob = logits - lmax - lse                               # log_softmax

        # ---- F.gumbel_softmax(hard=True)[..., 0:1] : argmax of (prob + g) ----
        y = prob + gum_ref[b]                                    # (Nm, 2)
        hard0 = (y[:, 0:1] >= y[:, 1:2]).astype(jnp.float32)     # (Nm, 1)
        curr_m = hard0 * pm                                      # (Nm, 1)
        m_out_ref[b] = curr_m

        # ---- build softmax_with_policy attention policy for this batch ----
        pol_col = jnp.concatenate(
            [jnp.ones((1, 1), jnp.float32), curr_m], axis=0)     # (N, 1)
        # pol_bc[i, j] = pol_col[j]  (row-broadcast via a tiny MXU matmul,
        # avoids any transpose/relayout)
        pol_bc = lax.dot_general(jnp.ones((N, 1), jnp.float32), pol_col,
                                 (((1,), (1,)), ((), ())),
                                 preferred_element_type=jnp.float32)  # (N, N)
        ri = lax.broadcasted_iota(jnp.int32, (N, N), 0)
        ci = lax.broadcasted_iota(jnp.int32, (N, N), 1)
        eye = (ri == ci).astype(jnp.float32)
        policies.append(pol_bc + (1.0 - pol_bc) * eye)

    # ---- transformer block with policy softmax ----
    x2 = _block_apply(x2, B=B, N=N, C=C, H=H, HD=HD,
                      ln1_g=ln1_g[...], ln1_b=ln1_b[...],
                      wq=wq[...], wk=wk[...], wv=wv[...],
                      wproj=wproj[...], bproj=bproj[...],
                      ln2_g=ln2_g[...], ln2_b=ln2_b[...],
                      wfc1=wfc1[...], bfc1=bfc1[...],
                      wfc2=wfc2[...], bfc2=bfc2[...],
                      policies=policies)

    if apply_final_norm:                     # encoder's final self.norm fused in
        x2 = _layernorm(x2, norm_g[...], norm_b[...])

    x_out_ref[...] = x2


def _run_fsm_step(prep, idx, x2, prev_m, noise_feature, gumbel, apply_final_norm):
    B = prev_m.shape[0]
    f = prep['fsm'][idx]
    blk = prep['blocks'][NUM_PREFIX + idx]
    kernel = functools.partial(_fsm_step_kernel, B=B, N=N_TOKENS, C=EMBED,
                               H=HEADS, HD=HEAD_DIM,
                               apply_final_norm=apply_final_norm)
    x_out, m_out = pl.pallas_call(
        kernel,
        out_shape=(jax.ShapeDtypeStruct((B * N_TOKENS, EMBED), jnp.float32),
                   jax.ShapeDtypeStruct((B, MASK_NUM_IMGC, 1), jnp.float32)),
        compiler_params=_COMPILER_PARAMS,
    )(x2, prev_m, noise_feature, gumbel,
      f['ln_g'], f['ln_b'], f['in_w'], f['in_b'],
      f['w1'], f['b1'], f['w2'], f['b2'], f['w3'], f['b3'],
      blk['ln1_g'], blk['ln1_b'], blk['wq'], blk['wk'], blk['wv'],
      blk['wproj'], blk['bproj'], blk['ln2_g'], blk['ln2_b'],
      blk['wfc1'], blk['bfc1'], blk['wfc2'], blk['bfc2'],
      prep['norm_g'], prep['norm_b'])
    return x_out, m_out


# ----------------------------- full forward ('imgc', training mode) ----------
def vit_encoder_fsm_forward(prep, x_img, noise_std, key):
    B = x_img.shape[0]
    Hp = IMG // PATCH

    # PatchEmbed input prep: pure reshape/transpose (zero-FLOP, done by XLA).
    patches = x_img.reshape(B, CIN, Hp, PATCH, Hp, PATCH)
    patches = patches.transpose(0, 2, 4, 1, 3, 5).reshape(
        B * NUM_PATCHES, CIN * PATCH * PATCH)

    # Fused kernel 1: patch-embed + token assembly + first 2 blocks.
    x2 = _run_prefix(prep, patches)                             # (B*N, C)

    # Tiny scalar MLPs stay in plain jnp (XLA fuses them into one fusion).
    nf = jax.nn.relu(noise_std @ prep['noise_w1'] + prep['noise_b1'])
    nf = jax.nn.relu(nf @ prep['noise_w2'] + prep['noise_b2'])
    noise_feature = jax.nn.relu(nf @ prep['noise_w3'] + prep['noise_b3'])  # (1, C//2)

    r = noise_std
    for Hm in prep['rho_H']:                                    # rho_function
        r = jnp.tanh((r @ jnp.abs(Hm)) * 1.7)
    rho = r
    rho_list = [rho ** (i + 1) for i in range(NUM_FSM)]

    prev_m = jnp.ones((B, MASK_NUM_IMGC, 1), jnp.float32)
    m_group = []
    keys = jax.random.split(key, NUM_FSM)
    for i in range(NUM_FSM):
        # TODO(synk): gumbel noise drawn with JAX PRNG, not torch RNG (same
        # distribution, not bit-identical; straight-through grad not needed
        # for the forward pass).
        g = jax.random.gumbel(keys[i], (B, MASK_NUM_IMGC, 2), jnp.float32)
        x2, curr_m = _run_fsm_step(prep, i, x2, prev_m, noise_feature, g,
                                   apply_final_norm=(i == NUM_FSM - 1))
        m_group.append(curr_m)
        prev_m = curr_m

    x = x2.reshape(B, N_TOKENS, EMBED)
    return x, m_group, rho_list


# ----------------------------- deterministic parameter init ------------------
def init_params(key):
    C = EMBED
    hidden = HIDDEN
    keys = iter(jax.random.split(key, 256))

    def lin(out_f, in_f):
        std = math.sqrt(2.0 / (in_f + out_f))      # xavier-like
        return jax.random.normal(next(keys), (out_f, in_f), jnp.float32) * std

    params = {
        'patch_w': lin(C, CIN * PATCH * PATCH),
        'patch_b': jnp.zeros((C,), jnp.float32),
        'cls_token': jax.random.normal(next(keys), (1, 1, C), jnp.float32) * 0.02,
        'task_embedd': jax.random.normal(next(keys), (1, 1, C), jnp.float32) * 0.02,
        'pos_embed': get_sinusoid_encoding_table(NUM_PATCHES + 1, C),
        'norm_g': jnp.ones((C,), jnp.float32),
        'norm_b': jnp.zeros((C,), jnp.float32),
    }
    params['blocks'] = [{
        'ln1_g': jnp.ones((C,), jnp.float32), 'ln1_b': jnp.zeros((C,), jnp.float32),
        'w_qkv': lin(3 * C, C),
        'w_proj': lin(C, C), 'b_proj': jnp.zeros((C,), jnp.float32),
        'ln2_g': jnp.ones((C,), jnp.float32), 'ln2_b': jnp.zeros((C,), jnp.float32),
        'w_fc1': lin(hidden, C), 'b_fc1': jnp.zeros((hidden,), jnp.float32),
        'w_fc2': lin(C, hidden), 'b_fc2': jnp.zeros((C,), jnp.float32),
    } for _ in range(DEPTH)]
    params['fsm'] = [{
        'in_ln_g': jnp.ones((C,), jnp.float32), 'in_ln_b': jnp.zeros((C,), jnp.float32),
        'in_w': lin(C, C), 'in_b': jnp.zeros((C,), jnp.float32),
        'out_w1': lin(C // 2, C + C // 2), 'out_b1': jnp.zeros((C // 2,), jnp.float32),
        'out_w2': lin(C // 4, C // 2), 'out_b2': jnp.zeros((C // 4,), jnp.float32),
        'out_w3': lin(2, C // 4), 'out_b3': jnp.zeros((2,), jnp.float32),
    } for _ in range(NUM_FSM)]
    params['noise_w1'] = lin(16, 1); params['noise_b1'] = jnp.zeros((16,), jnp.float32)
    params['noise_w2'] = lin(64, 16); params['noise_b2'] = jnp.zeros((64,), jnp.float32)
    params['noise_w3'] = lin(C // 2, 64); params['noise_b3'] = jnp.zeros((C // 2,), jnp.float32)
    params['rho_H'] = [jax.random.normal(next(keys), s, jnp.float32) * 0.1
                       for s in [(16, 1), (16, 16), (16, 16), (1, 16)]]
    return params


# ------------------- host-side (offline) weight preparation ------------------
def prepare_params(params):
    """Pre-transpose to (K, O), pre-split heads, fold attention scale; done once."""
    C, H, HD, HID = EMBED, HEADS, HEAD_DIM, HIDDEN
    scale = HD ** -0.5

    def split_heads_cols(w_t, fold=1.0):
        # w_t: (C_in, C_out) with per-head output columns -> (H, C_in, HD)
        return jnp.transpose((w_t * fold).reshape(w_t.shape[0], H, HD), (1, 0, 2))

    blocks = []
    for bp in params['blocks']:
        wqkv_t = bp['w_qkv'].T                                  # (C, 3C)
        blocks.append(dict(
            ln1_g=bp['ln1_g'].reshape(1, C), ln1_b=bp['ln1_b'].reshape(1, C),
            wq=split_heads_cols(wqkv_t[:, 0 * C:1 * C], fold=scale),
            wk=split_heads_cols(wqkv_t[:, 1 * C:2 * C]),
            wv=split_heads_cols(wqkv_t[:, 2 * C:3 * C]),
            wproj=bp['w_proj'].T.reshape(H, HD, C),
            bproj=bp['b_proj'].reshape(1, C),
            ln2_g=bp['ln2_g'].reshape(1, C), ln2_b=bp['ln2_b'].reshape(1, C),
            wfc1=bp['w_fc1'].T, bfc1=bp['b_fc1'].reshape(1, HID),
            wfc2=bp['w_fc2'].T, bfc2=bp['b_fc2'].reshape(1, C),
        ))
    stack = {k: jnp.stack([blocks[l][k] for l in range(NUM_PREFIX)], axis=0)
             for k in blocks[0]}

    fsm = [dict(
        ln_g=fp['in_ln_g'].reshape(1, C), ln_b=fp['in_ln_b'].reshape(1, C),
        in_w=fp['in_w'].T, in_b=fp['in_b'].reshape(1, C),
        w1=fp['out_w1'].T, b1=fp['out_b1'].reshape(1, C // 2),
        w2=fp['out_w2'].T, b2=fp['out_b2'].reshape(1, C // 4),
        w3=fp['out_w3'].T, b3=fp['out_b3'].reshape(1, 2),
    ) for fp in params['fsm']]

    return dict(
        patch_w=params['patch_w'].T,                 # (CIN*P*P, C)
        patch_b=params['patch_b'].reshape(1, C),
        cls=params['cls_token'].reshape(1, C),
        task=params['task_embedd'].reshape(1, C),
        pos=params['pos_embed'].reshape(NUM_PATCHES + 1, C),
        norm_g=params['norm_g'].reshape(1, C), norm_b=params['norm_b'].reshape(1, C),
        blocks=blocks, stack=stack, fsm=fsm,
        noise_w1=params['noise_w1'].T, noise_b1=params['noise_b1'].reshape(1, 16),
        noise_w2=params['noise_w2'].T, noise_b2=params['noise_b2'].reshape(1, 64),
        noise_w3=params['noise_w3'].T, noise_b3=params['noise_b3'].reshape(1, C // 2),
        rho_H=[h.T for h in params['rho_H']],
    )


# ----------------------------- main ------------------------------------------
if __name__ == "__main__":
    root = jax.random.PRNGKey(0)
    k_params, k_x, k_gumbel = jax.random.split(root, 3)

    params = init_params(k_params)
    prep = prepare_params(params)
    x = jax.random.normal(k_x, (2, CIN, IMG, IMG), jnp.float32)   # NCHW
    noise_std = jnp.array([[0.1]], jnp.float32)

    fwd = jax.jit(vit_encoder_fsm_forward)
    out_x, m_group, rho_list = fwd(prep, x, noise_std, k_gumbel)
    jax.block_until_ready(out_x)
    jax.block_until_ready(m_group)
    jax.block_until_ready(rho_list)

    assert out_x.shape == (2, N_TOKENS, EMBED)
    assert len(m_group) == NUM_FSM and m_group[0].shape == (2, MASK_NUM_IMGC, 1)
    assert len(rho_list) == NUM_FSM and rho_list[0].shape == (1, 1)
    print("KERNEL_OK")
</pallas_src>

<mosaic_0001>
module attributes {stable_mosaic.version = 11 : i64} {
  func.func @_prefix_kernel(%arg0: memref<8x256xf32, #tpu.memory_space<vmem>>, %arg1: memref<256x32xf32, #tpu.memory_space<vmem>>, %arg2: memref<1x32xf32, #tpu.memory_space<vmem>>, %arg3: memref<1x32xf32, #tpu.memory_space<vmem>>, %arg4: memref<1x32xf32, #tpu.memory_space<vmem>>, %arg5: memref<5x32xf32, #tpu.memory_space<vmem>>, %arg6: memref<2x1x32xf32, #tpu.memory_space<vmem>>, %arg7: memref<2x1x32xf32, #tpu.memory_space<vmem>>, %arg8: memref<2x4x32x8xf32, #tpu.memory_space<vmem>>, %arg9: memref<2x4x32x8xf32, #tpu.memory_space<vmem>>, %arg10: memref<2x4x32x8xf32, #tpu.memory_space<vmem>>, %arg11: memref<2x4x8x32xf32, #tpu.memory_space<vmem>>, %arg12: memref<2x1x32xf32, #tpu.memory_space<vmem>>, %arg13: memref<2x1x32xf32, #tpu.memory_space<vmem>>, %arg14: memref<2x1x32xf32, #tpu.memory_space<vmem>>, %arg15: memref<2x32x128xf32, #tpu.memory_space<vmem>>, %arg16: memref<2x1x128xf32, #tpu.memory_space<vmem>>, %arg17: memref<2x128x32xf32, #tpu.memory_space<vmem>>, %arg18: memref<2x1x32xf32, #tpu.memory_space<vmem>>, %arg19: memref<12x32xf32, #tpu.memory_space<vmem>>) attributes {dimension_semantics = [], scalar_prefetch = 0 : i64, scratch_operands = 0 : i64, tpu.core_type = #tpu.core_type<tc>} {
    %c0 = arith.constant 0 : index
    %c0_0 = arith.constant 0 : index
    %0 = vector.load %arg0[%c0, %c0_0] : memref<8x256xf32, #tpu.memory_space<vmem>>, vector<8x256xf32>
    %c0_1 = arith.constant 0 : index
    %c0_2 = arith.constant 0 : index
    %1 = vector.load %arg1[%c0_1, %c0_2] : memref<256x32xf32, #tpu.memory_space<vmem>>, vector<256x32xf32>
    %cst = arith.constant dense<0.000000e+00> : vector<8x32xf32>
    %2 = tpu.matmul %0, %1, %cst {dimension_numbers = #tpu.dot_dimension_numbers<[1], [0], [0], [1], [0, 0, 1, 1], [], []>} : vector<8x256xf32>, vector<256x32xf32>, vector<8x32xf32> -> vector<8x32xf32>
    %c0_3 = arith.constant 0 : index
    %c0_4 = arith.constant 0 : index
    %3 = vector.load %arg2[%c0_3, %c0_4] : memref<1x32xf32, #tpu.memory_space<vmem>>, vector<1x32xf32>
    %4 = vector.broadcast %3 : vector<1x32xf32> to vector<8x32xf32>
    %5 = arith.addf %2, %4 : vector<8x32xf32>
    %c0_5 = arith.constant 0 : index
    %c0_6 = arith.constant 0 : index
    %6 = vector.load %arg5[%c0_5, %c0_6] : memref<5x32xf32, #tpu.memory_space<vmem>>, vector<5x32xf32>
    %c0_7 = arith.constant 0 : index
    %c0_8 = arith.constant 0 : index
    %7 = vector.load %arg3[%c0_7, %c0_8] : memref<1x32xf32, #tpu.memory_space<vmem>>, vector<1x32xf32>
    %8 = vector.extract_strided_slice %6 {offsets = [0, 0], sizes = [1, 32], strides = [1, 1]} : vector<5x32xf32> to vector<1x32xf32>
    %9 = arith.addf %7, %8 : vector<1x32xf32>
    %10 = vector.extract_strided_slice %6 {offsets = [1, 0], sizes = [4, 32], strides = [1, 1]} : vector<5x32xf32> to vector<4x32xf32>
    %c0_9 = arith.constant 0 : index
    %c0_10 = arith.constant 0 : index
    %11 = vector.load %arg4[%c0_9, %c0_10] : memref<1x32xf32, #tpu.memory_space<vmem>>, vector<1x32xf32>
    %12 = vector.extract_strided_slice %5 {offsets = [0, 0], sizes = [4, 32], strides = [1, 1]} : vector<8x32xf32> to vector<4x32xf32>
    %13 = arith.addf %12, %10 : vector<4x32xf32>
    %14 = vector.extract_strided_slice %5 {offsets = [4, 0], sizes = [4, 32], strides = [1, 1]} : vector<8x32xf32> to vector<4x32xf32>
    %15 = arith.addf %14, %10 : vector<4x32xf32>
    %16 = tpu.concatenate %9, %13, %11, %9, %15, %11 in 0 : vector<1x32xf32>, vector<4x32xf32>, vector<1x32xf32>, vector<1x32xf32>, vector<4x32xf32>, vector<1x32xf32> -> vector<12x32xf32>
    %c0_11 = arith.constant 0 : index
    %c0_12 = arith.constant 0 : index
    %c0_13 = arith.constant 0 : index
    %17 = vector.load %arg6[%c0_11, %c0_12, %c0_13] : memref<2x1x32xf32, #tpu.memory_space<vmem>>, vector<1x1x32xf32>
    %18 = vector.shape_cast %17 : vector<1x1x32xf32> to vector<1x32xf32>
    %c0_14 = arith.constant 0 : index
    %c0_15 = arith.constant 0 : index
    %c0_16 = arith.constant 0 : index
    %19 = vector.load %arg7[%c0_14, %c0_15, %c0_16] : memref<2x1x32xf32, #tpu.memory_space<vmem>>, vector<1x1x32xf32>
    %20 = vector.shape_cast %19 : vector<1x1x32xf32> to vector<1x32xf32>
    %c0_17 = arith.constant 0 : index
    %c0_18 = arith.constant 0 : index
    %c0_19 = arith.constant 0 : index
    %c0_20 = arith.constant 0 : index
    %21 = vector.load %arg8[%c0_17, %c0_18, %c0_19, %c0_20] : memref<2x4x32x8xf32, #tpu.memory_space<vmem>>, vector<1x4x32x8xf32>
    %22 = vector.shape_cast %21 : vector<1x4x32x8xf32> to vector<4x32x8xf32>
    %c0_21 = arith.constant 0 : index
    %c0_22 = arith.constant 0 : index
    %c0_23 = arith.constant 0 : index
    %c0_24 = arith.constant 0 : index
    %23 = vector.load %arg9[%c0_21, %c0_22, %c0_23, %c0_24] : memref<2x4x32x8xf32, #tpu.memory_space<vmem>>, vector<1x4x32x8xf32>
    %24 = vector.shape_cast %23 : vector<1x4x32x8xf32> to vector<4x32x8xf32>
    %c0_25 = arith.constant 0 : index
    %c0_26 = arith.constant 0 : index
    %c0_27 = arith.constant 0 : index
    %c0_28 = arith.constant 0 : index
    %25 = vector.load %arg10[%c0_25, %c0_26, %c0_27, %c0_28] : memref<2x4x32x8xf32, #tpu.memory_space<vmem>>, vector<1x4x32x8xf32>
    %26 = vector.shape_cast %25 : vector<1x4x32x8xf32> to vector<4x32x8xf32>
    %c0_29 = arith.constant 0 : index
    %c0_30 = arith.constant 0 : index
    %c0_31 = arith.constant 0 : index
    %c0_32 = arith.constant 0 : index
    %27 = vector.load %arg11[%c0_29, %c0_30, %c0_31, %c0_32] : memref<2x4x8x32xf32, #tpu.memory_space<vmem>>, vector<1x4x8x32xf32>
    %28 = vector.shape_cast %27 : vector<1x4x8x32xf32> to vector<4x8x32xf32>
    %c0_33 = arith.constant 0 : index
    %c0_34 = arith.constant 0 : index
    %c0_35 = arith.constant 0 : index
    %29 = vector.load %arg12[%c0_33, %c0_34, %c0_35] : memref<2x1x32xf32, #tpu.memory_space<vmem>>, vector<1x1x32xf32>
    %30 = vector.shape_cast %29 : vector<1x1x32xf32> to vector<1x32xf32>
    %c0_36 = arith.constant 0 : index
    %c0_37 = arith.constant 0 : index
    %c0_38 = arith.constant 0 : index
    %31 = vector.load %arg13[%c0_36, %c0_37, %c0_38] : memref<2x1x32xf32, #tpu.memory_space<vmem>>, vector<1x1x32xf32>
    %32 = vector.shape_cast %31 : vector<1x1x32xf32> to vector<1x32xf32>
    %c0_39 = arith.constant 0 : index
    %c0_40 = arith.constant 0 : index
    %c0_41 = arith.constant 0 : index
    %33 = vector.load %arg14[%c0_39, %c0_40, %c0_41] : memref<2x1x32xf32, #tpu.memory_space<vmem>>, vector<1x1x32xf32>
    %34 = vector.shape_cast %33 : vector<1x1x32xf32> to vector<1x32xf32>
    %c0_42 = arith.constant 0 : index
    %c0_43 = arith.constant 0 : index
    %c0_44 = arith.constant 0 : index
    %35 = vector.load %arg15[%c0_42, %c0_43, %c0_44] : memref<2x32x128xf32, #tpu.memory_space<vmem>>, vector<1x32x128xf32>
    %36 = vector.shape_cast %35 : vector<1x32x128xf32> to vector<32x128xf32>
    %c0_45 = arith.constant 0 : index
    %c0_46 = arith.constant 0 : index
    %c0_47 = arith.constant 0 : index
    %37 = vector.load %arg16[%c0_45, %c0_46, %c0_47] : memref<2x1x128xf32, #tpu.memory_space<vmem>>, vector<1x1x128xf32>
    %38 = vector.shape_cast %37 : vector<1x1x128xf32> to vector<1x128xf32>
    %c0_48 = arith.constant 0 : index
    %c0_49 = arith.constant 0 : index
    %c0_50 = arith.constant 0 : index
    %39 = vector.load %arg17[%c0_48, %c0_49, %c0_50] : memref<2x128x32xf32, #tpu.memory_space<vmem>>, vector<1x128x32xf32>
    %40 = vector.shape_cast %39 : vector<1x128x32xf32> to vector<128x32xf32>
    %c0_51 = arith.constant 0 : index
    %c0_52 = arith.constant 0 : index
    %c0_53 = arith.constant 0 : index
    %41 = vector.load %arg18[%c0_51, %c0_52, %c0_53] : memref<2x1x32xf32, #tpu.memory_space<vmem>>, vector<1x1x32xf32>
    %42 = vector.shape_cast %41 : vector<1x1x32xf32> to vector<1x32xf32>
    %cst_54 = arith.constant dense<0.000000e+00> : vector<12xf32>
    %43 = vector.multi_reduction <add>, %16, %cst_54 [1] : vector<12x32xf32> to vector<12xf32>
    %44 = vector.shape_cast %43 : vector<12xf32> to vector<12x1xf32>
    %cst_55 = arith.constant 3.200000e+01 : f32
    %45 = vector.broadcast %cst_55 : f32 to vector<12x1xf32>
    %46 = arith.divf %44, %45 : vector<12x1xf32>
    %47 = vector.broadcast %46 : vector<12x1xf32> to vector<12x32xf32>
    %48 = arith.subf %16, %47 : vector<12x32xf32>
    %49 = arith.mulf %48, %48 : vector<12x32xf32>
    %cst_56 = arith.constant dense<0.000000e+00> : vector<12xf32>
    %50 = vector.multi_reduction <add>, %49, %cst_56 [1] : vector<12x32xf32> to vector<12xf32>
    %51 = vector.shape_cast %50 : vector<12xf32> to vector<12x1xf32>
    %cst_57 = arith.constant 3.200000e+01 : f32
    %52 = vector.broadcast %cst_57 : f32 to vector<12x1xf32>
    %53 = arith.divf %51, %52 : vector<12x1xf32>
    %54 = vector.broadcast %46 : vector<12x1xf32> to vector<12x32xf32>
    %55 = arith.subf %16, %54 : vector<12x32xf32>
    %cst_58 = arith.constant 9.99999974E-6 : f32
    %56 = vector.broadcast %cst_58 : f32 to vector<12x1xf32>
    %57 = arith.addf %53, %56 : vector<12x1xf32>
    %58 = math.rsqrt %57 : vector<12x1xf32>
    %59 = vector.broadcast %58 : vector<12x1xf32> to vector<12x32xf32>
    %60 = arith.mulf %55, %59 : vector<12x32xf32>
    %61 = vector.broadcast %18 : vector<1x32xf32> to vector<12x32xf32>
    %62 = arith.mulf %60, %61 : vector<12x32xf32>
    %63 = vector.broadcast %20 : vector<1x32xf32> to vector<12x32xf32>
    %64 = arith.addf %62, %63 : vector<12x32xf32>
    %cst_59 = arith.constant 0.000000e+00 : f32
    %65 = vector.broadcast %cst_59 : f32 to vector<6x32xf32>
    %cst_60 = arith.constant 0.000000e+00 : f32
    %66 = vector.broadcast %cst_60 : f32 to vector<6x32xf32>
    %67 = vector.extract_strided_slice %22 {offsets = [0, 0, 0], sizes = [1, 32, 8], strides = [1, 1, 1]} : vector<4x32x8xf32> to vector<1x32x8xf32>
    %68 = vector.shape_cast %67 : vector<1x32x8xf32> to vector<32x8xf32>
    %cst_61 = arith.constant dense<0.000000e+00> : vector<12x8xf32>
    %69 = tpu.matmul %64, %68, %cst_61 {dimension_numbers = #tpu.dot_dimension_numbers<[1], [0], [0], [1], [0, 0, 1, 1], [], []>} : vector<12x32xf32>, vector<32x8xf32>, vector<12x8xf32> -> vector<12x8xf32>
    %70 = vector.extract_strided_slice %24 {offsets = [0, 0, 0], sizes = [1, 32, 8], strides = [1, 1, 1]} : vector<4x32x8xf32> to vector<1x32x8xf32>
    %71 = vector.shape_cast %70 : vector<1x32x8xf32> to vector<32x8xf32>
    %cst_62 = arith.constant dense<0.000000e+00> : vector<12x8xf32>
    %72 = tpu.matmul %64, %71, %cst_62 {dimension_numbers = #tpu.dot_dimension_numbers<[1], [0], [0], [1], [0, 0, 1, 1], [], []>} : vector<12x32xf32>, vector<32x8xf32>, vector<12x8xf32> -> vector<12x8xf32>
    %73 = vector.extract_strided_slice %26 {offsets = [0, 0, 0], sizes = [1, 32, 8], strides = [1, 1, 1]} : vector<4x32x8xf32> to vector<1x32x8xf32>
    %74 = vector.shape_cast %73 : vector<1x32x8xf32> to vector<32x8xf32>
    %cst_63 = arith.constant dense<0.000000e+00> : vector<12x8xf32>
    %75 = tpu.matmul %64, %74, %cst_63 {dimension_numbers = #tpu.dot_dimension_numbers<[1], [0], [0], [1], [0, 0, 1, 1], [], []>} : vector<12x32xf32>, vector<32x8xf32>, vector<12x8xf32> -> vector<12x8xf32>
    %76 = vector.extract_strided_slice %69 {offsets = [0, 0], sizes = [6, 8], strides = [1, 1]} : vector<12x8xf32> to vector<6x8xf32>
    %77 = vector.extract_strided_slice %72 {offsets = [0, 0], sizes = [6, 8], strides = [1, 1]} : vector<12x8xf32> to vector<6x8xf32>
    %78 = vector.extract_strided_slice %75 {offsets = [0, 0], sizes = [6, 8], strides = [1, 1]} : vector<12x8xf32> to vector<6x8xf32>
    %cst_64 = arith.constant dense<0.000000e+00> : vector<6x6xf32>
    %79 = tpu.matmul %76, %77, %cst_64 {dimension_numbers = #tpu.dot_dimension_numbers<[1], [1], [0], [0], [0, 0, 1, 0], [], []>} : vector<6x8xf32>, vector<6x8xf32>, vector<6x6xf32> -> vector<6x6xf32>
    %cst_65 = arith.constant dense<0xFF800000> : vector<6xf32>
    %80 = vector.multi_reduction <maximumf>, %79, %cst_65 [1] : vector<6x6xf32> to vector<6xf32>
    %81 = vector.shape_cast %80 : vector<6xf32> to vector<6x1xf32>
    %82 = vector.broadcast %81 : vector<6x1xf32> to vector<6x6xf32>
    %83 = arith.subf %79, %82 : vector<6x6xf32>
    %84 = math.exp %83 : vector<6x6xf32>
    %cst_66 = arith.constant dense<0.000000e+00> : vector<6xf32>
    %85 = vector.multi_reduction <add>, %84, %cst_66 [1] : vector<6x6xf32> to vector<6xf32>
    %86 = vector.shape_cast %85 : vector<6xf32> to vector<6x1xf32>
    %87 = vector.broadcast %86 : vector<6x1xf32> to vector<6x6xf32>
    %88 = arith.divf %84, %87 : vector<6x6xf32>
    %cst_67 = arith.constant dense<0.000000e+00> : vector<6x8xf32>
    %89 = tpu.matmul %88, %78, %cst_67 {dimension_numbers = #tpu.dot_dimension_numbers<[1], [0], [0], [1], [0, 0, 1, 1], [], []>} : vector<6x6xf32>, vector<6x8xf32>, vector<6x8xf32> -> vector<6x8xf32>
    %90 = vector.extract_strided_slice %28 {offsets = [0, 0, 0], sizes = [1, 8, 32], strides = [1, 1, 1]} : vector<4x8x32xf32> to vector<1x8x32xf32>
    %91 = vector.shape_cast %90 : vector<1x8x32xf32> to vector<8x32xf32>
    %cst_68 = arith.constant dense<0.000000e+00> : vector<6x32xf32>
    %92 = tpu.matmul %89, %91, %cst_68 {dimension_numbers = #tpu.dot_dimension_numbers<[1], [0], [0], [1], [0, 0, 1, 1], [], []>} : vector<6x8xf32>, vector<8x32xf32>, vector<6x32xf32> -> vector<6x32xf32>
    %93 = arith.addf %65, %92 : vector<6x32xf32>
    %94 = vector.extract_strided_slice %69 {offsets = [6, 0], sizes = [6, 8], strides = [1, 1]} : vector<12x8xf32> to vector<6x8xf32>
    %95 = vector.extract_strided_slice %72 {offsets = [6, 0], sizes = [6, 8], strides = [1, 1]} : vector<12x8xf32> to vector<6x8xf32>
    %96 = vector.extract_strided_slice %75 {offsets = [6, 0], sizes = [6, 8], strides = [1, 1]} : vector<12x8xf32> to vector<6x8xf32>
    %cst_69 = arith.constant dense<0.000000e+00> : vector<6x6xf32>
    %97 = tpu.matmul %94, %95, %cst_69 {dimension_numbers = #tpu.dot_dimension_numbers<[1], [1], [0], [0], [0, 0, 1, 0], [], []>} : vector<6x8xf32>, vector<6x8xf32>, vector<6x6xf32> -> vector<6x6xf32>
    %cst_70 = arith.constant dense<0xFF800000> : vector<6xf32>
    %98 = vector.multi_reduction <maximumf>, %97, %cst_70 [1] : vector<6x6xf32> to vector<6xf32>
    %99 = vector.shape_cast %98 : vector<6xf32> to vector<6x1xf32>
    %100 = vector.broadcast %99 : vector<6x1xf32> to vector<6x6xf32>
    %101 = arith.subf %97, %100 : vector<6x6xf32>
    %102 = math.exp %101 : vector<6x6xf32>
    %cst_71 = arith.constant dense<0.000000e+00> : vector<6xf32>
    %103 = vector.multi_reduction <add>, %102, %cst_71 [1] : vector<6x6xf32> to vector<6xf32>
    %104 = vector.shape_cast %103 : vector<6xf32> to vector<6x1xf32>
    %105 = vector.broadcast %104 : vector<6x1xf32> to vector<6x6xf32>
    %106 = arith.divf %102, %105 : vector<6x6xf32>
    %cst_72 = arith.constant dense<0.000000e+00> : vector<6x8xf32>
    %107 = tpu.matmul %106, %96, %cst_72 {dimension_numbers = #tpu.dot_dimension_numbers<[1], [0], [0], [1], [0, 0, 1, 1], [], []>} : vector<6x6xf32>, vector<6x8xf32>, vector<6x8xf32> -> vector<6x8xf32>
    %108 = vector.extract_strided_slice %28 {offsets = [0, 0, 0], sizes = [1, 8, 32], strides = [1, 1, 1]} : vector<4x8x32xf32> to vector<1x8x32xf32>
    %109 = vector.shape_cast %108 : vector<1x8x32xf32> to vector<8x32xf32>
    %cst_73 = arith.constant dense<0.000000e+00> : vector<6x32xf32>
    %110 = tpu.matmul %107, %109, %cst_73 {dimension_numbers = #tpu.dot_dimension_numbers<[1], [0], [0], [1], [0, 0, 1, 1], [], []>} : vector<6x8xf32>, vector<8x32xf32>, vector<6x32xf32> -> vector<6x32xf32>
    %111 = arith.addf %66, %110 : vector<6x32xf32>
    %112 = vector.extract_strided_slice %22 {offsets = [1, 0, 0], sizes = [1, 32, 8], strides = [1, 1, 1]} : vector<4x32x8xf32> to vector<1x32x8xf32>
    %113 = vector.shape_cast %112 : vector<1x32x8xf32> to vector<32x8xf32>
    %cst_74 = arith.constant dense<0.000000e+00> : vector<12x8xf32>
    %114 = tpu.matmul %64, %113, %cst_74 {dimension_numbers = #tpu.dot_dimension_numbers<[1], [0], [0], [1], [0, 0, 1, 1], [], []>} : vector<12x32xf32>, vector<32x8xf32>, vector<12x8xf32> -> vector<12x8xf32>
    %115 = vector.extract_strided_slice %24 {offsets = [1, 0, 0], sizes = [1, 32, 8], strides = [1, 1, 1]} : vector<4x32x8xf32> to vector<1x32x8xf32>
    %116 = vector.shape_cast %115 : vector<1x32x8xf32> to vector<32x8xf32>
    %cst_75 = arith.constant dense<0.000000e+00> : vector<12x8xf32>
    %117 = tpu.matmul %64, %116, %cst_75 {dimension_numbers = #tpu.dot_dimension_numbers<[1], [0], [0], [1], [0, 0, 1, 1], [], []>} : vector<12x32xf32>, vector<32x8xf32>, vector<12x8xf32> -> vector<12x8xf32>
    %118 = vector.extract_strided_slice %26 {offsets = [1, 0, 0], sizes = [1, 32, 8], strides = [1, 1, 1]} : vector<4x32x8xf32> to vector<1x32x8xf32>
    %119 = vector.shape_cast %118 : vector<1x32x8xf32> to vector<32x8xf32>
    %cst_76 = arith.constant dense<0.000000e+00> : vector<12x8xf32>
    %120 = tpu.matmul %64, %119, %cst_76 {dimension_numbers = #tpu.dot_dimension_numbers<[1], [0], [0], [1], [0, 0, 1, 1], [], []>} : vector<12x32xf32>, vector<32x8xf32>, vector<12x8xf32> -> vector<12x8xf32>
    %121 = vector.extract_strided_slice %114 {offsets = [0, 0], sizes = [6, 8], strides = [1, 1]} : vector<12x8xf32> to vector<6x8xf32>
    %122 = vector.extract_strided_slice %117 {offsets = [0, 0], sizes = [6, 8], strides = [1, 1]} : vector<12x8xf32> to vector<6x8xf32>
    %123 = vector.extract_strided_slice %120 {offsets = [0, 0], sizes = [6, 8], strides = [1, 1]} : vector<12x8xf32> to vector<6x8xf32>
    %cst_77 = arith.constant dense<0.000000e+00> : vector<6x6xf32>
    %124 = tpu.matmul %121, %122, %cst_77 {dimension_numbers = #tpu.dot_dimension_numbers<[1], [1], [0], [0], [0, 0, 1, 0], [], []>} : vector<6x8xf32>, vector<6x8xf32>, vector<6x6xf32> -> vector<6x6xf32>
    %cst_78 = arith.constant dense<0xFF800000> : vector<6xf32>
    %125 = vector.multi_reduction <maximumf>, %124, %cst_78 [1] : vector<6x6xf32> to vector<6xf32>
    %126 = vector.shape_cast %125 : vector<6xf32> to vector<6x1xf32>
    %127 = vector.broadcast %126 : vector<6x1xf32> to vector<6x6xf32>
    %128 = arith.subf %124, %127 : vector<6x6xf32>
    %129 = math.exp %128 : vector<6x6xf32>
    %cst_79 = arith.constant dense<0.000000e+00> : vector<6xf32>
    %130 = vector.multi_reduction <add>, %129, %cst_79 [1] : vector<6x6xf32> to vector<6xf32>
    %131 = vector.shape_cast %130 : vector<6xf32> to vector<6x1xf32>
    %132 = vector.broadcast %131 : vector<6x1xf32> to vector<6x6xf32>
    %133 = arith.divf %129, %132 : vector<6x6xf32>
    %cst_80 = arith.constant dense<0.000000e+00> : vector<6x8xf32>
    %134 = tpu.matmul %133, %123, %cst_80 {dimension_numbers = #tpu.dot_dimension_numbers<[1], [0], [0], [1], [0, 0, 1, 1], [], []>} : vector<6x6xf32>, vector<6x8xf32>, vector<6x8xf32> -> vector<6x8xf32>
    %135 = vector.extract_strided_slice %28 {offsets = [1, 0, 0], sizes = [1, 8, 32], strides = [1, 1, 1]} : vector<4x8x32xf32> to vector<1x8x32xf32>
    %136 = vector.shape_cast %135 : vector<1x8x32xf32> to vector<8x32xf32>
    %cst_81 = arith.constant dense<0.000000e+00> : vector<6x32xf32>
    %137 = tpu.matmul %134, %136, %cst_81 {dimension_numbers = #tpu.dot_dimension_numbers<[1], [0], [0], [1], [0, 0, 1, 1], [], []>} : vector<6x8xf32>, vector<8x32xf32>, vector<6x32xf32> -> vector<6x32xf32>
    %138 = arith.addf %93, %137 : vector<6x32xf32>
    %139 = vector.extract_strided_slice %114 {offsets = [6, 0], sizes = [6, 8], strides = [1, 1]} : vector<12x8xf32> to vector<6x8xf32>
    %140 = vector.extract_strided_slice %117 {offsets = [6, 0], sizes = [6, 8], strides = [1, 1]} : vector<12x8xf32> to vector<6x8xf32>
    %141 = vector.extract_strided_slice %120 {offsets = [6, 0], sizes = [6, 8], strides = [1, 1]} : vector<12x8xf32> to vector<6x8xf32>
    %cst_82 = arith.constant dense<0.000000e+00> : vector<6x6xf32>
    %142 = tpu.matmul %139, %140, %cst_82 {dimension_numbers = #tpu.dot_dimension_numbers<[1], [1], [0], [0], [0, 0, 1, 0], [], []>} : vector<6x8xf32>, vector<6x8xf32>, vector<6x6xf32> -> vector<6x6xf32>
    %cst_83 = arith.constant dense<0xFF800000> : vector<6xf32>
    %143 = vector.multi_reduction <maximumf>, %142, %cst_83 [1] : vector<6x6xf32> to vector<6xf32>
    %144 = vector.shape_cast %143 : vector<6xf32> to vector<6x1xf32>
    %145 = vector.broadcast %144 : vector<6x1xf32> to vector<6x6xf32>
    %146 = arith.subf %142, %145 : vector<6x6xf32>
    %147 = math.exp %146 : vector<6x6xf32>
    %cst_84 = arith.constant dense<0.000000e+00> : vector<6xf32>
    %148 = vector.multi_reduction <add>, %147, %cst_84 [1] : vector<6x6xf32> to vector<6xf32>
    %149 = vector.shape_cast %148 : vector<6xf32> to vector<6x1xf32>
    %150 = vector.broadcast %149 : vector<6x1xf32> to vector<6x6xf32>
    %151 = arith.divf %147, %150 : vector<6x6xf32>
    %cst_85 = arith.constant dense<0.000000e+00> : vector<6x8xf32>
    %152 = tpu.matmul %151, %141, %cst_85 {dimension_numbers = #tpu.dot_dimension_numbers<[1], [0], [0], [1], [0, 0, 1, 1], [], []>} : vector<6x6xf32>, vector<6x8xf32>, vector<6x8xf32> -> vector<6x8xf32>
    %153 = vector.extract_strided_slice %28 {offsets = [1, 0, 0], sizes = [1, 8, 32], strides = [1, 1, 1]} : vector<4x8x32xf32> to vector<1x8x32xf32>
    %154 = vector.shape_cast %153 : vector<1x8x32xf32> to vector<8x32xf32>
    %cst_86 = arith.constant dense<0.000000e+00> : vector<6x32xf32>
    %155 = tpu.matmul %152, %154, %cst_86 {dimension_numbers = #tpu.dot_dimension_numbers<[1], [0], [0], [1], [0, 0, 1, 1], [], []>} : vector<6x8xf32>, vector<8x32xf32>, vector<6x32xf32> -> vector<6x32xf32>
    %156 = arith.addf %111, %155 : vector<6x32xf32>
    %157 = vector.extract_strided_slice %22 {offsets = [2, 0, 0], sizes = [1, 32, 8], strides = [1, 1, 1]} : vector<4x32x8xf32> to vector<1x32x8xf32>
    %158 = vector.shape_cast %157 : vector<1x32x8xf32> to vector<32x8xf32>
    %cst_87 = arith.constant dense<0.000000e+00> : vector<12x8xf32>
    %159 = tpu.matmul %64, %158, %cst_87 {dimension_numbers = #tpu.dot_dimension_numbers<[1], [0], [0], [1], [0, 0, 1, 1], [], []>} : vector<12x32xf32>, vector<32x8xf32>, vector<12x8xf32> -> vector<12x8xf32>
    %160 = vector.extract_strided_slice %24 {offsets = [2, 0, 0], sizes = [1, 32, 8], strides = [1, 1, 1]} : vector<4x32x8xf32> to vector<1x32x8xf32>
    %161 = vector.shape_cast %160 : vector<1x32x8xf32> to vector<32x8xf32>
    %cst_88 = arith.constant dense<0.000000e+00> : vector<12x8xf32>
    %162 = tpu.matmul %64, %161, %cst_88 {dimension_numbers = #tpu.dot_dimension_numbers<[1], [0], [0], [1], [0, 0, 1, 1], [], []>} : vector<12x32xf32>, vector<32x8xf32>, vector<12x8xf32> -> vector<12x8xf32>
    %163 = vector.extract_strided_slice %26 {offsets = [2, 0, 0], sizes = [1, 32, 8], strides = [1, 1, 1]} : vector<4x32x8xf32> to vector<1x32x8xf32>
    %164 = vector.shape_cast %163 : vector<1x32x8xf32> to vector<32x8xf32>
    %cst_89 = arith.constant dense<0.000000e+00> : vector<12x8xf32>
    %165 = tpu.matmul %64, %164, %cst_89 {dimension_numbers = #tpu.dot_dimension_numbers<[1], [0], [0], [1], [0, 0, 1, 1], [], []>} : vector<12x32xf32>, vector<32x8xf32>, vector<12x8xf32> -> vector<12x8xf32>
    %166 = vector.extract_strided_slice %159 {offsets = [0, 0], sizes = [6, 8], strides = [1, 1]} : vector<12x8xf32> to vector<6x8xf32>
    %167 = vector.extract_strided_slice %162 {offsets = [0, 0], sizes = [6, 8], strides = [1, 1]} : vector<12x8xf32> to vector<6x8xf32>
    %168 = vector.extract_strided_slice %165 {offsets = [0, 0], sizes = [6, 8], strides = [1, 1]} : vector<12x8xf32> to vector<6x8xf32>
    %cst_90 = arith.constant dense<0.000000e+00> : vector<6x6xf32>
    %169 = tpu.matmul %166, %167, %cst_90 {dimension_numbers = #tpu.dot_dimension_numbers<[1], [1], [0], [0], [0, 0, 1, 0], [], []>} : vector<6x8xf32>, vector<6x8xf32>, vector<6x6xf32> -> vector<6x6xf32>
    %cst_91 = arith.constant dense<0xFF800000> : vector<6xf32>
    %170 = vector.multi_reduction <maximumf>, %169, %cst_91 [1] : vector<6x6xf32> to vector<6xf32>
    %171 = vector.shape_cast %170 : vector<6xf32> to vector<6x1xf32>
    %172 = vector.broadcast %171 : vector<6x1xf32> to vector<6x6xf32>
    %173 = arith.subf %169, %172 : vector<6x6xf32>
    %174 = math.exp %173 : vector<6x6xf32>
    %cst_92 = arith.constant dense<0.000000e+00> : vector<6xf32>
    %175 = vector.multi_reduction <add>, %174, %cst_92 [1] : vector<6x6xf32> to vector<6xf32>
    %176 = vector.shape_cast %175 : vector<6xf32> to vector<6x1xf32>
    %177 = vector.broadcast %176 : vector<6x1xf32> to vector<6x6xf32>
    %178 = arith.divf %174, %177 : vector<6x6xf32>
    %cst_93 = arith.constant dense<0.000000e+00> : vector<6x8xf32>
    %179 = tpu.matmul %178, %168, %cst_93 {dimension_numbers = #tpu.dot_dimension_numbers<[1], [0], [0], [1], [0, 0, 1, 1], [], []>} : vector<6x6xf32>, vector<6x8xf32>, vector<6x8xf32> -> vector<6x8xf32>
    %180 = vector.extract_strided_slice %28 {offsets = [2, 0, 0], sizes = [1, 8, 32], strides = [1, 1, 1]} : vector<4x8x32xf32> to vector<1x8x32xf32>
    %181 = vector.shape_cast %180 : vector<1x8x32xf32> to vector<8x32xf32>
    %cst_94 = arith.constant dense<0.000000e+00> : vector<6x32xf32>
    %182 = tpu.matmul %179, %181, %cst_94 {dimension_numbers = #tpu.dot_dimension_numbers<[1], [0], [0], [1], [0, 0, 1, 1], [], []>} : vector<6x8xf32>, vector<8x32xf32>, vector<6x32xf32> -> vector<6x32xf32>
    %183 = arith.addf %138, %182 : vector<6x32xf32>
    %184 = vector.extract_strided_slice %159 {offsets = [6, 0], sizes = [6, 8], strides = [1, 1]} : vector<12x8xf32> to vector<6x8xf32>
    %185 = vector.extract_strided_slice %162 {offsets = [6, 0], sizes = [6, 8], strides = [1, 1]} : vector<12x8xf32> to vector<6x8xf32>
    %186 = vector.extract_strided_slice %165 {offsets = [6, 0], sizes = [6, 8], strides = [1, 1]} : vector<12x8xf32> to vector<6x8xf32>
    %cst_95 = arith.constant dense<0.000000e+00> : vector<6x6xf32>
    %187 = tpu.matmul %184, %185, %cst_95 {dimension_numbers = #tpu.dot_dimension_numbers<[1], [1], [0], [0], [0, 0, 1, 0], [], []>} : vector<6x8xf32>, vector<6x8xf32>, vector<6x6xf32> -> vector<6x6xf32>
    %cst_96 = arith.constant dense<0xFF800000> : vector<6xf32>
    %188 = vector.multi_reduction <maximumf>, %187, %cst_96 [1] : vector<6x6xf32> to vector<6xf32>
    %189 = vector.shape_cast %188 : vector<6xf32> to vector<6x1xf32>
    %190 = vector.broadcast %189 : vector<6x1xf32> to vector<6x6xf32>
    %191 = arith.subf %187, %190 : vector<6x6xf32>
    %192 = math.exp %191 : vector<6x6xf32>
    %cst_97 = arith.constant dense<0.000000e+00> : vector<6xf32>
    %193 = vector.multi_reduction <add>, %192, %cst_97 [1] : vector<6x6xf32> to vector<6xf32>
    %194 = vector.shape_cast %193 : vector<6xf32> to vector<6x1xf32>
    %195 = vector.broadcast %194 : vector<6x1xf32> to vector<6x6xf32>
    %196 = arith.divf %192, %195 : vector<6x6xf32>
    %cst_98 = arith.constant dense<0.000000e+00> : vector<6x8xf32>
    %197 = tpu.matmul %196, %186, %cst_98 {dimension_numbers = #tpu.dot_dimension_numbers<[1], [0], [0], [1], [0, 0, 1, 1], [], []>} : vector<6x6xf32>, vector<6x8xf32>, vector<6x8xf32> -> vector<6x8xf32>
    %198 = vector.extract_strided_slice %28 {offsets = [2, 0, 0], sizes = [1, 8, 32], strides = [1, 1, 1]} : vector<4x8x32xf32> to vector<1x8x32xf32>
    %199 = vector.shape_cast %198 : vector<1x8x32xf32> to vector<8x32xf32>
    %cst_99 = arith.constant dense<0.000000e+00> : vector<6x32xf32>
    %200 = tpu.matmul %197, %199, %cst_99 {dimension_numbers = #tpu.dot_dimension_numbers<[1], [0], [0], [1], [0, 0, 1, 1], [], []>} : vector<6x8xf32>, vector<8x32xf32>, vector<6x32xf32> -> vector<6x32xf32>
    %201 = arith.addf %156, %200 : vector<6x32xf32>
    %202 = vector.extract_strided_slice %22 {offsets = [3, 0, 0], sizes = [1, 32, 8], strides = [1, 1, 1]} : vector<4x32x8xf32> to vector<1x32x8xf32>
    %203 = vector.shape_cast %202 : vector<1x32x8xf32> to vector<32x8xf32>
    %cst_100 = arith.constant dense<0.000000e+00> : vector<12x8xf32>
    %204 = tpu.matmul %64, %203, %cst_100 {dimension_numbers = #tpu.dot_dimension_numbers<[1], [0], [0], [1], [0, 0, 1, 1], [], []>} : vector<12x32xf32>, vector<32x8xf32>, vector<12x8xf32> -> vector<12x8xf32>
    %205 = vector.extract_strided_slice %24 {offsets = [3, 0, 0], sizes = [1, 32, 8], strides = [1, 1, 1]} : vector<4x32x8xf32> to vector<1x32x8xf32>
    %206 = vector.shape_cast %205 : vector<1x32x8xf32> to vector<32x8xf32>
    %cst_101 = arith.constant dense<0.000000e+00> : vector<12x8xf32>
    %207 = tpu.matmul %64, %206, %cst_101 {dimension_numbers = #tpu.dot_dimension_numbers<[1], [0], [0], [1], [0, 0, 1, 1], [], []>} : vector<12x32xf32>, vector<32x8xf32>, vector<12x8xf32> -> vector<12x8xf32>
    %208 = vector.extract_strided_slice %26 {offsets = [3, 0, 0], sizes = [1, 32, 8], strides = [1, 1, 1]} : vector<4x32x8xf32> to vector<1x32x8xf32>
    %209 = vector.shape_cast %208 : vector<1x32x8xf32> to vector<32x8xf32>
    %cst_102 = arith.constant dense<0.000000e+00> : vector<12x8xf32>
    %210 = tpu.matmul %64, %209, %cst_102 {dimension_numbers = #tpu.dot_dimension_numbers<[1], [0], [0], [1], [0, 0, 1, 1], [], []>} : vector<12x32xf32>, vector<32x8xf32>, vector<12x8xf32> -> vector<12x8xf32>
    %211 = vector.extract_strided_slice %204 {offsets = [0, 0], sizes = [6, 8], strides = [1, 1]} : vector<12x8xf32> to vector<6x8xf32>
    %212 = vector.extract_strided_slice %207 {offsets = [0, 0], sizes = [6, 8], strides = [1, 1]} : vector<12x8xf32> to vector<6x8xf32>
    %213 = vector.extract_strided_slice %210 {offsets = [0, 0], sizes = [6, 8], strides = [1, 1]} : vector<12x8xf32> to vector<6x8xf32>
    %cst_103 = arith.constant dense<0.000000e+00> : vector<6x6xf32>
    %214 = tpu.matmul %211, %212, %cst_103 {dimension_numbers = #tpu.dot_dimension_numbers<[1], [1], [0], [0], [0, 0, 1, 0], [], []>} : vector<6x8xf32>, vector<6x8xf32>, vector<6x6xf32> -> vector<6x6xf32>
    %cst_104 = arith.constant dense<0xFF800000> : vector<6xf32>
    %215 = vector.multi_reduction <maximumf>, %214, %cst_104 [1] : vector<6x6xf32> to vector<6xf32>
    %216 = vector.shape_cast %215 : vector<6xf32> to vector<6x1xf32>
    %217 = vector.broadcast %216 : vector<6x1xf32> to vector<6x6xf32>
    %218 = arith.subf %214, %217 : vector<6x6xf32>
    %219 = math.exp %218 : vector<6x6xf32>
    %cst_105 = arith.constant dense<0.000000e+00> : vector<6xf32>
    %220 = vector.multi_reduction <add>, %219, %cst_105 [1] : vector<6x6xf32> to vector<6xf32>
    %221 = vector.shape_cast %220 : vector<6xf32> to vector<6x1xf32>
    %222 = vector.broadcast %221 : vector<6x1xf32> to vector<6x6xf32>
    %223 = arith.divf %219, %222 : vector<6x6xf32>
    %cst_106 = arith.constant dense<0.000000e+00> : vector<6x8xf32>
    %224 = tpu.matmul %223, %213, %cst_106 {dimension_numbers = #tpu.dot_dimension_numbers<[1], [0], [0], [1], [0, 0, 1, 1], [], []>} : vector<6x6xf32>, vector<6x8xf32>, vector<6x8xf32> -> vector<6x8xf32>
    %225 = vector.extract_strided_slice %28 {offsets = [3, 0, 0], sizes = [1, 8, 32], strides = [1, 1, 1]} : vector<4x8x32xf32> to vector<1x8x32xf32>
    %226 = vector.shape_cast %225 : vector<1x8x32xf32> to vector<8x32xf32>
    %cst_107 = arith.constant dense<0.000000e+00> : vector<6x32xf32>
    %227 = tpu.matmul %224, %226, %cst_107 {dimension_numbers = #tpu.dot_dimension_numbers<[1], [0], [0], [1], [0, 0, 1, 1], [], []>} : vector<6x8xf32>, vector<8x32xf32>, vector<6x32xf32> -> vector<6x32xf32>
    %228 = arith.addf %183, %227 : vector<6x32xf32>
    %229 = vector.extract_strided_slice %204 {offsets = [6, 0], sizes = [6, 8], strides = [1, 1]} : vector<12x8xf32> to vector<6x8xf32>
    %230 = vector.extract_strided_slice %207 {offsets = [6, 0], sizes = [6, 8], strides = [1, 1]} : vector<12x8xf32> to vector<6x8xf32>
    %231 = vector.extract_strided_slice %210 {offsets = [6, 0], sizes = [6, 8], strides = [1, 1]} : vector<12x8xf32> to vector<6x8xf32>
    %cst_108 = arith.constant dense<0.000000e+00> : vector<6x6xf32>
    %232 = tpu.matmul %229, %230, %cst_108 {dimension_numbers = #tpu.dot_dimension_numbers<[1], [1], [0], [0], [0, 0, 1, 0], [], []>} : vector<6x8xf32>, vector<6x8xf32>, vector<6x6xf32> -> vector<6x6xf32>
    %cst_109 = arith.constant dense<0xFF800000> : vector<6xf32>
    %233 = vector.multi_reduction <maximumf>, %232, %cst_109 [1] : vector<6x6xf32> to vector<6xf32>
    %234 = vector.shape_cast %233 : vector<6xf32> to vector<6x1xf32>
    %235 = vector.broadcast %234 : vector<6x1xf32> to vector<6x6xf32>
    %236 = arith.subf %232, %235 : vector<6x6xf32>
    %237 = math.exp %236 : vector<6x6xf32>
    %cst_110 = arith.constant dense<0.000000e+00> : vector<6xf32>
    %238 = vector.multi_reduction <add>, %237, %cst_110 [1] : vector<6x6xf32> to vector<6xf32>
    %239 = vector.shape_cast %238 : vector<6xf32> to vector<6x1xf32>
    %240 = vector.broadcast %239 : vector<6x1xf32> to vector<6x6xf32>
    %241 = arith.divf %237, %240 : vector<6x6xf32>
    %cst_111 = arith.constant dense<0.000000e+00> : vector<6x8xf32>
    %242 = tpu.matmul %241, %231, %cst_111 {dimension_numbers = #tpu.dot_dimension_numbers<[1], [0], [0], [1], [0, 0, 1, 1], [], []>} : vector<6x6xf32>, vector<6x8xf32>, vector<6x8xf32> -> vector<6x8xf32>
    %243 = vector.extract_strided_slice %28 {offsets = [3, 0, 0], sizes = [1, 8, 32], strides = [1, 1, 1]} : vector<4x8x32xf32> to vector<1x8x32xf32>
    %244 = vector.shape_cast %243 : vector<1x8x32xf32> to vector<8x32xf32>
    %cst_112 = arith.constant dense<0.000000e+00> : vector<6x32xf32>
    %245 = tpu.matmul %242, %244, %cst_112 {dimension_numbers = #tpu.dot_dimension_numbers<[1], [0], [0], [1], [0, 0, 1, 1], [], []>} : vector<6x8xf32>, vector<8x32xf32>, vector<6x32xf32> -> vector<6x32xf32>
    %246 = arith.addf %201, %245 : vector<6x32xf32>
    %247 = tpu.concatenate %228, %246 in 0 : vector<6x32xf32>, vector<6x32xf32> -> vector<12x32xf32>
    %248 = arith.addf %16, %247 : vector<12x32xf32>
    %249 = vector.broadcast %30 : vector<1x32xf32> to vector<12x32xf32>
    %250 = arith.addf %248, %249 : vector<12x32xf32>
    %cst_113 = arith.constant dense<0.000000e+00> : vector<12xf32>
    %251 = vector.multi_reduction <add>, %250, %cst_113 [1] : vector<12x32xf32> to vector<12xf32>
    %252 = vector.shape_cast %251 : vector<12xf32> to vector<12x1xf32>
    %cst_114 = arith.constant 3.200000e+01 : f32
    %253 = vector.broadcast %cst_114 : f32 to vector<12x1xf32>
    %254 = arith.divf %252, %253 : vector<12x1xf32>
    %255 = vector.broadcast %254 : vector<12x1xf32> to vector<12x32xf32>
    %256 = arith.subf %250, %255 : vector<12x32xf32>
    %257 = arith.mulf %256, %256 : vector<12x32xf32>
    %cst_115 = arith.constant dense<0.000000e+00> : vector<12xf32>
    %258 = vector.multi_reduction <add>, %257, %cst_115 [1] : vector<12x32xf32> to vector<12xf32>
    %259 = vector.shape_cast %258 : vector<12xf32> to vector<12x1xf32>
    %cst_116 = arith.constant 3.200000e+01 : f32
    %260 = vector.broadcast %cst_116 : f32 to vector<12x1xf32>
    %261 = arith.divf %259, %260 : vector<12x1xf32>
    %262 = vector.broadcast %254 : vector<12x1xf32> to vector<12x32xf32>
    %263 = arith.subf %250, %262 : vector<12x32xf32>
    %cst_117 = arith.constant 9.99999974E-6 : f32
    %264 = vector.broadcast %cst_117 : f32 to vector<12x1xf32>
    %265 = arith.addf %261, %264 : vector<12x1xf32>
    %266 = math.rsqrt %265 : vector<12x1xf32>
    %267 = vector.broadcast %266 : vector<12x1xf32> to vector<12x32xf32>
    %268 = arith.mulf %263, %267 : vector<12x32xf32>
    %269 = vector.broadcast %32 : vector<1x32xf32> to vector<12x32xf32>
    %270 = arith.mulf %268, %269 : vector<12x32xf32>
    %271 = vector.broadcast %34 : vector<1x32xf32> to vector<12x32xf32>
    %272 = arith.addf %270, %271 : vector<12x32xf32>
    %cst_118 = arith.constant dense<0.000000e+00> : vector<12x128xf32>
    %273 = tpu.matmul %272, %36, %cst_118 {dimension_numbers = #tpu.dot_dimension_numbers<[1], [0], [0], [1], [0, 0, 1, 1], [], []>} : vector<12x32xf32>, vector<32x128xf32>, vector<12x128xf32> -> vector<12x128xf32>
    %274 = vector.broadcast %38 : vector<1x128xf32> to vector<12x128xf32>
    %275 = arith.addf %273, %274 : vector<12x128xf32>
    %cst_119 = arith.constant 5.000000e-01 : f32
    %276 = vector.broadcast %cst_119 : f32 to vector<12x128xf32>
    %277 = arith.mulf %276, %275 : vector<12x128xf32>
    %cst_120 = arith.constant 0.707106769 : f32
    %278 = vector.broadcast %cst_120 : f32 to vector<12x128xf32>
    %279 = arith.mulf %275, %278 : vector<12x128xf32>
    %280 = math.erf %279 : vector<12x128xf32>
    %cst_121 = arith.constant 1.000000e+00 : f32
    %281 = vector.broadcast %cst_121 : f32 to vector<12x128xf32>
    %282 = arith.addf %281, %280 : vector<12x128xf32>
    %283 = arith.mulf %277, %282 : vector<12x128xf32>
    %cst_122 = arith.constant dense<0.000000e+00> : vector<12x32xf32>
    %284 = tpu.matmul %283, %40, %cst_122 {dimension_numbers = #tpu.dot_dimension_numbers<[1], [0], [0], [1], [0, 0, 1, 1], [], []>} : vector<12x128xf32>, vector<128x32xf32>, vector<12x32xf32> -> vector<12x32xf32>
    %285 = vector.broadcast %42 : vector<1x32xf32> to vector<12x32xf32>
    %286 = arith.addf %284, %285 : vector<12x32xf32>
    %287 = arith.addf %250, %286 : vector<12x32xf32>
    %c1 = arith.constant 1 : index
    %c0_123 = arith.constant 0 : index
    %c0_124 = arith.constant 0 : index
    %288 = vector.load %arg6[%c1, %c0_123, %c0_124] : memref<2x1x32xf32, #tpu.memory_space<vmem>>, vector<1x1x32xf32>
    %289 = vector.shape_cast %288 : vector<1x1x32xf32> to vector<1x32xf32>
    %c1_125 = arith.constant 1 : index
    %c0_126 = arith.constant 0 : index
    %c0_127 = arith.constant 0 : index
    %290 = vector.load %arg7[%c1_125, %c0_126, %c0_127] : memref<2x1x32xf32, #tpu.memory_space<vmem>>, vector<1x1x32xf32>
    %291 = vector.shape_cast %290 : vector<1x1x32xf32> to vector<1x32xf32>
    %c1_128 = arith.constant 1 : index
    %c0_129 = arith.constant 0 : index
    %c0_130 = arith.constant 0 : index
    %c0_131 = arith.constant 0 : index
    %292 = vector.load %arg8[%c1_128, %c0_129, %c0_130, %c0_131] : memref<2x4x32x8xf32, #tpu.memory_space<vmem>>, vector<1x4x32x8xf32>
    %293 = vector.shape_cast %292 : vector<1x4x32x8xf32> to vector<4x32x8xf32>
    %c1_132 = arith.constant 1 : index
    %c0_133 = arith.constant 0 : index
    %c0_134 = arith.constant 0 : index
    %c0_135 = arith.constant 0 : index
    %294 = vector.load %arg9[%c1_132, %c0_133, %c0_134, %c0_135] : memref<2x4x32x8xf32, #tpu.memory_space<vmem>>, vector<1x4x32x8xf32>
    %295 = vector.shape_cast %294 : vector<1x4x32x8xf32> to vector<4x32x8xf32>
    %c1_136 = arith.constant 1 : index
    %c0_137 = arith.constant 0 : index
    %c0_138 = arith.constant 0 : index
    %c0_139 = arith.constant 0 : index
    %296 = vector.load %arg10[%c1_136, %c0_137, %c0_138, %c0_139] : memref<2x4x32x8xf32, #tpu.memory_space<vmem>>, vector<1x4x32x8xf32>
    %297 = vector.shape_cast %296 : vector<1x4x32x8xf32> to vector<4x32x8xf32>
    %c1_140 = arith.constant 1 : index
    %c0_141 = arith.constant 0 : index
    %c0_142 = arith.constant 0 : index
    %c0_143 = arith.constant 0 : index
    %298 = vector.load %arg11[%c1_140, %c0_141, %c0_142, %c0_143] : memref<2x4x8x32xf32, #tpu.memory_space<vmem>>, vector<1x4x8x32xf32>
    %299 = vector.shape_cast %298 : vector<1x4x8x32xf32> to vector<4x8x32xf32>
    %c1_144 = arith.constant 1 : index
    %c0_145 = arith.constant 0 : index
    %c0_146 = arith.constant 0 : index
    %300 = vector.load %arg12[%c1_144, %c0_145, %c0_146] : memref<2x1x32xf32, #tpu.memory_space<vmem>>, vector<1x1x32xf32>
    %301 = vector.shape_cast %300 : vector<1x1x32xf32> to vector<1x32xf32>
    %c1_147 = arith.constant 1 : index
    %c0_148 = arith.constant 0 : index
    %c0_149 = arith.constant 0 : index
    %302 = vector.load %arg13[%c1_147, %c0_148, %c0_149] : memref<2x1x32xf32, #tpu.memory_space<vmem>>, vector<1x1x32xf32>
    %303 = vector.shape_cast %302 : vector<1x1x32xf32> to vector<1x32xf32>
    %c1_150 = arith.constant 1 : index
    %c0_151 = arith.constant 0 : index
    %c0_152 = arith.constant 0 : index
    %304 = vector.load %arg14[%c1_150, %c0_151, %c0_152] : memref<2x1x32xf32, #tpu.memory_space<vmem>>, vector<1x1x32xf32>
    %305 = vector.shape_cast %304 : vector<1x1x32xf32> to vector<1x32xf32>
    %c1_153 = arith.constant 1 : index
    %c0_154 = arith.constant 0 : index
    %c0_155 = arith.constant 0 : index
    %306 = vector.load %arg15[%c1_153, %c0_154, %c0_155] : memref<2x32x128xf32, #tpu.memory_space<vmem>>, vector<1x32x128xf32>
    %307 = vector.shape_cast %306 : vector<1x32x128xf32> to vector<32x128xf32>
    %c1_156 = arith.constant 1 : index
    %c0_157 = arith.constant 0 : index
    %c0_158 = arith.constant 0 : index
    %308 = vector.load %arg16[%c1_156, %c0_157, %c0_158] : memref<2x1x128xf32, #tpu.memory_space<vmem>>, vector<1x1x128xf32>
    %309 = vector.shape_cast %308 : vector<1x1x128xf32> to vector<1x128xf32>
    %c1_159 = arith.constant 1 : index
    %c0_160 = arith.constant 0 : index
    %c0_161 = arith.constant 0 : index
    %310 = vector.load %arg17[%c1_159, %c0_160, %c0_161] : memref<2x128x32xf32, #tpu.memory_space<vmem>>, vector<1x128x32xf32>
    %311 = vector.shape_cast %310 : vector<1x128x32xf32> to vector<128x32xf32>
    %c1_162 = arith.constant 1 : index
    %c0_163 = arith.constant 0 : index
    %c0_164 = arith.constant 0 : index
    %312 = vector.load %arg18[%c1_162, %c0_163, %c0_164] : memref<2x1x32xf32, #tpu.memory_space<vmem>>, vector<1x1x32xf32>
    %313 = vector.shape_cast %312 : vector<1x1x32xf32> to vector<1x32xf32>
    %cst_165 = arith.constant dense<0.000000e+00> : vector<12xf32>
    %314 = vector.multi_reduction <add>, %287, %cst_165 [1] : vector<12x32xf32> to vector<12xf32>
    %315 = vector.shape_cast %314 : vector<12xf32> to vector<12x1xf32>
    %cst_166 = arith.constant 3.200000e+01 : f32
    %316 = vector.broadcast %cst_166 : f32 to vector<12x1xf32>
    %317 = arith.divf %315, %316 : vector<12x1xf32>
    %318 = vector.broadcast %317 : vector<12x1xf32> to vector<12x32xf32>
    %319 = arith.subf %287, %318 : vector<12x32xf32>
    %320 = arith.mulf %319, %319 : vector<12x32xf32>
    %cst_167 = arith.constant dense<0.000000e+00> : vector<12xf32>
    %321 = vector.multi_reduction <add>, %320, %cst_167 [1] : vector<12x32xf32> to vector<12xf32>
    %322 = vector.shape_cast %321 : vector<12xf32> to vector<12x1xf32>
    %cst_168 = arith.constant 3.200000e+01 : f32
    %323 = vector.broadcast %cst_168 : f32 to vector<12x1xf32>
    %324 = arith.divf %322, %323 : vector<12x1xf32>
    %325 = vector.broadcast %317 : vector<12x1xf32> to vector<12x32xf32>
    %326 = arith.subf %287, %325 : vector<12x32xf32>
    %cst_169 = arith.constant 9.99999974E-6 : f32
    %327 = vector.broadcast %cst_169 : f32 to vector<12x1xf32>
    %328 = arith.addf %324, %327 : vector<12x1xf32>
    %329 = math.rsqrt %328 : vector<12x1xf32>
    %330 = vector.broadcast %329 : vector<12x1xf32> to vector<12x32xf32>
    %331 = arith.mulf %326, %330 : vector<12x32xf32>
    %332 = vector.broadcast %289 : vector<1x32xf32> to vector<12x32xf32>
    %333 = arith.mulf %331, %332 : vector<12x32xf32>
    %334 = vector.broadcast %291 : vector<1x32xf32> to vector<12x32xf32>
    %335 = arith.addf %333, %334 : vector<12x32xf32>
    %cst_170 = arith.constant 0.000000e+00 : f32
    %336 = vector.broadcast %cst_170 : f32 to vector<6x32xf32>
    %cst_171 = arith.constant 0.000000e+00 : f32
    %337 = vector.broadcast %cst_171 : f32 to vector<6x32xf32>
    %338 = vector.extract_strided_slice %293 {offsets = [0, 0, 0], sizes = [1, 32, 8], strides = [1, 1, 1]} : vector<4x32x8xf32> to vector<1x32x8xf32>
    %339 = vector.shape_cast %338 : vector<1x32x8xf32> to vector<32x8xf32>
    %cst_172 = arith.constant dense<0.000000e+00> : vector<12x8xf32>
    %340 = tpu.matmul %335, %339, %cst_172 {dimension_numbers = #tpu.dot_dimension_numbers<[1], [0], [0], [1], [0, 0, 1, 1], [], []>} : vector<12x32xf32>, vector<32x8xf32>, vector<12x8xf32> -> vector<12x8xf32>
    %341 = vector.extract_strided_slice %295 {offsets = [0, 0, 0], sizes = [1, 32, 8], strides = [1, 1, 1]} : vector<4x32x8xf32> to vector<1x32x8xf32>
    %342 = vector.shape_cast %341 : vector<1x32x8xf32> to vector<32x8xf32>
    %cst_173 = arith.constant dense<0.000000e+00> : vector<12x8xf32>
    %343 = tpu.matmul %335, %342, %cst_173 {dimension_numbers = #tpu.dot_dimension_numbers<[1], [0], [0], [1], [0, 0, 1, 1], [], []>} : vector<12x32xf32>, vector<32x8xf32>, vector<12x8xf32> -> vector<12x8xf32>
    %344 = vector.extract_strided_slice %297 {offsets = [0, 0, 0], sizes = [1, 32, 8], strides = [1, 1, 1]} : vector<4x32x8xf32> to vector<1x32x8xf32>
    %345 = vector.shape_cast %344 : vector<1x32x8xf32> to vector<32x8xf32>
    %cst_174 = arith.constant dense<0.000000e+00> : vector<12x8xf32>
    %346 = tpu.matmul %335, %345, %cst_174 {dimension_numbers = #tpu.dot_dimension_numbers<[1], [0], [0], [1], [0, 0, 1, 1], [], []>} : vector<12x32xf32>, vector<32x8xf32>, vector<12x8xf32> -> vector<12x8xf32>
    %347 = vector.extract_strided_slice %340 {offsets = [0, 0], sizes = [6, 8], strides = [1, 1]} : vector<12x8xf32> to vector<6x8xf32>
    %348 = vector.extract_strided_slice %343 {offsets = [0, 0], sizes = [6, 8], strides = [1, 1]} : vector<12x8xf32> to vector<6x8xf32>
    %349 = vector.extract_strided_slice %346 {offsets = [0, 0], sizes = [6, 8], strides = [1, 1]} : vector<12x8xf32> to vector<6x8xf32>
    %cst_175 = arith.constant dense<0.000000e+00> : vector<6x6xf32>
    %350 = tpu.matmul %347, %348, %cst_175 {dimension_numbers = #tpu.dot_dimension_numbers<[1], [1], [0], [0], [0, 0, 1, 0], [], []>} : vector<6x8xf32>, vector<6x8xf32>, vector<6x6xf32> -> vector<6x6xf32>
    %cst_176 = arith.constant dense<0xFF800000> : vector<6xf32>
    %351 = vector.multi_reduction <maximumf>, %350, %cst_176 [1] : vector<6x6xf32> to vector<6xf32>
    %352 = vector.shape_cast %351 : vector<6xf32> to vector<6x1xf32>
    %353 = vector.broadcast %352 : vector<6x1xf32> to vector<6x6xf32>
    %354 = arith.subf %350, %353 : vector<6x6xf32>
    %355 = math.exp %354 : vector<6x6xf32>
    %cst_177 = arith.constant dense<0.000000e+00> : vector<6xf32>
    %356 = vector.multi_reduction <add>, %355, %cst_177 [1] : vector<6x6xf32> to vector<6xf32>
    %357 = vector.shape_cast %356 : vector<6xf32> to vector<6x1xf32>
    %358 = vector.broadcast %357 : vector<6x1xf32> to vector<6x6xf32>
    %359 = arith.divf %355, %358 : vector<6x6xf32>
    %cst_178 = arith.constant dense<0.000000e+00> : vector<6x8xf32>
    %360 = tpu.matmul %359, %349, %cst_178 {dimension_numbers = #tpu.dot_dimension_numbers<[1], [0], [0], [1], [0, 0, 1, 1], [], []>} : vector<6x6xf32>, vector<6x8xf32>, vector<6x8xf32> -> vector<6x8xf32>
    %361 = vector.extract_strided_slice %299 {offsets = [0, 0, 0], sizes = [1, 8, 32], strides = [1, 1, 1]} : vector<4x8x32xf32> to vector<1x8x32xf32>
    %362 = vector.shape_cast %361 : vector<1x8x32xf32> to vector<8x32xf32>
    %cst_179 = arith.constant dense<0.000000e+00> : vector<6x32xf32>
    %363 = tpu.matmul %360, %362, %cst_179 {dimension_numbers = #tpu.dot_dimension_numbers<[1], [0], [0], [1], [0, 0, 1, 1], [], []>} : vector<6x8xf32>, vector<8x32xf32>, vector<6x32xf32> -> vector<6x32xf32>
    %364 = arith.addf %336, %363 : vector<6x32xf32>
    %365 = vector.extract_strided_slice %340 {offsets = [6, 0], sizes = [6, 8], strides = [1, 1]} : vector<12x8xf32> to vector<6x8xf32>
    %366 = vector.extract_strided_slice %343 {offsets = [6, 0], sizes = [6, 8], strides = [1, 1]} : vector<12x8xf32> to vector<6x8xf32>
    %367 = vector.extract_strided_slice %346 {offsets = [6, 0], sizes = [6, 8], strides = [1, 1]} : vector<12x8xf32> to vector<6x8xf32>
    %cst_180 = arith.constant dense<0.000000e+00> : vector<6x6xf32>
    %368 = tpu.matmul %365, %366, %cst_180 {dimension_numbers = #tpu.dot_dimension_numbers<[1], [1], [0], [0], [0, 0, 1, 0], [], []>} : vector<6x8xf32>, vector<6x8xf32>, vector<6x6xf32> -> vector<6x6xf32>
    %cst_181 = arith.constant dense<0xFF800000> : vector<6xf32>
    %369 = vector.multi_reduction <maximumf>, %368, %cst_181 [1] : vector<6x6xf32> to vector<6xf32>
    %370 = vector.shape_cast %369 : vector<6xf32> to vector<6x1xf32>
    %371 = vector.broadcast %370 : vector<6x1xf32> to vector<6x6xf32>
    %372 = arith.subf %368, %371 : vector<6x6xf32>
    %373 = math.exp %372 : vector<6x6xf32>
    %cst_182 = arith.constant dense<0.000000e+00> : vector<6xf32>
    %374 = vector.multi_reduction <add>, %373, %cst_182 [1] : vector<6x6xf32> to vector<6xf32>
    %375 = vector.shape_cast %374 : vector<6xf32> to vector<6x1xf32>
    %376 = vector.broadcast %375 : vector<6x1xf32> to vector<6x6xf32>
    %377 = arith.divf %373, %376 : vector<6x6xf32>
    %cst_183 = arith.constant dense<0.000000e+00> : vector<6x8xf32>
    %378 = tpu.matmul %377, %367, %cst_183 {dimension_numbers = #tpu.dot_dimension_numbers<[1], [0], [0], [1], [0, 0, 1, 1], [], []>} : vector<6x6xf32>, vector<6x8xf32>, vector<6x8xf32> -> vector<6x8xf32>
    %379 = vector.extract_strided_slice %299 {offsets = [0, 0, 0], sizes = [1, 8, 32], strides = [1, 1, 1]} : vector<4x8x32xf32> to vector<1x8x32xf32>
    %380 = vector.shape_cast %379 : vector<1x8x32xf32> to vector<8x32xf32>
    %cst_184 = arith.constant dense<0.000000e+00> : vector<6x32xf32>
    %381 = tpu.matmul %378, %380, %cst_184 {dimension_numbers = #tpu.dot_dimension_numbers<[1], [0], [0], [1], [0, 0, 1, 1], [], []>} : vector<6x8xf32>, vector<8x32xf32>, vector<6x32xf32> -> vector<6x32xf32>
    %382 = arith.addf %337, %381 : vector<6x32xf32>
    %383 = vector.extract_strided_slice %293 {offsets = [1, 0, 0], sizes = [1, 32, 8], strides = [1, 1, 1]} : vector<4x32x8xf32> to vector<1x32x8xf32>
    %384 = vector.shape_cast %383 : vector<1x32x8xf32> to vector<32x8xf32>
    %cst_185 = arith.constant dense<0.000000e+00> : vector<12x8xf32>
    %385 = tpu.matmul %335, %384, %cst_185 {dimension_numbers = #tpu.dot_dimension_numbers<[1], [0], [0], [1], [0, 0, 1, 1], [], []>} : vector<12x32xf32>, vector<32x8xf32>, vector<12x8xf32> -> vector<12x8xf32>
    %386 = vector.extract_strided_slice %295 {offsets = [1, 0, 0], sizes = [1, 32, 8], strides = [1, 1, 1]} : vector<4x32x8xf32> to vector<1x32x8xf32>
    %387 = vector.shape_cast %386 : vector<1x32x8xf32> to vector<32x8xf32>
    %cst_186 = arith.constant dense<0.000000e+00> : vector<12x8xf32>
    %388 = tpu.matmul %335, %387, %cst_186 {dimension_numbers = #tpu.dot_dimension_numbers<[1], [0], [0], [1], [0, 0, 1, 1], [], []>} : vector<12x32xf32>, vector<32x8xf32>, vector<12x8xf32> -> vector<12x8xf32>
    %389 = vector.extract_strided_slice %297 {offsets = [1, 0, 0], sizes = [1, 32, 8], strides = [1, 1, 1]} : vector<4x32x8xf32> to vector<1x32x8xf32>
    %390 = vector.shape_cast %389 : vector<1x32x8xf32> to vector<32x8xf32>
    %cst_187 = arith.constant dense<0.000000e+00> : vector<12x8xf32>
    %391 = tpu.matmul %335, %390, %cst_187 {dimension_numbers = #tpu.dot_dimension_numbers<[1], [0], [0], [1], [0, 0, 1, 1], [], []>} : vector<12x32xf32>, vector<32x8xf32>, vector<12x8xf32> -> vector<12x8xf32>
    %392 = vector.extract_strided_slice %385 {offsets = [0, 0], sizes = [6, 8], strides = [1, 1]} : vector<12x8xf32> to vector<6x8xf32>
    %393 = vector.extract_strided_slice %388 {offsets = [0, 0], sizes = [6, 8], strides = [1, 1]} : vector<12x8xf32> to vector<6x8xf32>
    %394 = vector.extract_strided_slice %391 {offsets = [0, 0], sizes = [6, 8], strides = [1, 1]} : vector<12x8xf32> to vector<6x8xf32>
    %cst_188 = arith.constant dense<0.000000e+00> : vector<6x6xf32>
    %395 = tpu.matmul %392, %393, %cst_188 {dimension_numbers = #tpu.dot_dimension_numbers<[1], [1], [0], [0], [0, 0, 1, 0], [], []>} : vector<6x8xf32>, vector<6x8xf32>, vector<6x6xf32> -> vector<6x6xf32>
    %cst_189 = arith.constant dense<0xFF800000> : vector<6xf32>
    %396 = vector.multi_reduction <maximumf>, %395, %cst_189 [1] : vector<6x6xf32> to vector<6xf32>
    %397 = vector.shape_cast %396 : vector<6xf32> to vector<6x1xf32>
    %398 = vector.broadcast %397 : vector<6x1xf32> to vector<6x6xf32>
    %399 = arith.subf %395, %398 : vector<6x6xf32>
    %400 = math.exp %399 : vector<6x6xf32>
    %cst_190 = arith.constant dense<0.000000e+00> : vector<6xf32>
    %401 = vector.multi_reduction <add>, %400, %cst_190 [1] : vector<6x6xf32> to vector<6xf32>
    %402 = vector.shape_cast %401 : vector<6xf32> to vector<6x1xf32>
    %403 = vector.broadcast %402 : vector<6x1xf32> to vector<6x6xf32>
    %404 = arith.divf %400, %403 : vector<6x6xf32>
    %cst_191 = arith.constant dense<0.000000e+00> : vector<6x8xf32>
    %405 = tpu.matmul %404, %394, %cst_191 {dimension_numbers = #tpu.dot_dimension_numbers<[1], [0], [0], [1], [0, 0, 1, 1], [], []>} : vector<6x6xf32>, vector<6x8xf32>, vector<6x8xf32> -> vector<6x8xf32>
    %406 = vector.extract_strided_slice %299 {offsets = [1, 0, 0], sizes = [1, 8, 32], strides = [1, 1, 1]} : vector<4x8x32xf32> to vector<1x8x32xf32>
    %407 = vector.shape_cast %406 : vector<1x8x32xf32> to vector<8x32xf32>
    %cst_192 = arith.constant dense<0.000000e+00> : vector<6x32xf32>
    %408 = tpu.matmul %405, %407, %cst_192 {dimension_numbers = #tpu.dot_dimension_numbers<[1], [0], [0], [1], [0, 0, 1, 1], [], []>} : vector<6x8xf32>, vector<8x32xf32>, vector<6x32xf32> -> vector<6x32xf32>
    %409 = arith.addf %364, %408 : vector<6x32xf32>
    %410 = vector.extract_strided_slice %385 {offsets = [6, 0], sizes = [6, 8], strides = [1, 1]} : vector<12x8xf32> to vector<6x8xf32>
    %411 = vector.extract_strided_slice %388 {offsets = [6, 0], sizes = [6, 8], strides = [1, 1]} : vector<12x8xf32> to vector<6x8xf32>
    %412 = vector.extract_strided_slice %391 {offsets = [6, 0], sizes = [6, 8], strides = [1, 1]} : vector<12x8xf32> to vector<6x8xf32>
    %cst_193 = arith.constant dense<0.000000e+00> : vector<6x6xf32>
    %413 = tpu.matmul %410, %411, %cst_193 {dimension_numbers = #tpu.dot_dimension_numbers<[1], [1], [0], [0], [0, 0, 1, 0], [], []>} : vector<6x8xf32>, vector<6x8xf32>, vector<6x6xf32> -> vector<6x6xf32>
    %cst_194 = arith.constant dense<0xFF800000> : vector<6xf32>
    %414 = vector.multi_reduction <maximumf>, %413, %cst_194 [1] : vector<6x6xf32> to vector<6xf32>
    %415 = vector.shape_cast %414 : vector<6xf32> to vector<6x1xf32>
    %416 = vector.broadcast %415 : vector<6x1xf32> to vector<6x6xf32>
    %417 = arith.subf %413, %416 : vector<6x6xf32>
    %418 = math.exp %417 : vector<6x6xf32>
    %cst_195 = arith.constant dense<0.000000e+00> : vector<6xf32>
    %419 = vector.multi_reduction <add>, %418, %cst_195 [1] : vector<6x6xf32> to vector<6xf32>
    %420 = vector.shape_cast %419 : vector<6xf32> to vector<6x1xf32>
    %421 = vector.broadcast %420 : vector<6x1xf32> to vector<6x6xf32>
    %422 = arith.divf %418, %421 : vector<6x6xf32>
    %cst_196 = arith.constant dense<0.000000e+00> : vector<6x8xf32>
    %423 = tpu.matmul %422, %412, %cst_196 {dimension_numbers = #tpu.dot_dimension_numbers<[1], [0], [0], [1], [0, 0, 1, 1], [], []>} : vector<6x6xf32>, vector<6x8xf32>, vector<6x8xf32> -> vector<6x8xf32>
    %424 = vector.extract_strided_slice %299 {offsets = [1, 0, 0], sizes = [1, 8, 32], strides = [1, 1, 1]} : vector<4x8x32xf32> to vector<1x8x32xf32>
    %425 = vector.shape_cast %424 : vector<1x8x32xf32> to vector<8x32xf32>
    %cst_197 = arith.constant dense<0.000000e+00> : vector<6x32xf32>
    %426 = tpu.matmul %423, %425, %cst_197 {dimension_numbers = #tpu.dot_dimension_numbers<[1], [0], [0], [1], [0, 0, 1, 1], [], []>} : vector<6x8xf32>, vector<8x32xf32>, vector<6x32xf32> -> vector<6x32xf32>
    %427 = arith.addf %382, %426 : vector<6x32xf32>
    %428 = vector.extract_strided_slice %293 {offsets = [2, 0, 0], sizes = [1, 32, 8], strides = [1, 1, 1]} : vector<4x32x8xf32> to vector<1x32x8xf32>
    %429 = vector.shape_cast %428 : vector<1x32x8xf32> to vector<32x8xf32>
    %cst_198 = arith.constant dense<0.000000e+00> : vector<12x8xf32>
    %430 = tpu.matmul %335, %429, %cst_198 {dimension_numbers = #tpu.dot_dimension_numbers<[1], [0], [0], [1], [0, 0, 1, 1], [], []>} : vector<12x32xf32>, vector<32x8xf32>, vector<12x8xf32> -> vector<12x8xf32>
    %431 = vector.extract_strided_slice %295 {offsets = [2, 0, 0], sizes = [1, 32, 8], strides = [1, 1, 1]} : vector<4x32x8xf32> to vector<1x32x8xf32>
    %432 = vector.shape_cast %431 : vector<1x32x8xf32> to vector<32x8xf32>
    %cst_199 = arith.constant dense<0.000000e+00> : vector<12x8xf32>
    %433 = tpu.matmul %335, %432, %cst_199 {dimension_numbers = #tpu.dot_dimension_numbers<[1], [0], [0], [1], [0, 0, 1, 1], [], []>} : vector<12x32xf32>, vector<32x8xf32>, vector<12x8xf32> -> vector<12x8xf32>
    %434 = vector.extract_strided_slice %297 {offsets = [2, 0, 0], sizes = [1, 32, 8], strides = [1, 1, 1]} : vector<4x32x8xf32> to vector<1x32x8xf32>
    %435 = vector.shape_cast %434 : vector<1x32x8xf32> to vector<32x8xf32>
    %cst_200 = arith.constant dense<0.000000e+00> : vector<12x8xf32>
    %436 = tpu.matmul %335, %435, %cst_200 {dimension_numbers = #tpu.dot_dimension_numbers<[1], [0], [0], [1], [0, 0, 1, 1], [], []>} : vector<12x32xf32>, vector<32x8xf32>, vector<12x8xf32> -> vector<12x8xf32>
    %437 = vector.extract_strided_slice %430 {offsets = [0, 0], sizes = [6, 8], strides = [1, 1]} : vector<12x8xf32> to vector<6x8xf32>
    %438 = vector.extract_strided_slice %433 {offsets = [0, 0], sizes = [6, 8], strides = [1, 1]} : vector<12x8xf32> to vector<6x8xf32>
    %439 = vector.extract_strided_slice %436 {offsets = [0, 0], sizes = [6, 8], strides = [1, 1]} : vector<12x8xf32> to vector<6x8xf32>
    %cst_201 = arith.constant dense<0.000000e+00> : vector<6x6xf32>
    %440 = tpu.matmul %437, %438, %cst_201 {dimension_numbers = #tpu.dot_dimension_numbers<[1], [1], [0], [0], [0, 0, 1, 0], [], []>} : vector<6x8xf32>, vector<6x8xf32>, vector<6x6xf32> -> vector<6x6xf32>
    %cst_202 = arith.constant dense<0xFF800000> : vector<6xf32>
    %441 = vector.multi_reduction <maximumf>, %440, %cst_202 [1] : vector<6x6xf32> to vector<6xf32>
    %442 = vector.shape_cast %441 : vector<6xf32> to vector<6x1xf32>
    %443 = vector.broadcast %442 : vector<6x1xf32> to vector<6x6xf32>
    %444 = arith.subf %440, %443 : vector<6x6xf32>
    %445 = math.exp %444 : vector<6x6xf32>
    %cst_203 = arith.constant dense<0.000000e+00> : vector<6xf32>
    %446 = vector.multi_reduction <add>, %445, %cst_203 [1] : vector<6x6xf32> to vector<6xf32>
    %447 = vector.shape_cast %446 : vector<6xf32> to vector<6x1xf32>
    %448 = vector.broadcast %447 : vector<6x1xf32> to vector<6x6xf32>
    %449 = arith.divf %445, %448 : vector<6x6xf32>
    %cst_204 = arith.constant dense<0.000000e+00> : vector<6x8xf32>
    %450 = tpu.matmul %449, %439, %cst_204 {dimension_numbers = #tpu.dot_dimension_numbers<[1], [0], [0], [1], [0, 0, 1, 1], [], []>} : vector<6x6xf32>, vector<6x8xf32>, vector<6x8xf32> -> vector<6x8xf32>
    %451 = vector.extract_strided_slice %299 {offsets = [2, 0, 0], sizes = [1, 8, 32], strides = [1, 1, 1]} : vector<4x8x32xf32> to vector<1x8x32xf32>
    %452 = vector.shape_cast %451 : vector<1x8x32xf32> to vector<8x32xf32>
    %cst_205 = arith.constant dense<0.000000e+00> : vector<6x32xf32>
    %453 = tpu.matmul %450, %452, %cst_205 {dimension_numbers = #tpu.dot_dimension_numbers<[1], [0], [0], [1], [0, 0, 1, 1], [], []>} : vector<6x8xf32>, vector<8x32xf32>, vector<6x32xf32> -> vector<6x32xf32>
    %454 = arith.addf %409, %453 : vector<6x32xf32>
    %455 = vector.extract_strided_slice %430 {offsets = [6, 0], sizes = [6, 8], strides = [1, 1]} : vector<12x8xf32> to vector<6x8xf32>
    %456 = vector.extract_strided_slice %433 {offsets = [6, 0], sizes = [6, 8], strides = [1, 1]} : vector<12x8xf32> to vector<6x8xf32>
    %457 = vector.extract_strided_slice %436 {offsets = [6, 0], sizes = [6, 8], strides = [1, 1]} : vector<12x8xf32> to vector<6x8xf32>
    %cst_206 = arith.constant dense<0.000000e+00> : vector<6x6xf32>
    %458 = tpu.matmul %455, %456, %cst_206 {dimension_numbers = #tpu.dot_dimension_numbers<[1], [1], [0], [0], [0, 0, 1, 0], [], []>} : vector<6x8xf32>, vector<6x8xf32>, vector<6x6xf32> -> vector<6x6xf32>
    %cst_207 = arith.constant dense<0xFF800000> : vector<6xf32>
    %459 = vector.multi_reduction <maximumf>, %458, %cst_207 [1] : vector<6x6xf32> to vector<6xf32>
    %460 = vector.shape_cast %459 : vector<6xf32> to vector<6x1xf32>
    %461 = vector.broadcast %460 : vector<6x1xf32> to vector<6x6xf32>
    %462 = arith.subf %458, %461 : vector<6x6xf32>
    %463 = math.exp %462 : vector<6x6xf32>
    %cst_208 = arith.constant dense<0.000000e+00> : vector<6xf32>
    %464 = vector.multi_reduction <add>, %463, %cst_208 [1] : vector<6x6xf32> to vector<6xf32>
    %465 = vector.shape_cast %464 : vector<6xf32> to vector<6x1xf32>
    %466 = vector.broadcast %465 : vector<6x1xf32> to vector<6x6xf32>
    %467 = arith.divf %463, %466 : vector<6x6xf32>
    %cst_209 = arith.constant dense<0.000000e+00> : vector<6x8xf32>
    %468 = tpu.matmul %467, %457, %cst_209 {dimension_numbers = #tpu.dot_dimension_numbers<[1], [0], [0], [1], [0, 0, 1, 1], [], []>} : vector<6x6xf32>, vector<6x8xf32>, vector<6x8xf32> -> vector<6x8xf32>
    %469 = vector.extract_strided_slice %299 {offsets = [2, 0, 0], sizes = [1, 8, 32], strides = [1, 1, 1]} : vector<4x8x32xf32> to vector<1x8x32xf32>
    %470 = vector.shape_cast %469 : vector<1x8x32xf32> to vector<8x32xf32>
    %cst_210 = arith.constant dense<0.000000e+00> : vector<6x32xf32>
    %471 = tpu.matmul %468, %470, %cst_210 {dimension_numbers = #tpu.dot_dimension_numbers<[1], [0], [0], [1], [0, 0, 1, 1], [], []>} : vector<6x8xf32>, vector<8x32xf32>, vector<6x32xf32> -> vector<6x32xf32>
    %472 = arith.addf %427, %471 : vector<6x32xf32>
    %473 = vector.extract_strided_slice %293 {offsets = [3, 0, 0], sizes = [1, 32, 8], strides = [1, 1, 1]} : vector<4x32x8xf32> to vector<1x32x8xf32>
    %474 = vector.shape_cast %473 : vector<1x32x8xf32> to vector<32x8xf32>
    %cst_211 = arith.constant dense<0.000000e+00> : vector<12x8xf32>
    %475 = tpu.matmul %335, %474, %cst_211 {dimension_numbers = #tpu.dot_dimension_numbers<[1], [0], [0], [1], [0, 0, 1, 1], [], []>} : vector<12x32xf32>, vector<32x8xf32>, vector<12x8xf32> -> vector<12x8xf32>
    %476 = vector.extract_strided_slice %295 {offsets = [3, 0, 0], sizes = [1, 32, 8], strides = [1, 1, 1]} : vector<4x32x8xf32> to vector<1x32x8xf32>
    %477 = vector.shape_cast %476 : vector<1x32x8xf32> to vector<32x8xf32>
    %cst_212 = arith.constant dense<0.000000e+00> : vector<12x8xf32>
    %478 = tpu.matmul %335, %477, %cst_212 {dimension_numbers = #tpu.dot_dimension_numbers<[1], [0], [0], [1], [0, 0, 1, 1], [], []>} : vector<12x32xf32>, vector<32x8xf32>, vector<12x8xf32> -> vector<12x8xf32>
    %479 = vector.extract_strided_slice %297 {offsets = [3, 0, 0], sizes = [1, 32, 8], strides = [1, 1, 1]} : vector<4x32x8xf32> to vector<1x32x8xf32>
    %480 = vector.shape_cast %479 : vector<1x32x8xf32> to vector<32x8xf32>
    %cst_213 = arith.constant dense<0.000000e+00> : vector<12x8xf32>
    %481 = tpu.matmul %335, %480, %cst_213 {dimension_numbers = #tpu.dot_dimension_numbers<[1], [0], [0], [1], [0, 0, 1, 1], [], []>} : vector<12x32xf32>, vector<32x8xf32>, vector<12x8xf32> -> vector<12x8xf32>
    %482 = vector.extract_strided_slice %475 {offsets = [0, 0], sizes = [6, 8], strides = [1, 1]} : vector<12x8xf32> to vector<6x8xf32>
    %483 = vector.extract_strided_slice %478 {offsets = [0, 0], sizes = [6, 8], strides = [1, 1]} : vector<12x8xf32> to vector<6x8xf32>
    %484 = vector.extract_strided_slice %481 {offsets = [0, 0], sizes = [6, 8], strides = [1, 1]} : vector<12x8xf32> to vector<6x8xf32>
    %cst_214 = arith.constant dense<0.000000e+00> : vector<6x6xf32>
    %485 = tpu.matmul %482, %483, %cst_214 {dimension_numbers = #tpu.dot_dimension_numbers<[1], [1], [0], [0], [0, 0, 1, 0], [], []>} : vector<6x8xf32>, vector<6x8xf32>, vector<6x6xf32> -> vector<6x6xf32>
    %cst_215 = arith.constant dense<0xFF800000> : vector<6xf32>
    %486 = vector.multi_reduction <maximumf>, %485, %cst_215 [1] : vector<6x6xf32> to vector<6xf32>
    %487 = vector.shape_cast %486 : vector<6xf32> to vector<6x1xf32>
    %488 = vector.broadcast %487 : vector<6x1xf32> to vector<6x6xf32>
    %489 = arith.subf %485, %488 : vector<6x6xf32>
    %490 = math.exp %489 : vector<6x6xf32>
    %cst_216 = arith.constant dense<0.000000e+00> : vector<6xf32>
    %491 = vector.multi_reduction <add>, %490, %cst_216 [1] : vector<6x6xf32> to vector<6xf32>
    %492 = vector.shape_cast %491 : vector<6xf32> to vector<6x1xf32>
    %493 = vector.broadcast %492 : vector<6x1xf32> to vector<6x6xf32>
    %494 = arith.divf %490, %493 : vector<6x6xf32>
    %cst_217 = arith.constant dense<0.000000e+00> : vector<6x8xf32>
    %495 = tpu.matmul %494, %484, %cst_217 {dimension_numbers = #tpu.dot_dimension_numbers<[1], [0], [0], [1], [0, 0, 1, 1], [], []>} : vector<6x6xf32>, vector<6x8xf32>, vector<6x8xf32> -> vector<6x8xf32>
    %496 = vector.extract_strided_slice %299 {offsets = [3, 0, 0], sizes = [1, 8, 32], strides = [1, 1, 1]} : vector<4x8x32xf32> to vector<1x8x32xf32>
    %497 = vector.shape_cast %496 : vector<1x8x32xf32> to vector<8x32xf32>
    %cst_218 = arith.constant dense<0.000000e+00> : vector<6x32xf32>
    %498 = tpu.matmul %495, %497, %cst_218 {dimension_numbers = #tpu.dot_dimension_numbers<[1], [0], [0], [1], [0, 0, 1, 1], [], []>} : vector<6x8xf32>, vector<8x32xf32>, vector<6x32xf32> -> vector<6x32xf32>
    %499 = arith.addf %454, %498 : vector<6x32xf32>
    %500 = vector.extract_strided_slice %475 {offsets = [6, 0], sizes = [6, 8], strides = [1, 1]} : vector<12x8xf32> to vector<6x8xf32>
    %501 = vector.extract_strided_slice %478 {offsets = [6, 0], sizes = [6, 8], strides = [1, 1]} : vector<12x8xf32> to vector<6x8xf32>
    %502 = vector.extract_strided_slice %481 {offsets = [6, 0], sizes = [6, 8], strides = [1, 1]} : vector<12x8xf32> to vector<6x8xf32>
    %cst_219 = arith.constant dense<0.000000e+00> : vector<6x6xf32>
    %503 = tpu.matmul %500, %501, %cst_219 {dimension_numbers = #tpu.dot_dimension_numbers<[1], [1], [0], [0], [0, 0, 1, 0], [], []>} : vector<6x8xf32>, vector<6x8xf32>, vector<6x6xf32> -> vector<6x6xf32>
    %cst_220 = arith.constant dense<0xFF800000> : vector<6xf32>
    %504 = vector.multi_reduction <maximumf>, %503, %cst_220 [1] : vector<6x6xf32> to vector<6xf32>
    %505 = vector.shape_cast %504 : vector<6xf32> to vector<6x1xf32>
    %506 = vector.broadcast %505 : vector<6x1xf32> to vector<6x6xf32>
    %507 = arith.subf %503, %506 : vector<6x6xf32>
    %508 = math.exp %507 : vector<6x6xf32>
    %cst_221 = arith.constant dense<0.000000e+00> : vector<6xf32>
    %509 = vector.multi_reduction <add>, %508, %cst_221 [1] : vector<6x6xf32> to vector<6xf32>
    %510 = vector.shape_cast %509 : vector<6xf32> to vector<6x1xf32>
    %511 = vector.broadcast %510 : vector<6x1xf32> to vector<6x6xf32>
    %512 = arith.divf %508, %511 : vector<6x6xf32>
    %cst_222 = arith.constant dense<0.000000e+00> : vector<6x8xf32>
    %513 = tpu.matmul %512, %502, %cst_222 {dimension_numbers = #tpu.dot_dimension_numbers<[1], [0], [0], [1], [0, 0, 1, 1], [], []>} : vector<6x6xf32>, vector<6x8xf32>, vector<6x8xf32> -> vector<6x8xf32>
    %514 = vector.extract_strided_slice %299 {offsets = [3, 0, 0], sizes = [1, 8, 32], strides = [1, 1, 1]} : vector<4x8x32xf32> to vector<1x8x32xf32>
    %515 = vector.shape_cast %514 : vector<1x8x32xf32> to vector<8x32xf32>
    %cst_223 = arith.constant dense<0.000000e+00> : vector<6x32xf32>
    %516 = tpu.matmul %513, %515, %cst_223 {dimension_numbers = #tpu.dot_dimension_numbers<[1], [0], [0], [1], [0, 0, 1, 1], [], []>} : vector<6x8xf32>, vector<8x32xf32>, vector<6x32xf32> -> vector<6x32xf32>
    %517 = arith.addf %472, %516 : vector<6x32xf32>
    %518 = tpu.concatenate %499, %517 in 0 : vector<6x32xf32>, vector<6x32xf32> -> vector<12x32xf32>
    %519 = arith.addf %287, %518 : vector<12x32xf32>
    %520 = vector.broadcast %301 : vector<1x32xf32> to vector<12x32xf32>
    %521 = arith.addf %519, %520 : vector<12x32xf32>
    %cst_224 = arith.constant dense<0.000000e+00> : vector<12xf32>
    %522 = vector.multi_reduction <add>, %521, %cst_224 [1] : vector<12x32xf32> to vector<12xf32>
    %523 = vector.shape_cast %522 : vector<12xf32> to vector<12x1xf32>
    %cst_225 = arith.constant 3.200000e+01 : f32
    %524 = vector.broadcast %cst_225 : f32 to vector<12x1xf32>
    %525 = arith.divf %523, %524 : vector<12x1xf32>
    %526 = vector.broadcast %525 : vector<12x1xf32> to vector<12x32xf32>
    %527 = arith.subf %521, %526 : vector<12x32xf32>
    %528 = arith.mulf %527, %527 : vector<12x32xf32>
    %cst_226 = arith.constant dense<0.000000e+00> : vector<12xf32>
    %529 = vector.multi_reduction <add>, %528, %cst_226 [1] : vector<12x32xf32> to vector<12xf32>
    %530 = vector.shape_cast %529 : vector<12xf32> to vector<12x1xf32>
    %cst_227 = arith.constant 3.200000e+01 : f32
    %531 = vector.broadcast %cst_227 : f32 to vector<12x1xf32>
    %532 = arith.divf %530, %531 : vector<12x1xf32>
    %533 = vector.broadcast %525 : vector<12x1xf32> to vector<12x32xf32>
    %534 = arith.subf %521, %533 : vector<12x32xf32>
    %cst_228 = arith.constant 9.99999974E-6 : f32
    %535 = vector.broadcast %cst_228 : f32 to vector<12x1xf32>
    %536 = arith.addf %532, %535 : vector<12x1xf32>
    %537 = math.rsqrt %536 : vector<12x1xf32>
    %538 = vector.broadcast %537 : vector<12x1xf32> to vector<12x32xf32>
    %539 = arith.mulf %534, %538 : vector<12x32xf32>
    %540 = vector.broadcast %303 : vector<1x32xf32> to vector<12x32xf32>
    %541 = arith.mulf %539, %540 : vector<12x32xf32>
    %542 = vector.broadcast %305 : vector<1x32xf32> to vector<12x32xf32>
    %543 = arith.addf %541, %542 : vector<12x32xf32>
    %cst_229 = arith.constant dense<0.000000e+00> : vector<12x128xf32>
    %544 = tpu.matmul %543, %307, %cst_229 {dimension_numbers = #tpu.dot_dimension_numbers<[1], [0], [0], [1], [0, 0, 1, 1], [], []>} : vector<12x32xf32>, vector<32x128xf32>, vector<12x128xf32> -> vector<12x128xf32>
    %545 = vector.broadcast %309 : vector<1x128xf32> to vector<12x128xf32>
    %546 = arith.addf %544, %545 : vector<12x128xf32>
    %cst_230 = arith.constant 5.000000e-01 : f32
    %547 = vector.broadcast %cst_230 : f32 to vector<12x128xf32>
    %548 = arith.mulf %547, %546 : vector<12x128xf32>
    %cst_231 = arith.constant 0.707106769 : f32
    %549 = vector.broadcast %cst_231 : f32 to vector<12x128xf32>
    %550 = arith.mulf %546, %549 : vector<12x128xf32>
    %551 = math.erf %550 : vector<12x128xf32>
    %cst_232 = arith.constant 1.000000e+00 : f32
    %552 = vector.broadcast %cst_232 : f32 to vector<12x128xf32>
    %553 = arith.addf %552, %551 : vector<12x128xf32>
    %554 = arith.mulf %548, %553 : vector<12x128xf32>
    %cst_233 = arith.constant dense<0.000000e+00> : vector<12x32xf32>
    %555 = tpu.matmul %554, %311, %cst_233 {dimension_numbers = #tpu.dot_dimension_numbers<[1], [0], [0], [1], [0, 0, 1, 1], [], []>} : vector<12x128xf32>, vector<128x32xf32>, vector<12x32xf32> -> vector<12x32xf32>
    %556 = vector.broadcast %313 : vector<1x32xf32> to vector<12x32xf32>
    %557 = arith.addf %555, %556 : vector<12x32xf32>
    %558 = arith.addf %521, %557 : vector<12x32xf32>
    %c0_234 = arith.constant 0 : index
    %c0_235 = arith.constant 0 : index
    %559 = vector.load %arg19[%c0_234, %c0_235] : memref<12x32xf32, #tpu.memory_space<vmem>>, vector<12x32xf32>
    tpu.vector_store %arg19[%c0_234, %c0_235], %558 {strides = array<i32>} : memref<12x32xf32, #tpu.memory_space<vmem>>, vector<12x32xf32>,
    return
  }
}

module attributes {stable_mosaic.version = 11 : i64} {
  func.func @_fsm_step_kernel(%arg0: memref<12x32xf32, #tpu.memory_space<vmem>>, %arg1: memref<2x5x1xf32, #tpu.memory_space<vmem>>, %arg2: memref<1x16xf32, #tpu.memory_space<vmem>>, %arg3: memref<2x5x2xf32, #tpu.memory_space<vmem>>, %arg4: memref<1x32xf32, #tpu.memory_space<vmem>>, %arg5: memref<1x32xf32, #tpu.memory_space<vmem>>, %arg6: memref<32x32xf32, #tpu.memory_space<vmem>>, %arg7: memref<1x32xf32, #tpu.memory_space<vmem>>, %arg8: memref<48x16xf32, #tpu.memory_space<vmem>>, %arg9: memref<1x16xf32, #tpu.memory_space<vmem>>, %arg10: memref<16x8xf32, #tpu.memory_space<vmem>>, %arg11: memref<1x8xf32, #tpu.memory_space<vmem>>, %arg12: memref<8x2xf32, #tpu.memory_space<vmem>>, %arg13: memref<1x2xf32, #tpu.memory_space<vmem>>, %arg14: memref<1x32xf32, #tpu.memory_space<vmem>>, %arg15: memref<1x32xf32, #tpu.memory_space<vmem>>, %arg16: memref<4x32x8xf32, #tpu.memory_space<vmem>>, %arg17: memref<4x32x8xf32, #tpu.memory_space<vmem>>, %arg18: memref<4x32x8xf32, #tpu.memory_space<vmem>>, %arg19: memref<4x8x32xf32, #tpu.memory_space<vmem>>, %arg20: memref<1x32xf32, #tpu.memory_space<vmem>>, %arg21: memref<1x32xf32, #tpu.memory_space<vmem>>, %arg22: memref<1x32xf32, #tpu.memory_space<vmem>>, %arg23: memref<32x128xf32, #tpu.memory_space<vmem>>, %arg24: memref<1x128xf32, #tpu.memory_space<vmem>>, %arg25: memref<128x32xf32, #tpu.memory_space<vmem>>, %arg26: memref<1x32xf32, #tpu.memory_space<vmem>>, %arg27: memref<1x32xf32, #tpu.memory_space<vmem>>, %arg28: memref<1x32xf32, #tpu.memory_space<vmem>>, %arg29: memref<12x32xf32, #tpu.memory_space<vmem>>, %arg30: memref<2x5x1xf32, #tpu.memory_space<vmem>>) attributes {dimension_semantics = [], scalar_prefetch = 0 : i64, scratch_operands = 0 : i64, tpu.core_type = #tpu.core_type<tc>} {
    %c0 = arith.constant 0 : index
    %c0_0 = arith.constant 0 : index
    %0 = vector.load %arg0[%c0, %c0_0] : memref<12x32xf32, #tpu.memory_space<vmem>>, vector<12x32xf32>
    %c0_1 = arith.constant 0 : index
    %c0_2 = arith.constant 0 : index
    %1 = vector.load %arg2[%c0_1, %c0_2] : memref<1x16xf32, #tpu.memory_space<vmem>>, vector<1x16xf32>
    %2 = vector.extract_strided_slice %0 {offsets = [1, 0], sizes = [5, 32], strides = [1, 1]} : vector<12x32xf32> to vector<5x32xf32>
    %c0_3 = arith.constant 0 : index
    %c0_4 = arith.constant 0 : index
    %c0_5 = arith.constant 0 : index
    %3 = vector.load %arg1[%c0_3, %c0_4, %c0_5] : memref<2x5x1xf32, #tpu.memory_space<vmem>>, vector<1x5x1xf32>
    %4 = vector.shape_cast %3 : vector<1x5x1xf32> to vector<5x1xf32>
    %c0_6 = arith.constant 0 : index
    %c0_7 = arith.constant 0 : index
    %5 = vector.load %arg4[%c0_6, %c0_7] : memref<1x32xf32, #tpu.memory_space<vmem>>, vector<1x32xf32>
    %c0_8 = arith.constant 0 : index
    %c0_9 = arith.constant 0 : index
    %6 = vector.load %arg5[%c0_8, %c0_9] : memref<1x32xf32, #tpu.memory_space<vmem>>, vector<1x32xf32>
    %cst = arith.constant dense<0.000000e+00> : vector<5xf32>
    %7 = vector.multi_reduction <add>, %2, %cst [1] : vector<5x32xf32> to vector<5xf32>
    %8 = vector.shape_cast %7 : vector<5xf32> to vector<5x1xf32>
    %cst_10 = arith.constant 3.200000e+01 : f32
    %9 = vector.broadcast %cst_10 : f32 to vector<5x1xf32>
    %10 = arith.divf %8, %9 : vector<5x1xf32>
    %11 = vector.broadcast %10 : vector<5x1xf32> to vector<5x32xf32>
    %12 = arith.subf %2, %11 : vector<5x32xf32>
    %13 = arith.mulf %12, %12 : vector<5x32xf32>
    %cst_11 = arith.constant dense<0.000000e+00> : vector<5xf32>
    %14 = vector.multi_reduction <add>, %13, %cst_11 [1] : vector<5x32xf32> to vector<5xf32>
    %15 = vector.shape_cast %14 : vector<5xf32> to vector<5x1xf32>
    %cst_12 = arith.constant 3.200000e+01 : f32
    %16 = vector.broadcast %cst_12 : f32 to vector<5x1xf32>
    %17 = arith.divf %15, %16 : vector<5x1xf32>
    %18 = vector.broadcast %10 : vector<5x1xf32> to vector<5x32xf32>
    %19 = arith.subf %2, %18 : vector<5x32xf32>
    %cst_13 = arith.constant 9.99999974E-6 : f32
    %20 = vector.broadcast %cst_13 : f32 to vector<5x1xf32>
    %21 = arith.addf %17, %20 : vector<5x1xf32>
    %22 = math.rsqrt %21 : vector<5x1xf32>
    %23 = vector.broadcast %22 : vector<5x1xf32> to vector<5x32xf32>
    %24 = arith.mulf %19, %23 : vector<5x32xf32>
    %25 = vector.broadcast %5 : vector<1x32xf32> to vector<5x32xf32>
    %26 = arith.mulf %24, %25 : vector<5x32xf32>
    %27 = vector.broadcast %6 : vector<1x32xf32> to vector<5x32xf32>
    %28 = arith.addf %26, %27 : vector<5x32xf32>
    %c0_14 = arith.constant 0 : index
    %c0_15 = arith.constant 0 : index
    %29 = vector.load %arg6[%c0_14, %c0_15] : memref<32x32xf32, #tpu.memory_space<vmem>>, vector<32x32xf32>
    %cst_16 = arith.constant dense<0.000000e+00> : vector<5x32xf32>
    %30 = tpu.matmul %28, %29, %cst_16 {dimension_numbers = #tpu.dot_dimension_numbers<[1], [0], [0], [1], [0, 0, 1, 1], [], []>} : vector<5x32xf32>, vector<32x32xf32>, vector<5x32xf32> -> vector<5x32xf32>
    %c0_17 = arith.constant 0 : index
    %c0_18 = arith.constant 0 : index
    %31 = vector.load %arg7[%c0_17, %c0_18] : memref<1x32xf32, #tpu.memory_space<vmem>>, vector<1x32xf32>
    %32 = vector.broadcast %31 : vector<1x32xf32> to vector<5x32xf32>
    %33 = arith.addf %30, %32 : vector<5x32xf32>
    %cst_19 = arith.constant 5.000000e-01 : f32
    %34 = vector.broadcast %cst_19 : f32 to vector<5x32xf32>
    %35 = arith.mulf %34, %33 : vector<5x32xf32>
    %cst_20 = arith.constant 0.707106769 : f32
    %36 = vector.broadcast %cst_20 : f32 to vector<5x32xf32>
    %37 = arith.mulf %33, %36 : vector<5x32xf32>
    %38 = math.erf %37 : vector<5x32xf32>
    %cst_21 = arith.constant 1.000000e+00 : f32
    %39 = vector.broadcast %cst_21 : f32 to vector<5x32xf32>
    %40 = arith.addf %39, %38 : vector<5x32xf32>
    %41 = arith.mulf %35, %40 : vector<5x32xf32>
    %42 = vector.extract_strided_slice %41 {offsets = [0, 0], sizes = [5, 16], strides = [1, 1]} : vector<5x32xf32> to vector<5x16xf32>
    %43 = vector.extract_strided_slice %41 {offsets = [0, 16], sizes = [5, 16], strides = [1, 1]} : vector<5x32xf32> to vector<5x16xf32>
    %cst_22 = arith.constant dense<0.000000e+00> : vector<1xf32>
    %44 = vector.multi_reduction <add>, %4, %cst_22 [0] : vector<5x1xf32> to vector<1xf32>
    %45 = vector.shape_cast %44 : vector<1xf32> to vector<1x1xf32>
    %46 = vector.broadcast %4 : vector<5x1xf32> to vector<5x16xf32>
    %47 = arith.mulf %43, %46 : vector<5x16xf32>
    %cst_23 = arith.constant dense<0.000000e+00> : vector<16xf32>
    %48 = vector.multi_reduction <add>, %47, %cst_23 [0] : vector<5x16xf32> to vector<16xf32>
    %49 = vector.shape_cast %48 : vector<16xf32> to vector<1x16xf32>
    %50 = vector.broadcast %45 : vector<1x1xf32> to vector<1x16xf32>
    %51 = arith.divf %49, %50 : vector<1x16xf32>
    %52 = vector.shape_cast %51 : vector<1x16xf32> to vector<1x16xf32>
    %53 = vector.broadcast %52 : vector<1x16xf32> to vector<5x16xf32>
    %54 = vector.shape_cast %1 : vector<1x16xf32> to vector<1x16xf32>
    %55 = vector.broadcast %54 : vector<1x16xf32> to vector<5x16xf32>
    %56 = tpu.concatenate %42, %53, %55 in 1 : vector<5x16xf32>, vector<5x16xf32>, vector<5x16xf32> -> vector<5x48xf32>
    %c0_24 = arith.constant 0 : index
    %c0_25 = arith.constant 0 : index
    %57 = vector.load %arg8[%c0_24, %c0_25] : memref<48x16xf32, #tpu.memory_space<vmem>>, vector<48x16xf32>
    %cst_26 = arith.constant dense<0.000000e+00> : vector<5x16xf32>
    %58 = tpu.matmul %56, %57, %cst_26 {dimension_numbers = #tpu.dot_dimension_numbers<[1], [0], [0], [1], [0, 0, 1, 1], [], []>} : vector<5x48xf32>, vector<48x16xf32>, vector<5x16xf32> -> vector<5x16xf32>
    %c0_27 = arith.constant 0 : index
    %c0_28 = arith.constant 0 : index
    %59 = vector.load %arg9[%c0_27, %c0_28] : memref<1x16xf32, #tpu.memory_space<vmem>>, vector<1x16xf32>
    %60 = vector.broadcast %59 : vector<1x16xf32> to vector<5x16xf32>
    %61 = arith.addf %58, %60 : vector<5x16xf32>
    %cst_29 = arith.constant 5.000000e-01 : f32
    %62 = vector.broadcast %cst_29 : f32 to vector<5x16xf32>
    %63 = arith.mulf %62, %61 : vector<5x16xf32>
    %cst_30 = arith.constant 0.707106769 : f32
    %64 = vector.broadcast %cst_30 : f32 to vector<5x16xf32>
    %65 = arith.mulf %61, %64 : vector<5x16xf32>
    %66 = math.erf %65 : vector<5x16xf32>
    %cst_31 = arith.constant 1.000000e+00 : f32
    %67 = vector.broadcast %cst_31 : f32 to vector<5x16xf32>
    %68 = arith.addf %67, %66 : vector<5x16xf32>
    %69 = arith.mulf %63, %68 : vector<5x16xf32>
    %c0_32 = arith.constant 0 : index
    %c0_33 = arith.constant 0 : index
    %70 = vector.load %arg10[%c0_32, %c0_33] : memref<16x8xf32, #tpu.memory_space<vmem>>, vector<16x8xf32>
    %cst_34 = arith.constant dense<0.000000e+00> : vector<5x8xf32>
    %71 = tpu.matmul %69, %70, %cst_34 {dimension_numbers = #tpu.dot_dimension_numbers<[1], [0], [0], [1], [0, 0, 1, 1], [], []>} : vector<5x16xf32>, vector<16x8xf32>, vector<5x8xf32> -> vector<5x8xf32>
    %c0_35 = arith.constant 0 : index
    %c0_36 = arith.constant 0 : index
    %72 = vector.load %arg11[%c0_35, %c0_36] : memref<1x8xf32, #tpu.memory_space<vmem>>, vector<1x8xf32>
    %73 = vector.broadcast %72 : vector<1x8xf32> to vector<5x8xf32>
    %74 = arith.addf %71, %73 : vector<5x8xf32>
    %cst_37 = arith.constant 5.000000e-01 : f32
    %75 = vector.broadcast %cst_37 : f32 to vector<5x8xf32>
    %76 = arith.mulf %75, %74 : vector<5x8xf32>
    %cst_38 = arith.constant 0.707106769 : f32
    %77 = vector.broadcast %cst_38 : f32 to vector<5x8xf32>
    %78 = arith.mulf %74, %77 : vector<5x8xf32>
    %79 = math.erf %78 : vector<5x8xf32>
    %cst_39 = arith.constant 1.000000e+00 : f32
    %80 = vector.broadcast %cst_39 : f32 to vector<5x8xf32>
    %81 = arith.addf %80, %79 : vector<5x8xf32>
    %82 = arith.mulf %76, %81 : vector<5x8xf32>
    %c0_40 = arith.constant 0 : index
    %c0_41 = arith.constant 0 : index
    %83 = vector.load %arg12[%c0_40, %c0_41] : memref<8x2xf32, #tpu.memory_space<vmem>>, vector<8x2xf32>
    %cst_42 = arith.constant dense<0.000000e+00> : vector<5x2xf32>
    %84 = tpu.matmul %82, %83, %cst_42 {dimension_numbers = #tpu.dot_dimension_numbers<[1], [0], [0], [1], [0, 0, 1, 1], [], []>} : vector<5x8xf32>, vector<8x2xf32>, vector<5x2xf32> -> vector<5x2xf32>
    %c0_43 = arith.constant 0 : index
    %c0_44 = arith.constant 0 : index
    %85 = vector.load %arg13[%c0_43, %c0_44] : memref<1x2xf32, #tpu.memory_space<vmem>>, vector<1x2xf32>
    %86 = vector.broadcast %85 : vector<1x2xf32> to vector<5x2xf32>
    %87 = arith.addf %84, %86 : vector<5x2xf32>
    %cst_45 = arith.constant dense<0xFF800000> : vector<5xf32>
    %88 = vector.multi_reduction <maximumf>, %87, %cst_45 [1] : vector<5x2xf32> to vector<5xf32>
    %89 = vector.shape_cast %88 : vector<5xf32> to vector<5x1xf32>
    %90 = vector.broadcast %89 : vector<5x1xf32> to vector<5x2xf32>
    %91 = arith.subf %87, %90 : vector<5x2xf32>
    %92 = math.exp %91 : vector<5x2xf32>
    %cst_46 = arith.constant dense<0.000000e+00> : vector<5xf32>
    %93 = vector.multi_reduction <add>, %92, %cst_46 [1] : vector<5x2xf32> to vector<5xf32>
    %94 = vector.shape_cast %93 : vector<5xf32> to vector<5x1xf32>
    %95 = math.log %94 : vector<5x1xf32>
    %96 = vector.broadcast %89 : vector<5x1xf32> to vector<5x2xf32>
    %97 = arith.subf %87, %96 : vector<5x2xf32>
    %98 = vector.broadcast %95 : vector<5x1xf32> to vector<5x2xf32>
    %99 = arith.subf %97, %98 : vector<5x2xf32>
    %c0_47 = arith.constant 0 : index
    %c0_48 = arith.constant 0 : index
    %c0_49 = arith.constant 0 : index
    %100 = vector.load %arg3[%c0_47, %c0_48, %c0_49] : memref<2x5x2xf32, #tpu.memory_space<vmem>>, vector<1x5x2xf32>
    %101 = vector.shape_cast %100 : vector<1x5x2xf32> to vector<5x2xf32>
    %102 = arith.addf %99, %101 : vector<5x2xf32>
    %103 = vector.extract_strided_slice %102 {offsets = [0, 0], sizes = [5, 1], strides = [1, 1]} : vector<5x2xf32> to vector<5x1xf32>
    %104 = vector.extract_strided_slice %102 {offsets = [0, 1], sizes = [5, 1], strides = [1, 1]} : vector<5x2xf32> to vector<5x1xf32>
    %105 = arith.cmpf oge, %103, %104 : vector<5x1xf32>
    %106 = arith.extui %105 : vector<5x1xi1> to vector<5x1xi32>
    %107 = arith.sitofp %106 : vector<5x1xi32> to vector<5x1xf32>
    %108 = arith.mulf %107, %4 : vector<5x1xf32>
    %c0_50 = arith.constant 0 : index
    %c0_51 = arith.constant 0 : index
    %c0_52 = arith.constant 0 : index
    %109 = vector.load %arg30[%c0_50, %c0_51, %c0_52] : memref<2x5x1xf32, #tpu.memory_space<vmem>>, vector<1x5x1xf32>
    %110 = vector.shape_cast %109 : vector<1x5x1xf32> to vector<5x1xf32>
    %111 = vector.shape_cast %108 : vector<5x1xf32> to vector<1x5x1xf32>
    tpu.vector_store %arg30[%c0_50, %c0_51, %c0_52], %111 {strides = array<i32>} : memref<2x5x1xf32, #tpu.memory_space<vmem>>, vector<1x5x1xf32>,
    %cst_53 = arith.constant 1.000000e+00 : f32
    %112 = vector.broadcast %cst_53 : f32 to vector<1x1xf32>
    %113 = tpu.concatenate %112, %108 in 0 : vector<1x1xf32>, vector<5x1xf32> -> vector<6x1xf32>
    %cst_54 = arith.constant 1.000000e+00 : f32
    %114 = vector.broadcast %cst_54 : f32 to vector<6x1xf32>
    %cst_55 = arith.constant dense<0.000000e+00> : vector<6x6xf32>
    %115 = tpu.matmul %114, %113, %cst_55 {dimension_numbers = #tpu.dot_dimension_numbers<[1], [1], [0], [0], [0, 0, 1, 0], [], []>} : vector<6x1xf32>, vector<6x1xf32>, vector<6x6xf32> -> vector<6x6xf32>
    %116 = tpu.iota {dimensions = array<i32: 0>} : vector<6x6xi32>
    %117 = tpu.iota {dimensions = array<i32: 1>} : vector<6x6xi32>
    %118 = arith.cmpi eq, %116, %117 : vector<6x6xi32>
    %119 = arith.extui %118 : vector<6x6xi1> to vector<6x6xi32>
    %120 = arith.sitofp %119 : vector<6x6xi32> to vector<6x6xf32>
    %cst_56 = arith.constant 1.000000e+00 : f32
    %121 = vector.broadcast %cst_56 : f32 to vector<6x6xf32>
    %122 = arith.subf %121, %115 : vector<6x6xf32>
    %123 = arith.mulf %122, %120 : vector<6x6xf32>
    %124 = arith.addf %115, %123 : vector<6x6xf32>
    %125 = vector.extract_strided_slice %0 {offsets = [7, 0], sizes = [5, 32], strides = [1, 1]} : vector<12x32xf32> to vector<5x32xf32>
    %c1 = arith.constant 1 : index
    %c0_57 = arith.constant 0 : index
    %c0_58 = arith.constant 0 : index
    %126 = vector.load %arg1[%c1, %c0_57, %c0_58] : memref<2x5x1xf32, #tpu.memory_space<vmem>>, vector<1x5x1xf32>
    %127 = vector.shape_cast %126 : vector<1x5x1xf32> to vector<5x1xf32>
    %c0_59 = arith.constant 0 : index
    %c0_60 = arith.constant 0 : index
    %128 = vector.load %arg4[%c0_59, %c0_60] : memref<1x32xf32, #tpu.memory_space<vmem>>, vector<1x32xf32>
    %c0_61 = arith.constant 0 : index
    %c0_62 = arith.constant 0 : index
    %129 = vector.load %arg5[%c0_61, %c0_62] : memref<1x32xf32, #tpu.memory_space<vmem>>, vector<1x32xf32>
    %cst_63 = arith.constant dense<0.000000e+00> : vector<5xf32>
    %130 = vector.multi_reduction <add>, %125, %cst_63 [1] : vector<5x32xf32> to vector<5xf32>
    %131 = vector.shape_cast %130 : vector<5xf32> to vector<5x1xf32>
    %cst_64 = arith.constant 3.200000e+01 : f32
    %132 = vector.broadcast %cst_64 : f32 to vector<5x1xf32>
    %133 = arith.divf %131, %132 : vector<5x1xf32>
    %134 = vector.broadcast %133 : vector<5x1xf32> to vector<5x32xf32>
    %135 = arith.subf %125, %134 : vector<5x32xf32>
    %136 = arith.mulf %135, %135 : vector<5x32xf32>
    %cst_65 = arith.constant dense<0.000000e+00> : vector<5xf32>
    %137 = vector.multi_reduction <add>, %136, %cst_65 [1] : vector<5x32xf32> to vector<5xf32>
    %138 = vector.shape_cast %137 : vector<5xf32> to vector<5x1xf32>
    %cst_66 = arith.constant 3.200000e+01 : f32
    %139 = vector.broadcast %cst_66 : f32 to vector<5x1xf32>
    %140 = arith.divf %138, %139 : vector<5x1xf32>
    %141 = vector.broadcast %133 : vector<5x1xf32> to vector<5x32xf32>
    %142 = arith.subf %125, %141 : vector<5x32xf32>
    %cst_67 = arith.constant 9.99999974E-6 : f32
    %143 = vector.broadcast %cst_67 : f32 to vector<5x1xf32>
    %144 = arith.addf %140, %143 : vector<5x1xf32>
    %145 = math.rsqrt %144 : vector<5x1xf32>
    %146 = vector.broadcast %145 : vector<5x1xf32> to vector<5x32xf32>
    %147 = arith.mulf %142, %146 : vector<5x32xf32>
    %148 = vector.broadcast %128 : vector<1x32xf32> to vector<5x32xf32>
    %149 = arith.mulf %147, %148 : vector<5x32xf32>
    %150 = vector.broadcast %129 : vector<1x32xf32> to vector<5x32xf32>
    %151 = arith.addf %149, %150 : vector<5x32xf32>
    %c0_68 = arith.constant 0 : index
    %c0_69 = arith.constant 0 : index
    %152 = vector.load %arg6[%c0_68, %c0_69] : memref<32x32xf32, #tpu.memory_space<vmem>>, vector<32x32xf32>
    %cst_70 = arith.constant dense<0.000000e+00> : vector<5x32xf32>
    %153 = tpu.matmul %151, %152, %cst_70 {dimension_numbers = #tpu.dot_dimension_numbers<[1], [0], [0], [1], [0, 0, 1, 1], [], []>} : vector<5x32xf32>, vector<32x32xf32>, vector<5x32xf32> -> vector<5x32xf32>
    %c0_71 = arith.constant 0 : index
    %c0_72 = arith.constant 0 : index
    %154 = vector.load %arg7[%c0_71, %c0_72] : memref<1x32xf32, #tpu.memory_space<vmem>>, vector<1x32xf32>
    %155 = vector.broadcast %154 : vector<1x32xf32> to vector<5x32xf32>
    %156 = arith.addf %153, %155 : vector<5x32xf32>
    %cst_73 = arith.constant 5.000000e-01 : f32
    %157 = vector.broadcast %cst_73 : f32 to vector<5x32xf32>
    %158 = arith.mulf %157, %156 : vector<5x32xf32>
    %cst_74 = arith.constant 0.707106769 : f32
    %159 = vector.broadcast %cst_74 : f32 to vector<5x32xf32>
    %160 = arith.mulf %156, %159 : vector<5x32xf32>
    %161 = math.erf %160 : vector<5x32xf32>
    %cst_75 = arith.constant 1.000000e+00 : f32
    %162 = vector.broadcast %cst_75 : f32 to vector<5x32xf32>
    %163 = arith.addf %162, %161 : vector<5x32xf32>
    %164 = arith.mulf %158, %163 : vector<5x32xf32>
    %165 = vector.extract_strided_slice %164 {offsets = [0, 0], sizes = [5, 16], strides = [1, 1]} : vector<5x32xf32> to vector<5x16xf32>
    %166 = vector.extract_strided_slice %164 {offsets = [0, 16], sizes = [5, 16], strides = [1, 1]} : vector<5x32xf32> to vector<5x16xf32>
    %cst_76 = arith.constant dense<0.000000e+00> : vector<1xf32>
    %167 = vector.multi_reduction <add>, %127, %cst_76 [0] : vector<5x1xf32> to vector<1xf32>
    %168 = vector.shape_cast %167 : vector<1xf32> to vector<1x1xf32>
    %169 = vector.broadcast %127 : vector<5x1xf32> to vector<5x16xf32>
    %170 = arith.mulf %166, %169 : vector<5x16xf32>
    %cst_77 = arith.constant dense<0.000000e+00> : vector<16xf32>
    %171 = vector.multi_reduction <add>, %170, %cst_77 [0] : vector<5x16xf32> to vector<16xf32>
    %172 = vector.shape_cast %171 : vector<16xf32> to vector<1x16xf32>
    %173 = vector.broadcast %168 : vector<1x1xf32> to vector<1x16xf32>
    %174 = arith.divf %172, %173 : vector<1x16xf32>
    %175 = vector.shape_cast %174 : vector<1x16xf32> to vector<1x16xf32>
    %176 = vector.broadcast %175 : vector<1x16xf32> to vector<5x16xf32>
    %177 = vector.shape_cast %1 : vector<1x16xf32> to vector<1x16xf32>
    %178 = vector.broadcast %177 : vector<1x16xf32> to vector<5x16xf32>
    %179 = tpu.concatenate %165, %176, %178 in 1 : vector<5x16xf32>, vector<5x16xf32>, vector<5x16xf32> -> vector<5x48xf32>
    %c0_78 = arith.constant 0 : index
    %c0_79 = arith.constant 0 : index
    %180 = vector.load %arg8[%c0_78, %c0_79] : memref<48x16xf32, #tpu.memory_space<vmem>>, vector<48x16xf32>
    %cst_80 = arith.constant dense<0.000000e+00> : vector<5x16xf32>
    %181 = tpu.matmul %179, %180, %cst_80 {dimension_numbers = #tpu.dot_dimension_numbers<[1], [0], [0], [1], [0, 0, 1, 1], [], []>} : vector<5x48xf32>, vector<48x16xf32>, vector<5x16xf32> -> vector<5x16xf32>
    %c0_81 = arith.constant 0 : index
    %c0_82 = arith.constant 0 : index
    %182 = vector.load %arg9[%c0_81, %c0_82] : memref<1x16xf32, #tpu.memory_space<vmem>>, vector<1x16xf32>
    %183 = vector.broadcast %182 : vector<1x16xf32> to vector<5x16xf32>
    %184 = arith.addf %181, %183 : vector<5x16xf32>
    %cst_83 = arith.constant 5.000000e-01 : f32
    %185 = vector.broadcast %cst_83 : f32 to vector<5x16xf32>
    %186 = arith.mulf %185, %184 : vector<5x16xf32>
    %cst_84 = arith.constant 0.707106769 : f32
    %187 = vector.broadcast %cst_84 : f32 to vector<5x16xf32>
    %188 = arith.mulf %184, %187 : vector<5x16xf32>
    %189 = math.erf %188 : vector<5x16xf32>
    %cst_85 = arith.constant 1.000000e+00 : f32
    %190 = vector.broadcast %cst_85 : f32 to vector<5x16xf32>
    %191 = arith.addf %190, %189 : vector<5x16xf32>
    %192 = arith.mulf %186, %191 : vector<5x16xf32>
    %c0_86 = arith.constant 0 : index
    %c0_87 = arith.constant 0 : index
    %193 = vector.load %arg10[%c0_86, %c0_87] : memref<16x8xf32, #tpu.memory_space<vmem>>, vector<16x8xf32>
    %cst_88 = arith.constant dense<0.000000e+00> : vector<5x8xf32>
    %194 = tpu.matmul %192, %193, %cst_88 {dimension_numbers = #tpu.dot_dimension_numbers<[1], [0], [0], [1], [0, 0, 1, 1], [], []>} : vector<5x16xf32>, vector<16x8xf32>, vector<5x8xf32> -> vector<5x8xf32>
    %c0_89 = arith.constant 0 : index
    %c0_90 = arith.constant 0 : index
    %195 = vector.load %arg11[%c0_89, %c0_90] : memref<1x8xf32, #tpu.memory_space<vmem>>, vector<1x8xf32>
    %196 = vector.broadcast %195 : vector<1x8xf32> to vector<5x8xf32>
    %197 = arith.addf %194, %196 : vector<5x8xf32>
    %cst_91 = arith.constant 5.000000e-01 : f32
    %198 = vector.broadcast %cst_91 : f32 to vector<5x8xf32>
    %199 = arith.mulf %198, %197 : vector<5x8xf32>
    %cst_92 = arith.constant 0.707106769 : f32
    %200 = vector.broadcast %cst_92 : f32 to vector<5x8xf32>
    %201 = arith.mulf %197, %200 : vector<5x8xf32>
    %202 = math.erf %201 : vector<5x8xf32>
    %cst_93 = arith.constant 1.000000e+00 : f32
    %203 = vector.broadcast %cst_93 : f32 to vector<5x8xf32>
    %204 = arith.addf %203, %202 : vector<5x8xf32>
    %205 = arith.mulf %199, %204 : vector<5x8xf32>
    %c0_94 = arith.constant 0 : index
    %c0_95 = arith.constant 0 : index
    %206 = vector.load %arg12[%c0_94, %c0_95] : memref<8x2xf32, #tpu.memory_space<vmem>>, vector<8x2xf32>
    %cst_96 = arith.constant dense<0.000000e+00> : vector<5x2xf32>
    %207 = tpu.matmul %205, %206, %cst_96 {dimension_numbers = #tpu.dot_dimension_numbers<[1], [0], [0], [1], [0, 0, 1, 1], [], []>} : vector<5x8xf32>, vector<8x2xf32>, vector<5x2xf32> -> vector<5x2xf32>
    %c0_97 = arith.constant 0 : index
    %c0_98 = arith.constant 0 : index
    %208 = vector.load %arg13[%c0_97, %c0_98] : memref<1x2xf32, #tpu.memory_space<vmem>>, vector<1x2xf32>
    %209 = vector.broadcast %208 : vector<1x2xf32> to vector<5x2xf32>
    %210 = arith.addf %207, %209 : vector<5x2xf32>
    %cst_99 = arith.constant dense<0xFF800000> : vector<5xf32>
    %211 = vector.multi_reduction <maximumf>, %210, %cst_99 [1] : vector<5x2xf32> to vector<5xf32>
    %212 = vector.shape_cast %211 : vector<5xf32> to vector<5x1xf32>
    %213 = vector.broadcast %212 : vector<5x1xf32> to vector<5x2xf32>
    %214 = arith.subf %210, %213 : vector<5x2xf32>
    %215 = math.exp %214 : vector<5x2xf32>
    %cst_100 = arith.constant dense<0.000000e+00> : vector<5xf32>
    %216 = vector.multi_reduction <add>, %215, %cst_100 [1] : vector<5x2xf32> to vector<5xf32>
    %217 = vector.shape_cast %216 : vector<5xf32> to vector<5x1xf32>
    %218 = math.log %217 : vector<5x1xf32>
    %219 = vector.broadcast %212 : vector<5x1xf32> to vector<5x2xf32>
    %220 = arith.subf %210, %219 : vector<5x2xf32>
    %221 = vector.broadcast %218 : vector<5x1xf32> to vector<5x2xf32>
    %222 = arith.subf %220, %221 : vector<5x2xf32>
    %c1_101 = arith.constant 1 : index
    %c0_102 = arith.constant 0 : index
    %c0_103 = arith.constant 0 : index
    %223 = vector.load %arg3[%c1_101, %c0_102, %c0_103] : memref<2x5x2xf32, #tpu.memory_space<vmem>>, vector<1x5x2xf32>
    %224 = vector.shape_cast %223 : vector<1x5x2xf32> to vector<5x2xf32>
    %225 = arith.addf %222, %224 : vector<5x2xf32>
    %226 = vector.extract_strided_slice %225 {offsets = [0, 0], sizes = [5, 1], strides = [1, 1]} : vector<5x2xf32> to vector<5x1xf32>
    %227 = vector.extract_strided_slice %225 {offsets = [0, 1], sizes = [5, 1], strides = [1, 1]} : vector<5x2xf32> to vector<5x1xf32>
    %228 = arith.cmpf oge, %226, %227 : vector<5x1xf32>
    %229 = arith.extui %228 : vector<5x1xi1> to vector<5x1xi32>
    %230 = arith.sitofp %229 : vector<5x1xi32> to vector<5x1xf32>
    %231 = arith.mulf %230, %127 : vector<5x1xf32>
    %c1_104 = arith.constant 1 : index
    %c0_105 = arith.constant 0 : index
    %c0_106 = arith.constant 0 : index
    %232 = vector.load %arg30[%c1_104, %c0_105, %c0_106] : memref<2x5x1xf32, #tpu.memory_space<vmem>>, vector<1x5x1xf32>
    %233 = vector.shape_cast %232 : vector<1x5x1xf32> to vector<5x1xf32>
    %234 = vector.shape_cast %231 : vector<5x1xf32> to vector<1x5x1xf32>
    tpu.vector_store %arg30[%c1_104, %c0_105, %c0_106], %234 {strides = array<i32>} : memref<2x5x1xf32, #tpu.memory_space<vmem>>, vector<1x5x1xf32>,
    %cst_107 = arith.constant 1.000000e+00 : f32
    %235 = vector.broadcast %cst_107 : f32 to vector<1x1xf32>
    %236 = tpu.concatenate %235, %231 in 0 : vector<1x1xf32>, vector<5x1xf32> -> vector<6x1xf32>
    %cst_108 = arith.constant 1.000000e+00 : f32
    %237 = vector.broadcast %cst_108 : f32 to vector<6x1xf32>
    %cst_109 = arith.constant dense<0.000000e+00> : vector<6x6xf32>
    %238 = tpu.matmul %237, %236, %cst_109 {dimension_numbers = #tpu.dot_dimension_numbers<[1], [1], [0], [0], [0, 0, 1, 0], [], []>} : vector<6x1xf32>, vector<6x1xf32>, vector<6x6xf32> -> vector<6x6xf32>
    %239 = tpu.iota {dimensions = array<i32: 0>} : vector<6x6xi32>
    %240 = tpu.iota {dimensions = array<i32: 1>} : vector<6x6xi32>
    %241 = arith.cmpi eq, %239, %240 : vector<6x6xi32>
    %242 = arith.extui %241 : vector<6x6xi1> to vector<6x6xi32>
    %243 = arith.sitofp %242 : vector<6x6xi32> to vector<6x6xf32>
    %cst_110 = arith.constant 1.000000e+00 : f32
    %244 = vector.broadcast %cst_110 : f32 to vector<6x6xf32>
    %245 = arith.subf %244, %238 : vector<6x6xf32>
    %246 = arith.mulf %245, %243 : vector<6x6xf32>
    %247 = arith.addf %238, %246 : vector<6x6xf32>
    %c0_111 = arith.constant 0 : index
    %c0_112 = arith.constant 0 : index
    %248 = vector.load %arg14[%c0_111, %c0_112] : memref<1x32xf32, #tpu.memory_space<vmem>>, vector<1x32xf32>
    %c0_113 = arith.constant 0 : index
    %c0_114 = arith.constant 0 : index
    %249 = vector.load %arg15[%c0_113, %c0_114] : memref<1x32xf32, #tpu.memory_space<vmem>>, vector<1x32xf32>
    %c0_115 = arith.constant 0 : index
    %c0_116 = arith.constant 0 : index
    %c0_117 = arith.constant 0 : index
    %250 = vector.load %arg16[%c0_115, %c0_116, %c0_117] : memref<4x32x8xf32, #tpu.memory_space<vmem>>, vector<4x32x8xf32>
    %c0_118 = arith.constant 0 : index
    %c0_119 = arith.constant 0 : index
    %c0_120 = arith.constant 0 : index
    %251 = vector.load %arg17[%c0_118, %c0_119, %c0_120] : memref<4x32x8xf32, #tpu.memory_space<vmem>>, vector<4x32x8xf32>
    %c0_121 = arith.constant 0 : index
    %c0_122 = arith.constant 0 : index
    %c0_123 = arith.constant 0 : index
    %252 = vector.load %arg18[%c0_121, %c0_122, %c0_123] : memref<4x32x8xf32, #tpu.memory_space<vmem>>, vector<4x32x8xf32>
    %c0_124 = arith.constant 0 : index
    %c0_125 = arith.constant 0 : index
    %c0_126 = arith.constant 0 : index
    %253 = vector.load %arg19[%c0_124, %c0_125, %c0_126] : memref<4x8x32xf32, #tpu.memory_space<vmem>>, vector<4x8x32xf32>
    %c0_127 = arith.constant 0 : index
    %c0_128 = arith.constant 0 : index
    %254 = vector.load %arg20[%c0_127, %c0_128] : memref<1x32xf32, #tpu.memory_space<vmem>>, vector<1x32xf32>
    %c0_129 = arith.constant 0 : index
    %c0_130 = arith.constant 0 : index
    %255 = vector.load %arg21[%c0_129, %c0_130] : memref<1x32xf32, #tpu.memory_space<vmem>>, vector<1x32xf32>
    %c0_131 = arith.constant 0 : index
    %c0_132 = arith.constant 0 : index
    %256 = vector.load %arg22[%c0_131, %c0_132] : memref<1x32xf32, #tpu.memory_space<vmem>>, vector<1x32xf32>
    %c0_133 = arith.constant 0 : index
    %c0_134 = arith.constant 0 : index
    %257 = vector.load %arg23[%c0_133, %c0_134] : memref<32x128xf32, #tpu.memory_space<vmem>>, vector<32x128xf32>
    %c0_135 = arith.constant 0 : index
    %c0_136 = arith.constant 0 : index
    %258 = vector.load %arg24[%c0_135, %c0_136] : memref<1x128xf32, #tpu.memory_space<vmem>>, vector<1x128xf32>
    %c0_137 = arith.constant 0 : index
    %c0_138 = arith.constant 0 : index
    %259 = vector.load %arg25[%c0_137, %c0_138] : memref<128x32xf32, #tpu.memory_space<vmem>>, vector<128x32xf32>
    %c0_139 = arith.constant 0 : index
    %c0_140 = arith.constant 0 : index
    %260 = vector.load %arg26[%c0_139, %c0_140] : memref<1x32xf32, #tpu.memory_space<vmem>>, vector<1x32xf32>
    %cst_141 = arith.constant dense<0.000000e+00> : vector<12xf32>
    %261 = vector.multi_reduction <add>, %0, %cst_141 [1] : vector<12x32xf32> to vector<12xf32>
    %262 = vector.shape_cast %261 : vector<12xf32> to vector<12x1xf32>
    %cst_142 = arith.constant 3.200000e+01 : f32
    %263 = vector.broadcast %cst_142 : f32 to vector<12x1xf32>
    %264 = arith.divf %262, %263 : vector<12x1xf32>
    %265 = vector.broadcast %264 : vector<12x1xf32> to vector<12x32xf32>
    %266 = arith.subf %0, %265 : vector<12x32xf32>
    %267 = arith.mulf %266, %266 : vector<12x32xf32>
    %cst_143 = arith.constant dense<0.000000e+00> : vector<12xf32>
    %268 = vector.multi_reduction <add>, %267, %cst_143 [1] : vector<12x32xf32> to vector<12xf32>
    %269 = vector.shape_cast %268 : vector<12xf32> to vector<12x1xf32>
    %cst_144 = arith.constant 3.200000e+01 : f32
    %270 = vector.broadcast %cst_144 : f32 to vector<12x1xf32>
    %271 = arith.divf %269, %270 : vector<12x1xf32>
    %272 = vector.broadcast %264 : vector<12x1xf32> to vector<12x32xf32>
    %273 = arith.subf %0, %272 : vector<12x32xf32>
    %cst_145 = arith.constant 9.99999974E-6 : f32
    %274 = vector.broadcast %cst_145 : f32 to vector<12x1xf32>
    %275 = arith.addf %271, %274 : vector<12x1xf32>
    %276 = math.rsqrt %275 : vector<12x1xf32>
    %277 = vector.broadcast %276 : vector<12x1xf32> to vector<12x32xf32>
    %278 = arith.mulf %273, %277 : vector<12x32xf32>
    %279 = vector.broadcast %248 : vector<1x32xf32> to vector<12x32xf32>
    %280 = arith.mulf %278, %279 : vector<12x32xf32>
    %281 = vector.broadcast %249 : vector<1x32xf32> to vector<12x32xf32>
    %282 = arith.addf %280, %281 : vector<12x32xf32>
    %cst_146 = arith.constant 0.000000e+00 : f32
    %283 = vector.broadcast %cst_146 : f32 to vector<6x32xf32>
    %cst_147 = arith.constant 0.000000e+00 : f32
    %284 = vector.broadcast %cst_147 : f32 to vector<6x32xf32>
    %285 = vector.extract_strided_slice %250 {offsets = [0, 0, 0], sizes = [1, 32, 8], strides = [1, 1, 1]} : vector<4x32x8xf32> to vector<1x32x8xf32>
    %286 = vector.shape_cast %285 : vector<1x32x8xf32> to vector<32x8xf32>
    %cst_148 = arith.constant dense<0.000000e+00> : vector<12x8xf32>
    %287 = tpu.matmul %282, %286, %cst_148 {dimension_numbers = #tpu.dot_dimension_numbers<[1], [0], [0], [1], [0, 0, 1, 1], [], []>} : vector<12x32xf32>, vector<32x8xf32>, vector<12x8xf32> -> vector<12x8xf32>
    %288 = vector.extract_strided_slice %251 {offsets = [0, 0, 0], sizes = [1, 32, 8], strides = [1, 1, 1]} : vector<4x32x8xf32> to vector<1x32x8xf32>
    %289 = vector.shape_cast %288 : vector<1x32x8xf32> to vector<32x8xf32>
    %cst_149 = arith.constant dense<0.000000e+00> : vector<12x8xf32>
    %290 = tpu.matmul %282, %289, %cst_149 {dimension_numbers = #tpu.dot_dimension_numbers<[1], [0], [0], [1], [0, 0, 1, 1], [], []>} : vector<12x32xf32>, vector<32x8xf32>, vector<12x8xf32> -> vector<12x8xf32>
    %291 = vector.extract_strided_slice %252 {offsets = [0, 0, 0], sizes = [1, 32, 8], strides = [1, 1, 1]} : vector<4x32x8xf32> to vector<1x32x8xf32>
    %292 = vector.shape_cast %291 : vector<1x32x8xf32> to vector<32x8xf32>
    %cst_150 = arith.constant dense<0.000000e+00> : vector<12x8xf32>
    %293 = tpu.matmul %282, %292, %cst_150 {dimension_numbers = #tpu.dot_dimension_numbers<[1], [0], [0], [1], [0, 0, 1, 1], [], []>} : vector<12x32xf32>, vector<32x8xf32>, vector<12x8xf32> -> vector<12x8xf32>
    %294 = vector.extract_strided_slice %287 {offsets = [0, 0], sizes = [6, 8], strides = [1, 1]} : vector<12x8xf32> to vector<6x8xf32>
    %295 = vector.extract_strided_slice %290 {offsets = [0, 0], sizes = [6, 8], strides = [1, 1]} : vector<12x8xf32> to vector<6x8xf32>
    %296 = vector.extract_strided_slice %293 {offsets = [0, 0], sizes = [6, 8], strides = [1, 1]} : vector<12x8xf32> to vector<6x8xf32>
    %cst_151 = arith.constant dense<0.000000e+00> : vector<6x6xf32>
    %297 = tpu.matmul %294, %295, %cst_151 {dimension_numbers = #tpu.dot_dimension_numbers<[1], [1], [0], [0], [0, 0, 1, 0], [], []>} : vector<6x8xf32>, vector<6x8xf32>, vector<6x6xf32> -> vector<6x6xf32>
    %cst_152 = arith.constant dense<0xFF800000> : vector<6xf32>
    %298 = vector.multi_reduction <maximumf>, %297, %cst_152 [1] : vector<6x6xf32> to vector<6xf32>
    %299 = vector.shape_cast %298 : vector<6xf32> to vector<6x1xf32>
    %300 = vector.broadcast %299 : vector<6x1xf32> to vector<6x6xf32>
    %301 = arith.subf %297, %300 : vector<6x6xf32>
    %302 = math.exp %301 : vector<6x6xf32>
    %303 = arith.mulf %302, %124 : vector<6x6xf32>
    %cst_153 = arith.constant 1.66666666E-7 : f32
    %304 = vector.broadcast %cst_153 : f32 to vector<6x6xf32>
    %305 = arith.addf %303, %304 : vector<6x6xf32>
    %cst_154 = arith.constant dense<0.000000e+00> : vector<6xf32>
    %306 = vector.multi_reduction <add>, %303, %cst_154 [1] : vector<6x6xf32> to vector<6xf32>
    %307 = vector.shape_cast %306 : vector<6xf32> to vector<6x1xf32>
    %cst_155 = arith.constant 9.99999997E-7 : f32
    %308 = vector.broadcast %cst_155 : f32 to vector<6x1xf32>
    %309 = arith.addf %307, %308 : vector<6x1xf32>
    %310 = vector.broadcast %309 : vector<6x1xf32> to vector<6x6xf32>
    %311 = arith.divf %305, %310 : vector<6x6xf32>
    %cst_156 = arith.constant dense<0.000000e+00> : vector<6x8xf32>
    %312 = tpu.matmul %311, %296, %cst_156 {dimension_numbers = #tpu.dot_dimension_numbers<[1], [0], [0], [1], [0, 0, 1, 1], [], []>} : vector<6x6xf32>, vector<6x8xf32>, vector<6x8xf32> -> vector<6x8xf32>
    %313 = vector.extract_strided_slice %253 {offsets = [0, 0, 0], sizes = [1, 8, 32], strides = [1, 1, 1]} : vector<4x8x32xf32> to vector<1x8x32xf32>
    %314 = vector.shape_cast %313 : vector<1x8x32xf32> to vector<8x32xf32>
    %cst_157 = arith.constant dense<0.000000e+00> : vector<6x32xf32>
    %315 = tpu.matmul %312, %314, %cst_157 {dimension_numbers = #tpu.dot_dimension_numbers<[1], [0], [0], [1], [0, 0, 1, 1], [], []>} : vector<6x8xf32>, vector<8x32xf32>, vector<6x32xf32> -> vector<6x32xf32>
    %316 = arith.addf %283, %315 : vector<6x32xf32>
    %317 = vector.extract_strided_slice %287 {offsets = [6, 0], sizes = [6, 8], strides = [1, 1]} : vector<12x8xf32> to vector<6x8xf32>
    %318 = vector.extract_strided_slice %290 {offsets = [6, 0], sizes = [6, 8], strides = [1, 1]} : vector<12x8xf32> to vector<6x8xf32>
    %319 = vector.extract_strided_slice %293 {offsets = [6, 0], sizes = [6, 8], strides = [1, 1]} : vector<12x8xf32> to vector<6x8xf32>
    %cst_158 = arith.constant dense<0.000000e+00> : vector<6x6xf32>
    %320 = tpu.matmul %317, %318, %cst_158 {dimension_numbers = #tpu.dot_dimension_numbers<[1], [1], [0], [0], [0, 0, 1, 0], [], []>} : vector<6x8xf32>, vector<6x8xf32>, vector<6x6xf32> -> vector<6x6xf32>
    %cst_159 = arith.constant dense<0xFF800000> : vector<6xf32>
    %321 = vector.multi_reduction <maximumf>, %320, %cst_159 [1] : vector<6x6xf32> to vector<6xf32>
    %322 = vector.shape_cast %321 : vector<6xf32> to vector<6x1xf32>
    %323 = vector.broadcast %322 : vector<6x1xf32> to vector<6x6xf32>
    %324 = arith.subf %320, %323 : vector<6x6xf32>
    %325 = math.exp %324 : vector<6x6xf32>
    %326 = arith.mulf %325, %247 : vector<6x6xf32>
    %cst_160 = arith.constant 1.66666666E-7 : f32
    %327 = vector.broadcast %cst_160 : f32 to vector<6x6xf32>
    %328 = arith.addf %326, %327 : vector<6x6xf32>
    %cst_161 = arith.constant dense<0.000000e+00> : vector<6xf32>
    %329 = vector.multi_reduction <add>, %326, %cst_161 [1] : vector<6x6xf32> to vector<6xf32>
    %330 = vector.shape_cast %329 : vector<6xf32> to vector<6x1xf32>
    %cst_162 = arith.constant 9.99999997E-7 : f32
    %331 = vector.broadcast %cst_162 : f32 to vector<6x1xf32>
    %332 = arith.addf %330, %331 : vector<6x1xf32>
    %333 = vector.broadcast %332 : vector<6x1xf32> to vector<6x6xf32>
    %334 = arith.divf %328, %333 : vector<6x6xf32>
    %cst_163 = arith.constant dense<0.000000e+00> : vector<6x8xf32>
    %335 = tpu.matmul %334, %319, %cst_163 {dimension_numbers = #tpu.dot_dimension_numbers<[1], [0], [0], [1], [0, 0, 1, 1], [], []>} : vector<6x6xf32>, vector<6x8xf32>, vector<6x8xf32> -> vector<6x8xf32>
    %336 = vector.extract_strided_slice %253 {offsets = [0, 0, 0], sizes = [1, 8, 32], strides = [1, 1, 1]} : vector<4x8x32xf32> to vector<1x8x32xf32>
    %337 = vector.shape_cast %336 : vector<1x8x32xf32> to vector<8x32xf32>
    %cst_164 = arith.constant dense<0.000000e+00> : vector<6x32xf32>
    %338 = tpu.matmul %335, %337, %cst_164 {dimension_numbers = #tpu.dot_dimension_numbers<[1], [0], [0], [1], [0, 0, 1, 1], [], []>} : vector<6x8xf32>, vector<8x32xf32>, vector<6x32xf32> -> vector<6x32xf32>
    %339 = arith.addf %284, %338 : vector<6x32xf32>
    %340 = vector.extract_strided_slice %250 {offsets = [1, 0, 0], sizes = [1, 32, 8], strides = [1, 1, 1]} : vector<4x32x8xf32> to vector<1x32x8xf32>
    %341 = vector.shape_cast %340 : vector<1x32x8xf32> to vector<32x8xf32>
    %cst_165 = arith.constant dense<0.000000e+00> : vector<12x8xf32>
    %342 = tpu.matmul %282, %341, %cst_165 {dimension_numbers = #tpu.dot_dimension_numbers<[1], [0], [0], [1], [0, 0, 1, 1], [], []>} : vector<12x32xf32>, vector<32x8xf32>, vector<12x8xf32> -> vector<12x8xf32>
    %343 = vector.extract_strided_slice %251 {offsets = [1, 0, 0], sizes = [1, 32, 8], strides = [1, 1, 1]} : vector<4x32x8xf32> to vector<1x32x8xf32>
    %344 = vector.shape_cast %343 : vector<1x32x8xf32> to vector<32x8xf32>
    %cst_166 = arith.constant dense<0.000000e+00> : vector<12x8xf32>
    %345 = tpu.matmul %282, %344, %cst_166 {dimension_numbers = #tpu.dot_dimension_numbers<[1], [0], [0], [1], [0, 0, 1, 1], [], []>} : vector<12x32xf32>, vector<32x8xf32>, vector<12x8xf32> -> vector<12x8xf32>
    %346 = vector.extract_strided_slice %252 {offsets = [1, 0, 0], sizes = [1, 32, 8], strides = [1, 1, 1]} : vector<4x32x8xf32> to vector<1x32x8xf32>
    %347 = vector.shape_cast %346 : vector<1x32x8xf32> to vector<32x8xf32>
    %cst_167 = arith.constant dense<0.000000e+00> : vector<12x8xf32>
    %348 = tpu.matmul %282, %347, %cst_167 {dimension_numbers = #tpu.dot_dimension_numbers<[1], [0], [0], [1], [0, 0, 1, 1], [], []>} : vector<12x32xf32>, vector<32x8xf32>, vector<12x8xf32> -> vector<12x8xf32>
    %349 = vector.extract_strided_slice %342 {offsets = [0, 0], sizes = [6, 8], strides = [1, 1]} : vector<12x8xf32> to vector<6x8xf32>
    %350 = vector.extract_strided_slice %345 {offsets = [0, 0], sizes = [6, 8], strides = [1, 1]} : vector<12x8xf32> to vector<6x8xf32>
    %351 = vector.extract_strided_slice %348 {offsets = [0, 0], sizes = [6, 8], strides = [1, 1]} : vector<12x8xf32> to vector<6x8xf32>
    %cst_168 = arith.constant dense<0.000000e+00> : vector<6x6xf32>
    %352 = tpu.matmul %349, %350, %cst_168 {dimension_numbers = #tpu.dot_dimension_numbers<[1], [1], [0], [0], [0, 0, 1, 0], [], []>} : vector<6x8xf32>, vector<6x8xf32>, vector<6x6xf32> -> vector<6x6xf32>
    %cst_169 = arith.constant dense<0xFF800000> : vector<6xf32>
    %353 = vector.multi_reduction <maximumf>, %352, %cst_169 [1] : vector<6x6xf32> to vector<6xf32>
    %354 = vector.shape_cast %353 : vector<6xf32> to vector<6x1xf32>
    %355 = vector.broadcast %354 : vector<6x1xf32> to vector<6x6xf32>
    %356 = arith.subf %352, %355 : vector<6x6xf32>
    %357 = math.exp %356 : vector<6x6xf32>
    %358 = arith.mulf %357, %124 : vector<6x6xf32>
    %cst_170 = arith.constant 1.66666666E-7 : f32
    %359 = vector.broadcast %cst_170 : f32 to vector<6x6xf32>
    %360 = arith.addf %358, %359 : vector<6x6xf32>
    %cst_171 = arith.constant dense<0.000000e+00> : vector<6xf32>
    %361 = vector.multi_reduction <add>, %358, %cst_171 [1] : vector<6x6xf32> to vector<6xf32>
    %362 = vector.shape_cast %361 : vector<6xf32> to vector<6x1xf32>
    %cst_172 = arith.constant 9.99999997E-7 : f32
    %363 = vector.broadcast %cst_172 : f32 to vector<6x1xf32>
    %364 = arith.addf %362, %363 : vector<6x1xf32>
    %365 = vector.broadcast %364 : vector<6x1xf32> to vector<6x6xf32>
    %366 = arith.divf %360, %365 : vector<6x6xf32>
    %cst_173 = arith.constant dense<0.000000e+00> : vector<6x8xf32>
    %367 = tpu.matmul %366, %351, %cst_173 {dimension_numbers = #tpu.dot_dimension_numbers<[1], [0], [0], [1], [0, 0, 1, 1], [], []>} : vector<6x6xf32>, vector<6x8xf32>, vector<6x8xf32> -> vector<6x8xf32>
    %368 = vector.extract_strided_slice %253 {offsets = [1, 0, 0], sizes = [1, 8, 32], strides = [1, 1, 1]} : vector<4x8x32xf32> to vector<1x8x32xf32>
    %369 = vector.shape_cast %368 : vector<1x8x32xf32> to vector<8x32xf32>
    %cst_174 = arith.constant dense<0.000000e+00> : vector<6x32xf32>
    %370 = tpu.matmul %367, %369, %cst_174 {dimension_numbers = #tpu.dot_dimension_numbers<[1], [0], [0], [1], [0, 0, 1, 1], [], []>} : vector<6x8xf32>, vector<8x32xf32>, vector<6x32xf32> -> vector<6x32xf32>
    %371 = arith.addf %316, %370 : vector<6x32xf32>
    %372 = vector.extract_strided_slice %342 {offsets = [6, 0], sizes = [6, 8], strides = [1, 1]} : vector<12x8xf32> to vector<6x8xf32>
    %373 = vector.extract_strided_slice %345 {offsets = [6, 0], sizes = [6, 8], strides = [1, 1]} : vector<12x8xf32> to vector<6x8xf32>
    %374 = vector.extract_strided_slice %348 {offsets = [6, 0], sizes = [6, 8], strides = [1, 1]} : vector<12x8xf32> to vector<6x8xf32>
    %cst_175 = arith.constant dense<0.000000e+00> : vector<6x6xf32>
    %375 = tpu.matmul %372, %373, %cst_175 {dimension_numbers = #tpu.dot_dimension_numbers<[1], [1], [0], [0], [0, 0, 1, 0], [], []>} : vector<6x8xf32>, vector<6x8xf32>, vector<6x6xf32> -> vector<6x6xf32>
    %cst_176 = arith.constant dense<0xFF800000> : vector<6xf32>
    %376 = vector.multi_reduction <maximumf>, %375, %cst_176 [1] : vector<6x6xf32> to vector<6xf32>
    %377 = vector.shape_cast %376 : vector<6xf32> to vector<6x1xf32>
    %378 = vector.broadcast %377 : vector<6x1xf32> to vector<6x6xf32>
    %379 = arith.subf %375, %378 : vector<6x6xf32>
    %380 = math.exp %379 : vector<6x6xf32>
    %381 = arith.mulf %380, %247 : vector<6x6xf32>
    %cst_177 = arith.constant 1.66666666E-7 : f32
    %382 = vector.broadcast %cst_177 : f32 to vector<6x6xf32>
    %383 = arith.addf %381, %382 : vector<6x6xf32>
    %cst_178 = arith.constant dense<0.000000e+00> : vector<6xf32>
    %384 = vector.multi_reduction <add>, %381, %cst_178 [1] : vector<6x6xf32> to vector<6xf32>
    %385 = vector.shape_cast %384 : vector<6xf32> to vector<6x1xf32>
    %cst_179 = arith.constant 9.99999997E-7 : f32
    %386 = vector.broadcast %cst_179 : f32 to vector<6x1xf32>
    %387 = arith.addf %385, %386 : vector<6x1xf32>
    %388 = vector.broadcast %387 : vector<6x1xf32> to vector<6x6xf32>
    %389 = arith.divf %383, %388 : vector<6x6xf32>
    %cst_180 = arith.constant dense<0.000000e+00> : vector<6x8xf32>
    %390 = tpu.matmul %389, %374, %cst_180 {dimension_numbers = #tpu.dot_dimension_numbers<[1], [0], [0], [1], [0, 0, 1, 1], [], []>} : vector<6x6xf32>, vector<6x8xf32>, vector<6x8xf32> -> vector<6x8xf32>
    %391 = vector.extract_strided_slice %253 {offsets = [1, 0, 0], sizes = [1, 8, 32], strides = [1, 1, 1]} : vector<4x8x32xf32> to vector<1x8x32xf32>
    %392 = vector.shape_cast %391 : vector<1x8x32xf32> to vector<8x32xf32>
    %cst_181 = arith.constant dense<0.000000e+00> : vector<6x32xf32>
    %393 = tpu.matmul %390, %392, %cst_181 {dimension_numbers = #tpu.dot_dimension_numbers<[1], [0], [0], [1], [0, 0, 1, 1], [], []>} : vector<6x8xf32>, vector<8x32xf32>, vector<6x32xf32> -> vector<6x32xf32>
    %394 = arith.addf %339, %393 : vector<6x32xf32>
    %395 = vector.extract_strided_slice %250 {offsets = [2, 0, 0], sizes = [1, 32, 8], strides = [1, 1, 1]} : vector<4x32x8xf32> to vector<1x32x8xf32>
    %396 = vector.shape_cast %395 : vector<1x32x8xf32> to vector<32x8xf32>
    %cst_182 = arith.constant dense<0.000000e+00> : vector<12x8xf32>
    %397 = tpu.matmul %282, %396, %cst_182 {dimension_numbers = #tpu.dot_dimension_numbers<[1], [0], [0], [1], [0, 0, 1, 1], [], []>} : vector<12x32xf32>, vector<32x8xf32>, vector<12x8xf32> -> vector<12x8xf32>
    %398 = vector.extract_strided_slice %251 {offsets = [2, 0, 0], sizes = [1, 32, 8], strides = [1, 1, 1]} : vector<4x32x8xf32> to vector<1x32x8xf32>
    %399 = vector.shape_cast %398 : vector<1x32x8xf32> to vector<32x8xf32>
    %cst_183 = arith.constant dense<0.000000e+00> : vector<12x8xf32>
    %400 = tpu.matmul %282, %399, %cst_183 {dimension_numbers = #tpu.dot_dimension_numbers<[1], [0], [0], [1], [0, 0, 1, 1], [], []>} : vector<12x32xf32>, vector<32x8xf32>, vector<12x8xf32> -> vector<12x8xf32>
    %401 = vector.extract_strided_slice %252 {offsets = [2, 0, 0], sizes = [1, 32, 8], strides = [1, 1, 1]} : vector<4x32x8xf32> to vector<1x32x8xf32>
    %402 = vector.shape_cast %401 : vector<1x32x8xf32> to vector<32x8xf32>
    %cst_184 = arith.constant dense<0.000000e+00> : vector<12x8xf32>
    %403 = tpu.matmul %282, %402, %cst_184 {dimension_numbers = #tpu.dot_dimension_numbers<[1], [0], [0], [1], [0, 0, 1, 1], [], []>} : vector<12x32xf32>, vector<32x8xf32>, vector<12x8xf32> -> vector<12x8xf32>
    %404 = vector.extract_strided_slice %397 {offsets = [0, 0], sizes = [6, 8], strides = [1, 1]} : vector<12x8xf32> to vector<6x8xf32>
    %405 = vector.extract_strided_slice %400 {offsets = [0, 0], sizes = [6, 8], strides = [1, 1]} : vector<12x8xf32> to vector<6x8xf32>
    %406 = vector.extract_strided_slice %403 {offsets = [0, 0], sizes = [6, 8], strides = [1, 1]} : vector<12x8xf32> to vector<6x8xf32>
    %cst_185 = arith.constant dense<0.000000e+00> : vector<6x6xf32>
    %407 = tpu.matmul %404, %405, %cst_185 {dimension_numbers = #tpu.dot_dimension_numbers<[1], [1], [0], [0], [0, 0, 1, 0], [], []>} : vector<6x8xf32>, vector<6x8xf32>, vector<6x6xf32> -> vector<6x6xf32>
    %cst_186 = arith.constant dense<0xFF800000> : vector<6xf32>
    %408 = vector.multi_reduction <maximumf>, %407, %cst_186 [1] : vector<6x6xf32> to vector<6xf32>
    %409 = vector.shape_cast %408 : vector<6xf32> to vector<6x1xf32>
    %410 = vector.broadcast %409 : vector<6x1xf32> to vector<6x6xf32>
    %411 = arith.subf %407, %410 : vector<6x6xf32>
    %412 = math.exp %411 : vector<6x6xf32>
    %413 = arith.mulf %412, %124 : vector<6x6xf32>
    %cst_187 = arith.constant 1.66666666E-7 : f32
    %414 = vector.broadcast %cst_187 : f32 to vector<6x6xf32>
    %415 = arith.addf %413, %414 : vector<6x6xf32>
    %cst_188 = arith.constant dense<0.000000e+00> : vector<6xf32>
    %416 = vector.multi_reduction <add>, %413, %cst_188 [1] : vector<6x6xf32> to vector<6xf32>
    %417 = vector.shape_cast %416 : vector<6xf32> to vector<6x1xf32>
    %cst_189 = arith.constant 9.99999997E-7 : f32
    %418 = vector.broadcast %cst_189 : f32 to vector<6x1xf32>
    %419 = arith.addf %417, %418 : vector<6x1xf32>
    %420 = vector.broadcast %419 : vector<6x1xf32> to vector<6x6xf32>
    %421 = arith.divf %415, %420 : vector<6x6xf32>
    %cst_190 = arith.constant dense<0.000000e+00> : vector<6x8xf32>
    %422 = tpu.matmul %421, %406, %cst_190 {dimension_numbers = #tpu.dot_dimension_numbers<[1], [0], [0], [1], [0, 0, 1, 1], [], []>} : vector<6x6xf32>, vector<6x8xf32>, vector<6x8xf32> -> vector<6x8xf32>
    %423 = vector.extract_strided_slice %253 {offsets = [2, 0, 0], sizes = [1, 8, 32], strides = [1, 1, 1]} : vector<4x8x32xf32> to vector<1x8x32xf32>
    %424 = vector.shape_cast %423 : vector<1x8x32xf32> to vector<8x32xf32>
    %cst_191 = arith.constant dense<0.000000e+00> : vector<6x32xf32>
    %425 = tpu.matmul %422, %424, %cst_191 {dimension_numbers = #tpu.dot_dimension_numbers<[1], [0], [0], [1], [0, 0, 1, 1], [], []>} : vector<6x8xf32>, vector<8x32xf32>, vector<6x32xf32> -> vector<6x32xf32>
    %426 = arith.addf %371, %425 : vector<6x32xf32>
    %427 = vector.extract_strided_slice %397 {offsets = [6, 0], sizes = [6, 8], strides = [1, 1]} : vector<12x8xf32> to vector<6x8xf32>
    %428 = vector.extract_strided_slice %400 {offsets = [6, 0], sizes = [6, 8], strides = [1, 1]} : vector<12x8xf32> to vector<6x8xf32>
    %429 = vector.extract_strided_slice %403 {offsets = [6, 0], sizes = [6, 8], strides = [1, 1]} : vector<12x8xf32> to vector<6x8xf32>
    %cst_192 = arith.constant dense<0.000000e+00> : vector<6x6xf32>
    %430 = tpu.matmul %427, %428, %cst_192 {dimension_numbers = #tpu.dot_dimension_numbers<[1], [1], [0], [0], [0, 0, 1, 0], [], []>} : vector<6x8xf32>, vector<6x8xf32>, vector<6x6xf32> -> vector<6x6xf32>
    %cst_193 = arith.constant dense<0xFF800000> : vector<6xf32>
    %431 = vector.multi_reduction <maximumf>, %430, %cst_193 [1] : vector<6x6xf32> to vector<6xf32>
    %432 = vector.shape_cast %431 : vector<6xf32> to vector<6x1xf32>
    %433 = vector.broadcast %432 : vector<6x1xf32> to vector<6x6xf32>
    %434 = arith.subf %430, %433 : vector<6x6xf32>
    %435 = math.exp %434 : vector<6x6xf32>
    %436 = arith.mulf %435, %247 : vector<6x6xf32>
    %cst_194 = arith.constant 1.66666666E-7 : f32
    %437 = vector.broadcast %cst_194 : f32 to vector<6x6xf32>
    %438 = arith.addf %436, %437 : vector<6x6xf32>
    %cst_195 = arith.constant dense<0.000000e+00> : vector<6xf32>
    %439 = vector.multi_reduction <add>, %436, %cst_195 [1] : vector<6x6xf32> to vector<6xf32>
    %440 = vector.shape_cast %439 : vector<6xf32> to vector<6x1xf32>
    %cst_196 = arith.constant 9.99999997E-7 : f32
    %441 = vector.broadcast %cst_196 : f32 to vector<6x1xf32>
    %442 = arith.addf %440, %441 : vector<6x1xf32>
    %443 = vector.broadcast %442 : vector<6x1xf32> to vector<6x6xf32>
    %444 = arith.divf %438, %443 : vector<6x6xf32>
    %cst_197 = arith.constant dense<0.000000e+00> : vector<6x8xf32>
    %445 = tpu.matmul %444, %429, %cst_197 {dimension_numbers = #tpu.dot_dimension_numbers<[1], [0], [0], [1], [0, 0, 1, 1], [], []>} : vector<6x6xf32>, vector<6x8xf32>, vector<6x8xf32> -> vector<6x8xf32>
    %446 = vector.extract_strided_slice %253 {offsets = [2, 0, 0], sizes = [1, 8, 32], strides = [1, 1, 1]} : vector<4x8x32xf32> to vector<1x8x32xf32>
    %447 = vector.shape_cast %446 : vector<1x8x32xf32> to vector<8x32xf32>
    %cst_198 = arith.constant dense<0.000000e+00> : vector<6x32xf32>
    %448 = tpu.matmul %445, %447, %cst_198 {dimension_numbers = #tpu.dot_dimension_numbers<[1], [0], [0], [1], [0, 0, 1, 1], [], []>} : vector<6x8xf32>, vector<8x32xf32>, vector<6x32xf32> -> vector<6x32xf32>
    %449 = arith.addf %394, %448 : vector<6x32xf32>
    %450 = vector.extract_strided_slice %250 {offsets = [3, 0, 0], sizes = [1, 32, 8], strides = [1, 1, 1]} : vector<4x32x8xf32> to vector<1x32x8xf32>
    %451 = vector.shape_cast %450 : vector<1x32x8xf32> to vector<32x8xf32>
    %cst_199 = arith.constant dense<0.000000e+00> : vector<12x8xf32>
    %452 = tpu.matmul %282, %451, %cst_199 {dimension_numbers = #tpu.dot_dimension_numbers<[1], [0], [0], [1], [0, 0, 1, 1], [], []>} : vector<12x32xf32>, vector<32x8xf32>, vector<12x8xf32> -> vector<12x8xf32>
    %453 = vector.extract_strided_slice %251 {offsets = [3, 0, 0], sizes = [1, 32, 8], strides = [1, 1, 1]} : vector<4x32x8xf32> to vector<1x32x8xf32>
    %454 = vector.shape_cast %453 : vector<1x32x8xf32> to vector<32x8xf32>
    %cst_200 = arith.constant dense<0.000000e+00> : vector<12x8xf32>
    %455 = tpu.matmul %282, %454, %cst_200 {dimension_numbers = #tpu.dot_dimension_numbers<[1], [0], [0], [1], [0, 0, 1, 1], [], []>} : vector<12x32xf32>, vector<32x8xf32>, vector<12x8xf32> -> vector<12x8xf32>
    %456 = vector.extract_strided_slice %252 {offsets = [3, 0, 0], sizes = [1, 32, 8], strides = [1, 1, 1]} : vector<4x32x8xf32> to vector<1x32x8xf32>
    %457 = vector.shape_cast %456 : vector<1x32x8xf32> to vector<32x8xf32>
    %cst_201 = arith.constant dense<0.000000e+00> : vector<12x8xf32>
    %458 = tpu.matmul %282, %457, %cst_201 {dimension_numbers = #tpu.dot_dimension_numbers<[1], [0], [0], [1], [0, 0, 1, 1], [], []>} : vector<12x32xf32>, vector<32x8xf32>, vector<12x8xf32> -> vector<12x8xf32>
    %459 = vector.extract_strided_slice %452 {offsets = [0, 0], sizes = [6, 8], strides = [1, 1]} : vector<12x8xf32> to vector<6x8xf32>
    %460 = vector.extract_strided_slice %455 {offsets = [0, 0], sizes = [6, 8], strides = [1, 1]} : vector<12x8xf32> to vector<6x8xf32>
    %461 = vector.extract_strided_slice %458 {offsets = [0, 0], sizes = [6, 8], strides = [1, 1]} : vector<12x8xf32> to vector<6x8xf32>
    %cst_202 = arith.constant dense<0.000000e+00> : vector<6x6xf32>
    %462 = tpu.matmul %459, %460, %cst_202 {dimension_numbers = #tpu.dot_dimension_numbers<[1], [1], [0], [0], [0, 0, 1, 0], [], []>} : vector<6x8xf32>, vector<6x8xf32>, vector<6x6xf32> -> vector<6x6xf32>
    %cst_203 = arith.constant dense<0xFF800000> : vector<6xf32>
    %463 = vector.multi_reduction <maximumf>, %462, %cst_203 [1] : vector<6x6xf32> to vector<6xf32>
    %464 = vector.shape_cast %463 : vector<6xf32> to vector<6x1xf32>
    %465 = vector.broadcast %464 : vector<6x1xf32> to vector<6x6xf32>
    %466 = arith.subf %462, %465 : vector<6x6xf32>
    %467 = math.exp %466 : vector<6x6xf32>
    %468 = arith.mulf %467, %124 : vector<6x6xf32>
    %cst_204 = arith.constant 1.66666666E-7 : f32
    %469 = vector.broadcast %cst_204 : f32 to vector<6x6xf32>
    %470 = arith.addf %468, %469 : vector<6x6xf32>
    %cst_205 = arith.constant dense<0.000000e+00> : vector<6xf32>
    %471 = vector.multi_reduction <add>, %468, %cst_205 [1] : vector<6x6xf32> to vector<6xf32>
    %472 = vector.shape_cast %471 : vector<6xf32> to vector<6x1xf32>
    %cst_206 = arith.constant 9.99999997E-7 : f32
    %473 = vector.broadcast %cst_206 : f32 to vector<6x1xf32>
    %474 = arith.addf %472, %473 : vector<6x1xf32>
    %475 = vector.broadcast %474 : vector<6x1xf32> to vector<6x6xf32>
    %476 = arith.divf %470, %475 : vector<6x6xf32>
    %cst_207 = arith.constant dense<0.000000e+00> : vector<6x8xf32>
    %477 = tpu.matmul %476, %461, %cst_207 {dimension_numbers = #tpu.dot_dimension_numbers<[1], [0], [0], [1], [0, 0, 1, 1], [], []>} : vector<6x6xf32>, vector<6x8xf32>, vector<6x8xf32> -> vector<6x8xf32>
    %478 = vector.extract_strided_slice %253 {offsets = [3, 0, 0], sizes = [1, 8, 32], strides = [1, 1, 1]} : vector<4x8x32xf32> to vector<1x8x32xf32>
    %479 = vector.shape_cast %478 : vector<1x8x32xf32> to vector<8x32xf32>
    %cst_208 = arith.constant dense<0.000000e+00> : vector<6x32xf32>
    %480 = tpu.matmul %477, %479, %cst_208 {dimension_numbers = #tpu.dot_dimension_numbers<[1], [0], [0], [1], [0, 0, 1, 1], [], []>} : vector<6x8xf32>, vector<8x32xf32>, vector<6x32xf32> -> vector<6x32xf32>
    %481 = arith.addf %426, %480 : vector<6x32xf32>
    %482 = vector.extract_strided_slice %452 {offsets = [6, 0], sizes = [6, 8], strides = [1, 1]} : vector<12x8xf32> to vector<6x8xf32>
    %483 = vector.extract_strided_slice %455 {offsets = [6, 0], sizes = [6, 8], strides = [1, 1]} : vector<12x8xf32> to vector<6x8xf32>
    %484 = vector.extract_strided_slice %458 {offsets = [6, 0], sizes = [6, 8], strides = [1, 1]} : vector<12x8xf32> to vector<6x8xf32>
    %cst_209 = arith.constant dense<0.000000e+00> : vector<6x6xf32>
    %485 = tpu.matmul %482, %483, %cst_209 {dimension_numbers = #tpu.dot_dimension_numbers<[1], [1], [0], [0], [0, 0, 1, 0], [], []>} : vector<6x8xf32>, vector<6x8xf32>, vector<6x6xf32> -> vector<6x6xf32>
    %cst_210 = arith.constant dense<0xFF800000> : vector<6xf32>
    %486 = vector.multi_reduction <maximumf>, %485, %cst_210 [1] : vector<6x6xf32> to vector<6xf32>
    %487 = vector.shape_cast %486 : vector<6xf32> to vector<6x1xf32>
    %488 = vector.broadcast %487 : vector<6x1xf32> to vector<6x6xf32>
    %489 = arith.subf %485, %488 : vector<6x6xf32>
    %490 = math.exp %489 : vector<6x6xf32>
    %491 = arith.mulf %490, %247 : vector<6x6xf32>
    %cst_211 = arith.constant 1.66666666E-7 : f32
    %492 = vector.broadcast %cst_211 : f32 to vector<6x6xf32>
    %493 = arith.addf %491, %492 : vector<6x6xf32>
    %cst_212 = arith.constant dense<0.000000e+00> : vector<6xf32>
    %494 = vector.multi_reduction <add>, %491, %cst_212 [1] : vector<6x6xf32> to vector<6xf32>
    %495 = vector.shape_cast %494 : vector<6xf32> to vector<6x1xf32>
    %cst_213 = arith.constant 9.99999997E-7 : f32
    %496 = vector.broadcast %cst_213 : f32 to vector<6x1xf32>
    %497 = arith.addf %495, %496 : vector<6x1xf32>
    %498 = vector.broadcast %497 : vector<6x1xf32> to vector<6x6xf32>
    %499 = arith.divf %493, %498 : vector<6x6xf32>
    %cst_214 = arith.constant dense<0.000000e+00> : vector<6x8xf32>
    %500 = tpu.matmul %499, %484, %cst_214 {dimension_numbers = #tpu.dot_dimension_numbers<[1], [0], [0], [1], [0, 0, 1, 1], [], []>} : vector<6x6xf32>, vector<6x8xf32>, vector<6x8xf32> -> vector<6x8xf32>
    %501 = vector.extract_strided_slice %253 {offsets = [3, 0, 0], sizes = [1, 8, 32], strides = [1, 1, 1]} : vector<4x8x32xf32> to vector<1x8x32xf32>
    %502 = vector.shape_cast %501 : vector<1x8x32xf32> to vector<8x32xf32>
    %cst_215 = arith.constant dense<0.000000e+00> : vector<6x32xf32>
    %503 = tpu.matmul %500, %502, %cst_215 {dimension_numbers = #tpu.dot_dimension_numbers<[1], [0], [0], [1], [0, 0, 1, 1], [], []>} : vector<6x8xf32>, vector<8x32xf32>, vector<6x32xf32> -> vector<6x32xf32>
    %504 = arith.addf %449, %503 : vector<6x32xf32>
    %505 = tpu.concatenate %481, %504 in 0 : vector<6x32xf32>, vector<6x32xf32> -> vector<12x32xf32>
    %506 = arith.addf %0, %505 : vector<12x32xf32>
    %507 = vector.broadcast %254 : vector<1x32xf32> to vector<12x32xf32>
    %508 = arith.addf %506, %507 : vector<12x32xf32>
    %cst_216 = arith.constant dense<0.000000e+00> : vector<12xf32>
    %509 = vector.multi_reduction <add>, %508, %cst_216 [1] : vector<12x32xf32> to vector<12xf32>
    %510 = vector.shape_cast %509 : vector<12xf32> to vector<12x1xf32>
    %cst_217 = arith.constant 3.200000e+01 : f32
    %511 = vector.broadcast %cst_217 : f32 to vector<12x1xf32>
    %512 = arith.divf %510, %511 : vector<12x1xf32>
    %513 = vector.broadcast %512 : vector<12x1xf32> to vector<12x32xf32>
    %514 = arith.subf %508, %513 : vector<12x32xf32>
    %515 = arith.mulf %514, %514 : vector<12x32xf32>
    %cst_218 = arith.constant dense<0.000000e+00> : vector<12xf32>
    %516 = vector.multi_reduction <add>, %515, %cst_218 [1] : vector<12x32xf32> to vector<12xf32>
    %517 = vector.shape_cast %516 : vector<12xf32> to vector<12x1xf32>
    %cst_219 = arith.constant 3.200000e+01 : f32
    %518 = vector.broadcast %cst_219 : f32 to vector<12x1xf32>
    %519 = arith.divf %517, %518 : vector<12x1xf32>
    %520 = vector.broadcast %512 : vector<12x1xf32> to vector<12x32xf32>
    %521 = arith.subf %508, %520 : vector<12x32xf32>
    %cst_220 = arith.constant 9.99999974E-6 : f32
    %522 = vector.broadcast %cst_220 : f32 to vector<12x1xf32>
    %523 = arith.addf %519, %522 : vector<12x1xf32>
    %524 = math.rsqrt %523 : vector<12x1xf32>
    %525 = vector.broadcast %524 : vector<12x1xf32> to vector<12x32xf32>
    %526 = arith.mulf %521, %525 : vector<12x32xf32>
    %527 = vector.broadcast %255 : vector<1x32xf32> to vector<12x32xf32>
    %528 = arith.mulf %526, %527 : vector<12x32xf32>
    %529 = vector.broadcast %256 : vector<1x32xf32> to vector<12x32xf32>
    %530 = arith.addf %528, %529 : vector<12x32xf32>
    %cst_221 = arith.constant dense<0.000000e+00> : vector<12x128xf32>
    %531 = tpu.matmul %530, %257, %cst_221 {dimension_numbers = #tpu.dot_dimension_numbers<[1], [0], [0], [1], [0, 0, 1, 1], [], []>} : vector<12x32xf32>, vector<32x128xf32>, vector<12x128xf32> -> vector<12x128xf32>
    %532 = vector.broadcast %258 : vector<1x128xf32> to vector<12x128xf32>
    %533 = arith.addf %531, %532 : vector<12x128xf32>
    %cst_222 = arith.constant 5.000000e-01 : f32
    %534 = vector.broadcast %cst_222 : f32 to vector<12x128xf32>
    %535 = arith.mulf %534, %533 : vector<12x128xf32>
    %cst_223 = arith.constant 0.707106769 : f32
    %536 = vector.broadcast %cst_223 : f32 to vector<12x128xf32>
    %537 = arith.mulf %533, %536 : vector<12x128xf32>
    %538 = math.erf %537 : vector<12x128xf32>
    %cst_224 = arith.constant 1.000000e+00 : f32
    %539 = vector.broadcast %cst_224 : f32 to vector<12x128xf32>
    %540 = arith.addf %539, %538 : vector<12x128xf32>
    %541 = arith.mulf %535, %540 : vector<12x128xf32>
    %cst_225 = arith.constant dense<0.000000e+00> : vector<12x32xf32>
    %542 = tpu.matmul %541, %259, %cst_225 {dimension_numbers = #tpu.dot_dimension_numbers<[1], [0], [0], [1], [0, 0, 1, 1], [], []>} : vector<12x128xf32>, vector<128x32xf32>, vector<12x32xf32> -> vector<12x32xf32>
    %543 = vector.broadcast %260 : vector<1x32xf32> to vector<12x32xf32>
    %544 = arith.addf %542, %543 : vector<12x32xf32>
    %545 = arith.addf %508, %544 : vector<12x32xf32>
    %c0_226 = arith.constant 0 : index
    %c0_227 = arith.constant 0 : index
    %546 = vector.load %arg29[%c0_226, %c0_227] : memref<12x32xf32, #tpu.memory_space<vmem>>, vector<12x32xf32>
    tpu.vector_store %arg29[%c0_226, %c0_227], %545 {strides = array<i32>} : memref<12x32xf32, #tpu.memory_space<vmem>>, vector<12x32xf32>,
    return
  }
}

module attributes {stable_mosaic.version = 11 : i64} {
  func.func @_fsm_step_kernel(%arg0: memref<12x32xf32, #tpu.memory_space<vmem>>, %arg1: memref<2x5x1xf32, #tpu.memory_space<vmem>>, %arg2: memref<1x16xf32, #tpu.memory_space<vmem>>, %arg3: memref<2x5x2xf32, #tpu.memory_space<vmem>>, %arg4: memref<1x32xf32, #tpu.memory_space<vmem>>, %arg5: memref<1x32xf32, #tpu.memory_space<vmem>>, %arg6: memref<32x32xf32, #tpu.memory_space<vmem>>, %arg7: memref<1x32xf32, #tpu.memory_space<vmem>>, %arg8: memref<48x16xf32, #tpu.memory_space<vmem>>, %arg9: memref<1x16xf32, #tpu.memory_space<vmem>>, %arg10: memref<16x8xf32, #tpu.memory_space<vmem>>, %arg11: memref<1x8xf32, #tpu.memory_space<vmem>>, %arg12: memref<8x2xf32, #tpu.memory_space<vmem>>, %arg13: memref<1x2xf32, #tpu.memory_space<vmem>>, %arg14: memref<1x32xf32, #tpu.memory_space<vmem>>, %arg15: memref<1x32xf32, #tpu.memory_space<vmem>>, %arg16: memref<4x32x8xf32, #tpu.memory_space<vmem>>, %arg17: memref<4x32x8xf32, #tpu.memory_space<vmem>>, %arg18: memref<4x32x8xf32, #tpu.memory_space<vmem>>, %arg19: memref<4x8x32xf32, #tpu.memory_space<vmem>>, %arg20: memref<1x32xf32, #tpu.memory_space<vmem>>, %arg21: memref<1x32xf32, #tpu.memory_space<vmem>>, %arg22: memref<1x32xf32, #tpu.memory_space<vmem>>, %arg23: memref<32x128xf32, #tpu.memory_space<vmem>>, %arg24: memref<1x128xf32, #tpu.memory_space<vmem>>, %arg25: memref<128x32xf32, #tpu.memory_space<vmem>>, %arg26: memref<1x32xf32, #tpu.memory_space<vmem>>, %arg27: memref<1x32xf32, #tpu.memory_space<vmem>>, %arg28: memref<1x32xf32, #tpu.memory_space<vmem>>, %arg29: memref<12x32xf32, #tpu.memory_space<vmem>>, %arg30: memref<2x5x1xf32, #tpu.memory_space<vmem>>) attributes {dimension_semantics = [], scalar_prefetch = 0 : i64, scratch_operands = 0 : i64, tpu.core_type = #tpu.core_type<tc>} {
    %c0 = arith.constant 0 : index
    %c0_0 = arith.constant 0 : index
    %0 = vector.load %arg0[%c0, %c0_0] : memref<12x32xf32, #tpu.memory_space<vmem>>, vector<12x32xf32>
    %c0_1 = arith.constant 0 : index
    %c0_2 = arith.constant 0 : index
    %1 = vector.load %arg2[%c0_1, %c0_2] : memref<1x16xf32, #tpu.memory_space<vmem>>, vector<1x16xf32>
    %2 = vector.extract_strided_slice %0 {offsets = [1, 0], sizes = [5, 32], strides = [1, 1]} : vector<12x32xf32> to vector<5x32xf32>
    %c0_3 = arith.constant 0 : index
    %c0_4 = arith.constant 0 : index
    %c0_5 = arith.constant 0 : index
    %3 = vector.load %arg1[%c0_3, %c0_4, %c0_5] : memref<2x5x1xf32, #tpu.memory_space<vmem>>, vector<1x5x1xf32>
    %4 = vector.shape_cast %3 : vector<1x5x1xf32> to vector<5x1xf32>
    %c0_6 = arith.constant 0 : index
    %c0_7 = arith.constant 0 : index
    %5 = vector.load %arg4[%c0_6, %c0_7] : memref<1x32xf32, #tpu.memory_space<vmem>>, vector<1x32xf32>
    %c0_8 = arith.constant 0 : index
    %c0_9 = arith.constant 0 : index
    %6 = vector.load %arg5[%c0_8, %c0_9] : memref<1x32xf32, #tpu.memory_space<vmem>>, vector<1x32xf32>
    %cst = arith.constant dense<0.000000e+00> : vector<5xf32>
    %7 = vector.multi_reduction <add>, %2, %cst [1] : vector<5x32xf32> to vector<5xf32>
    %8 = vector.shape_cast %7 : vector<5xf32> to vector<5x1xf32>
    %cst_10 = arith.constant 3.200000e+01 : f32
    %9 = vector.broadcast %cst_10 : f32 to vector<5x1xf32>
    %10 = arith.divf %8, %9 : vector<5x1xf32>
    %11 = vector.broadcast %10 : vector<5x1xf32> to vector<5x32xf32>
    %12 = arith.subf %2, %11 : vector<5x32xf32>
    %13 = arith.mulf %12, %12 : vector<5x32xf32>
    %cst_11 = arith.constant dense<0.000000e+00> : vector<5xf32>
    %14 = vector.multi_reduction <add>, %13, %cst_11 [1] : vector<5x32xf32> to vector<5xf32>
    %15 = vector.shape_cast %14 : vector<5xf32> to vector<5x1xf32>
    %cst_12 = arith.constant 3.200000e+01 : f32
    %16 = vector.broadcast %cst_12 : f32 to vector<5x1xf32>
    %17 = arith.divf %15, %16 : vector<5x1xf32>
    %18 = vector.broadcast %10 : vector<5x1xf32> to vector<5x32xf32>
    %19 = arith.subf %2, %18 : vector<5x32xf32>
    %cst_13 = arith.constant 9.99999974E-6 : f32
    %20 = vector.broadcast %cst_13 : f32 to vector<5x1xf32>
    %21 = arith.addf %17, %20 : vector<5x1xf32>
    %22 = math.rsqrt %21 : vector<5x1xf32>
    %23 = vector.broadcast %22 : vector<5x1xf32> to vector<5x32xf32>
    %24 = arith.mulf %19, %23 : vector<5x32xf32>
    %25 = vector.broadcast %5 : vector<1x32xf32> to vector<5x32xf32>
    %26 = arith.mulf %24, %25 : vector<5x32xf32>
    %27 = vector.broadcast %6 : vector<1x32xf32> to vector<5x32xf32>
    %28 = arith.addf %26, %27 : vector<5x32xf32>
    %c0_14 = arith.constant 0 : index
    %c0_15 = arith.constant 0 : index
    %29 = vector.load %arg6[%c0_14, %c0_15] : memref<32x32xf32, #tpu.memory_space<vmem>>, vector<32x32xf32>
    %cst_16 = arith.constant dense<0.000000e+00> : vector<5x32xf32>
    %30 = tpu.matmul %28, %29, %cst_16 {dimension_numbers = #tpu.dot_dimension_numbers<[1], [0], [0], [1], [0, 0, 1, 1], [], []>} : vector<5x32xf32>, vector<32x32xf32>, vector<5x32xf32> -> vector<5x32xf32>
    %c0_17 = arith.constant 0 : index
    %c0_18 = arith.constant 0 : index
    %31 = vector.load %arg7[%c0_17, %c0_18] : memref<1x32xf32, #tpu.memory_space<vmem>>, vector<1x32xf32>
    %32 = vector.broadcast %31 : vector<1x32xf32> to vector<5x32xf32>
    %33 = arith.addf %30, %32 : vector<5x32xf32>
    %cst_19 = arith.constant 5.000000e-01 : f32
    %34 = vector.broadcast %cst_19 : f32 to vector<5x32xf32>
    %35 = arith.mulf %34, %33 : vector<5x32xf32>
    %cst_20 = arith.constant 0.707106769 : f32
    %36 = vector.broadcast %cst_20 : f32 to vector<5x32xf32>
    %37 = arith.mulf %33, %36 : vector<5x32xf32>
    %38 = math.erf %37 : vector<5x32xf32>
    %cst_21 = arith.constant 1.000000e+00 : f32
    %39 = vector.broadcast %cst_21 : f32 to vector<5x32xf32>
    %40 = arith.addf %39, %38 : vector<5x32xf32>
    %41 = arith.mulf %35, %40 : vector<5x32xf32>
    %42 = vector.extract_strided_slice %41 {offsets = [0, 0], sizes = [5, 16], strides = [1, 1]} : vector<5x32xf32> to vector<5x16xf32>
    %43 = vector.extract_strided_slice %41 {offsets = [0, 16], sizes = [5, 16], strides = [1, 1]} : vector<5x32xf32> to vector<5x16xf32>
    %cst_22 = arith.constant dense<0.000000e+00> : vector<1xf32>
    %44 = vector.multi_reduction <add>, %4, %cst_22 [0] : vector<5x1xf32> to vector<1xf32>
    %45 = vector.shape_cast %44 : vector<1xf32> to vector<1x1xf32>
    %46 = vector.broadcast %4 : vector<5x1xf32> to vector<5x16xf32>
    %47 = arith.mulf %43, %46 : vector<5x16xf32>
    %cst_23 = arith.constant dense<0.000000e+00> : vector<16xf32>
    %48 = vector.multi_reduction <add>, %47, %cst_23 [0] : vector<5x16xf32> to vector<16xf32>
    %49 = vector.shape_cast %48 : vector<16xf32> to vector<1x16xf32>
    %50 = vector.broadcast %45 : vector<1x1xf32> to vector<1x16xf32>
    %51 = arith.divf %49, %50 : vector<1x16xf32>
    %52 = vector.shape_cast %51 : vector<1x16xf32> to vector<1x16xf32>
    %53 = vector.broadcast %52 : vector<1x16xf32> to vector<5x16xf32>
    %54 = vector.shape_cast %1 : vector<1x16xf32> to vector<1x16xf32>
    %55 = vector.broadcast %54 : vector<1x16xf32> to vector<5x16xf32>
    %56 = tpu.concatenate %42, %53, %55 in 1 : vector<5x16xf32>, vector<5x16xf32>, vector<5x16xf32> -> vector<5x48xf32>
    %c0_24 = arith.constant 0 : index
    %c0_25 = arith.constant 0 : index
    %57 = vector.load %arg8[%c0_24, %c0_25] : memref<48x16xf32, #tpu.memory_space<vmem>>, vector<48x16xf32>
    %cst_26 = arith.constant dense<0.000000e+00> : vector<5x16xf32>
    %58 = tpu.matmul %56, %57, %cst_26 {dimension_numbers = #tpu.dot_dimension_numbers<[1], [0], [0], [1], [0, 0, 1, 1], [], []>} : vector<5x48xf32>, vector<48x16xf32>, vector<5x16xf32> -> vector<5x16xf32>
    %c0_27 = arith.constant 0 : index
    %c0_28 = arith.constant 0 : index
    %59 = vector.load %arg9[%c0_27, %c0_28] : memref<1x16xf32, #tpu.memory_space<vmem>>, vector<1x16xf32>
    %60 = vector.broadcast %59 : vector<1x16xf32> to vector<5x16xf32>
    %61 = arith.addf %58, %60 : vector<5x16xf32>
    %cst_29 = arith.constant 5.000000e-01 : f32
    %62 = vector.broadcast %cst_29 : f32 to vector<5x16xf32>
    %63 = arith.mulf %62, %61 : vector<5x16xf32>
    %cst_30 = arith.constant 0.707106769 : f32
    %64 = vector.broadcast %cst_30 : f32 to vector<5x16xf32>
    %65 = arith.mulf %61, %64 : vector<5x16xf32>
    %66 = math.erf %65 : vector<5x16xf32>
    %cst_31 = arith.constant 1.000000e+00 : f32
    %67 = vector.broadcast %cst_31 : f32 to vector<5x16xf32>
    %68 = arith.addf %67, %66 : vector<5x16xf32>
    %69 = arith.mulf %63, %68 : vector<5x16xf32>
    %c0_32 = arith.constant 0 : index
    %c0_33 = arith.constant 0 : index
    %70 = vector.load %arg10[%c0_32, %c0_33] : memref<16x8xf32, #tpu.memory_space<vmem>>, vector<16x8xf32>
    %cst_34 = arith.constant dense<0.000000e+00> : vector<5x8xf32>
    %71 = tpu.matmul %69, %70, %cst_34 {dimension_numbers = #tpu.dot_dimension_numbers<[1], [0], [0], [1], [0, 0, 1, 1], [], []>} : vector<5x16xf32>, vector<16x8xf32>, vector<5x8xf32> -> vector<5x8xf32>
    %c0_35 = arith.constant 0 : index
    %c0_36 = arith.constant 0 : index
    %72 = vector.load %arg11[%c0_35, %c0_36] : memref<1x8xf32, #tpu.memory_space<vmem>>, vector<1x8xf32>
    %73 = vector.broadcast %72 : vector<1x8xf32> to vector<5x8xf32>
    %74 = arith.addf %71, %73 : vector<5x8xf32>
    %cst_37 = arith.constant 5.000000e-01 : f32
    %75 = vector.broadcast %cst_37 : f32 to vector<5x8xf32>
    %76 = arith.mulf %75, %74 : vector<5x8xf32>
    %cst_38 = arith.constant 0.707106769 : f32
    %77 = vector.broadcast %cst_38 : f32 to vector<5x8xf32>
    %78 = arith.mulf %74, %77 : vector<5x8xf32>
    %79 = math.erf %78 : vector<5x8xf32>
    %cst_39 = arith.constant 1.000000e+00 : f32
    %80 = vector.broadcast %cst_39 : f32 to vector<5x8xf32>
    %81 = arith.addf %80, %79 : vector<5x8xf32>
    %82 = arith.mulf %76, %81 : vector<5x8xf32>
    %c0_40 = arith.constant 0 : index
    %c0_41 = arith.constant 0 : index
    %83 = vector.load %arg12[%c0_40, %c0_41] : memref<8x2xf32, #tpu.memory_space<vmem>>, vector<8x2xf32>
    %cst_42 = arith.constant dense<0.000000e+00> : vector<5x2xf32>
    %84 = tpu.matmul %82, %83, %cst_42 {dimension_numbers = #tpu.dot_dimension_numbers<[1], [0], [0], [1], [0, 0, 1, 1], [], []>} : vector<5x8xf32>, vector<8x2xf32>, vector<5x2xf32> -> vector<5x2xf32>
    %c0_43 = arith.constant 0 : index
    %c0_44 = arith.constant 0 : index
    %85 = vector.load %arg13[%c0_43, %c0_44] : memref<1x2xf32, #tpu.memory_space<vmem>>, vector<1x2xf32>
    %86 = vector.broadcast %85 : vector<1x2xf32> to vector<5x2xf32>
    %87 = arith.addf %84, %86 : vector<5x2xf32>
    %cst_45 = arith.constant dense<0xFF800000> : vector<5xf32>
    %88 = vector.multi_reduction <maximumf>, %87, %cst_45 [1] : vector<5x2xf32> to vector<5xf32>
    %89 = vector.shape_cast %88 : vector<5xf32> to vector<5x1xf32>
    %90 = vector.broadcast %89 : vector<5x1xf32> to vector<5x2xf32>
    %91 = arith.subf %87, %90 : vector<5x2xf32>
    %92 = math.exp %91 : vector<5x2xf32>
    %cst_46 = arith.constant dense<0.000000e+00> : vector<5xf32>
    %93 = vector.multi_reduction <add>, %92, %cst_46 [1] : vector<5x2xf32> to vector<5xf32>
    %94 = vector.shape_cast %93 : vector<5xf32> to vector<5x1xf32>
    %95 = math.log %94 : vector<5x1xf32>
    %96 = vector.broadcast %89 : vector<5x1xf32> to vector<5x2xf32>
    %97 = arith.subf %87, %96 : vector<5x2xf32>
    %98 = vector.broadcast %95 : vector<5x1xf32> to vector<5x2xf32>
    %99 = arith.subf %97, %98 : vector<5x2xf32>
    %c0_47 = arith.constant 0 : index
    %c0_48 = arith.constant 0 : index
    %c0_49 = arith.constant 0 : index
    %100 = vector.load %arg3[%c0_47, %c0_48, %c0_49] : memref<2x5x2xf32, #tpu.memory_space<vmem>>, vector<1x5x2xf32>
    %101 = vector.shape_cast %100 : vector<1x5x2xf32> to vector<5x2xf32>
    %102 = arith.addf %99, %101 : vector<5x2xf32>
    %103 = vector.extract_strided_slice %102 {offsets = [0, 0], sizes = [5, 1], strides = [1, 1]} : vector<5x2xf32> to vector<5x1xf32>
    %104 = vector.extract_strided_slice %102 {offsets = [0, 1], sizes = [5, 1], strides = [1, 1]} : vector<5x2xf32> to vector<5x1xf32>
    %105 = arith.cmpf oge, %103, %104 : vector<5x1xf32>
    %106 = arith.extui %105 : vector<5x1xi1> to vector<5x1xi32>
    %107 = arith.sitofp %106 : vector<5x1xi32> to vector<5x1xf32>
    %108 = arith.mulf %107, %4 : vector<5x1xf32>
    %c0_50 = arith.constant 0 : index
    %c0_51 = arith.constant 0 : index
    %c0_52 = arith.constant 0 : index
    %109 = vector.load %arg30[%c0_50, %c0_51, %c0_52] : memref<2x5x1xf32, #tpu.memory_space<vmem>>, vector<1x5x1xf32>
    %110 = vector.shape_cast %109 : vector<1x5x1xf32> to vector<5x1xf32>
    %111 = vector.shape_cast %108 : vector<5x1xf32> to vector<1x5x1xf32>
    tpu.vector_store %arg30[%c0_50, %c0_51, %c0_52], %111 {strides = array<i32>} : memref<2x5x1xf32, #tpu.memory_space<vmem>>, vector<1x5x1xf32>,
    %cst_53 = arith.constant 1.000000e+00 : f32
    %112 = vector.broadcast %cst_53 : f32 to vector<1x1xf32>
    %113 = tpu.concatenate %112, %108 in 0 : vector<1x1xf32>, vector<5x1xf32> -> vector<6x1xf32>
    %cst_54 = arith.constant 1.000000e+00 : f32
    %114 = vector.broadcast %cst_54 : f32 to vector<6x1xf32>
    %cst_55 = arith.constant dense<0.000000e+00> : vector<6x6xf32>
    %115 = tpu.matmul %114, %113, %cst_55 {dimension_numbers = #tpu.dot_dimension_numbers<[1], [1], [0], [0], [0, 0, 1, 0], [], []>} : vector<6x1xf32>, vector<6x1xf32>, vector<6x6xf32> -> vector<6x6xf32>
    %116 = tpu.iota {dimensions = array<i32: 0>} : vector<6x6xi32>
    %117 = tpu.iota {dimensions = array<i32: 1>} : vector<6x6xi32>
    %118 = arith.cmpi eq, %116, %117 : vector<6x6xi32>
    %119 = arith.extui %118 : vector<6x6xi1> to vector<6x6xi32>
    %120 = arith.sitofp %119 : vector<6x6xi32> to vector<6x6xf32>
    %cst_56 = arith.constant 1.000000e+00 : f32
    %121 = vector.broadcast %cst_56 : f32 to vector<6x6xf32>
    %122 = arith.subf %121, %115 : vector<6x6xf32>
    %123 = arith.mulf %122, %120 : vector<6x6xf32>
    %124 = arith.addf %115, %123 : vector<6x6xf32>
    %125 = vector.extract_strided_slice %0 {offsets = [7, 0], sizes = [5, 32], strides = [1, 1]} : vector<12x32xf32> to vector<5x32xf32>
    %c1 = arith.constant 1 : index
    %c0_57 = arith.constant 0 : index
    %c0_58 = arith.constant 0 : index
    %126 = vector.load %arg1[%c1, %c0_57, %c0_58] : memref<2x5x1xf32, #tpu.memory_space<vmem>>, vector<1x5x1xf32>
    %127 = vector.shape_cast %126 : vector<1x5x1xf32> to vector<5x1xf32>
    %c0_59 = arith.constant 0 : index
    %c0_60 = arith.constant 0 : index
    %128 = vector.load %arg4[%c0_59, %c0_60] : memref<1x32xf32, #tpu.memory_space<vmem>>, vector<1x32xf32>
    %c0_61 = arith.constant 0 : index
    %c0_62 = arith.constant 0 : index
    %129 = vector.load %arg5[%c0_61, %c0_62] : memref<1x32xf32, #tpu.memory_space<vmem>>, vector<1x32xf32>
    %cst_63 = arith.constant dense<0.000000e+00> : vector<5xf32>
    %130 = vector.multi_reduction <add>, %125, %cst_63 [1] : vector<5x32xf32> to vector<5xf32>
    %131 = vector.shape_cast %130 : vector<5xf32> to vector<5x1xf32>
    %cst_64 = arith.constant 3.200000e+01 : f32
    %132 = vector.broadcast %cst_64 : f32 to vector<5x1xf32>
    %133 = arith.divf %131, %132 : vector<5x1xf32>
    %134 = vector.broadcast %133 : vector<5x1xf32> to vector<5x32xf32>
    %135 = arith.subf %125, %134 : vector<5x32xf32>
    %136 = arith.mulf %135, %135 : vector<5x32xf32>
    %cst_65 = arith.constant dense<0.000000e+00> : vector<5xf32>
    %137 = vector.multi_reduction <add>, %136, %cst_65 [1] : vector<5x32xf32> to vector<5xf32>
    %138 = vector.shape_cast %137 : vector<5xf32> to vector<5x1xf32>
    %cst_66 = arith.constant 3.200000e+01 : f32
    %139 = vector.broadcast %cst_66 : f32 to vector<5x1xf32>
    %140 = arith.divf %138, %139 : vector<5x1xf32>
    %141 = vector.broadcast %133 : vector<5x1xf32> to vector<5x32xf32>
    %142 = arith.subf %125, %141 : vector<5x32xf32>
    %cst_67 = arith.constant 9.99999974E-6 : f32
    %143 = vector.broadcast %cst_67 : f32 to vector<5x1xf32>
    %144 = arith.addf %140, %143 : vector<5x1xf32>
    %145 = math.rsqrt %144 : vector<5x1xf32>
    %146 = vector.broadcast %145 : vector<5x1xf32> to vector<5x32xf32>
    %147 = arith.mulf %142, %146 : vector<5x32xf32>
    %148 = vector.broadcast %128 : vector<1x32xf32> to vector<5x32xf32>
    %149 = arith.mulf %147, %148 : vector<5x32xf32>
    %150 = vector.broadcast %129 : vector<1x32xf32> to vector<5x32xf32>
    %151 = arith.addf %149, %150 : vector<5x32xf32>
    %c0_68 = arith.constant 0 : index
    %c0_69 = arith.constant 0 : index
    %152 = vector.load %arg6[%c0_68, %c0_69] : memref<32x32xf32, #tpu.memory_space<vmem>>, vector<32x32xf32>
    %cst_70 = arith.constant dense<0.000000e+00> : vector<5x32xf32>
    %153 = tpu.matmul %151, %152, %cst_70 {dimension_numbers = #tpu.dot_dimension_numbers<[1], [0], [0], [1], [0, 0, 1, 1], [], []>} : vector<5x32xf32>, vector<32x32xf32>, vector<5x32xf32> -> vector<5x32xf32>
    %c0_71 = arith.constant 0 : index
    %c0_72 = arith.constant 0 : index
    %154 = vector.load %arg7[%c0_71, %c0_72] : memref<1x32xf32, #tpu.memory_space<vmem>>, vector<1x32xf32>
    %155 = vector.broadcast %154 : vector<1x32xf32> to vector<5x32xf32>
    %156 = arith.addf %153, %155 : vector<5x32xf32>
    %cst_73 = arith.constant 5.000000e-01 : f32
    %157 = vector.broadcast %cst_73 : f32 to vector<5x32xf32>
    %158 = arith.mulf %157, %156 : vector<5x32xf32>
    %cst_74 = arith.constant 0.707106769 : f32
    %159 = vector.broadcast %cst_74 : f32 to vector<5x32xf32>
    %160 = arith.mulf %156, %159 : vector<5x32xf32>
    %161 = math.erf %160 : vector<5x32xf32>
    %cst_75 = arith.constant 1.000000e+00 : f32
    %162 = vector.broadcast %cst_75 : f32 to vector<5x32xf32>
    %163 = arith.addf %162, %161 : vector<5x32xf32>
    %164 = arith.mulf %158, %163 : vector<5x32xf32>
    %165 = vector.extract_strided_slice %164 {offsets = [0, 0], sizes = [5, 16], strides = [1, 1]} : vector<5x32xf32> to vector<5x16xf32>
    %166 = vector.extract_strided_slice %164 {offsets = [0, 16], sizes = [5, 16], strides = [1, 1]} : vector<5x32xf32> to vector<5x16xf32>
    %cst_76 = arith.constant dense<0.000000e+00> : vector<1xf32>
    %167 = vector.multi_reduction <add>, %127, %cst_76 [0] : vector<5x1xf32> to vector<1xf32>
    %168 = vector.shape_cast %167 : vector<1xf32> to vector<1x1xf32>
    %169 = vector.broadcast %127 : vector<5x1xf32> to vector<5x16xf32>
    %170 = arith.mulf %166, %169 : vector<5x16xf32>
    %cst_77 = arith.constant dense<0.000000e+00> : vector<16xf32>
    %171 = vector.multi_reduction <add>, %170, %cst_77 [0] : vector<5x16xf32> to vector<16xf32>
    %172 = vector.shape_cast %171 : vector<16xf32> to vector<1x16xf32>
    %173 = vector.broadcast %168 : vector<1x1xf32> to vector<1x16xf32>
    %174 = arith.divf %172, %173 : vector<1x16xf32>
    %175 = vector.shape_cast %174 : vector<1x16xf32> to vector<1x16xf32>
    %176 = vector.broadcast %175 : vector<1x16xf32> to vector<5x16xf32>
    %177 = vector.shape_cast %1 : vector<1x16xf32> to vector<1x16xf32>
    %178 = vector.broadcast %177 : vector<1x16xf32> to vector<5x16xf32>
    %179 = tpu.concatenate %165, %176, %178 in 1 : vector<5x16xf32>, vector<5x16xf32>, vector<5x16xf32> -> vector<5x48xf32>
    %c0_78 = arith.constant 0 : index
    %c0_79 = arith.constant 0 : index
    %180 = vector.load %arg8[%c0_78, %c0_79] : memref<48x16xf32, #tpu.memory_space<vmem>>, vector<48x16xf32>
    %cst_80 = arith.constant dense<0.000000e+00> : vector<5x16xf32>
    %181 = tpu.matmul %179, %180, %cst_80 {dimension_numbers = #tpu.dot_dimension_numbers<[1], [0], [0], [1], [0, 0, 1, 1], [], []>} : vector<5x48xf32>, vector<48x16xf32>, vector<5x16xf32> -> vector<5x16xf32>
    %c0_81 = arith.constant 0 : index
    %c0_82 = arith.constant 0 : index
    %182 = vector.load %arg9[%c0_81, %c0_82] : memref<1x16xf32, #tpu.memory_space<vmem>>, vector<1x16xf32>
    %183 = vector.broadcast %182 : vector<1x16xf32> to vector<5x16xf32>
    %184 = arith.addf %181, %183 : vector<5x16xf32>
    %cst_83 = arith.constant 5.000000e-01 : f32
    %185 = vector.broadcast %cst_83 : f32 to vector<5x16xf32>
    %186 = arith.mulf %185, %184 : vector<5x16xf32>
    %cst_84 = arith.constant 0.707106769 : f32
    %187 = vector.broadcast %cst_84 : f32 to vector<5x16xf32>
    %188 = arith.mulf %184, %187 : vector<5x16xf32>
    %189 = math.erf %188 : vector<5x16xf32>
    %cst_85 = arith.constant 1.000000e+00 : f32
    %190 = vector.broadcast %cst_85 : f32 to vector<5x16xf32>
    %191 = arith.addf %190, %189 : vector<5x16xf32>
    %192 = arith.mulf %186, %191 : vector<5x16xf32>
    %c0_86 = arith.constant 0 : index
    %c0_87 = arith.constant 0 : index
    %193 = vector.load %arg10[%c0_86, %c0_87] : memref<16x8xf32, #tpu.memory_space<vmem>>, vector<16x8xf32>
    %cst_88 = arith.constant dense<0.000000e+00> : vector<5x8xf32>
    %194 = tpu.matmul %192, %193, %cst_88 {dimension_numbers = #tpu.dot_dimension_numbers<[1], [0], [0], [1], [0, 0, 1, 1], [], []>} : vector<5x16xf32>, vector<16x8xf32>, vector<5x8xf32> -> vector<5x8xf32>
    %c0_89 = arith.constant 0 : index
    %c0_90 = arith.constant 0 : index
    %195 = vector.load %arg11[%c0_89, %c0_90] : memref<1x8xf32, #tpu.memory_space<vmem>>, vector<1x8xf32>
    %196 = vector.broadcast %195 : vector<1x8xf32> to vector<5x8xf32>
    %197 = arith.addf %194, %196 : vector<5x8xf32>
    %cst_91 = arith.constant 5.000000e-01 : f32
    %198 = vector.broadcast %cst_91 : f32 to vector<5x8xf32>
    %199 = arith.mulf %198, %197 : vector<5x8xf32>
    %cst_92 = arith.constant 0.707106769 : f32
    %200 = vector.broadcast %cst_92 : f32 to vector<5x8xf32>
    %201 = arith.mulf %197, %200 : vector<5x8xf32>
    %202 = math.erf %201 : vector<5x8xf32>
    %cst_93 = arith.constant 1.000000e+00 : f32
    %203 = vector.broadcast %cst_93 : f32 to vector<5x8xf32>
    %204 = arith.addf %203, %202 : vector<5x8xf32>
    %205 = arith.mulf %199, %204 : vector<5x8xf32>
    %c0_94 = arith.constant 0 : index
    %c0_95 = arith.constant 0 : index
    %206 = vector.load %arg12[%c0_94, %c0_95] : memref<8x2xf32, #tpu.memory_space<vmem>>, vector<8x2xf32>
    %cst_96 = arith.constant dense<0.000000e+00> : vector<5x2xf32>
    %207 = tpu.matmul %205, %206, %cst_96 {dimension_numbers = #tpu.dot_dimension_numbers<[1], [0], [0], [1], [0, 0, 1, 1], [], []>} : vector<5x8xf32>, vector<8x2xf32>, vector<5x2xf32> -> vector<5x2xf32>
    %c0_97 = arith.constant 0 : index
    %c0_98 = arith.constant 0 : index
    %208 = vector.load %arg13[%c0_97, %c0_98] : memref<1x2xf32, #tpu.memory_space<vmem>>, vector<1x2xf32>
    %209 = vector.broadcast %208 : vector<1x2xf32> to vector<5x2xf32>
    %210 = arith.addf %207, %209 : vector<5x2xf32>
    %cst_99 = arith.constant dense<0xFF800000> : vector<5xf32>
    %211 = vector.multi_reduction <maximumf>, %210, %cst_99 [1] : vector<5x2xf32> to vector<5xf32>
    %212 = vector.shape_cast %211 : vector<5xf32> to vector<5x1xf32>
    %213 = vector.broadcast %212 : vector<5x1xf32> to vector<5x2xf32>
    %214 = arith.subf %210, %213 : vector<5x2xf32>
    %215 = math.exp %214 : vector<5x2xf32>
    %cst_100 = arith.constant dense<0.000000e+00> : vector<5xf32>
    %216 = vector.multi_reduction <add>, %215, %cst_100 [1] : vector<5x2xf32> to vector<5xf32>
    %217 = vector.shape_cast %216 : vector<5xf32> to vector<5x1xf32>
    %218 = math.log %217 : vector<5x1xf32>
    %219 = vector.broadcast %212 : vector<5x1xf32> to vector<5x2xf32>
    %220 = arith.subf %210, %219 : vector<5x2xf32>
    %221 = vector.broadcast %218 : vector<5x1xf32> to vector<5x2xf32>
    %222 = arith.subf %220, %221 : vector<5x2xf32>
    %c1_101 = arith.constant 1 : index
    %c0_102 = arith.constant 0 : index
    %c0_103 = arith.constant 0 : index
    %223 = vector.load %arg3[%c1_101, %c0_102, %c0_103] : memref<2x5x2xf32, #tpu.memory_space<vmem>>, vector<1x5x2xf32>
    %224 = vector.shape_cast %223 : vector<1x5x2xf32> to vector<5x2xf32>
    %225 = arith.addf %222, %224 : vector<5x2xf32>
    %226 = vector.extract_strided_slice %225 {offsets = [0, 0], sizes = [5, 1], strides = [1, 1]} : vector<5x2xf32> to vector<5x1xf32>
    %227 = vector.extract_strided_slice %225 {offsets = [0, 1], sizes = [5, 1], strides = [1, 1]} : vector<5x2xf32> to vector<5x1xf32>
    %228 = arith.cmpf oge, %226, %227 : vector<5x1xf32>
    %229 = arith.extui %228 : vector<5x1xi1> to vector<5x1xi32>
    %230 = arith.sitofp %229 : vector<5x1xi32> to vector<5x1xf32>
    %231 = arith.mulf %230, %127 : vector<5x1xf32>
    %c1_104 = arith.constant 1 : index
    %c0_105 = arith.constant 0 : index
    %c0_106 = arith.constant 0 : index
    %232 = vector.load %arg30[%c1_104, %c0_105, %c0_106] : memref<2x5x1xf32, #tpu.memory_space<vmem>>, vector<1x5x1xf32>
    %233 = vector.shape_cast %232 : vector<1x5x1xf32> to vector<5x1xf32>
    %234 = vector.shape_cast %231 : vector<5x1xf32> to vector<1x5x1xf32>
    tpu.vector_store %arg30[%c1_104, %c0_105, %c0_106], %234 {strides = array<i32>} : memref<2x5x1xf32, #tpu.memory_space<vmem>>, vector<1x5x1xf32>,
    %cst_107 = arith.constant 1.000000e+00 : f32
    %235 = vector.broadcast %cst_107 : f32 to vector<1x1xf32>
    %236 = tpu.concatenate %235, %231 in 0 : vector<1x1xf32>, vector<5x1xf32> -> vector<6x1xf32>
    %cst_108 = arith.constant 1.000000e+00 : f32
    %237 = vector.broadcast %cst_108 : f32 to vector<6x1xf32>
    %cst_109 = arith.constant dense<0.000000e+00> : vector<6x6xf32>
    %238 = tpu.matmul %237, %236, %cst_109 {dimension_numbers = #tpu.dot_dimension_numbers<[1], [1], [0], [0], [0, 0, 1, 0], [], []>} : vector<6x1xf32>, vector<6x1xf32>, vector<6x6xf32> -> vector<6x6xf32>
    %239 = tpu.iota {dimensions = array<i32: 0>} : vector<6x6xi32>
    %240 = tpu.iota {dimensions = array<i32: 1>} : vector<6x6xi32>
    %241 = arith.cmpi eq, %239, %240 : vector<6x6xi32>
    %242 = arith.extui %241 : vector<6x6xi1> to vector<6x6xi32>
    %243 = arith.sitofp %242 : vector<6x6xi32> to vector<6x6xf32>
    %cst_110 = arith.constant 1.000000e+00 : f32
    %244 = vector.broadcast %cst_110 : f32 to vector<6x6xf32>
    %245 = arith.subf %244, %238 : vector<6x6xf32>
    %246 = arith.mulf %245, %243 : vector<6x6xf32>
    %247 = arith.addf %238, %246 : vector<6x6xf32>
    %c0_111 = arith.constant 0 : index
    %c0_112 = arith.constant 0 : index
    %248 = vector.load %arg14[%c0_111, %c0_112] : memref<1x32xf32, #tpu.memory_space<vmem>>, vector<1x32xf32>
    %c0_113 = arith.constant 0 : index
    %c0_114 = arith.constant 0 : index
    %249 = vector.load %arg15[%c0_113, %c0_114] : memref<1x32xf32, #tpu.memory_space<vmem>>, vector<1x32xf32>
    %c0_115 = arith.constant 0 : index
    %c0_116 = arith.constant 0 : index
    %c0_117 = arith.constant 0 : index
    %250 = vector.load %arg16[%c0_115, %c0_116, %c0_117] : memref<4x32x8xf32, #tpu.memory_space<vmem>>, vector<4x32x8xf32>
    %c0_118 = arith.constant 0 : index
    %c0_119 = arith.constant 0 : index
    %c0_120 = arith.constant 0 : index
    %251 = vector.load %arg17[%c0_118, %c0_119, %c0_120] : memref<4x32x8xf32, #tpu.memory_space<vmem>>, vector<4x32x8xf32>
    %c0_121 = arith.constant 0 : index
    %c0_122 = arith.constant 0 : index
    %c0_123 = arith.constant 0 : index
    %252 = vector.load %arg18[%c0_121, %c0_122, %c0_123] : memref<4x32x8xf32, #tpu.memory_space<vmem>>, vector<4x32x8xf32>
    %c0_124 = arith.constant 0 : index
    %c0_125 = arith.constant 0 : index
    %c0_126 = arith.constant 0 : index
    %253 = vector.load %arg19[%c0_124, %c0_125, %c0_126] : memref<4x8x32xf32, #tpu.memory_space<vmem>>, vector<4x8x32xf32>
    %c0_127 = arith.constant 0 : index
    %c0_128 = arith.constant 0 : index
    %254 = vector.load %arg20[%c0_127, %c0_128] : memref<1x32xf32, #tpu.memory_space<vmem>>, vector<1x32xf32>
    %c0_129 = arith.constant 0 : index
    %c0_130 = arith.constant 0 : index
    %255 = vector.load %arg21[%c0_129, %c0_130] : memref<1x32xf32, #tpu.memory_space<vmem>>, vector<1x32xf32>
    %c0_131 = arith.constant 0 : index
    %c0_132 = arith.constant 0 : index
    %256 = vector.load %arg22[%c0_131, %c0_132] : memref<1x32xf32, #tpu.memory_space<vmem>>, vector<1x32xf32>
    %c0_133 = arith.constant 0 : index
    %c0_134 = arith.constant 0 : index
    %257 = vector.load %arg23[%c0_133, %c0_134] : memref<32x128xf32, #tpu.memory_space<vmem>>, vector<32x128xf32>
    %c0_135 = arith.constant 0 : index
    %c0_136 = arith.constant 0 : index
    %258 = vector.load %arg24[%c0_135, %c0_136] : memref<1x128xf32, #tpu.memory_space<vmem>>, vector<1x128xf32>
    %c0_137 = arith.constant 0 : index
    %c0_138 = arith.constant 0 : index
    %259 = vector.load %arg25[%c0_137, %c0_138] : memref<128x32xf32, #tpu.memory_space<vmem>>, vector<128x32xf32>
    %c0_139 = arith.constant 0 : index
    %c0_140 = arith.constant 0 : index
    %260 = vector.load %arg26[%c0_139, %c0_140] : memref<1x32xf32, #tpu.memory_space<vmem>>, vector<1x32xf32>
    %cst_141 = arith.constant dense<0.000000e+00> : vector<12xf32>
    %261 = vector.multi_reduction <add>, %0, %cst_141 [1] : vector<12x32xf32> to vector<12xf32>
    %262 = vector.shape_cast %261 : vector<12xf32> to vector<12x1xf32>
    %cst_142 = arith.constant 3.200000e+01 : f32
    %263 = vector.broadcast %cst_142 : f32 to vector<12x1xf32>
    %264 = arith.divf %262, %263 : vector<12x1xf32>
    %265 = vector.broadcast %264 : vector<12x1xf32> to vector<12x32xf32>
    %266 = arith.subf %0, %265 : vector<12x32xf32>
    %267 = arith.mulf %266, %266 : vector<12x32xf32>
    %cst_143 = arith.constant dense<0.000000e+00> : vector<12xf32>
    %268 = vector.multi_reduction <add>, %267, %cst_143 [1] : vector<12x32xf32> to vector<12xf32>
    %269 = vector.shape_cast %268 : vector<12xf32> to vector<12x1xf32>
    %cst_144 = arith.constant 3.200000e+01 : f32
    %270 = vector.broadcast %cst_144 : f32 to vector<12x1xf32>
    %271 = arith.divf %269, %270 : vector<12x1xf32>
    %272 = vector.broadcast %264 : vector<12x1xf32> to vector<12x32xf32>
    %273 = arith.subf %0, %272 : vector<12x32xf32>
    %cst_145 = arith.constant 9.99999974E-6 : f32
    %274 = vector.broadcast %cst_145 : f32 to vector<12x1xf32>
    %275 = arith.addf %271, %274 : vector<12x1xf32>
    %276 = math.rsqrt %275 : vector<12x1xf32>
    %277 = vector.broadcast %276 : vector<12x1xf32> to vector<12x32xf32>
    %278 = arith.mulf %273, %277 : vector<12x32xf32>
    %279 = vector.broadcast %248 : vector<1x32xf32> to vector<12x32xf32>
    %280 = arith.mulf %278, %279 : vector<12x32xf32>
    %281 = vector.broadcast %249 : vector<1x32xf32> to vector<12x32xf32>
    %282 = arith.addf %280, %281 : vector<12x32xf32>
    %cst_146 = arith.constant 0.000000e+00 : f32
    %283 = vector.broadcast %cst_146 : f32 to vector<6x32xf32>
    %cst_147 = arith.constant 0.000000e+00 : f32
    %284 = vector.broadcast %cst_147 : f32 to vector<6x32xf32>
    %285 = vector.extract_strided_slice %250 {offsets = [0, 0, 0], sizes = [1, 32, 8], strides = [1, 1, 1]} : vector<4x32x8xf32> to vector<1x32x8xf32>
    %286 = vector.shape_cast %285 : vector<1x32x8xf32> to vector<32x8xf32>
    %cst_148 = arith.constant dense<0.000000e+00> : vector<12x8xf32>
    %287 = tpu.matmul %282, %286, %cst_148 {dimension_numbers = #tpu.dot_dimension_numbers<[1], [0], [0], [1], [0, 0, 1, 1], [], []>} : vector<12x32xf32>, vector<32x8xf32>, vector<12x8xf32> -> vector<12x8xf32>
    %288 = vector.extract_strided_slice %251 {offsets = [0, 0, 0], sizes = [1, 32, 8], strides = [1, 1, 1]} : vector<4x32x8xf32> to vector<1x32x8xf32>
    %289 = vector.shape_cast %288 : vector<1x32x8xf32> to vector<32x8xf32>
    %cst_149 = arith.constant dense<0.000000e+00> : vector<12x8xf32>
    %290 = tpu.matmul %282, %289, %cst_149 {dimension_numbers = #tpu.dot_dimension_numbers<[1], [0], [0], [1], [0, 0, 1, 1], [], []>} : vector<12x32xf32>, vector<32x8xf32>, vector<12x8xf32> -> vector<12x8xf32>
    %291 = vector.extract_strided_slice %252 {offsets = [0, 0, 0], sizes = [1, 32, 8], strides = [1, 1, 1]} : vector<4x32x8xf32> to vector<1x32x8xf32>
    %292 = vector.shape_cast %291 : vector<1x32x8xf32> to vector<32x8xf32>
    %cst_150 = arith.constant dense<0.000000e+00> : vector<12x8xf32>
    %293 = tpu.matmul %282, %292, %cst_150 {dimension_numbers = #tpu.dot_dimension_numbers<[1], [0], [0], [1], [0, 0, 1, 1], [], []>} : vector<12x32xf32>, vector<32x8xf32>, vector<12x8xf32> -> vector<12x8xf32>
    %294 = vector.extract_strided_slice %287 {offsets = [0, 0], sizes = [6, 8], strides = [1, 1]} : vector<12x8xf32> to vector<6x8xf32>
    %295 = vector.extract_strided_slice %290 {offsets = [0, 0], sizes = [6, 8], strides = [1, 1]} : vector<12x8xf32> to vector<6x8xf32>
    %296 = vector.extract_strided_slice %293 {offsets = [0, 0], sizes = [6, 8], strides = [1, 1]} : vector<12x8xf32> to vector<6x8xf32>
    %cst_151 = arith.constant dense<0.000000e+00> : vector<6x6xf32>
    %297 = tpu.matmul %294, %295, %cst_151 {dimension_numbers = #tpu.dot_dimension_numbers<[1], [1], [0], [0], [0, 0, 1, 0], [], []>} : vector<6x8xf32>, vector<6x8xf32>, vector<6x6xf32> -> vector<6x6xf32>
    %cst_152 = arith.constant dense<0xFF800000> : vector<6xf32>
    %298 = vector.multi_reduction <maximumf>, %297, %cst_152 [1] : vector<6x6xf32> to vector<6xf32>
    %299 = vector.shape_cast %298 : vector<6xf32> to vector<6x1xf32>
    %300 = vector.broadcast %299 : vector<6x1xf32> to vector<6x6xf32>
    %301 = arith.subf %297, %300 : vector<6x6xf32>
    %302 = math.exp %301 : vector<6x6xf32>
    %303 = arith.mulf %302, %124 : vector<6x6xf32>
    %cst_153 = arith.constant 1.66666666E-7 : f32
    %304 = vector.broadcast %cst_153 : f32 to vector<6x6xf32>
    %305 = arith.addf %303, %304 : vector<6x6xf32>
    %cst_154 = arith.constant dense<0.000000e+00> : vector<6xf32>
    %306 = vector.multi_reduction <add>, %303, %cst_154 [1] : vector<6x6xf32> to vector<6xf32>
    %307 = vector.shape_cast %306 : vector<6xf32> to vector<6x1xf32>
    %cst_155 = arith.constant 9.99999997E-7 : f32
    %308 = vector.broadcast %cst_155 : f32 to vector<6x1xf32>
    %309 = arith.addf %307, %308 : vector<6x1xf32>
    %310 = vector.broadcast %309 : vector<6x1xf32> to vector<6x6xf32>
    %311 = arith.divf %305, %310 : vector<6x6xf32>
    %cst_156 = arith.constant dense<0.000000e+00> : vector<6x8xf32>
    %312 = tpu.matmul %311, %296, %cst_156 {dimension_numbers = #tpu.dot_dimension_numbers<[1], [0], [0], [1], [0, 0, 1, 1], [], []>} : vector<6x6xf32>, vector<6x8xf32>, vector<6x8xf32> -> vector<6x8xf32>
    %313 = vector.extract_strided_slice %253 {offsets = [0, 0, 0], sizes = [1, 8, 32], strides = [1, 1, 1]} : vector<4x8x32xf32> to vector<1x8x32xf32>
    %314 = vector.shape_cast %313 : vector<1x8x32xf32> to vector<8x32xf32>
    %cst_157 = arith.constant dense<0.000000e+00> : vector<6x32xf32>
    %315 = tpu.matmul %312, %314, %cst_157 {dimension_numbers = #tpu.dot_dimension_numbers<[1], [0], [0], [1], [0, 0, 1, 1], [], []>} : vector<6x8xf32>, vector<8x32xf32>, vector<6x32xf32> -> vector<6x32xf32>
    %316 = arith.addf %283, %315 : vector<6x32xf32>
    %317 = vector.extract_strided_slice %287 {offsets = [6, 0], sizes = [6, 8], strides = [1, 1]} : vector<12x8xf32> to vector<6x8xf32>
    %318 = vector.extract_strided_slice %290 {offsets = [6, 0], sizes = [6, 8], strides = [1, 1]} : vector<12x8xf32> to vector<6x8xf32>
    %319 = vector.extract_strided_slice %293 {offsets = [6, 0], sizes = [6, 8], strides = [1, 1]} : vector<12x8xf32> to vector<6x8xf32>
    %cst_158 = arith.constant dense<0.000000e+00> : vector<6x6xf32>
    %320 = tpu.matmul %317, %318, %cst_158 {dimension_numbers = #tpu.dot_dimension_numbers<[1], [1], [0], [0], [0, 0, 1, 0], [], []>} : vector<6x8xf32>, vector<6x8xf32>, vector<6x6xf32> -> vector<6x6xf32>
    %cst_159 = arith.constant dense<0xFF800000> : vector<6xf32>
    %321 = vector.multi_reduction <maximumf>, %320, %cst_159 [1] : vector<6x6xf32> to vector<6xf32>
    %322 = vector.shape_cast %321 : vector<6xf32> to vector<6x1xf32>
    %323 = vector.broadcast %322 : vector<6x1xf32> to vector<6x6xf32>
    %324 = arith.subf %320, %323 : vector<6x6xf32>
    %325 = math.exp %324 : vector<6x6xf32>
    %326 = arith.mulf %325, %247 : vector<6x6xf32>
    %cst_160 = arith.constant 1.66666666E-7 : f32
    %327 = vector.broadcast %cst_160 : f32 to vector<6x6xf32>
    %328 = arith.addf %326, %327 : vector<6x6xf32>
    %cst_161 = arith.constant dense<0.000000e+00> : vector<6xf32>
    %329 = vector.multi_reduction <add>, %326, %cst_161 [1] : vector<6x6xf32> to vector<6xf32>
    %330 = vector.shape_cast %329 : vector<6xf32> to vector<6x1xf32>
    %cst_162 = arith.constant 9.99999997E-7 : f32
    %331 = vector.broadcast %cst_162 : f32 to vector<6x1xf32>
    %332 = arith.addf %330, %331 : vector<6x1xf32>
    %333 = vector.broadcast %332 : vector<6x1xf32> to vector<6x6xf32>
    %334 = arith.divf %328, %333 : vector<6x6xf32>
    %cst_163 = arith.constant dense<0.000000e+00> : vector<6x8xf32>
    %335 = tpu.matmul %334, %319, %cst_163 {dimension_numbers = #tpu.dot_dimension_numbers<[1], [0], [0], [1], [0, 0, 1, 1], [], []>} : vector<6x6xf32>, vector<6x8xf32>, vector<6x8xf32> -> vector<6x8xf32>
    %336 = vector.extract_strided_slice %253 {offsets = [0, 0, 0], sizes = [1, 8, 32], strides = [1, 1, 1]} : vector<4x8x32xf32> to vector<1x8x32xf32>
    %337 = vector.shape_cast %336 : vector<1x8x32xf32> to vector<8x32xf32>
    %cst_164 = arith.constant dense<0.000000e+00> : vector<6x32xf32>
    %338 = tpu.matmul %335, %337, %cst_164 {dimension_numbers = #tpu.dot_dimension_numbers<[1], [0], [0], [1], [0, 0, 1, 1], [], []>} : vector<6x8xf32>, vector<8x32xf32>, vector<6x32xf32> -> vector<6x32xf32>
    %339 = arith.addf %284, %338 : vector<6x32xf32>
    %340 = vector.extract_strided_slice %250 {offsets = [1, 0, 0], sizes = [1, 32, 8], strides = [1, 1, 1]} : vector<4x32x8xf32> to vector<1x32x8xf32>
    %341 = vector.shape_cast %340 : vector<1x32x8xf32> to vector<32x8xf32>
    %cst_165 = arith.constant dense<0.000000e+00> : vector<12x8xf32>
    %342 = tpu.matmul %282, %341, %cst_165 {dimension_numbers = #tpu.dot_dimension_numbers<[1], [0], [0], [1], [0, 0, 1, 1], [], []>} : vector<12x32xf32>, vector<32x8xf32>, vector<12x8xf32> -> vector<12x8xf32>
    %343 = vector.extract_strided_slice %251 {offsets = [1, 0, 0], sizes = [1, 32, 8], strides = [1, 1, 1]} : vector<4x32x8xf32> to vector<1x32x8xf32>
    %344 = vector.shape_cast %343 : vector<1x32x8xf32> to vector<32x8xf32>
    %cst_166 = arith.constant dense<0.000000e+00> : vector<12x8xf32>
    %345 = tpu.matmul %282, %344, %cst_166 {dimension_numbers = #tpu.dot_dimension_numbers<[1], [0], [0], [1], [0, 0, 1, 1], [], []>} : vector<12x32xf32>, vector<32x8xf32>, vector<12x8xf32> -> vector<12x8xf32>
    %346 = vector.extract_strided_slice %252 {offsets = [1, 0, 0], sizes = [1, 32, 8], strides = [1, 1, 1]} : vector<4x32x8xf32> to vector<1x32x8xf32>
    %347 = vector.shape_cast %346 : vector<1x32x8xf32> to vector<32x8xf32>
    %cst_167 = arith.constant dense<0.000000e+00> : vector<12x8xf32>
    %348 = tpu.matmul %282, %347, %cst_167 {dimension_numbers = #tpu.dot_dimension_numbers<[1], [0], [0], [1], [0, 0, 1, 1], [], []>} : vector<12x32xf32>, vector<32x8xf32>, vector<12x8xf32> -> vector<12x8xf32>
    %349 = vector.extract_strided_slice %342 {offsets = [0, 0], sizes = [6, 8], strides = [1, 1]} : vector<12x8xf32> to vector<6x8xf32>
    %350 = vector.extract_strided_slice %345 {offsets = [0, 0], sizes = [6, 8], strides = [1, 1]} : vector<12x8xf32> to vector<6x8xf32>
    %351 = vector.extract_strided_slice %348 {offsets = [0, 0], sizes = [6, 8], strides = [1, 1]} : vector<12x8xf32> to vector<6x8xf32>
    %cst_168 = arith.constant dense<0.000000e+00> : vector<6x6xf32>
    %352 = tpu.matmul %349, %350, %cst_168 {dimension_numbers = #tpu.dot_dimension_numbers<[1], [1], [0], [0], [0, 0, 1, 0], [], []>} : vector<6x8xf32>, vector<6x8xf32>, vector<6x6xf32> -> vector<6x6xf32>
    %cst_169 = arith.constant dense<0xFF800000> : vector<6xf32>
    %353 = vector.multi_reduction <maximumf>, %352, %cst_169 [1] : vector<6x6xf32> to vector<6xf32>
    %354 = vector.shape_cast %353 : vector<6xf32> to vector<6x1xf32>
    %355 = vector.broadcast %354 : vector<6x1xf32> to vector<6x6xf32>
    %356 = arith.subf %352, %355 : vector<6x6xf32>
    %357 = math.exp %356 : vector<6x6xf32>
    %358 = arith.mulf %357, %124 : vector<6x6xf32>
    %cst_170 = arith.constant 1.66666666E-7 : f32
    %359 = vector.broadcast %cst_170 : f32 to vector<6x6xf32>
    %360 = arith.addf %358, %359 : vector<6x6xf32>
    %cst_171 = arith.constant dense<0.000000e+00> : vector<6xf32>
    %361 = vector.multi_reduction <add>, %358, %cst_171 [1] : vector<6x6xf32> to vector<6xf32>
    %362 = vector.shape_cast %361 : vector<6xf32> to vector<6x1xf32>
    %cst_172 = arith.constant 9.99999997E-7 : f32
    %363 = vector.broadcast %cst_172 : f32 to vector<6x1xf32>
    %364 = arith.addf %362, %363 : vector<6x1xf32>
    %365 = vector.broadcast %364 : vector<6x1xf32> to vector<6x6xf32>
    %366 = arith.divf %360, %365 : vector<6x6xf32>
    %cst_173 = arith.constant dense<0.000000e+00> : vector<6x8xf32>
    %367 = tpu.matmul %366, %351, %cst_173 {dimension_numbers = #tpu.dot_dimension_numbers<[1], [0], [0], [1], [0, 0, 1, 1], [], []>} : vector<6x6xf32>, vector<6x8xf32>, vector<6x8xf32> -> vector<6x8xf32>
    %368 = vector.extract_strided_slice %253 {offsets = [1, 0, 0], sizes = [1, 8, 32], strides = [1, 1, 1]} : vector<4x8x32xf32> to vector<1x8x32xf32>
    %369 = vector.shape_cast %368 : vector<1x8x32xf32> to vector<8x32xf32>
    %cst_174 = arith.constant dense<0.000000e+00> : vector<6x32xf32>
    %370 = tpu.matmul %367, %369, %cst_174 {dimension_numbers = #tpu.dot_dimension_numbers<[1], [0], [0], [1], [0, 0, 1, 1], [], []>} : vector<6x8xf32>, vector<8x32xf32>, vector<6x32xf32> -> vector<6x32xf32>
    %371 = arith.addf %316, %370 : vector<6x32xf32>
    %372 = vector.extract_strided_slice %342 {offsets = [6, 0], sizes = [6, 8], strides = [1, 1]} : vector<12x8xf32> to vector<6x8xf32>
    %373 = vector.extract_strided_slice %345 {offsets = [6, 0], sizes = [6, 8], strides = [1, 1]} : vector<12x8xf32> to vector<6x8xf32>
    %374 = vector.extract_strided_slice %348 {offsets = [6, 0], sizes = [6, 8], strides = [1, 1]} : vector<12x8xf32> to vector<6x8xf32>
    %cst_175 = arith.constant dense<0.000000e+00> : vector<6x6xf32>
    %375 = tpu.matmul %372, %373, %cst_175 {dimension_numbers = #tpu.dot_dimension_numbers<[1], [1], [0], [0], [0, 0, 1, 0], [], []>} : vector<6x8xf32>, vector<6x8xf32>, vector<6x6xf32> -> vector<6x6xf32>
    %cst_176 = arith.constant dense<0xFF800000> : vector<6xf32>
    %376 = vector.multi_reduction <maximumf>, %375, %cst_176 [1] : vector<6x6xf32> to vector<6xf32>
    %377 = vector.shape_cast %376 : vector<6xf32> to vector<6x1xf32>
    %378 = vector.broadcast %377 : vector<6x1xf32> to vector<6x6xf32>
    %379 = arith.subf %375, %378 : vector<6x6xf32>
    %380 = math.exp %379 : vector<6x6xf32>
    %381 = arith.mulf %380, %247 : vector<6x6xf32>
    %cst_177 = arith.constant 1.66666666E-7 : f32
    %382 = vector.broadcast %cst_177 : f32 to vector<6x6xf32>
    %383 = arith.addf %381, %382 : vector<6x6xf32>
    %cst_178 = arith.constant dense<0.000000e+00> : vector<6xf32>
    %384 = vector.multi_reduction <add>, %381, %cst_178 [1] : vector<6x6xf32> to vector<6xf32>
    %385 = vector.shape_cast %384 : vector<6xf32> to vector<6x1xf32>
    %cst_179 = arith.constant 9.99999997E-7 : f32
    %386 = vector.broadcast %cst_179 : f32 to vector<6x1xf32>
    %387 = arith.addf %385, %386 : vector<6x1xf32>
    %388 = vector.broadcast %387 : vector<6x1xf32> to vector<6x6xf32>
    %389 = arith.divf %383, %388 : vector<6x6xf32>
    %cst_180 = arith.constant dense<0.000000e+00> : vector<6x8xf32>
    %390 = tpu.matmul %389, %374, %cst_180 {dimension_numbers = #tpu.dot_dimension_numbers<[1], [0], [0], [1], [0, 0, 1, 1], [], []>} : vector<6x6xf32>, vector<6x8xf32>, vector<6x8xf32> -> vector<6x8xf32>
    %391 = vector.extract_strided_slice %253 {offsets = [1, 0, 0], sizes = [1, 8, 32], strides = [1, 1, 1]} : vector<4x8x32xf32> to vector<1x8x32xf32>
    %392 = vector.shape_cast %391 : vector<1x8x32xf32> to vector<8x32xf32>
    %cst_181 = arith.constant dense<0.000000e+00> : vector<6x32xf32>
    %393 = tpu.matmul %390, %392, %cst_181 {dimension_numbers = #tpu.dot_dimension_numbers<[1], [0], [0], [1], [0, 0, 1, 1], [], []>} : vector<6x8xf32>, vector<8x32xf32>, vector<6x32xf32> -> vector<6x32xf32>
    %394 = arith.addf %339, %393 : vector<6x32xf32>
    %395 = vector.extract_strided_slice %250 {offsets = [2, 0, 0], sizes = [1, 32, 8], strides = [1, 1, 1]} : vector<4x32x8xf32> to vector<1x32x8xf32>
    %396 = vector.shape_cast %395 : vector<1x32x8xf32> to vector<32x8xf32>
    %cst_182 = arith.constant dense<0.000000e+00> : vector<12x8xf32>
    %397 = tpu.matmul %282, %396, %cst_182 {dimension_numbers = #tpu.dot_dimension_numbers<[1], [0], [0], [1], [0, 0, 1, 1], [], []>} : vector<12x32xf32>, vector<32x8xf32>, vector<12x8xf32> -> vector<12x8xf32>
    %398 = vector.extract_strided_slice %251 {offsets = [2, 0, 0], sizes = [1, 32, 8], strides = [1, 1, 1]} : vector<4x32x8xf32> to vector<1x32x8xf32>
    %399 = vector.shape_cast %398 : vector<1x32x8xf32> to vector<32x8xf32>
    %cst_183 = arith.constant dense<0.000000e+00> : vector<12x8xf32>
    %400 = tpu.matmul %282, %399, %cst_183 {dimension_numbers = #tpu.dot_dimension_numbers<[1], [0], [0], [1], [0, 0, 1, 1], [], []>} : vector<12x32xf32>, vector<32x8xf32>, vector<12x8xf32> -> vector<12x8xf32>
    %401 = vector.extract_strided_slice %252 {offsets = [2, 0, 0], sizes = [1, 32, 8], strides = [1, 1, 1]} : vector<4x32x8xf32> to vector<1x32x8xf32>
    %402 = vector.shape_cast %401 : vector<1x32x8xf32> to vector<32x8xf32>
    %cst_184 = arith.constant dense<0.000000e+00> : vector<12x8xf32>
    %403 = tpu.matmul %282, %402, %cst_184 {dimension_numbers = #tpu.dot_dimension_numbers<[1], [0], [0], [1], [0, 0, 1, 1], [], []>} : vector<12x32xf32>, vector<32x8xf32>, vector<12x8xf32> -> vector<12x8xf32>
    %404 = vector.extract_strided_slice %397 {offsets = [0, 0], sizes = [6, 8], strides = [1, 1]} : vector<12x8xf32> to vector<6x8xf32>
    %405 = vector.extract_strided_slice %400 {offsets = [0, 0], sizes = [6, 8], strides = [1, 1]} : vector<12x8xf32> to vector<6x8xf32>
    %406 = vector.extract_strided_slice %403 {offsets = [0, 0], sizes = [6, 8], strides = [1, 1]} : vector<12x8xf32> to vector<6x8xf32>
    %cst_185 = arith.constant dense<0.000000e+00> : vector<6x6xf32>
    %407 = tpu.matmul %404, %405, %cst_185 {dimension_numbers = #tpu.dot_dimension_numbers<[1], [1], [0], [0], [0, 0, 1, 0], [], []>} : vector<6x8xf32>, vector<6x8xf32>, vector<6x6xf32> -> vector<6x6xf32>
    %cst_186 = arith.constant dense<0xFF800000> : vector<6xf32>
    %408 = vector.multi_reduction <maximumf>, %407, %cst_186 [1] : vector<6x6xf32> to vector<6xf32>
    %409 = vector.shape_cast %408 : vector<6xf32> to vector<6x1xf32>
    %410 = vector.broadcast %409 : vector<6x1xf32> to vector<6x6xf32>
    %411 = arith.subf %407, %410 : vector<6x6xf32>
    %412 = math.exp %411 : vector<6x6xf32>
    %413 = arith.mulf %412, %124 : vector<6x6xf32>
    %cst_187 = arith.constant 1.66666666E-7 : f32
    %414 = vector.broadcast %cst_187 : f32 to vector<6x6xf32>
    %415 = arith.addf %413, %414 : vector<6x6xf32>
    %cst_188 = arith.constant dense<0.000000e+00> : vector<6xf32>
    %416 = vector.multi_reduction <add>, %413, %cst_188 [1] : vector<6x6xf32> to vector<6xf32>
    %417 = vector.shape_cast %416 : vector<6xf32> to vector<6x1xf32>
    %cst_189 = arith.constant 9.99999997E-7 : f32
    %418 = vector.broadcast %cst_189 : f32 to vector<6x1xf32>
    %419 = arith.addf %417, %418 : vector<6x1xf32>
    %420 = vector.broadcast %419 : vector<6x1xf32> to vector<6x6xf32>
    %421 = arith.divf %415, %420 : vector<6x6xf32>
    %cst_190 = arith.constant dense<0.000000e+00> : vector<6x8xf32>
    %422 = tpu.matmul %421, %406, %cst_190 {dimension_numbers = #tpu.dot_dimension_numbers<[1], [0], [0], [1], [0, 0, 1, 1], [], []>} : vector<6x6xf32>, vector<6x8xf32>, vector<6x8xf32> -> vector<6x8xf32>
    %423 = vector.extract_strided_slice %253 {offsets = [2, 0, 0], sizes = [1, 8, 32], strides = [1, 1, 1]} : vector<4x8x32xf32> to vector<1x8x32xf32>
    %424 = vector.shape_cast %423 : vector<1x8x32xf32> to vector<8x32xf32>
    %cst_191 = arith.constant dense<0.000000e+00> : vector<6x32xf32>
    %425 = tpu.matmul %422, %424, %cst_191 {dimension_numbers = #tpu.dot_dimension_numbers<[1], [0], [0], [1], [0, 0, 1, 1], [], []>} : vector<6x8xf32>, vector<8x32xf32>, vector<6x32xf32> -> vector<6x32xf32>
    %426 = arith.addf %371, %425 : vector<6x32xf32>
    %427 = vector.extract_strided_slice %397 {offsets = [6, 0], sizes = [6, 8], strides = [1, 1]} : vector<12x8xf32> to vector<6x8xf32>
    %428 = vector.extract_strided_slice %400 {offsets = [6, 0], sizes = [6, 8], strides = [1, 1]} : vector<12x8xf32> to vector<6x8xf32>
    %429 = vector.extract_strided_slice %403 {offsets = [6, 0], sizes = [6, 8], strides = [1, 1]} : vector<12x8xf32> to vector<6x8xf32>
    %cst_192 = arith.constant dense<0.000000e+00> : vector<6x6xf32>
    %430 = tpu.matmul %427, %428, %cst_192 {dimension_numbers = #tpu.dot_dimension_numbers<[1], [1], [0], [0], [0, 0, 1, 0], [], []>} : vector<6x8xf32>, vector<6x8xf32>, vector<6x6xf32> -> vector<6x6xf32>
    %cst_193 = arith.constant dense<0xFF800000> : vector<6xf32>
    %431 = vector.multi_reduction <maximumf>, %430, %cst_193 [1] : vector<6x6xf32> to vector<6xf32>
    %432 = vector.shape_cast %431 : vector<6xf32> to vector<6x1xf32>
    %433 = vector.broadcast %432 : vector<6x1xf32> to vector<6x6xf32>
    %434 = arith.subf %430, %433 : vector<6x6xf32>
    %435 = math.exp %434 : vector<6x6xf32>
    %436 = arith.mulf %435, %247 : vector<6x6xf32>
    %cst_194 = arith.constant 1.66666666E-7 : f32
    %437 = vector.broadcast %cst_194 : f32 to vector<6x6xf32>
    %438 = arith.addf %436, %437 : vector<6x6xf32>
    %cst_195 = arith.constant dense<0.000000e+00> : vector<6xf32>
    %439 = vector.multi_reduction <add>, %436, %cst_195 [1] : vector<6x6xf32> to vector<6xf32>
    %440 = vector.shape_cast %439 : vector<6xf32> to vector<6x1xf32>
    %cst_196 = arith.constant 9.99999997E-7 : f32
    %441 = vector.broadcast %cst_196 : f32 to vector<6x1xf32>
    %442 = arith.addf %440, %441 : vector<6x1xf32>
    %443 = vector.broadcast %442 : vector<6x1xf32> to vector<6x6xf32>
    %444 = arith.divf %438, %443 : vector<6x6xf32>
    %cst_197 = arith.constant dense<0.000000e+00> : vector<6x8xf32>
    %445 = tpu.matmul %444, %429, %cst_197 {dimension_numbers = #tpu.dot_dimension_numbers<[1], [0], [0], [1], [0, 0, 1, 1], [], []>} : vector<6x6xf32>, vector<6x8xf32>, vector<6x8xf32> -> vector<6x8xf32>
    %446 = vector.extract_strided_slice %253 {offsets = [2, 0, 0], sizes = [1, 8, 32], strides = [1, 1, 1]} : vector<4x8x32xf32> to vector<1x8x32xf32>
    %447 = vector.shape_cast %446 : vector<1x8x32xf32> to vector<8x32xf32>
    %cst_198 = arith.constant dense<0.000000e+00> : vector<6x32xf32>
    %448 = tpu.matmul %445, %447, %cst_198 {dimension_numbers = #tpu.dot_dimension_numbers<[1], [0], [0], [1], [0, 0, 1, 1], [], []>} : vector<6x8xf32>, vector<8x32xf32>, vector<6x32xf32> -> vector<6x32xf32>
    %449 = arith.addf %394, %448 : vector<6x32xf32>
    %450 = vector.extract_strided_slice %250 {offsets = [3, 0, 0], sizes = [1, 32, 8], strides = [1, 1, 1]} : vector<4x32x8xf32> to vector<1x32x8xf32>
    %451 = vector.shape_cast %450 : vector<1x32x8xf32> to vector<32x8xf32>
    %cst_199 = arith.constant dense<0.000000e+00> : vector<12x8xf32>
    %452 = tpu.matmul %282, %451, %cst_199 {dimension_numbers = #tpu.dot_dimension_numbers<[1], [0], [0], [1], [0, 0, 1, 1], [], []>} : vector<12x32xf32>, vector<32x8xf32>, vector<12x8xf32> -> vector<12x8xf32>
    %453 = vector.extract_strided_slice %251 {offsets = [3, 0, 0], sizes = [1, 32, 8], strides = [1, 1, 1]} : vector<4x32x8xf32> to vector<1x32x8xf32>
    %454 = vector.shape_cast %453 : vector<1x32x8xf32> to vector<32x8xf32>
    %cst_200 = arith.constant dense<0.000000e+00> : vector<12x8xf32>
    %455 = tpu.matmul %282, %454, %cst_200 {dimension_numbers = #tpu.dot_dimension_numbers<[1], [0], [0], [1], [0, 0, 1, 1], [], []>} : vector<12x32xf32>, vector<32x8xf32>, vector<12x8xf32> -> vector<12x8xf32>
    %456 = vector.extract_strided_slice %252 {offsets = [3, 0, 0], sizes = [1, 32, 8], strides = [1, 1, 1]} : vector<4x32x8xf32> to vector<1x32x8xf32>
    %457 = vector.shape_cast %456 : vector<1x32x8xf32> to vector<32x8xf32>
    %cst_201 = arith.constant dense<0.000000e+00> : vector<12x8xf32>
    %458 = tpu.matmul %282, %457, %cst_201 {dimension_numbers = #tpu.dot_dimension_numbers<[1], [0], [0], [1], [0, 0, 1, 1], [], []>} : vector<12x32xf32>, vector<32x8xf32>, vector<12x8xf32> -> vector<12x8xf32>
    %459 = vector.extract_strided_slice %452 {offsets = [0, 0], sizes = [6, 8], strides = [1, 1]} : vector<12x8xf32> to vector<6x8xf32>
    %460 = vector.extract_strided_slice %455 {offsets = [0, 0], sizes = [6, 8], strides = [1, 1]} : vector<12x8xf32> to vector<6x8xf32>
    %461 = vector.extract_strided_slice %458 {offsets = [0, 0], sizes = [6, 8], strides = [1, 1]} : vector<12x8xf32> to vector<6x8xf32>
    %cst_202 = arith.constant dense<0.000000e+00> : vector<6x6xf32>
    %462 = tpu.matmul %459, %460, %cst_202 {dimension_numbers = #tpu.dot_dimension_numbers<[1], [1], [0], [0], [0, 0, 1, 0], [], []>} : vector<6x8xf32>, vector<6x8xf32>, vector<6x6xf32> -> vector<6x6xf32>
    %cst_203 = arith.constant dense<0xFF800000> : vector<6xf32>
    %463 = vector.multi_reduction <maximumf>, %462, %cst_203 [1] : vector<6x6xf32> to vector<6xf32>
    %464 = vector.shape_cast %463 : vector<6xf32> to vector<6x1xf32>
    %465 = vector.broadcast %464 : vector<6x1xf32> to vector<6x6xf32>
    %466 = arith.subf %462, %465 : vector<6x6xf32>
    %467 = math.exp %466 : vector<6x6xf32>
    %468 = arith.mulf %467, %124 : vector<6x6xf32>
    %cst_204 = arith.constant 1.66666666E-7 : f32
    %469 = vector.broadcast %cst_204 : f32 to vector<6x6xf32>
    %470 = arith.addf %468, %469 : vector<6x6xf32>
    %cst_205 = arith.constant dense<0.000000e+00> : vector<6xf32>
    %471 = vector.multi_reduction <add>, %468, %cst_205 [1] : vector<6x6xf32> to vector<6xf32>
    %472 = vector.shape_cast %471 : vector<6xf32> to vector<6x1xf32>
    %cst_206 = arith.constant 9.99999997E-7 : f32
    %473 = vector.broadcast %cst_206 : f32 to vector<6x1xf32>
    %474 = arith.addf %472, %473 : vector<6x1xf32>
    %475 = vector.broadcast %474 : vector<6x1xf32> to vector<6x6xf32>
    %476 = arith.divf %470, %475 : vector<6x6xf32>
    %cst_207 = arith.constant dense<0.000000e+00> : vector<6x8xf32>
    %477 = tpu.matmul %476, %461, %cst_207 {dimension_numbers = #tpu.dot_dimension_numbers<[1], [0], [0], [1], [0, 0, 1, 1], [], []>} : vector<6x6xf32>, vector<6x8xf32>, vector<6x8xf32> -> vector<6x8xf32>
    %478 = vector.extract_strided_slice %253 {offsets = [3, 0, 0], sizes = [1, 8, 32], strides = [1, 1, 1]} : vector<4x8x32xf32> to vector<1x8x32xf32>
    %479 = vector.shape_cast %478 : vector<1x8x32xf32> to vector<8x32xf32>
    %cst_208 = arith.constant dense<0.000000e+00> : vector<6x32xf32>
    %480 = tpu.matmul %477, %479, %cst_208 {dimension_numbers = #tpu.dot_dimension_numbers<[1], [0], [0], [1], [0, 0, 1, 1], [], []>} : vector<6x8xf32>, vector<8x32xf32>, vector<6x32xf32> -> vector<6x32xf32>
    %481 = arith.addf %426, %480 : vector<6x32xf32>
    %482 = vector.extract_strided_slice %452 {offsets = [6, 0], sizes = [6, 8], strides = [1, 1]} : vector<12x8xf32> to vector<6x8xf32>
    %483 = vector.extract_strided_slice %455 {offsets = [6, 0], sizes = [6, 8], strides = [1, 1]} : vector<12x8xf32> to vector<6x8xf32>
    %484 = vector.extract_strided_slice %458 {offsets = [6, 0], sizes = [6, 8], strides = [1, 1]} : vector<12x8xf32> to vector<6x8xf32>
    %cst_209 = arith.constant dense<0.000000e+00> : vector<6x6xf32>
    %485 = tpu.matmul %482, %483, %cst_209 {dimension_numbers = #tpu.dot_dimension_numbers<[1], [1], [0], [0], [0, 0, 1, 0], [], []>} : vector<6x8xf32>, vector<6x8xf32>, vector<6x6xf32> -> vector<6x6xf32>
    %cst_210 = arith.constant dense<0xFF800000> : vector<6xf32>
    %486 = vector.multi_reduction <maximumf>, %485, %cst_210 [1] : vector<6x6xf32> to vector<6xf32>
    %487 = vector.shape_cast %486 : vector<6xf32> to vector<6x1xf32>
    %488 = vector.broadcast %487 : vector<6x1xf32> to vector<6x6xf32>
    %489 = arith.subf %485, %488 : vector<6x6xf32>
    %490 = math.exp %489 : vector<6x6xf32>
    %491 = arith.mulf %490, %247 : vector<6x6xf32>
    %cst_211 = arith.constant 1.66666666E-7 : f32
    %492 = vector.broadcast %cst_211 : f32 to vector<6x6xf32>
    %493 = arith.addf %491, %492 : vector<6x6xf32>
    %cst_212 = arith.constant dense<0.000000e+00> : vector<6xf32>
    %494 = vector.multi_reduction <add>, %491, %cst_212 [1] : vector<6x6xf32> to vector<6xf32>
    %495 = vector.shape_cast %494 : vector<6xf32> to vector<6x1xf32>
    %cst_213 = arith.constant 9.99999997E-7 : f32
    %496 = vector.broadcast %cst_213 : f32 to vector<6x1xf32>
    %497 = arith.addf %495, %496 : vector<6x1xf32>
    %498 = vector.broadcast %497 : vector<6x1xf32> to vector<6x6xf32>
    %499 = arith.divf %493, %498 : vector<6x6xf32>
    %cst_214 = arith.constant dense<0.000000e+00> : vector<6x8xf32>
    %500 = tpu.matmul %499, %484, %cst_214 {dimension_numbers = #tpu.dot_dimension_numbers<[1], [0], [0], [1], [0, 0, 1, 1], [], []>} : vector<6x6xf32>, vector<6x8xf32>, vector<6x8xf32> -> vector<6x8xf32>
    %501 = vector.extract_strided_slice %253 {offsets = [3, 0, 0], sizes = [1, 8, 32], strides = [1, 1, 1]} : vector<4x8x32xf32> to vector<1x8x32xf32>
    %502 = vector.shape_cast %501 : vector<1x8x32xf32> to vector<8x32xf32>
    %cst_215 = arith.constant dense<0.000000e+00> : vector<6x32xf32>
    %503 = tpu.matmul %500, %502, %cst_215 {dimension_numbers = #tpu.dot_dimension_numbers<[1], [0], [0], [1], [0, 0, 1, 1], [], []>} : vector<6x8xf32>, vector<8x32xf32>, vector<6x32xf32> -> vector<6x32xf32>
    %504 = arith.addf %449, %503 : vector<6x32xf32>
    %505 = tpu.concatenate %481, %504 in 0 : vector<6x32xf32>, vector<6x32xf32> -> vector<12x32xf32>
    %506 = arith.addf %0, %505 : vector<12x32xf32>
    %507 = vector.broadcast %254 : vector<1x32xf32> to vector<12x32xf32>
    %508 = arith.addf %506, %507 : vector<12x32xf32>
    %cst_216 = arith.constant dense<0.000000e+00> : vector<12xf32>
    %509 = vector.multi_reduction <add>, %508, %cst_216 [1] : vector<12x32xf32> to vector<12xf32>
    %510 = vector.shape_cast %509 : vector<12xf32> to vector<12x1xf32>
    %cst_217 = arith.constant 3.200000e+01 : f32
    %511 = vector.broadcast %cst_217 : f32 to vector<12x1xf32>
    %512 = arith.divf %510, %511 : vector<12x1xf32>
    %513 = vector.broadcast %512 : vector<12x1xf32> to vector<12x32xf32>
    %514 = arith.subf %508, %513 : vector<12x32xf32>
    %515 = arith.mulf %514, %514 : vector<12x32xf32>
    %cst_218 = arith.constant dense<0.000000e+00> : vector<12xf32>
    %516 = vector.multi_reduction <add>, %515, %cst_218 [1] : vector<12x32xf32> to vector<12xf32>
    %517 = vector.shape_cast %516 : vector<12xf32> to vector<12x1xf32>
    %cst_219 = arith.constant 3.200000e+01 : f32
    %518 = vector.broadcast %cst_219 : f32 to vector<12x1xf32>
    %519 = arith.divf %517, %518 : vector<12x1xf32>
    %520 = vector.broadcast %512 : vector<12x1xf32> to vector<12x32xf32>
    %521 = arith.subf %508, %520 : vector<12x32xf32>
    %cst_220 = arith.constant 9.99999974E-6 : f32
    %522 = vector.broadcast %cst_220 : f32 to vector<12x1xf32>
    %523 = arith.addf %519, %522 : vector<12x1xf32>
    %524 = math.rsqrt %523 : vector<12x1xf32>
    %525 = vector.broadcast %524 : vector<12x1xf32> to vector<12x32xf32>
    %526 = arith.mulf %521, %525 : vector<12x32xf32>
    %527 = vector.broadcast %255 : vector<1x32xf32> to vector<12x32xf32>
    %528 = arith.mulf %526, %527 : vector<12x32xf32>
    %529 = vector.broadcast %256 : vector<1x32xf32> to vector<12x32xf32>
    %530 = arith.addf %528, %529 : vector<12x32xf32>
    %cst_221 = arith.constant dense<0.000000e+00> : vector<12x128xf32>
    %531 = tpu.matmul %530, %257, %cst_221 {dimension_numbers = #tpu.dot_dimension_numbers<[1], [0], [0], [1], [0, 0, 1, 1], [], []>} : vector<12x32xf32>, vector<32x128xf32>, vector<12x128xf32> -> vector<12x128xf32>
    %532 = vector.broadcast %258 : vector<1x128xf32> to vector<12x128xf32>
    %533 = arith.addf %531, %532 : vector<12x128xf32>
    %cst_222 = arith.constant 5.000000e-01 : f32
    %534 = vector.broadcast %cst_222 : f32 to vector<12x128xf32>
    %535 = arith.mulf %534, %533 : vector<12x128xf32>
    %cst_223 = arith.constant 0.707106769 : f32
    %536 = vector.broadcast %cst_223 : f32 to vector<12x128xf32>
    %537 = arith.mulf %533, %536 : vector<12x128xf32>
    %538 = math.erf %537 : vector<12x128xf32>
    %cst_224 = arith.constant 1.000000e+00 : f32
    %539 = vector.broadcast %cst_224 : f32 to vector<12x128xf32>
    %540 = arith.addf %539, %538 : vector<12x128xf32>
    %541 = arith.mulf %535, %540 : vector<12x128xf32>
    %cst_225 = arith.constant dense<0.000000e+00> : vector<12x32xf32>
    %542 = tpu.matmul %541, %259, %cst_225 {dimension_numbers = #tpu.dot_dimension_numbers<[1], [0], [0], [1], [0, 0, 1, 1], [], []>} : vector<12x128xf32>, vector<128x32xf32>, vector<12x32xf32> -> vector<12x32xf32>
    %543 = vector.broadcast %260 : vector<1x32xf32> to vector<12x32xf32>
    %544 = arith.addf %542, %543 : vector<12x32xf32>
    %545 = arith.addf %508, %544 : vector<12x32xf32>
    %c0_226 = arith.constant 0 : index
    %c0_227 = arith.constant 0 : index
    %546 = vector.load %arg27[%c0_226, %c0_227] : memref<1x32xf32, #tpu.memory_space<vmem>>, vector<1x32xf32>
    %c0_228 = arith.constant 0 : index
    %c0_229 = arith.constant 0 : index
    %547 = vector.load %arg28[%c0_228, %c0_229] : memref<1x32xf32, #tpu.memory_space<vmem>>, vector<1x32xf32>
    %cst_230 = arith.constant dense<0.000000e+00> : vector<12xf32>
    %548 = vector.multi_reduction <add>, %545, %cst_230 [1] : vector<12x32xf32> to vector<12xf32>
    %549 = vector.shape_cast %548 : vector<12xf32> to vector<12x1xf32>
    %cst_231 = arith.constant 3.200000e+01 : f32
    %550 = vector.broadcast %cst_231 : f32 to vector<12x1xf32>
    %551 = arith.divf %549, %550 : vector<12x1xf32>
    %552 = vector.broadcast %551 : vector<12x1xf32> to vector<12x32xf32>
    %553 = arith.subf %545, %552 : vector<12x32xf32>
    %554 = arith.mulf %553, %553 : vector<12x32xf32>
    %cst_232 = arith.constant dense<0.000000e+00> : vector<12xf32>
    %555 = vector.multi_reduction <add>, %554, %cst_232 [1] : vector<12x32xf32> to vector<12xf32>
    %556 = vector.shape_cast %555 : vector<12xf32> to vector<12x1xf32>
    %cst_233 = arith.constant 3.200000e+01 : f32
    %557 = vector.broadcast %cst_233 : f32 to vector<12x1xf32>
    %558 = arith.divf %556, %557 : vector<12x1xf32>
    %559 = vector.broadcast %551 : vector<12x1xf32> to vector<12x32xf32>
    %560 = arith.subf %545, %559 : vector<12x32xf32>
    %cst_234 = arith.constant 9.99999974E-6 : f32
    %561 = vector.broadcast %cst_234 : f32 to vector<12x1xf32>
    %562 = arith.addf %558, %561 : vector<12x1xf32>
    %563 = math.rsqrt %562 : vector<12x1xf32>
    %564 = vector.broadcast %563 : vector<12x1xf32> to vector<12x32xf32>
    %565 = arith.mulf %560, %564 : vector<12x32xf32>
    %566 = vector.broadcast %546 : vector<1x32xf32> to vector<12x32xf32>
    %567 = arith.mulf %565, %566 : vector<12x32xf32>
    %568 = vector.broadcast %547 : vector<1x32xf32> to vector<12x32xf32>
    %569 = arith.addf %567, %568 : vector<12x32xf32>
    %c0_235 = arith.constant 0 : index
    %c0_236 = arith.constant 0 : index
    %570 = vector.load %arg29[%c0_235, %c0_236] : memref<12x32xf32, #tpu.memory_space<vmem>>, vector<12x32xf32>
    tpu.vector_store %arg29[%c0_235, %c0_236], %569 {strides = array<i32>} : memref<12x32xf32, #tpu.memory_space<vmem>>, vector<12x32xf32>,
    return
  }
}

</mosaic_0001>

<bundles_post_ra>
// kernel: vit_encoder_fsm_forward.6
= control target key start
LH: loop header
LB: loop body
LE: loop exit
PB: predicated region body
PF: predicated region fallthrough
CT: control target
= control target key end

     0   :  { %vm131_vm0 = vcmask 259073   ;;  %v5226_v7 = vmov 0.0   ;;  %s5227_s6 = smov 6   ;;  %vm5228_vm1 = vmmov 0   ;;  %v5229_v12 = vmov 0   ;;  %s5230_s10 = smov 1   ;;  %s5901_s0 = inlined_call_operand.smem [shape: u32[31], index: -1, kind: input, shape index: {}] }
   0x1   :  { %s5268_s5 = sld [smem:[%s5901_s0]]   ;;  %4732 = vmatprep.subr.mxu0 %v5226_v7  ;;  %4740 = vmatprep.mubr.msk.f32.mxu0 %vm5228_vm1, %v5226_v7  ;;  %s5231_s14 = smov 2   ;;  %vm251_vm2 = vcmask 4096   ;;  %vm173_vm3 = vcmask 261120   ;;  %vm265_vm4 = vcmask 258176   ;;  %vm288_vm5 = vcmask 130048  }
   0x2   :  { %s4423_s9 = sld [smem:[%s5901_s0 + %s5227_s6]]   ;;  %4770 = vmatprep.subr.mxu1 %v5226_v7  ;;  %4772 = vmatprep.mubr.msk.f32.mxu1 %vm5228_vm1, %v5226_v7  ;;  %s5232_s18 = smov 32   ;;  %vm304_vm6 = vcmask 392192   ;;  %vm672_vm7 = vcmask 261127   ;;  %vm676_vm8 = vcmask 257024   ;;  %vm478_vm9 = vcmask 64512  }
   0x3   :  { %5150 = vset.pattern.permute.xlu1 %v5229_v12  ;;  %s5303_s13 = sld [smem:[%s5901_s0 + %s5230_s10]]   ;;  %5151 = vset.pattern.permute.xlu0 %v5229_v12  ;;  %s5233_s19 = smov 4   ;;  %vm579_vm10 = vcmask 1040384   ;;  %vm552_vm11 = vcmask 12288   ;;  %vm581_vm13 = vcmask 7168   ;;  %vm1711_vm15 = vcmask 1041408  }
   0x4   :  { %s4419_s17 = sld [smem:[%s5901_s0 + %s5231_s14]]   ;;  %s5234_s23 = smov 5  }
   0x5   :  { %s4421_s22 = sld [smem:[%s5901_s0 + %s5233_s19]]   ;;  %s5235_s27 = smov 8  }
   0x6   :  { %s4422_s26 = sld [smem:[%s5901_s0 + %s5234_s23]]   ;;  %s5236_s1 = smov 7  }
   0x7   :  { %v5271_v0 = vld [vmem:[%s5268_s5] sm:$0xff]  ;;  %s4425_s30 = sld [smem:[%s5901_s0 + %s5235_s27]]   ;;  %s5237_s6 = smov 10  }
   0x8   :  { %v132_v1 = vsel %vm131_vm0, %v5271_v0, 0.0  ;;  %v5284_v8 = vld [vmem:[%s4423_s9 + $0x18] sm:$0xff]  ;;  %v5286_v9 = vld [vmem:[%s4423_s9 + $0x10] sm:$0xff]  ;;  %v5290_v10 = vld [vmem:[%s4423_s9 + $0x8] sm:$0xff]  ;;  %s4424_s4 = sld [smem:[%s5901_s0 + %s5236_s1]]   ;;  %s5238_s10 = smov 9  }
   0x9   :  { %133 = vadd.xlane.f32.xlu0 %v132_v1  ;;  %4733 = vmatpush3.msra.mxu0 %v5284_v8  ;;  %v5294_v11 = vld [vmem:[%s4423_s9] sm:$0xff]  ;;  %s4427_s9 = sld [smem:[%s5901_s0 + %s5237_s6]]   ;;  %v126_v1 = vld [vmem:[%s5268_s5 + $0x8] sm:$0xf]  ;;  %s5239_s15 = smov 12  }
   0xa   :  { %4734 = vmatprep.subr.mxu0 %v5226_v7  ;;  %v5309_v13 = vld [vmem:[%s5303_s13] sm:$0x1f]  ;;  %s4426_s14 = sld [smem:[%s5901_s0 + %s5238_s10]]   ;;  %s5240_s19 = smov 11  }
   0xb   :  { %4735 = vmatpush3.msra.mxu0 %v5286_v9  ;;  %261 = vperm.xlu1 %5150, %v5309_v13   ;;  %v252_v14 = vsel %vm251_vm2, %v5309_v13, 0.0  ;;  %v4450_v15 = vld [vmem:[%s4419_s17] ss:$0 sm:$0xff]  ;;  %s5241_s23 = smov 13   ;;  %s5244_s1 = smov 30  }
   0xc   :  { %4736 = vmatprep.subr.mxu0 %v5226_v7  ;;  %v253_v16 = vrot.slane %v252_v14, 4  ;;  %v5320_v26 = vld [vmem:[%s4421_s22] ss:$0 sm:$0xff]  ;;  %s4428_s22 = sld [smem:[%s5901_s0 + %s5240_s19]]   ;;  %s5246_s6 = smov 16  }
   0xd   :  { %4737 = vmatpush3.msra.mxu0 %v5290_v10  ;;  %v5322_v28 = vld [vmem:[%s4422_s26] ss:$0 sm:$0xff]  ;;  %v5332_v32 = vld [vmem:[%s4425_s30 + $0x28] sm:$0xff]  ;;  %v5340_v34 = vld [vmem:[%s4425_s30 + $0x18] sm:$0xff]  ;;  %s4430_s26 = sld [smem:[%s5901_s0 + %s5241_s23]]   ;;  %s5247_s10 = smov 18  }
   0xe   :  { %4738 = vmatprep.subr.mxu0 %v5226_v7  ;;  %v254_v17 = vadd.f32 %v253_v16, %v252_v14  ;;  %v5336_v33 = vld [vmem:[%s4425_s30 + $0x20] sm:$0xff]  ;;  %v5344_v35 = vld [vmem:[%s4425_s30 + $0x10] sm:$0xff]  ;;  %v5346_v36 = vld [vmem:[%s4425_s30 + $0x8] sm:$0xff]  ;;  %s5249_s19 = smov 15   ;;  %s5250_s23 = smov 17  }
   0xf   :  { %4739 = vmatpush3.msra.mxu0 %v5294_v11  ;;  %v5352_v37 = vld [vmem:[%s4425_s30] sm:$0xff]  ;;  %v5374_v62 = vld [vmem:[%s4427_s9 + $0x8] sm:$0xff]  ;;  %s5243_s30 = smov 127   ;;  %s5254_s8 = smov 25  }
  0x10   :  { %4743 = vmatprep.subr.mxu0 %v5226_v7  ;;  %v255_v18 = vrot.slane %v254_v17, 2  ;;  %v5359_v38 = vld [vmem:[%s4424_s4] ss:$0 sm:$0xff]  ;;  %s5463_s4 = sld [smem:[%s5901_s0 + %s5244_s1]]   ;;  %s5255_s12 = smov 21  }
  0x11   :  { %v5378_v63 = vld [vmem:[%s4427_s9] sm:$0xff]  ;;  %s5513_s9 = sld [smem:[%s5901_s0 + %s5246_s6]]   ;;  %s5256_s17 = smov 22  }
  0x12   :  { %v256_v19 = vadd.f32 %v255_v18, %v254_v17  ;;  %s5862_s11 = sld [smem:[%s5901_s0 + %s5254_s8]]   ;;  %s5257_s21 = smov 24  }
  0x13   :  { %s4438_s16 = sld [smem:[%s5901_s0 + %s5255_s12]]   ;;  %s5258_s25 = smov 26  }
  0x14   :  { %v257_v20 = vrot.slane %v256_v19, 1  ;;  %s4439_s20 = sld [smem:[%s5901_s0 + %s5256_s17]]   ;;  %s5259_s28 = smov 29  }
  0x15   :  { %s4441_s24 = sld [smem:[%s5901_s0 + %s5257_s21]]  }
  0x16   :  { %v258_v21 = vadd.f32 %v257_v20, %v256_v19  ;;  %s4443_s27 = sld [smem:[%s5901_s0 + %s5258_s25]]  }
  0x17   :  { %s4444_s1 = sld [smem:[%s5901_s0 + %s5259_s28]]  }
  0x18   :  { %275 = vperm.xlu1 %5150, %v258_v21  }
  0x86   :  { %v262_v43 = vpop.permute.xlu1 %261 }
  0x92   :  { %v134_v2 = vpop.xlane.xlu0 %133 }
  0x93   :  { %v136_v3 = vmul.f32 0.03125, %v134_v2  ;;  %v276_v48 = vpop.permute.xlu1 %275  ;;  %v673_v2 = vsel %vm672_vm7, %v5271_v0, 0.0 }
  0x94   :  { %674 = vadd.xlane.f32.xlu1 %v673_v2 }
  0x95   :  { %v137_v4 = vsub.f32 %v5271_v0, %v136_v3  ;;  %v677_v3 = vsel %vm676_vm8, %v126_v1, 0.0 }
  0x97   :  { %v138_v5 = vmul.f32 %v137_v4, %v137_v4 }
  0x99   :  { %v139_v6 = vsel %vm131_vm0, %v138_v5, 0.0  ;;  %vm1636_vm0 = vcmask 1045504  }
  0x9a   :  { %140 = vadd.xlane.f32.xlu0 %v139_v6 }
  0xb0   :  { %285 = vrot.lane.b32.xlu0 %v4450_v15, %s5232_s18  ;;  %s4429_s18 = sld [smem:[%s5901_s0 + %s5239_s15]]   ;;  %s5248_s15 = smov 14  }
  0xb6   :  { %v5398_v19 = vld [vmem:[%s4429_s18] sm:$0xff]  ;;  %s4431_s18 = sld [smem:[%s5901_s0 + %s5248_s15]]  }
  0xcf   :  { %678 = vadd.xlane.f32.xlu0 %v677_v3  ;;  %v5445_v3 = vld [vmem:[%s5303_s13 + $0x8] sm:$0x1f]  ;;  %s5242_s13 = smov 3  }
  0xd0   :  { %s5454_s29 = sld [smem:[%s5901_s0 + %s5242_s13]]   ;;  %s5251_s13 = smov 19  }
 0x11d   :  { %v675_v20 = vpop.xlane.xlu1 %674 }
 0x123   :  { %v141_v22 = vpop.xlane.xlu0 %140 }
 0x124   :  { %v142_v23 = vmul.f32 0.03125, %v141_v22  ;;  %v680_v22 = vmul.f32 0.03125, %v675_v20 }
 0x126   :  { %v143_v24 = vadd.f32 1e-05, %v142_v23 }
 0x127   :  { %v5363_v59 = vpop.permute.xlu0 %285 }
 0x128   :  { %5152 = vrsqrt.f32 %v143_v24  ;;  %v682_v24 = vsub.f32 %v5271_v0, %v680_v22 }
 0x135   :  { %v5153_v25 = vpop.eup %5152 }
 0x136   :  { %v145_v27 = vmul.f32 %v5153_v25, %v137_v4  ;;  %v5389_v4 = vld [vmem:[%s4426_s14] ss:$0 sm:$0xff]  ;;  %s5520_s14 = sld [smem:[%s5901_s0 + %s5247_s10]]  }
 0x138   :  { %v152_v29 = vmul.f32 %v5320_v26, %v145_v27  ;;  %v684_v27 = vmul.f32 %v682_v24, %v682_v24 }
 0x13a   :  { %v159_v30 = vadd.f32 %v5322_v28, %v152_v29 }
 0x13c   :  { %v172_v31 = vrot.slane %v159_v30, 1  ;;  %v686_v30 = vsel %vm672_vm7, %v684_v27, 0.0 }
 0x13d   :  { %687 = vadd.xlane.f32.xlu1 %v686_v30  ;;  %v565_v30 = vld [vmem:[%s5454_s29] sm:$0x1f] }
 0x13e   :  { %4741 = vmatmul.mubr.msk.f32.vlgmr.msra.gmra.mxu0 %vm173_vm3, %v172_v31 }
 0x13f   :  { %4755 = vmatprep.mubr.msk.f32.mxu0 %vm5228_vm1, %v5226_v7  ;;  %4744 = vmatpush3.msra.mxu0 %v5332_v32 }
 0x140   :  { %4745 = vmatprep.subr.mxu0 %v5226_v7 }
 0x141   :  { %4746 = vmatpush3.msra.mxu0 %v5336_v33 }
 0x142   :  { %4747 = vmatprep.subr.mxu0 %v5226_v7 }
 0x143   :  { %4748 = vmatpush3.msra.mxu0 %v5340_v34 }
 0x144   :  { %4749 = vmatprep.subr.mxu0 %v5226_v7 }
 0x145   :  { %4750 = vmatpush3.msra.mxu0 %v5344_v35 }
 0x146   :  { %4751 = vmatprep.subr.mxu0 %v5226_v7 }
 0x147   :  { %4752 = vmatpush3.msra.mxu0 %v5346_v36 }
 0x148   :  { %4753 = vmatprep.subr.mxu0 %v5226_v7 }
 0x149   :  { %4754 = vmatpush3.msra.mxu0 %v5352_v37 }
 0x14a   :  { %4758 = vmatprep.subr.mxu0 %v5226_v7 }
 0x158   :  { %v679_v21 = vpop.xlane.xlu0 %678 }
 0x159   :  { %v681_v23 = vmul.f32 0.03125, %v679_v21 }
 0x15b   :  { %v683_v25 = vsub.f32 %v126_v1, %v681_v23 }
 0x15d   :  { %v685_v29 = vmul.f32 %v683_v25, %v683_v25 }
 0x15f   :  { %v689_v31 = vsel %vm676_vm8, %v685_v29, 0.0 }
 0x160   :  { %690 = vadd.xlane.f32.xlu1 %v689_v31 }
 0x1fe   :  { %v242_v39 = vpop.f32.mrf.mxu0 }
 0x1ff   :  { %v243_v40 = vadd.f32 %v5359_v38, %v242_v39  ;;  %v5408_v39 = vld [vmem:[%s4428_s22] ss:$0 sm:$0xff]  ;;  %s4432_s22 = sld [smem:[%s5901_s0 + %s5249_s19]]  }
 0x200   :  { %v4742_v41 = vpop.f32.mrf.mxu0 }
 0x201   :  { %v247_v42 = vmul.f32 0.70710677, %v243_v40  ;;  %v246_v45 = vmul.f32 0.5, %v243_v40 }
 0x203   :  { %5154 = verf.f32 %v247_v42 }
 0x204   :  { %5156 = vrcp.f32 %v276_v48  ;;  %v688_v48 = vpop.xlane.xlu1 %687 }
 0x210   :  { %v5155_v44 = vpop.eup %5154 }
 0x211   :  { %v249_v46 = vadd.f32 1.0, %v5155_v44  ;;  %v5157_v57 = vpop.eup %5156 }
 0x213   :  { %v250_v47 = vmul.f32 %v249_v46, %v246_v45 }
 0x215   :  { %v264_v49 = vmul.f32 %v262_v43, %v250_v47 }
 0x217   :  { %v266_v50 = vsel %vm265_vm4, %v264_v49, 0.0  ;;  %v692_v49 = vmul.f32 0.03125, %v688_v48 }
 0x218   :  { %v267_v51 = vrot.slane %v266_v50, 4 }
 0x21a   :  { %v268_v52 = vadd.f32 %v267_v51, %v266_v50  ;;  %v691_v50 = vpop.xlane.xlu1 %690 }
 0x21b   :  { %v693_v51 = vmul.f32 0.03125, %v691_v50 }
 0x21c   :  { %v269_v53 = vrot.slane %v268_v52, 2 }
 0x21e   :  { %v270_v54 = vadd.f32 %v269_v53, %v268_v52  ;;  %v695_v52 = vadd.f32 1e-05, %v693_v51 }
 0x220   :  { %v271_v55 = vrot.slane %v270_v54, 1 }
 0x222   :  { %v272_v56 = vadd.f32 %v271_v55, %v270_v54 }
 0x224   :  { %v279_v58 = vmul.f32 %v5157_v57, %v272_v56 }
 0x226   :  { %v289_v60 = vsel %vm288_vm5, %v250_v47, %v279_v58 }
 0x227   :  { %v290_v61 = vsel %vm173_vm3, %v289_v60, %v5363_v59 }
 0x228   :  { %4756 = vmatmul.mubr.msk.f32.vlgmr.msra.gmra.mxu0 %vm304_vm6, %v290_v61 }
 0x229   :  { %4762 = vmatprep.mubr.msk.f32.mxu0 %vm5228_vm1, %v5226_v7  ;;  %4759 = vmatpush3.msra.mxu0 %v5374_v62 }
 0x22a   :  { %4760 = vmatprep.subr.mxu0 %v5226_v7 }
 0x22b   :  { %4761 = vmatpush3.msra.mxu0 %v5378_v63 }
 0x22c   :  { %4765 = vmatprep.subr.mxu0 %v5226_v7 }
 0x2e8   :  { %v374_v5 = vpop.f32.mrf.mxu0 }
 0x2e9   :  { %v375_v6 = vadd.f32 %v5389_v4, %v374_v5 }
 0x2ea   :  { %v4757_v12 = vpop.f32.mrf.mxu0 }
 0x2eb   :  { %v379_v14 = vmul.f32 0.70710677, %v375_v6  ;;  %v378_v16 = vmul.f32 0.5, %v375_v6 }
 0x2ed   :  { %5158 = verf.f32 %v379_v14 }
 0x2fa   :  { %v5159_v15 = vpop.eup %5158 }
 0x2fb   :  { %v381_v17 = vadd.f32 1.0, %v5159_v15 }
 0x2fd   :  { %v382_v18 = vmul.f32 %v381_v17, %v378_v16 }
 0x2ff   :  { %4763 = vmatmul.mubr.msk.f32.vlgmr.msra.gmra.mxu0 %vm288_vm5, %v382_v18 }
 0x300   :  { %4767 = vmatprep.mubr.msk.f32.mxu0 %vm5228_vm1, %v5226_v7  ;;  %4766 = vmatpush3.msra.mxu0 %v5398_v19 }
 0x301   :  { %4775 = vmatprep.subr.mxu0 %v5226_v7 }
 0x3bf   :  { %v461_v40 = vpop.f32.mrf.mxu0 }
 0x3c0   :  { %v462_v41 = vadd.f32 %v5408_v39, %v461_v40 }
 0x3c1   :  { %v4764_v42 = vpop.f32.mrf.mxu0 }
 0x3c2   :  { %v466_v43 = vmul.f32 0.70710677, %v462_v41  ;;  %v465_v45 = vmul.f32 0.5, %v462_v41 }
 0x3c4   :  { %5160 = verf.f32 %v466_v43 }
 0x3d1   :  { %v5161_v44 = vpop.eup %5160 }
 0x3d2   :  { %v468_v46 = vadd.f32 1.0, %v5161_v44 }
 0x3d4   :  { %v469_v47 = vmul.f32 %v468_v46, %v465_v45 }
 0x3d6   :  { %4768 = vmatmul.mubr.msk.f32.vlgmr.msra.gmra.mxu0 %vm478_vm9, %v469_v47 }
 0x3d7   :  { %4776 = vmatpush3.msra.mxu0 %v5284_v8  ;;  %4783 = vmatprep.mubr.msk.f32.mxu0 %vm5228_vm1, %v5226_v7  ;;  %v694_v8 = vadd.f32 1e-05, %v692_v49 }
 0x3d8   :  { %4777 = vmatprep.subr.mxu0 %v5226_v7 }
 0x3d9   :  { %4778 = vmatpush3.msra.mxu0 %v5286_v9  ;;  %5162 = vrsqrt.f32 %v694_v8 }
 0x3da   :  { %4779 = vmatprep.subr.mxu0 %v5226_v7  ;;  %5164 = vrsqrt.f32 %v695_v52 }
 0x3db   :  { %4780 = vmatpush3.msra.mxu0 %v5290_v10 }
 0x3dc   :  { %4781 = vmatprep.subr.mxu0 %v5226_v7 }
 0x3dd   :  { %4782 = vmatpush3.msra.mxu0 %v5294_v11 }
 0x3de   :  { %4801 = vmatprep.subr.mxu0 %v5226_v7 }
 0x3e6   :  { %v5163_v53 = vpop.eup %5162 }
 0x3e7   :  { %v698_v9 = vmul.f32 %v5163_v53, %v682_v24  ;;  %v5165_v55 = vpop.eup %5164 }
 0x3e8   :  { %v5423_v10 = vmul.f32 %v5165_v55, %v683_v25 }
 0x3e9   :  { %v706_v54 = vmul.f32 %v5320_v26, %v698_v9 }
 0x3ea   :  { %v707_v11 = vmul.f32 %v5320_v26, %v5423_v10  ;;  %v5440_v26 = vld [vmem:[%s4430_s26] ss:$0 sm:$0xff]  ;;  %s5555_s26 = sld [smem:[%s5901_s0 + %s5250_s23]]  }
 0x3eb   :  { %v714_v56 = vadd.f32 %v5322_v28, %v706_v54 }
 0x3ec   :  { %v715_v57 = vadd.f32 %v5322_v28, %v707_v11 }
 0x3ed   :  { %v729_v58 = vrot.slane %v714_v56, 7 }
 0x3ee   :  { %v730_v60 = vrot.slane %v715_v57, 7 }
 0x3f0   :  { %v731_v61 = vsel %vm579_vm10, %v729_v58, %v730_v60  ;;  %v5245_v58 = vmov 1.0  }
 0x3f1   :  { %4784 = vmatmul.mubr.msk.f32.vlgmr.msra.gmra.mxu0 %vm173_vm3, %v731_v61 }
 0x3f2   :  { %4802 = vmatpush3.msra.mxu0 %v5374_v62  ;;  %4805 = vmatprep.mubr.msk.f32.mxu0 %vm5228_vm1, %v5226_v7 }
 0x3f3   :  { %4803 = vmatprep.subr.mxu0 %v5226_v7 }
 0x3f4   :  { %4804 = vmatpush3.msra.mxu0 %v5378_v63  ;;  %v809_v63 = vsel %vm251_vm2, %v5445_v3, 0.0 }
 0x3f5   :  { %4808 = vmatprep.subr.mxu0 %v5226_v7  ;;  %v810_v5 = vrot.slane %v809_v63, 4 }
 0x3f7   :  { %v811_v6 = vadd.f32 %v810_v5, %v809_v63 }
 0x3f9   :  { %v812_v12 = vrot.slane %v811_v6, 2 }
 0x3fb   :  { %v813_v14 = vadd.f32 %v812_v12, %v811_v6 }
 0x3fd   :  { %v814_v15 = vrot.slane %v813_v14, 1 }
 0x3ff   :  { %v815_v17 = vadd.f32 %v814_v15, %v813_v14 }
 0x401   :  { %831 = vperm.xlu0 %5151, %v815_v17   ;;  %v1281_v17 = vsel %vm173_vm3, %v5271_v0, 0.0 }
 0x420   :  { %1282 = vadd.xlane.f32.xlu0 %v1281_v17 }
 0x47c   :  { %v832_v51 = vpop.permute.xlu0 %831 }
 0x496   :  { %v548_v28 = vpop.f32.mrf.mxu0 }
 0x497   :  { %v549_v62 = vadd.f32 %v5440_v26, %v548_v28 }
 0x498   :  { %v4769_v1 = vpop.f32.mrf.mxu0 }
 0x499   :  { %v553_v2 = vsel %vm552_vm11, %v549_v62, -inf }
 0x49a   :  { %554 = vmax.xlane.f32.xlu1 %v553_v2 }
 0x4b1   :  { %v800_v16 = vpop.f32.mrf.mxu0 }
 0x4b2   :  { %v801_v41 = vadd.f32 %v5359_v38, %v800_v16 }
 0x4b3   :  { %v4785_v18 = vpop.f32.mrf.mxu0 }
 0x4b4   :  { %v805_v42 = vmul.f32 0.70710677, %v801_v41  ;;  %v804_v44 = vmul.f32 0.5, %v801_v41  ;;  %v1205_v41 = vld [vmem:[%s5513_s9 + $0x8] sm:$0xff] }
 0x523   :  { %v555_v20 = vpop.xlane.xlu1 %554 }
 0x524   :  { %v556_v21 = vsub.f32 %v549_v62, %v555_v20 }
 0x526   :  { %v557_v22 = vmul.f32 1.442695, %v556_v21 }
 0x528   :  { %5166 = vpow2.f32 %v557_v22 }
 0x535   :  { %v5167_v23 = vpop.eup %5166 }
 0x536   :  { %v559_v24 = vsel %vm552_vm11, %v5167_v23, 0.0 }
 0x537   :  { %560 = vadd.xlane.f32.xlu1 %v559_v24  ;;  %v1283_v24 = vpop.xlane.xlu0 %1282 }
 0x548   :  { %818 = vperm.xlu1 %5150, %v5445_v3  }
 0x5c0   :  { %v561_v25 = vpop.xlane.xlu1 %560 }
 0x5c1   :  { %5168 = vlog2.f32 %v561_v25  ;;  %v1284_v25 = vmul.f32 0.03125, %v1283_v24  ;;  %v1240_v24 = vld [vmem:[%s5520_s14 + $0x20] sm:$0xff] }
 0x5c2   :  { %5170 = verf.f32 %v805_v42  ;;  %v1204_v42 = vld [vmem:[%s5513_s9] sm:$0xff] }
 0x5c3   :  { %5172 = vrcp.f32 %v832_v51 }
 0x5c4   :  { %v819_v46 = vpop.permute.xlu1 %818 }
 0x5ce   :  { %v5169_v27 = vpop.eup %5168 }
 0x5cf   :  { %v563_v29 = vmul.f32 0.6931472, %v5169_v27  ;;  %v5171_v43 = vpop.eup %5170  ;;  %v1285_v27 = vsub.f32 %v5271_v0, %v1284_v25  ;;  %v1206_v0 = vld [vmem:[%s5513_s9 + $0x10] sm:$0xff] }
 0x5d0   :  { %v807_v45 = vadd.f32 1.0, %v5171_v43  ;;  %v5173_v60 = vpop.eup %5172  ;;  %v1239_v43 = vld [vmem:[%s5520_s14 + $0x18] sm:$0xff] }
 0x5d1   :  { %v564_v31 = vsub.f32 %v556_v21, %v563_v29  ;;  %v1286_v29 = vmul.f32 %v1285_v27, %v1285_v27 }
 0x5d2   :  { %v808_v47 = vmul.f32 %v807_v45, %v804_v44 }
 0x5d3   :  { %v566_v40 = vadd.f32 %v565_v30, %v564_v31 }
 0x5d4   :  { %v821_v48 = vmul.f32 %v819_v46, %v808_v47 }
 0x5d5   :  { %568 = vrot.lane.b32.xlu1 %v566_v40, %s5243_s30 }
 0x5d6   :  { %v822_v49 = vsel %vm265_vm4, %v821_v48, 0.0 }
 0x5d7   :  { %v823_v8 = vrot.slane %v822_v49, 4 }
 0x5d9   :  { %v824_v50 = vadd.f32 %v823_v8, %v822_v49  ;;  %v4472_v8 = vld [vmem:[%s5454_s29 + $0x8] sm:$0x1f]  ;;  %s5662_s29 = sld [smem:[%s5901_s0 + %s5251_s13]]  }
 0x5db   :  { %v825_v38 = vrot.slane %v824_v50, 2 }
 0x5dd   :  { %v826_v9 = vadd.f32 %v825_v38, %v824_v50  ;;  %v4477_v38 = vld [vmem:[%s4431_s18] ss:$0 sm:$0xff] }
 0x5df   :  { %v827_v56 = vrot.slane %v826_v9, 1 }
 0x5e1   :  { %v828_v57 = vadd.f32 %v827_v56, %v826_v9  ;;  %v1301_v9 = vmul.f32 %v4477_v38, %v5423_v10  ;;  %v1236_v10 = vld [vmem:[%s5520_s14] sm:$0xff] }
 0x647   :  { %v569_v52 = vpop.permute.xlu1 %568 }
 0x648   :  { %vm571_vm12 = vcmp.ge.f32.partialorder %v566_v40, %v569_v52  ;;  %v1287_v40 = vsel %vm173_vm3, %v1286_v29, 0.0 }
 0x649   :  { %v4457_v53 = vsel %vm571_vm12, 1.0, %v5226_v7 }
 0x64a   :  { %v574_v54 = vmul.f32 %v4457_v53, %v5309_v13  ;;  %v835_v13 = vmul.f32 %v5173_v60, %v828_v57  ;;  %v1238_v57 = vld [vmem:[%s5520_s14 + $0x10] sm:$0xff]  ;;  %v1237_v60 = vld [vmem:[%s5520_s14 + $0x8] sm:$0xff] }
 0x64c   :  { %575 = vst.msk [vmem:[%s5463_s4] sm:$0x1f] %vm251_vm2, %v574_v54  ;;  %v577_v55 = vrot.slane %v574_v54, 7  ;;  %v4478_v54 = vld [vmem:[%s4432_s22] ss:$0 sm:$0xff] }
 0x64e   :  { %v580_v11 = vsel %vm579_vm10, 1.0, %v577_v55 }
 0x64f   :  { %4771 = vmatpush3.xpose.msk.msra.mxu1 %vm581_vm13, %v580_v11  ;;  %v5536_v11 = vadd.f32 %v4478_v54, %v1301_v9 }
 0x650   :  { %4786 = vmatprep.subr.mxu1 %v5226_v7 }
 0x652   :  { %4773 = vmatmul.mubr.msk.f32.vlgmr.msra.gmra.mxu1 %vm581_vm13, %v5245_v58 }
 0x653   :  { %4787 = vmatpush3.msra.mxu1 %v5332_v32  ;;  %4798 = vmatprep.mubr.msk.f32.mxu1 %vm5228_vm1, %v5226_v7  ;;  %v836_v32 = vsel %vm288_vm5, %v808_v47, %v835_v13 }
 0x654   :  { %4788 = vmatprep.subr.mxu1 %v5226_v7 }
 0x655   :  { %4789 = vmatpush3.msra.mxu1 %v5336_v33  ;;  %v837_v33 = vsel %vm173_vm3, %v836_v32, %v5363_v59 }
 0x656   :  { %4790 = vmatprep.subr.mxu1 %v5226_v7 }
 0x657   :  { %4791 = vmatpush3.msra.mxu1 %v5340_v34 }
 0x658   :  { %4792 = vmatprep.subr.mxu1 %v5226_v7 }
 0x659   :  { %4793 = vmatpush3.msra.mxu1 %v5344_v35 }
 0x65a   :  { %4794 = vmatprep.subr.mxu1 %v5226_v7 }
 0x65b   :  { %4795 = vmatpush3.msra.mxu1 %v5346_v36 }
 0x65c   :  { %4796 = vmatprep.subr.mxu1 %v5226_v7 }
 0x65d   :  { %4797 = vmatpush3.msra.mxu1 %v5352_v37 }
 0x65e   :  { %4799 = vmatmul.mubr.msk.f32.vlgmr.msra.gmra.mxu1 %vm304_vm6, %v837_v33  ;;  %4813 = vmatprep.subr.mxu1 %v5226_v7 }
 0x65f   :  { %4815 = vmatprep.mubr.msk.f32.mxu1 %vm5228_vm1, %v5226_v7 }
 0x712   :  { %v5494_v34 = vpop.f32.mrf.mxu1 }
 0x714   :  { %v4774_v35 = vpop.f32.mrf.mxu1 }
 0x71e   :  { %v920_v61 = vpop.f32.mrf.mxu1 }
 0x71f   :  { %v921_v36 = vadd.f32 %v5389_v4, %v920_v61  ;;  %v1223_v61 = vld [vmem:[%s5555_s26 + $0x18] sm:$0xff] }
 0x720   :  { %v4800_v28 = vpop.f32.mrf.mxu1 }
 0x721   :  { %v925_v62 = vmul.f32 0.70710677, %v921_v36  ;;  %v924_v1 = vmul.f32 0.5, %v921_v36  ;;  %v1222_v28 = vld [vmem:[%s5555_s26 + $0x10] sm:$0xff] }
 0x723   :  { %5174 = verf.f32 %v925_v62  ;;  %v1221_v62 = vld [vmem:[%s5555_s26 + $0x8] sm:$0xff] }
 0x730   :  { %v5175_v37 = vpop.eup %5174 }
 0x731   :  { %v927_v2 = vadd.f32 1.0, %v5175_v37 }
 0x733   :  { %v928_v59 = vmul.f32 %v927_v2, %v924_v1 }
 0x735   :  { %4806 = vmatmul.mubr.msk.f32.vlgmr.msra.gmra.mxu0 %vm288_vm5, %v928_v59  ;;  %vm1632_vm5 = vcmask 48128  }
 0x736   :  { %4809 = vmatpush3.msra.mxu0 %v5398_v19  ;;  %4810 = vmatprep.mubr.msk.f32.mxu0 %vm5228_vm1, %v5226_v7 }
 0x7f5   :  { %v1007_v63 = vpop.f32.mrf.mxu0 }
 0x7f6   :  { %v1008_v5 = vadd.f32 %v5408_v39, %v1007_v63 }
 0x7f7   :  { %v4807_v6 = vpop.f32.mrf.mxu0 }
 0x7f8   :  { %v1012_v12 = vmul.f32 0.70710677, %v1008_v5  ;;  %v1011_v14 = vmul.f32 0.5, %v1008_v5 }
 0x7fa   :  { %5176 = verf.f32 %v1012_v12 }
 0x807   :  { %v5177_v4 = vpop.eup %5176 }
 0x808   :  { %v1014_v15 = vadd.f32 1.0, %v5177_v4 }
 0x80a   :  { %v1015_v16 = vmul.f32 %v1014_v15, %v1011_v14  ;;  %v1211_v14 = vld [vmem:[%s5513_s9 + $0x38] sm:$0xff] }
 0x80c   :  { %4811 = vmatmul.mubr.msk.f32.vlgmr.msra.gmra.mxu0 %vm478_vm9, %v1015_v16 }
 0x8cc   :  { %v1093_v19 = vpop.f32.mrf.mxu0 }
 0x8cd   :  { %v1094_v18 = vadd.f32 %v5440_v26, %v1093_v19  ;;  %v1207_v26 = vld [vmem:[%s5513_s9 + $0x18] sm:$0xff] }
 0x8ce   :  { %v4812_v20 = vpop.f32.mrf.mxu0  ;;  %4818 = vmatprep.subr.mxu0 %v1207_v26 }
 0x8cf   :  { %v1097_v21 = vsel %vm552_vm11, %v1094_v18, -inf  ;;  %4819 = vmatpush3.msra.mxu0 %v1207_v26  ;;  %v1209_v20 = vld [vmem:[%s5513_s9 + $0x28] sm:$0xff]  ;;  %v658_v26 = vlaneseq }
 0x8d0   :  { %1098 = vmax.xlane.f32.xlu1 %v1097_v21  ;;  %4820 = vmatprep.subr.mxu0 %v1206_v0  ;;  %v1208_v21 = vld [vmem:[%s5513_s9 + $0x20] sm:$0xff] }
 0x8d1   :  { %4821 = vmatpush3.msra.mxu0 %v1206_v0 }
 0x8d2   :  { %4822 = vmatprep.subr.mxu0 %v1205_v41 }
 0x8d3   :  { %4823 = vmatpush3.msra.mxu0 %v1205_v41 }
 0x8d4   :  { %4824 = vmatprep.subr.mxu0 %v1204_v42 }
 0x8d5   :  { %4825 = vmatpush3.msra.mxu0 %v1204_v42  ;;  %v659_v42 = vshrl.u32 %v658_v26, 7 }
 0x8d6   :  { %4840 = vmatprep.subr.mxu0 %v1239_v43 }
 0x959   :  { %v1099_v39 = vpop.xlane.xlu1 %1098 }
 0x95a   :  { %v1100_v22 = vsub.f32 %v1094_v18, %v1099_v39  ;;  %v1210_v18 = vld [vmem:[%s5513_s9 + $0x30] sm:$0xff]  ;;  %v1243_v39 = vld [vmem:[%s5520_s14 + $0x38] sm:$0xff] }
 0x95c   :  { %v1101_v23 = vmul.f32 1.442695, %v1100_v22 }
 0x95e   :  { %5178 = vpow2.f32 %v1101_v23  ;;  %v1241_v23 = vld [vmem:[%s5520_s14 + $0x28] sm:$0xff] }
 0x96b   :  { %v5179_v30 = vpop.eup %5178 }
 0x96c   :  { %v1103_v31 = vsel %vm552_vm11, %v5179_v30, 0.0 }
 0x96d   :  { %1104 = vadd.xlane.f32.xlu1 %v1103_v31 }
 0x971   :  { %1288 = vadd.xlane.f32.xlu1 %v1287_v40 }
 0x9f6   :  { %v1105_v44 = vpop.xlane.xlu1 %1104 }
 0x9f7   :  { %5180 = vlog2.f32 %v1105_v44 }
 0x9fa   :  { %v1289_v45 = vpop.xlane.xlu1 %1288 }
 0x9fb   :  { %v1290_v46 = vmul.f32 0.03125, %v1289_v45 }
 0x9fd   :  { %v1291_v47 = vadd.f32 1e-05, %v1290_v46 }
 0x9ff   :  { %5182 = vrsqrt.f32 %v1291_v47 }
 0xa04   :  { %v5181_v48 = vpop.eup %5180 }
 0xa05   :  { %v1107_v49 = vmul.f32 0.6931472, %v5181_v48  ;;  %v665_v48 = vsub.f32 1.0, %v5494_v34 }
 0xa07   :  { %v1108_v50 = vsub.f32 %v1100_v22, %v1107_v49  ;;  %v1242_v22 = vld [vmem:[%s5520_s14 + $0x30] sm:$0xff] }
 0xa09   :  { %v1111_v51 = vadd.f32 %v4472_v8, %v1108_v50 }
 0xa0b   :  { %1113 = vrot.lane.b32.xlu1 %v1111_v51, %s5243_s30  ;;  %s5252_s30 = smov 20  }
 0xa0c   :  { %v5183_v52 = vpop.eup %5182  ;;  %s4437_s3 = sld [smem:[%s5901_s0 + %s5252_s30]]  }
 0xa0d   :  { %v1293_v53 = vmul.f32 %v5183_v52, %v1285_v27 }
 0xa0f   :  { %v1300_v55 = vmul.f32 %v4477_v38, %v1293_v53 }
 0xa11   :  { %v5534_v56 = vadd.f32 %v4478_v54, %v1300_v55 }
 0xa13   :  { %4826 = vmatprep.mubr.msk.f32.mxu0 %vm173_vm3, %v5534_v56 }
 0xa14   :  { %4827 = vmatmul.mubr.msk.f32.vlgmr.msra.gmra.mxu0 %vm173_vm3, %v5536_v11 }
 0xa15   :  { %4841 = vmatpush3.msra.mxu0 %v1239_v43  ;;  %4848 = vmatprep.mubr.msk.f32.mxu0 %vm173_vm3, %v5534_v56  ;;  %v661_v43 = vand.u32 127, %v658_v26 }
 0xa16   :  { %4842 = vmatprep.subr.mxu0 %v1238_v57 }
 0xa17   :  { %4843 = vmatpush3.msra.mxu0 %v1238_v57  ;;  %vm662_vm4 = vcmp.eq.s32.totalorder %v659_v42, %v661_v43  ;;  %v1252_v42 = vld [vmem:[%s5662_s29] sm:$0xff] }
 0xa18   :  { %4844 = vmatprep.subr.mxu0 %v1237_v60  ;;  %v4460_v49 = vsel %vm662_vm4, 1.0, %v5226_v7 }
 0xa19   :  { %4845 = vmatpush3.msra.mxu0 %v1237_v60  ;;  %v666_v8 = vmul.f32 %v4460_v49, %v665_v48 }
 0xa1a   :  { %4846 = vmatprep.subr.mxu0 %v1236_v10 }
 0xa1b   :  { %4847 = vmatpush3.msra.mxu0 %v1236_v10 }
 0xa1c   :  { %4849 = vmatmul.mubr.msk.f32.vlgmr.msra.gmra.mxu0 %vm173_vm3, %v5536_v11  ;;  %4861 = vmatprep.subr.mxu0 %v5226_v7 }
 0xa1d   :  { %4863 = vmatprep.mubr.msk.f32.mxu0 %vm5228_vm1, %v5226_v7 }
 0xa7d   :  { %v1114_v13 = vpop.permute.xlu1 %1113 }
 0xa7e   :  { %vm1116_vm14 = vcmp.ge.f32.partialorder %v1111_v51, %v1114_v13  ;;  %v5619_v51 = vadd.f32 %v666_v8, %v5494_v34 }
 0xa7f   :  { %v4473_v32 = vsel %vm1116_vm14, 1.0, %v5226_v7 }
 0xa80   :  { %v1119_v33 = vmul.f32 %v4473_v32, %v5445_v3  ;;  %v1220_v3 = vld [vmem:[%s5555_s26] sm:$0xff] }
 0xa82   :  { %4474 = vst.msk [vmem:[%s5463_s4 + $0x8] sm:$0x1f] %vm251_vm2, %v1119_v33  ;;  %v1123_v35 = vrot.slane %v1119_v33, 7  ;;  %vm1617_vm2 = vcmask 46080  }
 0xa84   :  { %v1125_v36 = vsel %vm579_vm10, 1.0, %v1123_v35 }
 0xa85   :  { %4814 = vmatpush3.xpose.msk.msra.mxu1 %vm581_vm13, %v1125_v36 }
 0xa86   :  { %4829 = vmatprep.subr.mxu1 %v1223_v61 }
 0xa88   :  { %4816 = vmatmul.mubr.msk.f32.vlgmr.msra.gmra.mxu1 %vm581_vm13, %v5245_v58 }
 0xa89   :  { %4830 = vmatpush3.msra.mxu1 %v1223_v61  ;;  %4837 = vmatprep.mubr.msk.f32.mxu1 %vm173_vm3, %v5534_v56 }
 0xa8a   :  { %4831 = vmatprep.subr.mxu1 %v1222_v28 }
 0xa8b   :  { %4832 = vmatpush3.msra.mxu1 %v1222_v28 }
 0xa8c   :  { %4833 = vmatprep.subr.mxu1 %v1221_v62 }
 0xa8d   :  { %4834 = vmatpush3.msra.mxu1 %v1221_v62  ;;  %v1227_v62 = vld [vmem:[%s5555_s26 + $0x38] sm:$0xff] }
 0xa8e   :  { %4835 = vmatprep.subr.mxu1 %v1220_v3 }
 0xa8f   :  { %4836 = vmatpush3.msra.mxu1 %v1220_v3 }
 0xa90   :  { %4838 = vmatmul.mubr.msk.f32.vlgmr.msra.gmra.mxu1 %vm173_vm3, %v5536_v11  ;;  %4851 = vmatprep.subr.mxu1 %v5226_v7 }
 0xa91   :  { %4853 = vmatprep.mubr.msk.f32.mxu1 %vm5228_vm1, %v5226_v7 }
 0xad4   :  { %v4828_v1 = vpop.f32.mrf.mxu0 }
 0xad5   :  { %v1713_v16 = vrot.slane %v4828_v1, 6 }
 0xad6   :  { %v1382_v2 = vpop.f32.mrf.mxu0 }
 0xad7   :  { %v1712_v4 = vrot.slane %v1382_v2, 6 }
 0xad9   :  { %v1714_v19 = vsel %vm1711_vm15, %v1712_v4, %v1713_v16 }
 0xadc   :  { %v5578_v63 = vpop.f32.mrf.mxu0 }
 0xadd   :  { %v1809_v36 = vrot.slane %v5578_v63, 6  ;;  %v1224_v63 = vld [vmem:[%s5555_s26 + $0x20] sm:$0xff] }
 0xade   :  { %v5584_v17 = vpop.f32.mrf.mxu0 }
 0xadf   :  { %v1808_v33 = vrot.slane %v5584_v17, 6 }
 0xb48   :  { %v5576_v58 = vpop.f32.mrf.mxu1 }
 0xb49   :  { %v1199_v50 = vsub.f32 1.0, %v5576_v58 }
 0xb4a   :  { %v4817_v37 = vpop.f32.mrf.mxu1 }
 0xb4b   :  { %v1200_v38 = vmul.f32 %v4460_v49, %v1199_v50 }
 0xb4d   :  { %v5623_v9 = vadd.f32 %v1200_v38, %v5576_v58  ;;  %v1810_v58 = vsel %vm1711_vm15, %v1808_v33, %v1809_v36 }
 0xb50   :  { %v4839_v59 = vpop.f32.mrf.mxu1 }
 0xb51   :  { %v1717_v6 = vrot.slane %v4839_v59, 6  ;;  %v1225_v59 = vld [vmem:[%s5555_s26 + $0x28] sm:$0xff] }
 0xb52   :  { %v1457_v5 = vpop.f32.mrf.mxu1 }
 0xb53   :  { %v1716_v12 = vrot.slane %v1457_v5, 6  ;;  %4852 = vmatpush3.xpose.msk.msra.mxu1 %vm478_vm9, %v1457_v5 }
 0xb54   :  { %4856 = vmatprep.subr.mxu1 %v5226_v7 }
 0xb55   :  { %v1718_v15 = vsel %vm1711_vm15, %v1716_v12, %v1717_v6 }
 0xb56   :  { %4854 = vmatmul.mubr.msk.f32.vlgmr.msra.gmra.mxu1 %vm478_vm9, %v1382_v2  ;;  %4862 = vmatpush3.xpose.msk.msra.mxu0 %vm478_vm9, %v1718_v15  ;;  %v1226_v2 = vld [vmem:[%s5555_s26 + $0x30] sm:$0xff] }
 0xb57   :  { %4857 = vmatpush3.msk.msra.mxu1 %vm1636_vm0, %v5584_v17  ;;  %4871 = vmatprep.subr.mxu0 %v1211_v14 }
 0xb58   :  { %4858 = vmatprep.mubr.msk.f32.mxu1 %vm5228_vm1, %v5226_v7  ;;  %4866 = vmatprep.subr.mxu1 %v5226_v7 }
 0xb59   :  { %4864 = vmatmul.mubr.msk.f32.vlgmr.msra.gmra.mxu0 %vm478_vm9, %v1714_v19 }
 0xb5a   :  { %4872 = vmatpush3.msra.mxu0 %v1211_v14  ;;  %4879 = vmatprep.mubr.msk.f32.mxu0 %vm173_vm3, %v5534_v56 }
 0xb5b   :  { %4873 = vmatprep.subr.mxu0 %v1210_v18 }
 0xb5c   :  { %4874 = vmatpush3.msra.mxu0 %v1210_v18 }
 0xb5d   :  { %4875 = vmatprep.subr.mxu0 %v1209_v20 }
 0xb5e   :  { %4876 = vmatpush3.msra.mxu0 %v1209_v20 }
 0xb5f   :  { %4877 = vmatprep.subr.mxu0 %v1208_v21 }
 0xb60   :  { %4878 = vmatpush3.msra.mxu0 %v1208_v21 }
 0xb61   :  { %4880 = vmatmul.mubr.msk.f32.vlgmr.msra.gmra.mxu0 %vm173_vm3, %v5536_v11  ;;  %4893 = vmatprep.subr.mxu0 %v1243_v39 }
 0xb62   :  { %4894 = vmatpush3.msra.mxu0 %v1243_v39  ;;  %4901 = vmatprep.mubr.msk.f32.mxu0 %vm173_vm3, %v5534_v56 }
 0xb63   :  { %4895 = vmatprep.subr.mxu0 %v1242_v22 }
 0xb64   :  { %4896 = vmatpush3.msra.mxu0 %v1242_v22 }
 0xb65   :  { %4897 = vmatprep.subr.mxu0 %v1241_v23 }
 0xb66   :  { %4898 = vmatpush3.msra.mxu0 %v1241_v23 }
 0xb67   :  { %4899 = vmatprep.subr.mxu0 %v1240_v24 }
 0xb68   :  { %4900 = vmatpush3.msra.mxu0 %v1240_v24 }
 0xb69   :  { %4902 = vmatmul.mubr.msk.f32.vlgmr.msra.gmra.mxu0 %vm173_vm3, %v5536_v11  ;;  %4914 = vmatprep.subr.mxu0 %v5226_v7 }
 0xb6a   :  { %4916 = vmatprep.mubr.msk.f32.mxu0 %vm5228_vm1, %v5226_v7 }
 0xc16   :  { %v1613_v25 = vpop.f32.mrf.mxu1 }
 0xc17   :  { %v1618_v27 = vsel %vm1617_vm2, %v1613_v25, -inf }
 0xc18   :  { %1619 = vmax.xlane.f32.xlu0 %v1618_v27  ;;  %v4855_v29 = vpop.f32.mrf.mxu1 }
 0xc19   :  { %v1789_v30 = vpop.f32.mrf.mxu0 }
 0xc1a   :  { %v1793_v31 = vsel %vm1617_vm2, %v1789_v30, -inf }
 0xc1b   :  { %v4865_v40 = vpop.f32.mrf.mxu0 }
 0xc1c   :  { %1794 = vmax.xlane.f32.xlu0 %v1793_v31 }
 0xc21   :  { %v4881_v14 = vpop.f32.mrf.mxu0 }
 0xc22   :  { %v2425_v50 = vrot.slane %v4881_v14, 6  ;;  %v1213_v14 = vld [vmem:[%s5513_s9 + $0x48] sm:$0xff] }
 0xc23   :  { %v1952_v15 = vpop.f32.mrf.mxu0 }
 0xc24   :  { %v2424_v48 = vrot.slane %v1952_v15, 6 }
 0xc29   :  { %v4903_v17 = vpop.f32.mrf.mxu0 }
 0xc2b   :  { %v2102_v18 = vpop.f32.mrf.mxu0 }
 0xc2c   :  { %v2520_v43 = vrot.slane %v2102_v18, 6 }
 0xca1   :  { %v1620_v0 = vpop.xlane.xlu0 %1619 }
 0xca2   :  { %v1621_v41 = vsub.f32 %v1613_v25, %v1620_v0 }
 0xca4   :  { %v1622_v44 = vmul.f32 1.442695, %v1621_v41 }
 0xca5   :  { %v1795_v45 = vpop.xlane.xlu0 %1794 }
 0xca6   :  { %5184 = vpow2.f32 %v1622_v44  ;;  %v1796_v46 = vsub.f32 %v1789_v30, %v1795_v45  ;;  %v1253_v30 = vld [vmem:[%s5662_s29 + $0x8] sm:$0xff]  ;;  %v2521_v44 = vrot.slane %v4903_v17, 6 }
 0xca7   :  { %4915 = vmatpush3.msra.mxu0 %v1253_v30 }
 0xca8   :  { %v1797_v47 = vmul.f32 1.442695, %v1796_v46  ;;  %4924 = vmatprep.subr.mxu0 %v5226_v7  ;;  %v2522_v45 = vsel %vm1711_vm15, %v2520_v43, %v2521_v44 }
 0xcaa   :  { %5186 = vpow2.f32 %v1797_v47 }
 0xcb3   :  { %v5185_v52 = vpop.eup %5184 }
 0xcb4   :  { %v1624_v53 = vmul.f32 %v5185_v52, %v5619_v51 }
 0xcb6   :  { %v1626_v54 = vsel %vm1617_vm2, %v1624_v53, 0.0  ;;  %v1625_v35 = vadd.f32 1.6666667e-07, %v1624_v53  ;;  %v2426_v53 = vsel %vm1711_vm15, %v2424_v48, %v2425_v50 }
 0xcb7   :  { %v5187_v55 = vpop.eup %5186  ;;  %1627 = vadd.xlane.f32.xlu1 %v1626_v54 }
 0xcb8   :  { %v1799_v57 = vmul.f32 %v5187_v55, %v5623_v9 }
 0xcba   :  { %v1801_v60 = vsel %vm1617_vm2, %v1799_v57, 0.0  ;;  %v1800_v3 = vadd.f32 1.6666667e-07, %v1799_v57 }
 0xcbb   :  { %1802 = vadd.xlane.f32.xlu0 %v1801_v60 }
 0xd40   :  { %v1628_v10 = vpop.xlane.xlu1 %1627 }
 0xd41   :  { %v1629_v34 = vadd.f32 1e-06, %v1628_v10 }
 0xd43   :  { %5188 = vrcp.f32 %v1629_v34 }
 0xd44   :  { %v1803_v13 = vpop.xlane.xlu0 %1802 }
 0xd45   :  { %v1804_v32 = vadd.f32 1e-06, %v1803_v13 }
 0xd47   :  { %5190 = vrcp.f32 %v1804_v32 }
 0xd50   :  { %v5189_v61 = vpop.eup %5188 }
 0xd51   :  { %v1631_v28 = vmul.f32 %v5189_v61, %v1625_v35 }
 0xd53   :  { %4859 = vmatmul.mubr.msk.f32.vlgmr.msra.gmra.mxu1 %vm1632_vm5, %v1631_v28 }
 0xd54   :  { %v5191_v37 = vpop.eup %5190  ;;  %4867 = vmatpush3.msk.msra.mxu1 %vm1636_vm0, %v1810_v58  ;;  %4868 = vmatprep.mubr.msk.f32.mxu1 %vm5228_vm1, %v5226_v7 }
 0xd55   :  { %4882 = vmatprep.subr.mxu1 %v1227_v62  ;;  %v1806_v1 = vmul.f32 %v5191_v37, %v1800_v3 }
 0xd57   :  { %4869 = vmatmul.mubr.msk.f32.vlgmr.msra.gmra.mxu1 %vm1632_vm5, %v1806_v1  ;;  %v1231_v1 = vld [vmem:[%s5555_s26 + $0x58] sm:$0xff] }
 0xd58   :  { %4883 = vmatpush3.msra.mxu1 %v1227_v62  ;;  %4890 = vmatprep.mubr.msk.f32.mxu1 %vm173_vm3, %v5534_v56 }
 0xd59   :  { %4884 = vmatprep.subr.mxu1 %v1226_v2 }
 0xd5a   :  { %4885 = vmatpush3.msra.mxu1 %v1226_v2  ;;  %v1230_v2 = vld [vmem:[%s5555_s26 + $0x50] sm:$0xff] }
 0xd5b   :  { %4886 = vmatprep.subr.mxu1 %v1225_v59 }
 0xd5c   :  { %4887 = vmatpush3.msra.mxu1 %v1225_v59  ;;  %v1229_v59 = vld [vmem:[%s5555_s26 + $0x48] sm:$0xff] }
 0xd5d   :  { %4888 = vmatprep.subr.mxu1 %v1224_v63 }
 0xd5e   :  { %4889 = vmatpush3.msra.mxu1 %v1224_v63  ;;  %v1228_v63 = vld [vmem:[%s5555_s26 + $0x40] sm:$0xff] }
 0xd5f   :  { %4891 = vmatmul.mubr.msk.f32.vlgmr.msra.gmra.mxu1 %vm173_vm3, %v5536_v11  ;;  %4904 = vmatprep.subr.mxu1 %v5226_v7 }
 0xd60   :  { %4906 = vmatprep.mubr.msk.f32.mxu1 %vm5228_vm1, %v5226_v7 }
 0xe13   :  { %v1706_v5 = vpop.f32.mrf.mxu1 }
 0xe15   :  { %v4860_v6 = vpop.f32.mrf.mxu1 }
 0xe17   :  { %v5647_v12 = vpop.f32.mrf.mxu1 }
 0xe19   :  { %v4870_v4 = vpop.f32.mrf.mxu1 }
 0xe1f   :  { %v4892_v16 = vpop.f32.mrf.mxu1 }
 0xe20   :  { %v2429_v47 = vrot.slane %v4892_v16, 6  ;;  %v1212_v16 = vld [vmem:[%s5513_s9 + $0x40] sm:$0xff] }
 0xe21   :  { %v2027_v19 = vpop.f32.mrf.mxu1 }
 0xe22   :  { %4905 = vmatpush3.xpose.msk.msra.mxu1 %vm478_vm9, %v2027_v19  ;;  %v2428_v46 = vrot.slane %v2027_v19, 6  ;;  %v1247_v19 = vld [vmem:[%s5520_s14 + $0x58] sm:$0xff] }
 0xe23   :  { %4909 = vmatprep.subr.mxu1 %v5226_v7 }
 0xe24   :  { %v2430_v8 = vsel %vm1711_vm15, %v2428_v46, %v2429_v47 }
 0xe25   :  { %4907 = vmatmul.mubr.msk.f32.vlgmr.msra.gmra.mxu1 %vm478_vm9, %v1952_v15 }
 0xe26   :  { %4910 = vmatpush3.msk.msra.mxu1 %vm1636_vm0, %v2102_v18  ;;  %4911 = vmatprep.mubr.msk.f32.mxu1 %vm5228_vm1, %v5226_v7  ;;  %v1246_v18 = vld [vmem:[%s5520_s14 + $0x50] sm:$0xff] }
 0xe27   :  { %4919 = vmatprep.subr.mxu1 %v5226_v7 }
 0xee5   :  { %v2183_v20 = vpop.f32.mrf.mxu1 }
 0xee6   :  { %v2187_v21 = vsel %vm1617_vm2, %v2183_v20, -inf }
 0xee7   :  { %2188 = vmax.xlane.f32.xlu0 %v2187_v21  ;;  %v4908_v39 = vpop.f32.mrf.mxu1 }
 0xee8   :  { %v1244_v39 = vld [vmem:[%s5520_s14 + $0x40] sm:$0xff] }
 0xf70   :  { %v2189_v22 = vpop.xlane.xlu0 %2188 }
 0xf71   :  { %v2190_v23 = vsub.f32 %v2183_v20, %v2189_v22  ;;  %v1245_v20 = vld [vmem:[%s5520_s14 + $0x48] sm:$0xff] }
 0xf73   :  { %v2191_v24 = vmul.f32 1.442695, %v2190_v23 }
 0xf75   :  { %5192 = vpow2.f32 %v2191_v24 }
 0xf82   :  { %v5193_v25 = vpop.eup %5192 }
 0xf83   :  { %v2193_v27 = vmul.f32 %v5193_v25, %v5619_v51 }
 0xf85   :  { %v2195_v29 = vsel %vm1617_vm2, %v2193_v27, 0.0  ;;  %v2194_v26 = vadd.f32 1.6666667e-07, %v2193_v27 }
 0xf86   :  { %2196 = vadd.xlane.f32.xlu0 %v2195_v29 }
0x100f   :  { %v2197_v31 = vpop.xlane.xlu0 %2196 }
0x1010   :  { %v2198_v40 = vadd.f32 1e-06, %v2197_v31 }
0x1012   :  { %5194 = vrcp.f32 %v2198_v40 }
0x101f   :  { %v5195_v0 = vpop.eup %5194 }
0x1020   :  { %v2200_v41 = vmul.f32 %v5195_v0, %v2194_v26 }
0x1022   :  { %4912 = vmatmul.mubr.msk.f32.vlgmr.msra.gmra.mxu1 %vm1632_vm5, %v2200_v41 }
0x1023   :  { %4920 = vmatpush3.msra.mxu1 %v1252_v42  ;;  %4921 = vmatprep.mubr.msk.f32.mxu1 %vm5228_vm1, %v5226_v7 }
0x1024   :  { %4929 = vmatprep.subr.mxu1 %v5226_v7 }
0x1026   :  { %4922 = vmatmul.mubr.msk.f32.vlgmr.msra.gmra.mxu1 %vm478_vm9, %v1706_v5  ;;  %v1215_v5 = vld [vmem:[%s5513_s9 + $0x58] sm:$0xff] }
0x1027   :  { %4930 = vmatpush3.msk.msra.mxu1 %vm1636_vm0, %v2522_v45  ;;  %4931 = vmatprep.mubr.msk.f32.mxu1 %vm5228_vm1, %v5226_v7 }
0x1028   :  { %4939 = vmatprep.subr.mxu1 %v5226_v7 }
0x10e2   :  { %v2273_v49 = vpop.f32.mrf.mxu1 }
0x10e3   :  { %4917 = vmatmul.mubr.msk.f32.vlgmr.msra.gmra.mxu0 %vm478_vm9, %v2273_v49  ;;  %v1254_v49 = vld [vmem:[%s5662_s29 + $0x10] sm:$0xff] }
0x10e4   :  { %4925 = vmatpush3.xpose.msk.msra.mxu0 %vm478_vm9, %v2430_v8  ;;  %v4913_v38 = vpop.f32.mrf.mxu1  ;;  %4926 = vmatprep.mubr.msk.f32.mxu0 %vm5228_vm1, %v5226_v7 }
0x10e5   :  { %4934 = vmatprep.subr.mxu0 %v5226_v7 }
0x10e6   :  { %v5683_v52 = vpop.f32.mrf.mxu1 }
0x10e7   :  { %4927 = vmatmul.mubr.msk.f32.vlgmr.msra.gmra.mxu0 %vm478_vm9, %v2426_v53 }
0x10e8   :  { %v4923_v54 = vpop.f32.mrf.mxu1  ;;  %4935 = vmatpush3.msra.mxu0 %v1253_v30  ;;  %4936 = vmatprep.mubr.msk.f32.mxu0 %vm5228_vm1, %v5226_v7 }
0x10e9   :  { %4944 = vmatprep.subr.mxu0 %v1215_v5 }
0x11a3   :  { %v5689_v55 = vpop.f32.mrf.mxu0 }
0x11a5   :  { %v4918_v57 = vpop.f32.mrf.mxu0 }
0x11a7   :  { %v2501_v60 = vpop.f32.mrf.mxu0 }
0x11a8   :  { %v2505_v10 = vsel %vm1617_vm2, %v2501_v60, -inf }
0x11a9   :  { %2506 = vmax.xlane.f32.xlu0 %v2505_v10  ;;  %v4928_v34 = vpop.f32.mrf.mxu0 }
0x1232   :  { %v2507_v13 = vpop.xlane.xlu0 %2506 }
0x1233   :  { %v2508_v32 = vsub.f32 %v2501_v60, %v2507_v13 }
0x1235   :  { %v2509_v33 = vmul.f32 1.442695, %v2508_v32 }
0x1237   :  { %5196 = vpow2.f32 %v2509_v33 }
0x1244   :  { %v5197_v35 = vpop.eup %5196 }
0x1245   :  { %v2511_v61 = vmul.f32 %v5197_v35, %v5623_v9 }
0x1247   :  { %v2513_v36 = vsel %vm1617_vm2, %v2511_v61, 0.0  ;;  %v2512_v3 = vadd.f32 1.6666667e-07, %v2511_v61 }
0x1248   :  { %2514 = vadd.xlane.f32.xlu0 %v2513_v36 }
0x12d1   :  { %v2515_v28 = vpop.xlane.xlu0 %2514 }
0x12d2   :  { %v2516_v62 = vadd.f32 1e-06, %v2515_v28 }
0x12d4   :  { %5198 = vrcp.f32 %v2516_v62 }
0x12e1   :  { %v5199_v58 = vpop.eup %5198 }
0x12e2   :  { %v2518_v37 = vmul.f32 %v5199_v58, %v2512_v3 }
0x12e4   :  { %4932 = vmatmul.mubr.msk.f32.vlgmr.msra.gmra.mxu1 %vm1632_vm5, %v2518_v37 }
0x12e5   :  { %4940 = vmatpush3.msra.mxu1 %v1252_v42  ;;  %4941 = vmatprep.mubr.msk.f32.mxu1 %vm5228_vm1, %v5226_v7 }
0x12e6   :  { %4955 = vmatprep.subr.mxu1 %v1231_v1 }
0x12e8   :  { %4942 = vmatmul.mubr.msk.f32.vlgmr.msra.gmra.mxu1 %vm478_vm9, %v5647_v12  ;;  %v1214_v12 = vld [vmem:[%s5513_s9 + $0x50] sm:$0xff] }
0x12e9   :  { %4956 = vmatpush3.msra.mxu1 %v1231_v1  ;;  %4963 = vmatprep.mubr.msk.f32.mxu1 %vm173_vm3, %v5534_v56 }
0x12ea   :  { %4957 = vmatprep.subr.mxu1 %v1230_v2 }
0x12eb   :  { %4958 = vmatpush3.msra.mxu1 %v1230_v2 }
0x12ec   :  { %4959 = vmatprep.subr.mxu1 %v1229_v59 }
0x12ed   :  { %4960 = vmatpush3.msra.mxu1 %v1229_v59  ;;  %v1219_v59 = vld [vmem:[%s5513_s9 + $0x78] sm:$0xff] }
0x12ee   :  { %4961 = vmatprep.subr.mxu1 %v1228_v63 }
0x12ef   :  { %4962 = vmatpush3.msra.mxu1 %v1228_v63  ;;  %v2420_v63 = vadd.f32 %v5683_v52, %v5689_v55  ;;  %v1217_v52 = vld [vmem:[%s5513_s9 + $0x68] sm:$0xff]  ;;  %v1216_v55 = vld [vmem:[%s5513_s9 + $0x60] sm:$0xff] }
0x12f0   :  { %4964 = vmatmul.mubr.msk.f32.vlgmr.msra.gmra.mxu1 %vm173_vm3, %v5536_v11  ;;  %4977 = vmatprep.subr.mxu1 %v5226_v7 }
0x12f1   :  { %4979 = vmatprep.mubr.msk.f32.mxu1 %vm5228_vm1, %v5226_v7 }
0x13a4   :  { %v2594_v6 = vpop.f32.mrf.mxu1 }
0x13a5   :  { %4937 = vmatmul.mubr.msk.f32.vlgmr.msra.gmra.mxu0 %vm478_vm9, %v2594_v6 }
0x13a6   :  { %4945 = vmatpush3.msra.mxu0 %v1215_v5  ;;  %v4933_v4 = vpop.f32.mrf.mxu1  ;;  %4952 = vmatprep.mubr.msk.f32.mxu0 %vm173_vm3, %v5534_v56 }
0x13a7   :  { %4946 = vmatprep.subr.mxu0 %v1214_v12 }
0x13a8   :  { %4947 = vmatpush3.msra.mxu0 %v1214_v12  ;;  %v5716_v15 = vpop.f32.mrf.mxu1 }
0x13a9   :  { %4948 = vmatprep.subr.mxu0 %v1213_v14 }
0x13aa   :  { %4949 = vmatpush3.msra.mxu0 %v1213_v14  ;;  %v4943_v17 = vpop.f32.mrf.mxu1 }
0x13ab   :  { %4950 = vmatprep.subr.mxu0 %v1212_v16 }
0x13ac   :  { %4951 = vmatpush3.msra.mxu0 %v1212_v16 }
0x13ad   :  { %4953 = vmatmul.mubr.msk.f32.vlgmr.msra.gmra.mxu0 %vm173_vm3, %v5536_v11  ;;  %4966 = vmatprep.subr.mxu0 %v1247_v19 }
0x13ae   :  { %4967 = vmatpush3.msra.mxu0 %v1247_v19  ;;  %4974 = vmatprep.mubr.msk.f32.mxu0 %vm173_vm3, %v5534_v56 }
0x13af   :  { %4968 = vmatprep.subr.mxu0 %v1246_v18 }
0x13b0   :  { %v4965_v21 = vpop.f32.mrf.mxu1  ;;  %4969 = vmatpush3.msra.mxu0 %v1246_v18  ;;  %v1218_v18 = vld [vmem:[%s5513_s9 + $0x70] sm:$0xff] }
0x13b1   :  { %4970 = vmatprep.subr.mxu0 %v1245_v20  ;;  %v3215_v57 = vrot.slane %v4965_v21, 6  ;;  %v1250_v21 = vld [vmem:[%s5520_s14 + $0x70] sm:$0xff] }
0x13b2   :  { %v2885_v22 = vpop.f32.mrf.mxu1  ;;  %4971 = vmatpush3.msra.mxu0 %v1245_v20  ;;  %v1251_v20 = vld [vmem:[%s5520_s14 + $0x78] sm:$0xff] }
0x13b3   :  { %4972 = vmatprep.subr.mxu0 %v1244_v39  ;;  %4978 = vmatpush3.xpose.msk.msra.mxu1 %vm478_vm9, %v2885_v22  ;;  %v3214_v38 = vrot.slane %v2885_v22, 6  ;;  %v1248_v22 = vld [vmem:[%s5520_s14 + $0x60] sm:$0xff] }
0x13b4   :  { %4973 = vmatpush3.msra.mxu0 %v1244_v39  ;;  %4982 = vmatprep.subr.mxu1 %v5226_v7  ;;  %v1249_v39 = vld [vmem:[%s5520_s14 + $0x68] sm:$0xff] }
0x13b5   :  { %4975 = vmatmul.mubr.msk.f32.vlgmr.msra.gmra.mxu0 %vm173_vm3, %v5536_v11  ;;  %4987 = vmatprep.subr.mxu0 %v5226_v7  ;;  %v3216_v10 = vsel %vm1711_vm15, %v3214_v38, %v3215_v57 }
0x13b6   :  { %4989 = vmatprep.mubr.msk.f32.mxu0 %vm5228_vm1, %v5226_v7  ;;  %4988 = vmatpush3.msra.mxu0 %v1254_v49 }
0x13b7   :  { %4997 = vmatprep.subr.mxu0 %v5226_v7 }
0x1465   :  { %v5734_v23 = vpop.f32.mrf.mxu0 }
0x1467   :  { %v4938_v24 = vpop.f32.mrf.mxu0 }
0x1468   :  { %v1235_v24 = vld [vmem:[%s5555_s26 + $0x78] sm:$0xff] }
0x146d   :  { %v4954_v25 = vpop.f32.mrf.mxu0 }
0x146e   :  { %v3211_v29 = vrot.slane %v4954_v25, 6 }
0x146f   :  { %v2810_v27 = vpop.f32.mrf.mxu0 }
0x1470   :  { %v3210_v30 = vrot.slane %v2810_v27, 6  ;;  %4980 = vmatmul.mubr.msk.f32.vlgmr.msra.gmra.mxu1 %vm478_vm9, %v2810_v27  ;;  %v1234_v27 = vld [vmem:[%s5555_s26 + $0x70] sm:$0xff] }
0x1471   :  { %4984 = vmatprep.mubr.msk.f32.mxu1 %vm5228_vm1, %v5226_v7 }
0x1472   :  { %v3212_v31 = vsel %vm1711_vm15, %v3210_v30, %v3211_v29  ;;  %v1233_v30 = vld [vmem:[%s5555_s26 + $0x68] sm:$0xff] }
0x1475   :  { %v4976_v40 = vpop.f32.mrf.mxu0 }
0x1476   :  { %v3307_v13 = vrot.slane %v4976_v40, 6  ;;  %v2741_v40 = vadd.f32 %v5716_v15, %v5734_v23 }
0x1477   :  { %v2960_v26 = vpop.f32.mrf.mxu0 }
0x1478   :  { %4983 = vmatpush3.msk.msra.mxu1 %vm1636_vm0, %v2960_v26  ;;  %v3306_v34 = vrot.slane %v2960_v26, 6 }
0x1479   :  { %4992 = vmatprep.subr.mxu1 %v5226_v7 }
0x147a   :  { %v3308_v33 = vsel %vm1711_vm15, %v3306_v34, %v3307_v13 }
0x1530   :  { %v3041_v0 = vpop.f32.mrf.mxu1 }
0x1531   :  { %v3045_v41 = vsel %vm1617_vm2, %v3041_v0, -inf }
0x1532   :  { %3046 = vmax.xlane.f32.xlu0 %v3045_v41  ;;  %v4981_v42 = vpop.f32.mrf.mxu1 }
0x15bb   :  { %v3047_v43 = vpop.xlane.xlu0 %3046 }
0x15bc   :  { %v3048_v44 = vsub.f32 %v3041_v0, %v3047_v43 }
0x15be   :  { %v3049_v45 = vmul.f32 1.442695, %v3048_v44 }
0x15c0   :  { %5200 = vpow2.f32 %v3049_v45 }
0x15cd   :  { %v5201_v46 = vpop.eup %5200 }
0x15ce   :  { %v3051_v47 = vmul.f32 %v5201_v46, %v5619_v51 }
0x15d0   :  { %v3053_v48 = vsel %vm1617_vm2, %v3051_v47, 0.0  ;;  %v3052_v53 = vadd.f32 1.6666667e-07, %v3051_v47 }
0x15d1   :  { %3054 = vadd.xlane.f32.xlu0 %v3053_v48 }
0x165a   :  { %v3055_v8 = vpop.xlane.xlu0 %3054 }
0x165b   :  { %v3056_v50 = vadd.f32 1e-06, %v3055_v8 }
0x165d   :  { %5202 = vrcp.f32 %v3056_v50 }
0x166a   :  { %v5203_v54 = vpop.eup %5202 }
0x166b   :  { %v3058_v60 = vmul.f32 %v5203_v54, %v3052_v53  ;;  %v1255_v53 = vld [vmem:[%s5662_s29 + $0x18] sm:$0xff] }
0x166d   :  { %4985 = vmatmul.mubr.msk.f32.vlgmr.msra.gmra.mxu1 %vm1632_vm5, %v3058_v60 }
0x166e   :  { %4993 = vmatpush3.xpose.msk.msra.mxu1 %vm478_vm9, %v3216_v10  ;;  %4994 = vmatprep.mubr.msk.f32.mxu1 %vm5228_vm1, %v5226_v7 }
0x166f   :  { %5002 = vmatprep.subr.mxu1 %v5226_v7 }
0x1671   :  { %4995 = vmatmul.mubr.msk.f32.vlgmr.msra.gmra.mxu1 %vm478_vm9, %v3212_v31  ;;  %v1232_v31 = vld [vmem:[%s5555_s26 + $0x60] sm:$0xff] }
0x1672   :  { %5003 = vmatpush3.msra.mxu1 %v1254_v49  ;;  %5004 = vmatprep.mubr.msk.f32.mxu1 %vm5228_vm1, %v5226_v7 }
0x1673   :  { %5018 = vmatprep.subr.mxu1 %v1235_v24 }
0x172d   :  { %v3131_v32 = vpop.f32.mrf.mxu1 }
0x172e   :  { %4990 = vmatmul.mubr.msk.f32.vlgmr.msra.gmra.mxu0 %vm478_vm9, %v3131_v32 }
0x172f   :  { %4998 = vmatpush3.msk.msra.mxu0 %vm1636_vm0, %v3308_v33  ;;  %v4986_v35 = vpop.f32.mrf.mxu1  ;;  %4999 = vmatprep.mubr.msk.f32.mxu0 %vm5228_vm1, %v5226_v7 }
0x1730   :  { %5007 = vmatprep.subr.mxu0 %v1219_v59 }
0x1731   :  { %v3287_v61 = vpop.f32.mrf.mxu1 }
0x1732   :  { %v3291_v36 = vsel %vm1617_vm2, %v3287_v61, -inf }
0x1733   :  { %3292 = vmax.xlane.f32.xlu0 %v3291_v36  ;;  %v4996_v28 = vpop.f32.mrf.mxu1 }
0x17bc   :  { %v3293_v62 = vpop.xlane.xlu0 %3292 }
0x17bd   :  { %v3294_v3 = vsub.f32 %v3287_v61, %v3293_v62 }
0x17bf   :  { %v3295_v58 = vmul.f32 1.442695, %v3294_v3 }
0x17c1   :  { %5204 = vpow2.f32 %v3295_v58 }
0x17ce   :  { %v5205_v37 = vpop.eup %5204 }
0x17cf   :  { %v3297_v1 = vmul.f32 %v5205_v37, %v5623_v9 }
0x17d1   :  { %v3299_v2 = vsel %vm1617_vm2, %v3297_v1, 0.0  ;;  %v3298_v16 = vadd.f32 1.6666667e-07, %v3297_v1 }
0x17d2   :  { %3300 = vadd.xlane.f32.xlu0 %v3299_v2 }
0x17ee   :  { %v3204_v5 = vpop.f32.mrf.mxu0 }
0x17ef   :  { %v5767_v6 = vadd.f32 %v3204_v5, %v2420_v63 }
0x17f0   :  { %v4991_v12 = vpop.f32.mrf.mxu0 }
0x185b   :  { %v3301_v4 = vpop.xlane.xlu0 %3300 }
0x185c   :  { %v3302_v14 = vadd.f32 1e-06, %v3301_v4 }
0x185e   :  { %5206 = vrcp.f32 %v3302_v14 }
0x186b   :  { %v5207_v17 = vpop.eup %5206 }
0x186c   :  { %v3304_v19 = vmul.f32 %v5207_v17, %v3298_v16 }
0x186e   :  { %5000 = vmatmul.mubr.msk.f32.vlgmr.msra.gmra.mxu0 %vm1632_vm5, %v3304_v19 }
0x186f   :  { %5008 = vmatpush3.msra.mxu0 %v1219_v59  ;;  %5015 = vmatprep.mubr.msk.f32.mxu0 %vm173_vm3, %v5534_v56 }
0x1870   :  { %5009 = vmatprep.subr.mxu0 %v1218_v18 }
0x1871   :  { %5010 = vmatpush3.msra.mxu0 %v1218_v18 }
0x1872   :  { %5011 = vmatprep.subr.mxu0 %v1217_v52 }
0x1873   :  { %5012 = vmatpush3.msra.mxu0 %v1217_v52 }
0x1874   :  { %5013 = vmatprep.subr.mxu0 %v1216_v55 }
0x1875   :  { %5014 = vmatpush3.msra.mxu0 %v1216_v55 }
0x1876   :  { %5016 = vmatmul.mubr.msk.f32.vlgmr.msra.gmra.mxu0 %vm173_vm3, %v5536_v11  ;;  %5029 = vmatprep.subr.mxu0 %v1251_v20 }
0x1877   :  { %5030 = vmatpush3.msra.mxu0 %v1251_v20  ;;  %5037 = vmatprep.mubr.msk.f32.mxu0 %vm173_vm3, %v5534_v56 }
0x1878   :  { %5031 = vmatprep.subr.mxu0 %v1250_v21 }
0x1879   :  { %5032 = vmatpush3.msra.mxu0 %v1250_v21 }
0x187a   :  { %5033 = vmatprep.subr.mxu0 %v1249_v39 }
0x187b   :  { %5034 = vmatpush3.msra.mxu0 %v1249_v39 }
0x187c   :  { %5035 = vmatprep.subr.mxu0 %v1248_v22 }
0x187d   :  { %5036 = vmatpush3.msra.mxu0 %v1248_v22 }
0x187e   :  { %5038 = vmatmul.mubr.msk.f32.vlgmr.msra.gmra.mxu0 %vm173_vm3, %v5536_v11  ;;  %5050 = vmatprep.subr.mxu0 %v5226_v7 }
0x187f   :  { %5052 = vmatprep.mubr.msk.f32.mxu0 %vm5228_vm1, %v5226_v7  ;;  %5051 = vmatpush3.msra.mxu0 %v1255_v53 }
0x1880   :  { %5060 = vmatprep.subr.mxu0 %v5226_v7 }
0x192e   :  { %v3380_v25 = vpop.f32.mrf.mxu0 }
0x192f   :  { %5005 = vmatmul.mubr.msk.f32.vlgmr.msra.gmra.mxu1 %vm478_vm9, %v3380_v25  ;;  %v4543_v25 = vld [vmem:[%s4437_s3] ss:$0 sm:$0xff] }
0x1930   :  { %5019 = vmatpush3.msra.mxu1 %v1235_v24  ;;  %v5001_v29 = vpop.f32.mrf.mxu0  ;;  %5026 = vmatprep.mubr.msk.f32.mxu1 %vm173_vm3, %v5534_v56 }
0x1931   :  { %5020 = vmatprep.subr.mxu1 %v1234_v27  ;;  %v5224_v29 = vld [vmem:[%s5268_s5 + $0x8] sm:$0xf] }
0x1932   :  { %5021 = vmatpush3.msra.mxu1 %v1234_v27 }
0x1933   :  { %5022 = vmatprep.subr.mxu1 %v1233_v30 }
0x1934   :  { %5023 = vmatpush3.msra.mxu1 %v1233_v30 }
0x1935   :  { %5024 = vmatprep.subr.mxu1 %v1232_v31 }
0x1936   :  { %5025 = vmatpush3.msra.mxu1 %v1232_v31  ;;  %v5017_v41 = vpop.f32.mrf.mxu0  ;;  %v5225_v31 = vld [vmem:[%s5268_s5] sm:$0xff]  ;;  %s5253_s5 = smov 23  }
0x1937   :  { %5027 = vmatmul.mubr.msk.f32.vlgmr.msra.gmra.mxu1 %vm173_vm3, %v5536_v11  ;;  %5040 = vmatprep.subr.mxu1 %v5226_v7  ;;  %v3925_v35 = vrot.slane %v5017_v41, 6  ;;  %s4440_s7 = sld [smem:[%s5901_s0 + %s5253_s5]]  }
0x1938   :  { %5042 = vmatprep.mubr.msk.f32.mxu1 %vm5228_vm1, %v5226_v7  ;;  %v3524_v42 = vpop.f32.mrf.mxu0 }
0x1939   :  { %v3924_v33 = vrot.slane %v3524_v42, 6 }
0x193b   :  { %v3926_v61 = vsel %vm1711_vm15, %v3924_v33, %v3925_v35  ;;  %v4544_v35 = vld [vmem:[%s4438_s16] ss:$0 sm:$0xff] }
0x193e   :  { %v5039_v44 = vpop.f32.mrf.mxu0 }
0x193f   :  { %v4021_v28 = vrot.slane %v5039_v44, 6 }
0x1940   :  { %v3674_v11 = vpop.f32.mrf.mxu0 }
0x1941   :  { %v4020_v36 = vrot.slane %v3674_v11, 6 }
0x1943   :  { %v4022_v3 = vsel %vm1711_vm15, %v4020_v36, %v4021_v28 }
0x19ef   :  { %v3453_v56 = vpop.f32.mrf.mxu1 }
0x19f0   :  { %v5802_v26 = vadd.f32 %v3453_v56, %v2741_v40 }
0x19f1   :  { %v5006_v0 = vpop.f32.mrf.mxu1 }
0x19f7   :  { %v5028_v43 = vpop.f32.mrf.mxu1 }
0x19f8   :  { %v3929_v13 = vrot.slane %v5028_v43, 6 }
0x19f9   :  { %v3599_v45 = vpop.f32.mrf.mxu1 }
0x19fa   :  { %5041 = vmatpush3.xpose.msk.msra.mxu1 %vm478_vm9, %v3599_v45  ;;  %v3928_v60 = vrot.slane %v3599_v45, 6 }
0x19fb   :  { %5045 = vmatprep.subr.mxu1 %v5226_v7 }
0x19fd   :  { %5043 = vmatmul.mubr.msk.f32.vlgmr.msra.gmra.mxu1 %vm478_vm9, %v3524_v42 }
0x19fe   :  { %5046 = vmatpush3.msk.msra.mxu1 %vm1636_vm0, %v3674_v11  ;;  %5047 = vmatprep.mubr.msk.f32.mxu1 %vm5228_vm1, %v5226_v7 }
0x19ff   :  { %5055 = vmatprep.subr.mxu1 %v5226_v7 }
0x1abd   :  { %v3755_v15 = vpop.f32.mrf.mxu1 }
0x1abe   :  { %v3759_v23 = vsel %vm1617_vm2, %v3755_v15, -inf }
0x1abf   :  { %3760 = vmax.xlane.f32.xlu1 %v3759_v23  ;;  %v5044_v46 = vpop.f32.mrf.mxu1 }
0x1b48   :  { %v3761_v47 = vpop.xlane.xlu1 %3760 }
0x1b49   :  { %v3762_v48 = vsub.f32 %v3755_v15, %v3761_v47 }
0x1b4b   :  { %v3763_v49 = vmul.f32 1.442695, %v3762_v48 }
0x1b4d   :  { %5208 = vpow2.f32 %v3763_v49  ;;  %v1262_v49 = vld [vmem:[%s4440_s7 + $0x18] sm:$0xff] }
0x1b5a   :  { %v5209_v8 = vpop.eup %5208 }
0x1b5b   :  { %v3765_v50 = vmul.f32 %v5209_v8, %v5619_v51  ;;  %v3930_v51 = vsel %vm1711_vm15, %v3928_v60, %v3929_v13  ;;  %v1261_v8 = vld [vmem:[%s4440_s7 + $0x10] sm:$0xff] }
0x1b5d   :  { %v3767_v38 = vsel %vm1617_vm2, %v3765_v50, 0.0  ;;  %v3766_v10 = vadd.f32 1.6666667e-07, %v3765_v50  ;;  %v1260_v50 = vld [vmem:[%s4440_s7 + $0x8] sm:$0xff] }
0x1b5e   :  { %3768 = vadd.xlane.f32.xlu0 %v3767_v38  ;;  %v1259_v38 = vld [vmem:[%s4440_s7] sm:$0xff] }
0x1be7   :  { %v3769_v54 = vpop.xlane.xlu0 %3768 }
0x1be8   :  { %v3770_v57 = vadd.f32 1e-06, %v3769_v54  ;;  %v1278_v54 = vld [vmem:[%s5862_s11 + $0x70] sm:$0xff] }
0x1bea   :  { %5210 = vrcp.f32 %v3770_v57  ;;  %v1277_v57 = vld [vmem:[%s5862_s11 + $0x68] sm:$0xff] }
0x1bf7   :  { %v5211_v34 = vpop.eup %5210 }
0x1bf8   :  { %v3772_v32 = vmul.f32 %v5211_v34, %v3766_v10 }
0x1bfa   :  { %5048 = vmatmul.mubr.msk.f32.vlgmr.msra.gmra.mxu1 %vm1632_vm5, %v3772_v32 }
0x1bfb   :  { %5056 = vmatpush3.xpose.msk.msra.mxu1 %vm478_vm9, %v3930_v51  ;;  %5057 = vmatprep.mubr.msk.f32.mxu1 %vm5228_vm1, %v5226_v7 }
0x1bfc   :  { %5065 = vmatprep.subr.mxu1 %v5226_v7 }
0x1bfe   :  { %5058 = vmatmul.mubr.msk.f32.vlgmr.msra.gmra.mxu1 %vm478_vm9, %v3926_v61 }
0x1bff   :  { %5066 = vmatpush3.msra.mxu1 %v1255_v53  ;;  %5067 = vmatprep.mubr.msk.f32.mxu1 %vm5228_vm1, %v5226_v7  ;;  %v1279_v53 = vld [vmem:[%s5862_s11 + $0x78] sm:$0xff] }
0x1c00   :  { %5081 = vmatprep.subr.mxu1 %v1279_v53 }
0x1cba   :  { %v3845_v62 = vpop.f32.mrf.mxu1 }
0x1cbb   :  { %5053 = vmatmul.mubr.msk.f32.vlgmr.msra.gmra.mxu0 %vm478_vm9, %v3845_v62  ;;  %v4545_v62 = vld [vmem:[%s4439_s20] ss:$0 sm:$0xff] }
0x1cbc   :  { %5061 = vmatpush3.msk.msra.mxu0 %vm1636_vm0, %v4022_v3  ;;  %v5049_v58 = vpop.f32.mrf.mxu1  ;;  %5062 = vmatprep.mubr.msk.f32.mxu0 %vm5228_vm1, %v5226_v7 }
0x1cbd   :  { %5070 = vmatprep.subr.mxu0 %v1262_v49 }
0x1cbe   :  { %v4001_v37 = vpop.f32.mrf.mxu1 }
0x1cbf   :  { %v4005_v1 = vsel %vm1617_vm2, %v4001_v37, -inf }
0x1cc0   :  { %4006 = vmax.xlane.f32.xlu1 %v4005_v1  ;;  %v5059_v2 = vpop.f32.mrf.mxu1 }
0x1cc1   :  { %v1276_v2 = vld [vmem:[%s5862_s11 + $0x60] sm:$0xff] }
0x1d49   :  { %v4007_v59 = vpop.xlane.xlu1 %4006 }
0x1d4a   :  { %v4008_v63 = vsub.f32 %v4001_v37, %v4007_v59  ;;  %v1275_v59 = vld [vmem:[%s5862_s11 + $0x58] sm:$0xff] }
0x1d4c   :  { %v4009_v5 = vmul.f32 1.442695, %v4008_v63  ;;  %v1274_v63 = vld [vmem:[%s5862_s11 + $0x50] sm:$0xff] }
0x1d4e   :  { %5212 = vpow2.f32 %v4009_v5  ;;  %v1273_v5 = vld [vmem:[%s5862_s11 + $0x48] sm:$0xff] }
0x1d5b   :  { %v5213_v12 = vpop.eup %5212 }
0x1d5c   :  { %v4011_v4 = vmul.f32 %v5213_v12, %v5623_v9  ;;  %v1272_v12 = vld [vmem:[%s5862_s11 + $0x40] sm:$0xff] }
0x1d5e   :  { %v4013_v14 = vsel %vm1617_vm2, %v4011_v4, 0.0  ;;  %v4012_v52 = vadd.f32 1.6666667e-07, %v4011_v4  ;;  %v1271_v4 = vld [vmem:[%s5862_s11 + $0x38] sm:$0xff] }
0x1d5f   :  { %4014 = vadd.xlane.f32.xlu0 %v4013_v14  ;;  %v1270_v14 = vld [vmem:[%s5862_s11 + $0x30] sm:$0xff] }
0x1d7b   :  { %v3918_v16 = vpop.f32.mrf.mxu0 }
0x1d7c   :  { %v3922_v17 = vadd.f32 %v3918_v16, %v5767_v6  ;;  %v1269_v16 = vld [vmem:[%s5862_s11 + $0x28] sm:$0xff] }
0x1d7d   :  { %v5054_v19 = vpop.f32.mrf.mxu0 }
0x1d7e   :  { %v1267_v19 = vld [vmem:[%s5862_s11 + $0x18] sm:$0xff] }
0x1de8   :  { %v4015_v7 = vpop.xlane.xlu0 %4014 }
0x1de9   :  { %v4016_v18 = vadd.f32 1e-06, %v4015_v7  ;;  %v1266_v7 = vld [vmem:[%s5862_s11 + $0x10] sm:$0xff] }
0x1deb   :  { %5214 = vrcp.f32 %v4016_v18  ;;  %v1265_v18 = vld [vmem:[%s5862_s11 + $0x8] sm:$0xff] }
0x1df8   :  { %v5215_v55 = vpop.eup %5214 }
0x1df9   :  { %v4018_v20 = vmul.f32 %v5215_v55, %v4012_v52  ;;  %v1264_v52 = vld [vmem:[%s5862_s11] sm:$0xff] }
0x1dfa   :  { %v4546_v55 = vld [vmem:[%s4441_s24] ss:$0 sm:$0xff] }
0x1dfb   :  { %5063 = vmatmul.mubr.msk.f32.vlgmr.msra.gmra.mxu0 %vm1632_vm5, %v4018_v20 }
0x1dfc   :  { %5071 = vmatpush3.msra.mxu0 %v1262_v49 }
0x1dfd   :  { %5072 = vmatprep.subr.mxu0 %v1261_v8 }
0x1dfe   :  { %5073 = vmatpush3.msra.mxu0 %v1261_v8 }
0x1dff   :  { %5074 = vmatprep.subr.mxu0 %v1260_v50 }
0x1e00   :  { %5075 = vmatpush3.msra.mxu0 %v1260_v50 }
0x1e01   :  { %5076 = vmatprep.subr.mxu0 %v1259_v38 }
0x1e02   :  { %5077 = vmatpush3.msra.mxu0 %v1259_v38 }
0x1ebb   :  { %v4094_v21 = vpop.f32.mrf.mxu0 }
0x1ebc   :  { %5068 = vmatmul.mubr.msk.f32.vlgmr.msra.gmra.mxu1 %vm478_vm9, %v4094_v21 }
0x1ebd   :  { %v5064_v9 = vpop.f32.mrf.mxu0  ;;  %5082 = vmatpush3.msra.mxu1 %v1279_v53 }
0x1ebe   :  { %5083 = vmatprep.subr.mxu1 %v1278_v54 }
0x1ebf   :  { %5084 = vmatpush3.msra.mxu1 %v1278_v54 }
0x1ec0   :  { %5085 = vmatprep.subr.mxu1 %v1277_v57 }
0x1ec1   :  { %5086 = vmatpush3.msra.mxu1 %v1277_v57 }
0x1ec2   :  { %5087 = vmatprep.subr.mxu1 %v1276_v2 }
0x1ec3   :  { %5088 = vmatpush3.msra.mxu1 %v1276_v2 }
0x1ec4   :  { %5089 = vmatprep.subr.mxu1 %v1275_v59 }
0x1ec5   :  { %5090 = vmatpush3.msra.mxu1 %v1275_v59 }
0x1ec6   :  { %5091 = vmatprep.subr.mxu1 %v1274_v63 }
0x1ec7   :  { %5092 = vmatpush3.msra.mxu1 %v1274_v63 }
0x1ec8   :  { %5093 = vmatprep.subr.mxu1 %v1273_v5 }
0x1ec9   :  { %5094 = vmatpush3.msra.mxu1 %v1273_v5 }
0x1eca   :  { %5095 = vmatprep.subr.mxu1 %v1272_v12 }
0x1ecb   :  { %5096 = vmatpush3.msra.mxu1 %v1272_v12 }
0x1ecc   :  { %5097 = vmatprep.subr.mxu1 %v1271_v4 }
0x1ecd   :  { %5098 = vmatpush3.msra.mxu1 %v1271_v4 }
0x1ece   :  { %5099 = vmatprep.subr.mxu1 %v1270_v14 }
0x1ecf   :  { %5100 = vmatpush3.msra.mxu1 %v1270_v14 }
0x1ed0   :  { %5101 = vmatprep.subr.mxu1 %v1269_v16 }
0x1ed1   :  { %5102 = vmatpush3.msra.mxu1 %v1269_v16 }
0x1f7c   :  { %v4167_v6 = vpop.f32.mrf.mxu1 }
0x1f7d   :  { %v4171_v39 = vadd.f32 %v4167_v6, %v5802_v26 }
0x1f7e   :  { %v5069_v22 = vpop.f32.mrf.mxu1 }
0x1f7f   :  { %v4173_v24 = vrot.slane %v4171_v39, 2 }
0x1f81   :  { %v4175_v27 = vsel %vm1636_vm0, %v3922_v17, %v4173_v24  ;;  %v4177_v30 = vadd.f32 %v5224_v29, %v4173_v24  ;;  %v1268_v17 = vld [vmem:[%s5862_s11 + $0x20] sm:$0xff] }
0x1f82   :  { %v4176_v40 = vadd.f32 %v5225_v31, %v4175_v27  ;;  %5103 = vmatprep.subr.mxu1 %v1268_v17 }
0x1f83   :  { %v5844_v56 = vadd.f32 %v4543_v25, %v4177_v30  ;;  %5104 = vmatpush3.msra.mxu1 %v1268_v17 }
0x1f84   :  { %v5846_v0 = vadd.f32 %v4543_v25, %v4176_v40  ;;  %5105 = vmatprep.subr.mxu1 %v1267_v19 }
0x1f85   :  { %v4189_v41 = vsel %vm676_vm8, %v5844_v56, 0.0  ;;  %5106 = vmatpush3.msra.mxu1 %v1267_v19 }
0x1f86   :  { %4190 = vadd.xlane.f32.xlu0 %v4189_v41  ;;  %v4186_v26 = vsel %vm173_vm3, %v5846_v0, 0.0  ;;  %5107 = vmatprep.subr.mxu1 %v1266_v7 }
0x1f87   :  { %4187 = vadd.xlane.f32.xlu1 %v4186_v26  ;;  %5108 = vmatpush3.msra.mxu1 %v1266_v7  ;;  %v4549_v26 = vld [vmem:[%s4443_s27] ss:$0 sm:$0xff] }
0x1f88   :  { %5109 = vmatprep.subr.mxu1 %v1265_v18 }
0x1f89   :  { %5110 = vmatpush3.msra.mxu1 %v1265_v18 }
0x1f8a   :  { %5111 = vmatprep.subr.mxu1 %v1264_v52 }
0x1f8b   :  { %5112 = vmatpush3.msra.mxu1 %v1264_v52 }
0x200f   :  { %v4191_v42 = vpop.xlane.xlu0 %4190 }
0x2010   :  { %v4193_v43 = vmul.f32 0.03125, %v4191_v42  ;;  %v4188_v44 = vpop.xlane.xlu1 %4187 }
0x2011   :  { %v4192_v45 = vmul.f32 0.03125, %v4188_v44 }
0x2012   :  { %v4195_v11 = vsub.f32 %v5844_v56, %v4193_v43 }
0x2013   :  { %v4194_v15 = vsub.f32 %v5846_v0, %v4192_v45 }
0x2014   :  { %v4197_v23 = vmul.f32 %v4195_v11, %v4195_v11 }
0x2015   :  { %v4196_v46 = vmul.f32 %v4194_v15, %v4194_v15 }
0x2016   :  { %v4201_v47 = vsel %vm676_vm8, %v4197_v23, 0.0 }
0x2017   :  { %4202 = vadd.xlane.f32.xlu0 %v4201_v47  ;;  %v4198_v48 = vsel %vm173_vm3, %v4196_v46, 0.0 }
0x2018   :  { %4199 = vadd.xlane.f32.xlu1 %v4198_v48 }
0x20a0   :  { %v4203_v60 = vpop.xlane.xlu0 %4202 }
0x20a1   :  { %v4205_v10 = vmul.f32 0.03125, %v4203_v60  ;;  %v4200_v34 = vpop.xlane.xlu1 %4199 }
0x20a2   :  { %v4204_v13 = vmul.f32 0.03125, %v4200_v34 }
0x20a3   :  { %v4207_v32 = vadd.f32 1e-05, %v4205_v10 }
0x20a4   :  { %v4206_v33 = vadd.f32 1e-05, %v4204_v13 }
0x20a5   :  { %5216 = vrsqrt.f32 %v4207_v32 }
0x20a6   :  { %5218 = vrsqrt.f32 %v4206_v33 }
0x20b2   :  { %v5217_v51 = vpop.eup %5216 }
0x20b3   :  { %v5219_v61 = vpop.eup %5218  ;;  %v4211_v36 = vmul.f32 %v5217_v51, %v4195_v11 }
0x20b4   :  { %v4210_v28 = vmul.f32 %v5219_v61, %v4194_v15 }
0x20b5   :  { %v4219_v3 = vmul.f32 %v4544_v35, %v4211_v36 }
0x20b6   :  { %v4218_v58 = vmul.f32 %v4544_v35, %v4210_v28 }
0x20b7   :  { %v4227_v1 = vadd.f32 %v4545_v62, %v4219_v3 }
0x20b8   :  { %v4226_v37 = vadd.f32 %v4545_v62, %v4218_v58 }
0x20ba   :  { %5078 = vmatprep.mubr.msk.f32.mxu0 %vm173_vm3, %v4226_v37 }
0x20bb   :  { %5079 = vmatmul.mubr.msk.f32.vlgmr.msra.gmra.mxu0 %vm173_vm3, %v4227_v1 }
0x217b   :  { %v5080_v20 = vpop.f32.mrf.mxu0 }
0x217c   :  { %v4312_v21 = vadd.f32 %v5080_v20, %v4546_v55 }
0x217d   :  { %v4306_v9 = vpop.f32.mrf.mxu0 }
0x217e   :  { %v4318_v6 = vmul.f32 0.70710677, %v4312_v21  ;;  %v4307_v39 = vadd.f32 %v4546_v55, %v4306_v9  ;;  %v4316_v31 = vmul.f32 0.5, %v4312_v21 }
0x2180   :  { %5220 = verf.f32 %v4318_v6  ;;  %v4317_v22 = vmul.f32 0.70710677, %v4307_v39  ;;  %v4315_v29 = vmul.f32 0.5, %v4307_v39 }
0x2182   :  { %5222 = verf.f32 %v4317_v22 }
0x218d   :  { %v5221_v24 = vpop.eup %5220 }
0x218e   :  { %v4322_v27 = vadd.f32 1.0, %v5221_v24 }
0x218f   :  { %v5223_v25 = vpop.eup %5222 }
0x2190   :  { %v4321_v30 = vadd.f32 1.0, %v5223_v25  ;;  %v4324_v41 = vmul.f32 %v4322_v27, %v4316_v31 }
0x2192   :  { %v4323_v40 = vmul.f32 %v4321_v30, %v4315_v29 }
0x2194   :  { %5113 = vmatprep.mubr.f32.mxu1 %v4323_v40 }
0x2195   :  { %5114 = vmatmul.mubr.f32.vlgmr.msra.gmra.mxu1 %v4324_v41 }
0x2255   :  { %v5115_v42 = vpop.f32.mrf.mxu1 }
0x2256   :  { %v4403_v43 = vadd.f32 %v5115_v42, %v4549_v26 }
0x2257   :  { %v4397_v44 = vpop.f32.mrf.mxu1 }
0x2258   :  { %v4407_v45 = vadd.f32 %v4403_v43, %v5844_v56  ;;  %v4398_v11 = vadd.f32 %v4549_v26, %v4397_v44 }
0x225a   :  { %4409 = vst.msk [vmem:[%s4444_s1 + $0x8] sm:$0xf] %vm676_vm8, %v4407_v45  ;;  %v4406_v15 = vadd.f32 %v4398_v11, %v5846_v0 }
0x225c   :  { %4408 = vst.msk [vmem:[%s4444_s1] sm:$0xff] %vm173_vm3, %v4406_v15 }

// kernel: vit_encoder_fsm_forward.7
= control target key start
LH: loop header
LB: loop body
LE: loop exit
PB: predicated region body
PF: predicated region fallthrough
CT: control target
= control target key end

     0   :  { %vm131_vm0 = vcmask 259073   ;;  %v5280_v7 = vmov 0.0   ;;  %s5281_s6 = smov 6   ;;  %vm5282_vm1 = vmmov 0   ;;  %v5283_v12 = vmov 0   ;;  %s5284_s10 = smov 1   ;;  %s5967_s0 = inlined_call_operand.smem [shape: u32[31], index: -1, kind: input, shape index: {}] }
   0x1   :  { %s5324_s5 = sld [smem:[%s5967_s0]]   ;;  %4780 = vmatprep.subr.mxu0 %v5280_v7  ;;  %4788 = vmatprep.mubr.msk.f32.mxu0 %vm5282_vm1, %v5280_v7  ;;  %s5285_s14 = smov 2   ;;  %vm251_vm2 = vcmask 4096   ;;  %vm173_vm3 = vcmask 261120   ;;  %vm265_vm4 = vcmask 258176   ;;  %vm288_vm5 = vcmask 130048  }
   0x2   :  { %s4467_s9 = sld [smem:[%s5967_s0 + %s5281_s6]]   ;;  %4818 = vmatprep.subr.mxu1 %v5280_v7  ;;  %4820 = vmatprep.mubr.msk.f32.mxu1 %vm5282_vm1, %v5280_v7  ;;  %s5286_s18 = smov 32   ;;  %vm304_vm6 = vcmask 392192   ;;  %vm672_vm7 = vcmask 261127   ;;  %vm676_vm8 = vcmask 257024   ;;  %vm478_vm9 = vcmask 64512  }
   0x3   :  { %5200 = vset.pattern.permute.xlu1 %v5283_v12  ;;  %s5359_s13 = sld [smem:[%s5967_s0 + %s5284_s10]]   ;;  %5201 = vset.pattern.permute.xlu0 %v5283_v12  ;;  %s5287_s19 = smov 4   ;;  %vm579_vm10 = vcmask 1040384   ;;  %vm552_vm11 = vcmask 12288   ;;  %vm581_vm13 = vcmask 7168   ;;  %vm1711_vm15 = vcmask 1041408  }
   0x4   :  { %s4463_s17 = sld [smem:[%s5967_s0 + %s5285_s14]]   ;;  %s5288_s23 = smov 5  }
   0x5   :  { %s4465_s22 = sld [smem:[%s5967_s0 + %s5287_s19]]   ;;  %s5289_s27 = smov 8  }
   0x6   :  { %s4466_s26 = sld [smem:[%s5967_s0 + %s5288_s23]]   ;;  %s5290_s1 = smov 7  }
   0x7   :  { %v5327_v0 = vld [vmem:[%s5324_s5] sm:$0xff]  ;;  %s4469_s30 = sld [smem:[%s5967_s0 + %s5289_s27]]   ;;  %s5291_s6 = smov 10  }
   0x8   :  { %v132_v1 = vsel %vm131_vm0, %v5327_v0, 0.0  ;;  %v5340_v8 = vld [vmem:[%s4467_s9 + $0x18] sm:$0xff]  ;;  %v5342_v9 = vld [vmem:[%s4467_s9 + $0x10] sm:$0xff]  ;;  %v5346_v10 = vld [vmem:[%s4467_s9 + $0x8] sm:$0xff]  ;;  %s4468_s4 = sld [smem:[%s5967_s0 + %s5290_s1]]   ;;  %s5292_s10 = smov 9  }
   0x9   :  { %133 = vadd.xlane.f32.xlu0 %v132_v1  ;;  %4781 = vmatpush3.msra.mxu0 %v5340_v8  ;;  %v5350_v11 = vld [vmem:[%s4467_s9] sm:$0xff]  ;;  %s4471_s9 = sld [smem:[%s5967_s0 + %s5291_s6]]   ;;  %v126_v1 = vld [vmem:[%s5324_s5 + $0x8] sm:$0xf]  ;;  %s5293_s15 = smov 12  }
   0xa   :  { %4782 = vmatprep.subr.mxu0 %v5280_v7  ;;  %v5365_v13 = vld [vmem:[%s5359_s13] sm:$0x1f]  ;;  %s4470_s14 = sld [smem:[%s5967_s0 + %s5292_s10]]   ;;  %s5294_s19 = smov 11  }
   0xb   :  { %4783 = vmatpush3.msra.mxu0 %v5342_v9  ;;  %261 = vperm.xlu1 %5200, %v5365_v13   ;;  %v252_v14 = vsel %vm251_vm2, %v5365_v13, 0.0  ;;  %v4496_v15 = vld [vmem:[%s4463_s17] ss:$0 sm:$0xff]  ;;  %s5295_s23 = smov 13   ;;  %s5298_s1 = smov 30  }
   0xc   :  { %4784 = vmatprep.subr.mxu0 %v5280_v7  ;;  %v253_v16 = vrot.slane %v252_v14, 4  ;;  %v5376_v26 = vld [vmem:[%s4465_s22] ss:$0 sm:$0xff]  ;;  %s4472_s22 = sld [smem:[%s5967_s0 + %s5294_s19]]   ;;  %s5300_s6 = smov 16  }
   0xd   :  { %4785 = vmatpush3.msra.mxu0 %v5346_v10  ;;  %v5378_v28 = vld [vmem:[%s4466_s26] ss:$0 sm:$0xff]  ;;  %v5388_v32 = vld [vmem:[%s4469_s30 + $0x28] sm:$0xff]  ;;  %v5396_v34 = vld [vmem:[%s4469_s30 + $0x18] sm:$0xff]  ;;  %s4474_s26 = sld [smem:[%s5967_s0 + %s5295_s23]]   ;;  %s5301_s10 = smov 18  }
   0xe   :  { %4786 = vmatprep.subr.mxu0 %v5280_v7  ;;  %v254_v17 = vadd.f32 %v253_v16, %v252_v14  ;;  %v5392_v33 = vld [vmem:[%s4469_s30 + $0x20] sm:$0xff]  ;;  %v5400_v35 = vld [vmem:[%s4469_s30 + $0x10] sm:$0xff]  ;;  %v5402_v36 = vld [vmem:[%s4469_s30 + $0x8] sm:$0xff]  ;;  %s5303_s19 = smov 15   ;;  %s5304_s23 = smov 17  }
   0xf   :  { %4787 = vmatpush3.msra.mxu0 %v5350_v11  ;;  %v5408_v37 = vld [vmem:[%s4469_s30] sm:$0xff]  ;;  %v5430_v62 = vld [vmem:[%s4471_s9 + $0x8] sm:$0xff]  ;;  %s5297_s30 = smov 127   ;;  %s5308_s8 = smov 25  }
  0x10   :  { %4791 = vmatprep.subr.mxu0 %v5280_v7  ;;  %v255_v18 = vrot.slane %v254_v17, 2  ;;  %v5415_v38 = vld [vmem:[%s4468_s4] ss:$0 sm:$0xff]  ;;  %s5519_s4 = sld [smem:[%s5967_s0 + %s5298_s1]]   ;;  %s5309_s12 = smov 21  }
  0x11   :  { %v5434_v63 = vld [vmem:[%s4471_s9] sm:$0xff]  ;;  %s5569_s9 = sld [smem:[%s5967_s0 + %s5300_s6]]   ;;  %s5310_s17 = smov 22  }
  0x12   :  { %v256_v19 = vadd.f32 %v255_v18, %v254_v17  ;;  %s5918_s11 = sld [smem:[%s5967_s0 + %s5308_s8]]   ;;  %s5311_s21 = smov 24  }
  0x13   :  { %s4482_s16 = sld [smem:[%s5967_s0 + %s5309_s12]]   ;;  %s5312_s25 = smov 26  }
  0x14   :  { %v257_v20 = vrot.slane %v256_v19, 1  ;;  %s4483_s20 = sld [smem:[%s5967_s0 + %s5310_s17]]   ;;  %s5313_s28 = smov 27  }
  0x15   :  { %s4485_s24 = sld [smem:[%s5967_s0 + %s5311_s21]]   ;;  %s5314_s2 = smov 28  }
  0x16   :  { %v258_v21 = vadd.f32 %v257_v20, %v256_v19  ;;  %s4487_s27 = sld [smem:[%s5967_s0 + %s5312_s25]]   ;;  %s5315_s6 = smov 29  }
  0x17   :  { %s4488_s1 = sld [smem:[%s5967_s0 + %s5313_s28]]  }
  0x18   :  { %275 = vperm.xlu1 %5200, %v258_v21  }
  0x86   :  { %v262_v43 = vpop.permute.xlu1 %261 }
  0x92   :  { %v134_v2 = vpop.xlane.xlu0 %133 }
  0x93   :  { %v136_v3 = vmul.f32 0.03125, %v134_v2  ;;  %v276_v48 = vpop.permute.xlu1 %275  ;;  %v673_v2 = vsel %vm672_vm7, %v5327_v0, 0.0 }
  0x94   :  { %674 = vadd.xlane.f32.xlu1 %v673_v2 }
  0x95   :  { %v137_v4 = vsub.f32 %v5327_v0, %v136_v3  ;;  %v677_v3 = vsel %vm676_vm8, %v126_v1, 0.0 }
  0x97   :  { %v138_v5 = vmul.f32 %v137_v4, %v137_v4 }
  0x99   :  { %v139_v6 = vsel %vm131_vm0, %v138_v5, 0.0  ;;  %vm1636_vm0 = vcmask 1045504  }
  0x9a   :  { %140 = vadd.xlane.f32.xlu0 %v139_v6 }
  0xb0   :  { %285 = vrot.lane.b32.xlu0 %v4496_v15, %s5286_s18  ;;  %s4473_s18 = sld [smem:[%s5967_s0 + %s5293_s15]]   ;;  %s5302_s15 = smov 14  }
  0xb6   :  { %v5454_v19 = vld [vmem:[%s4473_s18] sm:$0xff]  ;;  %s4475_s18 = sld [smem:[%s5967_s0 + %s5302_s15]]  }
  0xcf   :  { %678 = vadd.xlane.f32.xlu0 %v677_v3  ;;  %v5501_v3 = vld [vmem:[%s5359_s13 + $0x8] sm:$0x1f]  ;;  %s5296_s13 = smov 3  }
  0xd0   :  { %s5510_s29 = sld [smem:[%s5967_s0 + %s5296_s13]]   ;;  %s5305_s13 = smov 19  }
 0x11d   :  { %v675_v20 = vpop.xlane.xlu1 %674 }
 0x123   :  { %v141_v22 = vpop.xlane.xlu0 %140 }
 0x124   :  { %v142_v23 = vmul.f32 0.03125, %v141_v22  ;;  %v680_v22 = vmul.f32 0.03125, %v675_v20 }
 0x126   :  { %v143_v24 = vadd.f32 1e-05, %v142_v23 }
 0x127   :  { %v5419_v59 = vpop.permute.xlu0 %285 }
 0x128   :  { %5202 = vrsqrt.f32 %v143_v24  ;;  %v682_v24 = vsub.f32 %v5327_v0, %v680_v22 }
 0x135   :  { %v5203_v25 = vpop.eup %5202 }
 0x136   :  { %v145_v27 = vmul.f32 %v5203_v25, %v137_v4  ;;  %v5445_v4 = vld [vmem:[%s4470_s14] ss:$0 sm:$0xff]  ;;  %s5576_s14 = sld [smem:[%s5967_s0 + %s5301_s10]]  }
 0x138   :  { %v152_v29 = vmul.f32 %v5376_v26, %v145_v27  ;;  %v684_v27 = vmul.f32 %v682_v24, %v682_v24 }
 0x13a   :  { %v159_v30 = vadd.f32 %v5378_v28, %v152_v29 }
 0x13c   :  { %v172_v31 = vrot.slane %v159_v30, 1  ;;  %v686_v30 = vsel %vm672_vm7, %v684_v27, 0.0 }
 0x13d   :  { %687 = vadd.xlane.f32.xlu1 %v686_v30  ;;  %v565_v30 = vld [vmem:[%s5510_s29] sm:$0x1f] }
 0x13e   :  { %4789 = vmatmul.mubr.msk.f32.vlgmr.msra.gmra.mxu0 %vm173_vm3, %v172_v31 }
 0x13f   :  { %4803 = vmatprep.mubr.msk.f32.mxu0 %vm5282_vm1, %v5280_v7  ;;  %4792 = vmatpush3.msra.mxu0 %v5388_v32 }
 0x140   :  { %4793 = vmatprep.subr.mxu0 %v5280_v7 }
 0x141   :  { %4794 = vmatpush3.msra.mxu0 %v5392_v33 }
 0x142   :  { %4795 = vmatprep.subr.mxu0 %v5280_v7 }
 0x143   :  { %4796 = vmatpush3.msra.mxu0 %v5396_v34 }
 0x144   :  { %4797 = vmatprep.subr.mxu0 %v5280_v7 }
 0x145   :  { %4798 = vmatpush3.msra.mxu0 %v5400_v35 }
 0x146   :  { %4799 = vmatprep.subr.mxu0 %v5280_v7 }
 0x147   :  { %4800 = vmatpush3.msra.mxu0 %v5402_v36 }
 0x148   :  { %4801 = vmatprep.subr.mxu0 %v5280_v7 }
 0x149   :  { %4802 = vmatpush3.msra.mxu0 %v5408_v37 }
 0x14a   :  { %4806 = vmatprep.subr.mxu0 %v5280_v7 }
 0x158   :  { %v679_v21 = vpop.xlane.xlu0 %678 }
 0x159   :  { %v681_v23 = vmul.f32 0.03125, %v679_v21 }
 0x15b   :  { %v683_v25 = vsub.f32 %v126_v1, %v681_v23 }
 0x15d   :  { %v685_v29 = vmul.f32 %v683_v25, %v683_v25 }
 0x15f   :  { %v689_v31 = vsel %vm676_vm8, %v685_v29, 0.0 }
 0x160   :  { %690 = vadd.xlane.f32.xlu1 %v689_v31 }
 0x1fe   :  { %v242_v39 = vpop.f32.mrf.mxu0 }
 0x1ff   :  { %v243_v40 = vadd.f32 %v5415_v38, %v242_v39  ;;  %v5464_v39 = vld [vmem:[%s4472_s22] ss:$0 sm:$0xff]  ;;  %s4476_s22 = sld [smem:[%s5967_s0 + %s5303_s19]]  }
 0x200   :  { %v4790_v41 = vpop.f32.mrf.mxu0 }
 0x201   :  { %v247_v42 = vmul.f32 0.70710677, %v243_v40  ;;  %v246_v45 = vmul.f32 0.5, %v243_v40 }
 0x203   :  { %5204 = verf.f32 %v247_v42 }
 0x204   :  { %5206 = vrcp.f32 %v276_v48  ;;  %v688_v48 = vpop.xlane.xlu1 %687 }
 0x210   :  { %v5205_v44 = vpop.eup %5204 }
 0x211   :  { %v249_v46 = vadd.f32 1.0, %v5205_v44  ;;  %v5207_v57 = vpop.eup %5206 }
 0x213   :  { %v250_v47 = vmul.f32 %v249_v46, %v246_v45 }
 0x215   :  { %v264_v49 = vmul.f32 %v262_v43, %v250_v47 }
 0x217   :  { %v266_v50 = vsel %vm265_vm4, %v264_v49, 0.0  ;;  %v692_v49 = vmul.f32 0.03125, %v688_v48 }
 0x218   :  { %v267_v51 = vrot.slane %v266_v50, 4 }
 0x21a   :  { %v268_v52 = vadd.f32 %v267_v51, %v266_v50  ;;  %v691_v50 = vpop.xlane.xlu1 %690 }
 0x21b   :  { %v693_v51 = vmul.f32 0.03125, %v691_v50 }
 0x21c   :  { %v269_v53 = vrot.slane %v268_v52, 2 }
 0x21e   :  { %v270_v54 = vadd.f32 %v269_v53, %v268_v52  ;;  %v695_v52 = vadd.f32 1e-05, %v693_v51 }
 0x220   :  { %v271_v55 = vrot.slane %v270_v54, 1 }
 0x222   :  { %v272_v56 = vadd.f32 %v271_v55, %v270_v54 }
 0x224   :  { %v279_v58 = vmul.f32 %v5207_v57, %v272_v56 }
 0x226   :  { %v289_v60 = vsel %vm288_vm5, %v250_v47, %v279_v58 }
 0x227   :  { %v290_v61 = vsel %vm173_vm3, %v289_v60, %v5419_v59 }
 0x228   :  { %4804 = vmatmul.mubr.msk.f32.vlgmr.msra.gmra.mxu0 %vm304_vm6, %v290_v61 }
 0x229   :  { %4810 = vmatprep.mubr.msk.f32.mxu0 %vm5282_vm1, %v5280_v7  ;;  %4807 = vmatpush3.msra.mxu0 %v5430_v62 }
 0x22a   :  { %4808 = vmatprep.subr.mxu0 %v5280_v7 }
 0x22b   :  { %4809 = vmatpush3.msra.mxu0 %v5434_v63 }
 0x22c   :  { %4813 = vmatprep.subr.mxu0 %v5280_v7 }
 0x2e8   :  { %v374_v5 = vpop.f32.mrf.mxu0 }
 0x2e9   :  { %v375_v6 = vadd.f32 %v5445_v4, %v374_v5 }
 0x2ea   :  { %v4805_v12 = vpop.f32.mrf.mxu0 }
 0x2eb   :  { %v379_v14 = vmul.f32 0.70710677, %v375_v6  ;;  %v378_v16 = vmul.f32 0.5, %v375_v6 }
 0x2ed   :  { %5208 = verf.f32 %v379_v14 }
 0x2fa   :  { %v5209_v15 = vpop.eup %5208 }
 0x2fb   :  { %v381_v17 = vadd.f32 1.0, %v5209_v15 }
 0x2fd   :  { %v382_v18 = vmul.f32 %v381_v17, %v378_v16 }
 0x2ff   :  { %4811 = vmatmul.mubr.msk.f32.vlgmr.msra.gmra.mxu0 %vm288_vm5, %v382_v18 }
 0x300   :  { %4815 = vmatprep.mubr.msk.f32.mxu0 %vm5282_vm1, %v5280_v7  ;;  %4814 = vmatpush3.msra.mxu0 %v5454_v19 }
 0x301   :  { %4823 = vmatprep.subr.mxu0 %v5280_v7 }
 0x3bf   :  { %v461_v40 = vpop.f32.mrf.mxu0 }
 0x3c0   :  { %v462_v41 = vadd.f32 %v5464_v39, %v461_v40 }
 0x3c1   :  { %v4812_v42 = vpop.f32.mrf.mxu0 }
 0x3c2   :  { %v466_v43 = vmul.f32 0.70710677, %v462_v41  ;;  %v465_v45 = vmul.f32 0.5, %v462_v41 }
 0x3c4   :  { %5210 = verf.f32 %v466_v43 }
 0x3d1   :  { %v5211_v44 = vpop.eup %5210 }
 0x3d2   :  { %v468_v46 = vadd.f32 1.0, %v5211_v44 }
 0x3d4   :  { %v469_v47 = vmul.f32 %v468_v46, %v465_v45 }
 0x3d6   :  { %4816 = vmatmul.mubr.msk.f32.vlgmr.msra.gmra.mxu0 %vm478_vm9, %v469_v47 }
 0x3d7   :  { %4824 = vmatpush3.msra.mxu0 %v5340_v8  ;;  %4831 = vmatprep.mubr.msk.f32.mxu0 %vm5282_vm1, %v5280_v7  ;;  %v694_v8 = vadd.f32 1e-05, %v692_v49 }
 0x3d8   :  { %4825 = vmatprep.subr.mxu0 %v5280_v7 }
 0x3d9   :  { %4826 = vmatpush3.msra.mxu0 %v5342_v9  ;;  %5212 = vrsqrt.f32 %v694_v8 }
 0x3da   :  { %4827 = vmatprep.subr.mxu0 %v5280_v7  ;;  %5214 = vrsqrt.f32 %v695_v52 }
 0x3db   :  { %4828 = vmatpush3.msra.mxu0 %v5346_v10 }
 0x3dc   :  { %4829 = vmatprep.subr.mxu0 %v5280_v7 }
 0x3dd   :  { %4830 = vmatpush3.msra.mxu0 %v5350_v11 }
 0x3de   :  { %4849 = vmatprep.subr.mxu0 %v5280_v7 }
 0x3e6   :  { %v5213_v53 = vpop.eup %5212 }
 0x3e7   :  { %v698_v9 = vmul.f32 %v5213_v53, %v682_v24  ;;  %v5215_v55 = vpop.eup %5214 }
 0x3e8   :  { %v5479_v10 = vmul.f32 %v5215_v55, %v683_v25 }
 0x3e9   :  { %v706_v54 = vmul.f32 %v5376_v26, %v698_v9 }
 0x3ea   :  { %v707_v11 = vmul.f32 %v5376_v26, %v5479_v10  ;;  %v5496_v26 = vld [vmem:[%s4474_s26] ss:$0 sm:$0xff]  ;;  %s5611_s26 = sld [smem:[%s5967_s0 + %s5304_s23]]  }
 0x3eb   :  { %v714_v56 = vadd.f32 %v5378_v28, %v706_v54 }
 0x3ec   :  { %v715_v57 = vadd.f32 %v5378_v28, %v707_v11 }
 0x3ed   :  { %v729_v58 = vrot.slane %v714_v56, 7 }
 0x3ee   :  { %v730_v60 = vrot.slane %v715_v57, 7 }
 0x3f0   :  { %v731_v61 = vsel %vm579_vm10, %v729_v58, %v730_v60  ;;  %v5299_v58 = vmov 1.0  }
 0x3f1   :  { %4832 = vmatmul.mubr.msk.f32.vlgmr.msra.gmra.mxu0 %vm173_vm3, %v731_v61 }
 0x3f2   :  { %4850 = vmatpush3.msra.mxu0 %v5430_v62  ;;  %4853 = vmatprep.mubr.msk.f32.mxu0 %vm5282_vm1, %v5280_v7 }
 0x3f3   :  { %4851 = vmatprep.subr.mxu0 %v5280_v7 }
 0x3f4   :  { %4852 = vmatpush3.msra.mxu0 %v5434_v63  ;;  %v809_v63 = vsel %vm251_vm2, %v5501_v3, 0.0 }
 0x3f5   :  { %4856 = vmatprep.subr.mxu0 %v5280_v7  ;;  %v810_v5 = vrot.slane %v809_v63, 4 }
 0x3f7   :  { %v811_v6 = vadd.f32 %v810_v5, %v809_v63 }
 0x3f9   :  { %v812_v12 = vrot.slane %v811_v6, 2 }
 0x3fb   :  { %v813_v14 = vadd.f32 %v812_v12, %v811_v6 }
 0x3fd   :  { %v814_v15 = vrot.slane %v813_v14, 1 }
 0x3ff   :  { %v815_v17 = vadd.f32 %v814_v15, %v813_v14 }
 0x401   :  { %831 = vperm.xlu0 %5201, %v815_v17   ;;  %v1281_v17 = vsel %vm173_vm3, %v5327_v0, 0.0 }
 0x420   :  { %1282 = vadd.xlane.f32.xlu0 %v1281_v17 }
 0x47c   :  { %v832_v51 = vpop.permute.xlu0 %831 }
 0x496   :  { %v548_v28 = vpop.f32.mrf.mxu0 }
 0x497   :  { %v549_v62 = vadd.f32 %v5496_v26, %v548_v28 }
 0x498   :  { %v4817_v1 = vpop.f32.mrf.mxu0 }
 0x499   :  { %v553_v2 = vsel %vm552_vm11, %v549_v62, -inf }
 0x49a   :  { %554 = vmax.xlane.f32.xlu1 %v553_v2 }
 0x4b1   :  { %v800_v16 = vpop.f32.mrf.mxu0 }
 0x4b2   :  { %v801_v41 = vadd.f32 %v5415_v38, %v800_v16 }
 0x4b3   :  { %v4833_v18 = vpop.f32.mrf.mxu0 }
 0x4b4   :  { %v805_v42 = vmul.f32 0.70710677, %v801_v41  ;;  %v804_v44 = vmul.f32 0.5, %v801_v41  ;;  %v1205_v41 = vld [vmem:[%s5569_s9 + $0x8] sm:$0xff] }
 0x523   :  { %v555_v20 = vpop.xlane.xlu1 %554 }
 0x524   :  { %v556_v21 = vsub.f32 %v549_v62, %v555_v20 }
 0x526   :  { %v557_v22 = vmul.f32 1.442695, %v556_v21 }
 0x528   :  { %5216 = vpow2.f32 %v557_v22 }
 0x535   :  { %v5217_v23 = vpop.eup %5216 }
 0x536   :  { %v559_v24 = vsel %vm552_vm11, %v5217_v23, 0.0 }
 0x537   :  { %560 = vadd.xlane.f32.xlu1 %v559_v24  ;;  %v1283_v24 = vpop.xlane.xlu0 %1282 }
 0x548   :  { %818 = vperm.xlu1 %5200, %v5501_v3  }
 0x5c0   :  { %v561_v25 = vpop.xlane.xlu1 %560 }
 0x5c1   :  { %5218 = vlog2.f32 %v561_v25  ;;  %v1284_v25 = vmul.f32 0.03125, %v1283_v24  ;;  %v1240_v24 = vld [vmem:[%s5576_s14 + $0x20] sm:$0xff] }
 0x5c2   :  { %5220 = verf.f32 %v805_v42  ;;  %v1204_v42 = vld [vmem:[%s5569_s9] sm:$0xff] }
 0x5c3   :  { %5222 = vrcp.f32 %v832_v51 }
 0x5c4   :  { %v819_v46 = vpop.permute.xlu1 %818 }
 0x5ce   :  { %v5219_v27 = vpop.eup %5218 }
 0x5cf   :  { %v563_v29 = vmul.f32 0.6931472, %v5219_v27  ;;  %v5221_v43 = vpop.eup %5220  ;;  %v1285_v27 = vsub.f32 %v5327_v0, %v1284_v25  ;;  %v1206_v0 = vld [vmem:[%s5569_s9 + $0x10] sm:$0xff] }
 0x5d0   :  { %v807_v45 = vadd.f32 1.0, %v5221_v43  ;;  %v5223_v60 = vpop.eup %5222  ;;  %v1239_v43 = vld [vmem:[%s5576_s14 + $0x18] sm:$0xff] }
 0x5d1   :  { %v564_v31 = vsub.f32 %v556_v21, %v563_v29  ;;  %v1286_v29 = vmul.f32 %v1285_v27, %v1285_v27 }
 0x5d2   :  { %v808_v47 = vmul.f32 %v807_v45, %v804_v44 }
 0x5d3   :  { %v566_v40 = vadd.f32 %v565_v30, %v564_v31 }
 0x5d4   :  { %v821_v48 = vmul.f32 %v819_v46, %v808_v47 }
 0x5d5   :  { %568 = vrot.lane.b32.xlu1 %v566_v40, %s5297_s30 }
 0x5d6   :  { %v822_v49 = vsel %vm265_vm4, %v821_v48, 0.0 }
 0x5d7   :  { %v823_v8 = vrot.slane %v822_v49, 4 }
 0x5d9   :  { %v824_v50 = vadd.f32 %v823_v8, %v822_v49  ;;  %v4518_v8 = vld [vmem:[%s5510_s29 + $0x8] sm:$0x1f]  ;;  %s5718_s29 = sld [smem:[%s5967_s0 + %s5305_s13]]  }
 0x5db   :  { %v825_v38 = vrot.slane %v824_v50, 2 }
 0x5dd   :  { %v826_v9 = vadd.f32 %v825_v38, %v824_v50  ;;  %v4523_v38 = vld [vmem:[%s4475_s18] ss:$0 sm:$0xff] }
 0x5df   :  { %v827_v56 = vrot.slane %v826_v9, 1 }
 0x5e1   :  { %v828_v57 = vadd.f32 %v827_v56, %v826_v9  ;;  %v1301_v9 = vmul.f32 %v4523_v38, %v5479_v10  ;;  %v1236_v10 = vld [vmem:[%s5576_s14] sm:$0xff] }
 0x647   :  { %v569_v52 = vpop.permute.xlu1 %568 }
 0x648   :  { %vm571_vm12 = vcmp.ge.f32.partialorder %v566_v40, %v569_v52  ;;  %v1287_v40 = vsel %vm173_vm3, %v1286_v29, 0.0 }
 0x649   :  { %v4503_v53 = vsel %vm571_vm12, 1.0, %v5280_v7 }
 0x64a   :  { %v574_v54 = vmul.f32 %v4503_v53, %v5365_v13  ;;  %v835_v13 = vmul.f32 %v5223_v60, %v828_v57  ;;  %v1238_v57 = vld [vmem:[%s5576_s14 + $0x10] sm:$0xff]  ;;  %v1237_v60 = vld [vmem:[%s5576_s14 + $0x8] sm:$0xff] }
 0x64c   :  { %575 = vst.msk [vmem:[%s5519_s4] sm:$0x1f] %vm251_vm2, %v574_v54  ;;  %v577_v55 = vrot.slane %v574_v54, 7  ;;  %v4524_v54 = vld [vmem:[%s4476_s22] ss:$0 sm:$0xff] }
 0x64e   :  { %v580_v11 = vsel %vm579_vm10, 1.0, %v577_v55 }
 0x64f   :  { %4819 = vmatpush3.xpose.msk.msra.mxu1 %vm581_vm13, %v580_v11  ;;  %v5592_v11 = vadd.f32 %v4524_v54, %v1301_v9 }
 0x650   :  { %4834 = vmatprep.subr.mxu1 %v5280_v7 }
 0x652   :  { %4821 = vmatmul.mubr.msk.f32.vlgmr.msra.gmra.mxu1 %vm581_vm13, %v5299_v58 }
 0x653   :  { %4835 = vmatpush3.msra.mxu1 %v5388_v32  ;;  %4846 = vmatprep.mubr.msk.f32.mxu1 %vm5282_vm1, %v5280_v7  ;;  %v836_v32 = vsel %vm288_vm5, %v808_v47, %v835_v13 }
 0x654   :  { %4836 = vmatprep.subr.mxu1 %v5280_v7 }
 0x655   :  { %4837 = vmatpush3.msra.mxu1 %v5392_v33  ;;  %v837_v33 = vsel %vm173_vm3, %v836_v32, %v5419_v59 }
 0x656   :  { %4838 = vmatprep.subr.mxu1 %v5280_v7 }
 0x657   :  { %4839 = vmatpush3.msra.mxu1 %v5396_v34 }
 0x658   :  { %4840 = vmatprep.subr.mxu1 %v5280_v7 }
 0x659   :  { %4841 = vmatpush3.msra.mxu1 %v5400_v35 }
 0x65a   :  { %4842 = vmatprep.subr.mxu1 %v5280_v7 }
 0x65b   :  { %4843 = vmatpush3.msra.mxu1 %v5402_v36 }
 0x65c   :  { %4844 = vmatprep.subr.mxu1 %v5280_v7 }
 0x65d   :  { %4845 = vmatpush3.msra.mxu1 %v5408_v37 }
 0x65e   :  { %4847 = vmatmul.mubr.msk.f32.vlgmr.msra.gmra.mxu1 %vm304_vm6, %v837_v33  ;;  %4861 = vmatprep.subr.mxu1 %v5280_v7 }
 0x65f   :  { %4863 = vmatprep.mubr.msk.f32.mxu1 %vm5282_vm1, %v5280_v7 }
 0x712   :  { %v5550_v34 = vpop.f32.mrf.mxu1 }
 0x714   :  { %v4822_v35 = vpop.f32.mrf.mxu1 }
 0x71e   :  { %v920_v61 = vpop.f32.mrf.mxu1 }
 0x71f   :  { %v921_v36 = vadd.f32 %v5445_v4, %v920_v61  ;;  %v1223_v61 = vld [vmem:[%s5611_s26 + $0x18] sm:$0xff] }
 0x720   :  { %v4848_v28 = vpop.f32.mrf.mxu1 }
 0x721   :  { %v925_v62 = vmul.f32 0.70710677, %v921_v36  ;;  %v924_v1 = vmul.f32 0.5, %v921_v36  ;;  %v1222_v28 = vld [vmem:[%s5611_s26 + $0x10] sm:$0xff] }
 0x723   :  { %5224 = verf.f32 %v925_v62  ;;  %v1221_v62 = vld [vmem:[%s5611_s26 + $0x8] sm:$0xff] }
 0x730   :  { %v5225_v37 = vpop.eup %5224 }
 0x731   :  { %v927_v2 = vadd.f32 1.0, %v5225_v37 }
 0x733   :  { %v928_v59 = vmul.f32 %v927_v2, %v924_v1 }
 0x735   :  { %4854 = vmatmul.mubr.msk.f32.vlgmr.msra.gmra.mxu0 %vm288_vm5, %v928_v59  ;;  %vm1632_vm5 = vcmask 48128  }
 0x736   :  { %4857 = vmatpush3.msra.mxu0 %v5454_v19  ;;  %4858 = vmatprep.mubr.msk.f32.mxu0 %vm5282_vm1, %v5280_v7 }
 0x7f5   :  { %v1007_v63 = vpop.f32.mrf.mxu0 }
 0x7f6   :  { %v1008_v5 = vadd.f32 %v5464_v39, %v1007_v63 }
 0x7f7   :  { %v4855_v6 = vpop.f32.mrf.mxu0 }
 0x7f8   :  { %v1012_v12 = vmul.f32 0.70710677, %v1008_v5  ;;  %v1011_v14 = vmul.f32 0.5, %v1008_v5 }
 0x7fa   :  { %5226 = verf.f32 %v1012_v12 }
 0x807   :  { %v5227_v4 = vpop.eup %5226 }
 0x808   :  { %v1014_v15 = vadd.f32 1.0, %v5227_v4 }
 0x80a   :  { %v1015_v16 = vmul.f32 %v1014_v15, %v1011_v14  ;;  %v1211_v14 = vld [vmem:[%s5569_s9 + $0x38] sm:$0xff] }
 0x80c   :  { %4859 = vmatmul.mubr.msk.f32.vlgmr.msra.gmra.mxu0 %vm478_vm9, %v1015_v16 }
 0x8cc   :  { %v1093_v19 = vpop.f32.mrf.mxu0 }
 0x8cd   :  { %v1094_v18 = vadd.f32 %v5496_v26, %v1093_v19  ;;  %v1207_v26 = vld [vmem:[%s5569_s9 + $0x18] sm:$0xff] }
 0x8ce   :  { %v4860_v20 = vpop.f32.mrf.mxu0  ;;  %4866 = vmatprep.subr.mxu0 %v1207_v26 }
 0x8cf   :  { %v1097_v21 = vsel %vm552_vm11, %v1094_v18, -inf  ;;  %4867 = vmatpush3.msra.mxu0 %v1207_v26  ;;  %v1209_v20 = vld [vmem:[%s5569_s9 + $0x28] sm:$0xff]  ;;  %v658_v26 = vlaneseq }
 0x8d0   :  { %1098 = vmax.xlane.f32.xlu1 %v1097_v21  ;;  %4868 = vmatprep.subr.mxu0 %v1206_v0  ;;  %v1208_v21 = vld [vmem:[%s5569_s9 + $0x20] sm:$0xff] }
 0x8d1   :  { %4869 = vmatpush3.msra.mxu0 %v1206_v0 }
 0x8d2   :  { %4870 = vmatprep.subr.mxu0 %v1205_v41 }
 0x8d3   :  { %4871 = vmatpush3.msra.mxu0 %v1205_v41 }
 0x8d4   :  { %4872 = vmatprep.subr.mxu0 %v1204_v42 }
 0x8d5   :  { %4873 = vmatpush3.msra.mxu0 %v1204_v42  ;;  %v659_v42 = vshrl.u32 %v658_v26, 7 }
 0x8d6   :  { %4888 = vmatprep.subr.mxu0 %v1239_v43 }
 0x959   :  { %v1099_v39 = vpop.xlane.xlu1 %1098 }
 0x95a   :  { %v1100_v22 = vsub.f32 %v1094_v18, %v1099_v39  ;;  %v1210_v18 = vld [vmem:[%s5569_s9 + $0x30] sm:$0xff]  ;;  %v1243_v39 = vld [vmem:[%s5576_s14 + $0x38] sm:$0xff] }
 0x95c   :  { %v1101_v23 = vmul.f32 1.442695, %v1100_v22 }
 0x95e   :  { %5228 = vpow2.f32 %v1101_v23  ;;  %v1241_v23 = vld [vmem:[%s5576_s14 + $0x28] sm:$0xff] }
 0x96b   :  { %v5229_v30 = vpop.eup %5228 }
 0x96c   :  { %v1103_v31 = vsel %vm552_vm11, %v5229_v30, 0.0 }
 0x96d   :  { %1104 = vadd.xlane.f32.xlu1 %v1103_v31 }
 0x971   :  { %1288 = vadd.xlane.f32.xlu1 %v1287_v40 }
 0x9f6   :  { %v1105_v44 = vpop.xlane.xlu1 %1104 }
 0x9f7   :  { %5230 = vlog2.f32 %v1105_v44 }
 0x9fa   :  { %v1289_v45 = vpop.xlane.xlu1 %1288 }
 0x9fb   :  { %v1290_v46 = vmul.f32 0.03125, %v1289_v45 }
 0x9fd   :  { %v1291_v47 = vadd.f32 1e-05, %v1290_v46 }
 0x9ff   :  { %5232 = vrsqrt.f32 %v1291_v47 }
 0xa04   :  { %v5231_v48 = vpop.eup %5230 }
 0xa05   :  { %v1107_v49 = vmul.f32 0.6931472, %v5231_v48  ;;  %v665_v48 = vsub.f32 1.0, %v5550_v34 }
 0xa07   :  { %v1108_v50 = vsub.f32 %v1100_v22, %v1107_v49  ;;  %v1242_v22 = vld [vmem:[%s5576_s14 + $0x30] sm:$0xff] }
 0xa09   :  { %v1111_v51 = vadd.f32 %v4518_v8, %v1108_v50 }
 0xa0b   :  { %1113 = vrot.lane.b32.xlu1 %v1111_v51, %s5297_s30  ;;  %s5306_s30 = smov 20  }
 0xa0c   :  { %v5233_v52 = vpop.eup %5232  ;;  %s4481_s3 = sld [smem:[%s5967_s0 + %s5306_s30]]  }
 0xa0d   :  { %v1293_v53 = vmul.f32 %v5233_v52, %v1285_v27 }
 0xa0f   :  { %v1300_v55 = vmul.f32 %v4523_v38, %v1293_v53 }
 0xa11   :  { %v5590_v56 = vadd.f32 %v4524_v54, %v1300_v55 }
 0xa13   :  { %4874 = vmatprep.mubr.msk.f32.mxu0 %vm173_vm3, %v5590_v56 }
 0xa14   :  { %4875 = vmatmul.mubr.msk.f32.vlgmr.msra.gmra.mxu0 %vm173_vm3, %v5592_v11 }
 0xa15   :  { %4889 = vmatpush3.msra.mxu0 %v1239_v43  ;;  %4896 = vmatprep.mubr.msk.f32.mxu0 %vm173_vm3, %v5590_v56  ;;  %v661_v43 = vand.u32 127, %v658_v26 }
 0xa16   :  { %4890 = vmatprep.subr.mxu0 %v1238_v57 }
 0xa17   :  { %4891 = vmatpush3.msra.mxu0 %v1238_v57  ;;  %vm662_vm4 = vcmp.eq.s32.totalorder %v659_v42, %v661_v43  ;;  %v1252_v42 = vld [vmem:[%s5718_s29] sm:$0xff] }
 0xa18   :  { %4892 = vmatprep.subr.mxu0 %v1237_v60  ;;  %v4506_v49 = vsel %vm662_vm4, 1.0, %v5280_v7 }
 0xa19   :  { %4893 = vmatpush3.msra.mxu0 %v1237_v60  ;;  %v666_v8 = vmul.f32 %v4506_v49, %v665_v48 }
 0xa1a   :  { %4894 = vmatprep.subr.mxu0 %v1236_v10 }
 0xa1b   :  { %4895 = vmatpush3.msra.mxu0 %v1236_v10 }
 0xa1c   :  { %4897 = vmatmul.mubr.msk.f32.vlgmr.msra.gmra.mxu0 %vm173_vm3, %v5592_v11  ;;  %4909 = vmatprep.subr.mxu0 %v5280_v7 }
 0xa1d   :  { %4911 = vmatprep.mubr.msk.f32.mxu0 %vm5282_vm1, %v5280_v7 }
 0xa7d   :  { %v1114_v13 = vpop.permute.xlu1 %1113 }
 0xa7e   :  { %vm1116_vm14 = vcmp.ge.f32.partialorder %v1111_v51, %v1114_v13  ;;  %v5675_v51 = vadd.f32 %v666_v8, %v5550_v34 }
 0xa7f   :  { %v4519_v32 = vsel %vm1116_vm14, 1.0, %v5280_v7 }
 0xa80   :  { %v1119_v33 = vmul.f32 %v4519_v32, %v5501_v3  ;;  %v1220_v3 = vld [vmem:[%s5611_s26] sm:$0xff] }
 0xa82   :  { %4520 = vst.msk [vmem:[%s5519_s4 + $0x8] sm:$0x1f] %vm251_vm2, %v1119_v33  ;;  %v1123_v35 = vrot.slane %v1119_v33, 7  ;;  %vm1617_vm2 = vcmask 46080   ;;  %s4489_s4 = sld [smem:[%s5967_s0 + %s5314_s2]]  }
 0xa84   :  { %v1125_v36 = vsel %vm579_vm10, 1.0, %v1123_v35 }
 0xa85   :  { %4862 = vmatpush3.xpose.msk.msra.mxu1 %vm581_vm13, %v1125_v36 }
 0xa86   :  { %4877 = vmatprep.subr.mxu1 %v1223_v61 }
 0xa88   :  { %4864 = vmatmul.mubr.msk.f32.vlgmr.msra.gmra.mxu1 %vm581_vm13, %v5299_v58 }
 0xa89   :  { %4878 = vmatpush3.msra.mxu1 %v1223_v61  ;;  %4885 = vmatprep.mubr.msk.f32.mxu1 %vm173_vm3, %v5590_v56 }
 0xa8a   :  { %4879 = vmatprep.subr.mxu1 %v1222_v28 }
 0xa8b   :  { %4880 = vmatpush3.msra.mxu1 %v1222_v28 }
 0xa8c   :  { %4881 = vmatprep.subr.mxu1 %v1221_v62 }
 0xa8d   :  { %4882 = vmatpush3.msra.mxu1 %v1221_v62  ;;  %v1227_v62 = vld [vmem:[%s5611_s26 + $0x38] sm:$0xff] }
 0xa8e   :  { %4883 = vmatprep.subr.mxu1 %v1220_v3 }
 0xa8f   :  { %4884 = vmatpush3.msra.mxu1 %v1220_v3 }
 0xa90   :  { %4886 = vmatmul.mubr.msk.f32.vlgmr.msra.gmra.mxu1 %vm173_vm3, %v5592_v11  ;;  %4899 = vmatprep.subr.mxu1 %v5280_v7 }
 0xa91   :  { %4901 = vmatprep.mubr.msk.f32.mxu1 %vm5282_vm1, %v5280_v7 }
 0xad4   :  { %v4876_v1 = vpop.f32.mrf.mxu0 }
 0xad5   :  { %v1713_v16 = vrot.slane %v4876_v1, 6 }
 0xad6   :  { %v1382_v2 = vpop.f32.mrf.mxu0 }
 0xad7   :  { %v1712_v4 = vrot.slane %v1382_v2, 6 }
 0xad9   :  { %v1714_v19 = vsel %vm1711_vm15, %v1712_v4, %v1713_v16 }
 0xadc   :  { %v5634_v63 = vpop.f32.mrf.mxu0 }
 0xadd   :  { %v1809_v36 = vrot.slane %v5634_v63, 6  ;;  %v1224_v63 = vld [vmem:[%s5611_s26 + $0x20] sm:$0xff] }
 0xade   :  { %v5640_v17 = vpop.f32.mrf.mxu0 }
 0xadf   :  { %v1808_v33 = vrot.slane %v5640_v17, 6 }
 0xb48   :  { %v5632_v58 = vpop.f32.mrf.mxu1 }
 0xb49   :  { %v1199_v50 = vsub.f32 1.0, %v5632_v58 }
 0xb4a   :  { %v4865_v37 = vpop.f32.mrf.mxu1 }
 0xb4b   :  { %v1200_v38 = vmul.f32 %v4506_v49, %v1199_v50 }
 0xb4d   :  { %v5679_v9 = vadd.f32 %v1200_v38, %v5632_v58  ;;  %v1810_v58 = vsel %vm1711_vm15, %v1808_v33, %v1809_v36 }
 0xb50   :  { %v4887_v59 = vpop.f32.mrf.mxu1 }
 0xb51   :  { %v1717_v6 = vrot.slane %v4887_v59, 6  ;;  %v1225_v59 = vld [vmem:[%s5611_s26 + $0x28] sm:$0xff] }
 0xb52   :  { %v1457_v5 = vpop.f32.mrf.mxu1 }
 0xb53   :  { %v1716_v12 = vrot.slane %v1457_v5, 6  ;;  %4900 = vmatpush3.xpose.msk.msra.mxu1 %vm478_vm9, %v1457_v5 }
 0xb54   :  { %4904 = vmatprep.subr.mxu1 %v5280_v7 }
 0xb55   :  { %v1718_v15 = vsel %vm1711_vm15, %v1716_v12, %v1717_v6 }
 0xb56   :  { %4902 = vmatmul.mubr.msk.f32.vlgmr.msra.gmra.mxu1 %vm478_vm9, %v1382_v2  ;;  %4910 = vmatpush3.xpose.msk.msra.mxu0 %vm478_vm9, %v1718_v15  ;;  %v1226_v2 = vld [vmem:[%s5611_s26 + $0x30] sm:$0xff] }
 0xb57   :  { %4905 = vmatpush3.msk.msra.mxu1 %vm1636_vm0, %v5640_v17  ;;  %4919 = vmatprep.subr.mxu0 %v1211_v14 }
 0xb58   :  { %4906 = vmatprep.mubr.msk.f32.mxu1 %vm5282_vm1, %v5280_v7  ;;  %4914 = vmatprep.subr.mxu1 %v5280_v7 }
 0xb59   :  { %4912 = vmatmul.mubr.msk.f32.vlgmr.msra.gmra.mxu0 %vm478_vm9, %v1714_v19 }
 0xb5a   :  { %4920 = vmatpush3.msra.mxu0 %v1211_v14  ;;  %4927 = vmatprep.mubr.msk.f32.mxu0 %vm173_vm3, %v5590_v56 }
 0xb5b   :  { %4921 = vmatprep.subr.mxu0 %v1210_v18 }
 0xb5c   :  { %4922 = vmatpush3.msra.mxu0 %v1210_v18 }
 0xb5d   :  { %4923 = vmatprep.subr.mxu0 %v1209_v20 }
 0xb5e   :  { %4924 = vmatpush3.msra.mxu0 %v1209_v20 }
 0xb5f   :  { %4925 = vmatprep.subr.mxu0 %v1208_v21 }
 0xb60   :  { %4926 = vmatpush3.msra.mxu0 %v1208_v21 }
 0xb61   :  { %4928 = vmatmul.mubr.msk.f32.vlgmr.msra.gmra.mxu0 %vm173_vm3, %v5592_v11  ;;  %4941 = vmatprep.subr.mxu0 %v1243_v39 }
 0xb62   :  { %4942 = vmatpush3.msra.mxu0 %v1243_v39  ;;  %4949 = vmatprep.mubr.msk.f32.mxu0 %vm173_vm3, %v5590_v56 }
 0xb63   :  { %4943 = vmatprep.subr.mxu0 %v1242_v22 }
 0xb64   :  { %4944 = vmatpush3.msra.mxu0 %v1242_v22 }
 0xb65   :  { %4945 = vmatprep.subr.mxu0 %v1241_v23 }
 0xb66   :  { %4946 = vmatpush3.msra.mxu0 %v1241_v23 }
 0xb67   :  { %4947 = vmatprep.subr.mxu0 %v1240_v24 }
 0xb68   :  { %4948 = vmatpush3.msra.mxu0 %v1240_v24 }
 0xb69   :  { %4950 = vmatmul.mubr.msk.f32.vlgmr.msra.gmra.mxu0 %vm173_vm3, %v5592_v11  ;;  %4962 = vmatprep.subr.mxu0 %v5280_v7 }
 0xb6a   :  { %4964 = vmatprep.mubr.msk.f32.mxu0 %vm5282_vm1, %v5280_v7 }
 0xc16   :  { %v1613_v25 = vpop.f32.mrf.mxu1 }
 0xc17   :  { %v1618_v27 = vsel %vm1617_vm2, %v1613_v25, -inf }
 0xc18   :  { %1619 = vmax.xlane.f32.xlu0 %v1618_v27  ;;  %v4903_v29 = vpop.f32.mrf.mxu1 }
 0xc19   :  { %v1789_v30 = vpop.f32.mrf.mxu0 }
 0xc1a   :  { %v1793_v31 = vsel %vm1617_vm2, %v1789_v30, -inf }
 0xc1b   :  { %v4913_v40 = vpop.f32.mrf.mxu0 }
 0xc1c   :  { %1794 = vmax.xlane.f32.xlu0 %v1793_v31 }
 0xc21   :  { %v4929_v14 = vpop.f32.mrf.mxu0 }
 0xc22   :  { %v2425_v50 = vrot.slane %v4929_v14, 6  ;;  %v1213_v14 = vld [vmem:[%s5569_s9 + $0x48] sm:$0xff] }
 0xc23   :  { %v1952_v15 = vpop.f32.mrf.mxu0 }
 0xc24   :  { %v2424_v48 = vrot.slane %v1952_v15, 6 }
 0xc29   :  { %v4951_v17 = vpop.f32.mrf.mxu0 }
 0xc2b   :  { %v2102_v18 = vpop.f32.mrf.mxu0 }
 0xc2c   :  { %v2520_v43 = vrot.slane %v2102_v18, 6 }
 0xca1   :  { %v1620_v0 = vpop.xlane.xlu0 %1619 }
 0xca2   :  { %v1621_v41 = vsub.f32 %v1613_v25, %v1620_v0 }
 0xca4   :  { %v1622_v44 = vmul.f32 1.442695, %v1621_v41 }
 0xca5   :  { %v1795_v45 = vpop.xlane.xlu0 %1794 }
 0xca6   :  { %5234 = vpow2.f32 %v1622_v44  ;;  %v1796_v46 = vsub.f32 %v1789_v30, %v1795_v45  ;;  %v1253_v30 = vld [vmem:[%s5718_s29 + $0x8] sm:$0xff]  ;;  %v2521_v44 = vrot.slane %v4951_v17, 6 }
 0xca7   :  { %4963 = vmatpush3.msra.mxu0 %v1253_v30 }
 0xca8   :  { %v1797_v47 = vmul.f32 1.442695, %v1796_v46  ;;  %4972 = vmatprep.subr.mxu0 %v5280_v7  ;;  %v2522_v45 = vsel %vm1711_vm15, %v2520_v43, %v2521_v44 }
 0xcaa   :  { %5236 = vpow2.f32 %v1797_v47 }
 0xcb3   :  { %v5235_v52 = vpop.eup %5234 }
 0xcb4   :  { %v1624_v53 = vmul.f32 %v5235_v52, %v5675_v51 }
 0xcb6   :  { %v1626_v54 = vsel %vm1617_vm2, %v1624_v53, 0.0  ;;  %v1625_v35 = vadd.f32 1.6666667e-07, %v1624_v53  ;;  %v2426_v53 = vsel %vm1711_vm15, %v2424_v48, %v2425_v50 }
 0xcb7   :  { %v5237_v55 = vpop.eup %5236  ;;  %1627 = vadd.xlane.f32.xlu1 %v1626_v54 }
 0xcb8   :  { %v1799_v57 = vmul.f32 %v5237_v55, %v5679_v9 }
 0xcba   :  { %v1801_v60 = vsel %vm1617_vm2, %v1799_v57, 0.0  ;;  %v1800_v3 = vadd.f32 1.6666667e-07, %v1799_v57 }
 0xcbb   :  { %1802 = vadd.xlane.f32.xlu0 %v1801_v60 }
 0xd40   :  { %v1628_v10 = vpop.xlane.xlu1 %1627 }
 0xd41   :  { %v1629_v34 = vadd.f32 1e-06, %v1628_v10 }
 0xd43   :  { %5238 = vrcp.f32 %v1629_v34 }
 0xd44   :  { %v1803_v13 = vpop.xlane.xlu0 %1802 }
 0xd45   :  { %v1804_v32 = vadd.f32 1e-06, %v1803_v13 }
 0xd47   :  { %5240 = vrcp.f32 %v1804_v32 }
 0xd50   :  { %v5239_v61 = vpop.eup %5238 }
 0xd51   :  { %v1631_v28 = vmul.f32 %v5239_v61, %v1625_v35 }
 0xd53   :  { %4907 = vmatmul.mubr.msk.f32.vlgmr.msra.gmra.mxu1 %vm1632_vm5, %v1631_v28 }
 0xd54   :  { %v5241_v37 = vpop.eup %5240  ;;  %4915 = vmatpush3.msk.msra.mxu1 %vm1636_vm0, %v1810_v58  ;;  %4916 = vmatprep.mubr.msk.f32.mxu1 %vm5282_vm1, %v5280_v7 }
 0xd55   :  { %4930 = vmatprep.subr.mxu1 %v1227_v62  ;;  %v1806_v1 = vmul.f32 %v5241_v37, %v1800_v3 }
 0xd57   :  { %4917 = vmatmul.mubr.msk.f32.vlgmr.msra.gmra.mxu1 %vm1632_vm5, %v1806_v1  ;;  %v1231_v1 = vld [vmem:[%s5611_s26 + $0x58] sm:$0xff] }
 0xd58   :  { %4931 = vmatpush3.msra.mxu1 %v1227_v62  ;;  %4938 = vmatprep.mubr.msk.f32.mxu1 %vm173_vm3, %v5590_v56 }
 0xd59   :  { %4932 = vmatprep.subr.mxu1 %v1226_v2 }
 0xd5a   :  { %4933 = vmatpush3.msra.mxu1 %v1226_v2  ;;  %v1230_v2 = vld [vmem:[%s5611_s26 + $0x50] sm:$0xff] }
 0xd5b   :  { %4934 = vmatprep.subr.mxu1 %v1225_v59 }
 0xd5c   :  { %4935 = vmatpush3.msra.mxu1 %v1225_v59  ;;  %v1229_v59 = vld [vmem:[%s5611_s26 + $0x48] sm:$0xff] }
 0xd5d   :  { %4936 = vmatprep.subr.mxu1 %v1224_v63 }
 0xd5e   :  { %4937 = vmatpush3.msra.mxu1 %v1224_v63  ;;  %v1228_v63 = vld [vmem:[%s5611_s26 + $0x40] sm:$0xff] }
 0xd5f   :  { %4939 = vmatmul.mubr.msk.f32.vlgmr.msra.gmra.mxu1 %vm173_vm3, %v5592_v11  ;;  %4952 = vmatprep.subr.mxu1 %v5280_v7 }
 0xd60   :  { %4954 = vmatprep.mubr.msk.f32.mxu1 %vm5282_vm1, %v5280_v7 }
 0xe13   :  { %v1706_v5 = vpop.f32.mrf.mxu1 }
 0xe15   :  { %v4908_v6 = vpop.f32.mrf.mxu1 }
 0xe17   :  { %v5703_v12 = vpop.f32.mrf.mxu1 }
 0xe19   :  { %v4918_v4 = vpop.f32.mrf.mxu1 }
 0xe1f   :  { %v4940_v16 = vpop.f32.mrf.mxu1 }
 0xe20   :  { %v2429_v47 = vrot.slane %v4940_v16, 6  ;;  %v1212_v16 = vld [vmem:[%s5569_s9 + $0x40] sm:$0xff] }
 0xe21   :  { %v2027_v19 = vpop.f32.mrf.mxu1 }
 0xe22   :  { %4953 = vmatpush3.xpose.msk.msra.mxu1 %vm478_vm9, %v2027_v19  ;;  %v2428_v46 = vrot.slane %v2027_v19, 6  ;;  %v1247_v19 = vld [vmem:[%s5576_s14 + $0x58] sm:$0xff] }
 0xe23   :  { %4957 = vmatprep.subr.mxu1 %v5280_v7 }
 0xe24   :  { %v2430_v8 = vsel %vm1711_vm15, %v2428_v46, %v2429_v47 }
 0xe25   :  { %4955 = vmatmul.mubr.msk.f32.vlgmr.msra.gmra.mxu1 %vm478_vm9, %v1952_v15 }
 0xe26   :  { %4958 = vmatpush3.msk.msra.mxu1 %vm1636_vm0, %v2102_v18  ;;  %4959 = vmatprep.mubr.msk.f32.mxu1 %vm5282_vm1, %v5280_v7  ;;  %v1246_v18 = vld [vmem:[%s5576_s14 + $0x50] sm:$0xff] }
 0xe27   :  { %4967 = vmatprep.subr.mxu1 %v5280_v7 }
 0xee5   :  { %v2183_v20 = vpop.f32.mrf.mxu1 }
 0xee6   :  { %v2187_v21 = vsel %vm1617_vm2, %v2183_v20, -inf }
 0xee7   :  { %2188 = vmax.xlane.f32.xlu0 %v2187_v21  ;;  %v4956_v39 = vpop.f32.mrf.mxu1 }
 0xee8   :  { %v1244_v39 = vld [vmem:[%s5576_s14 + $0x40] sm:$0xff] }
 0xf70   :  { %v2189_v22 = vpop.xlane.xlu0 %2188 }
 0xf71   :  { %v2190_v23 = vsub.f32 %v2183_v20, %v2189_v22  ;;  %v1245_v20 = vld [vmem:[%s5576_s14 + $0x48] sm:$0xff] }
 0xf73   :  { %v2191_v24 = vmul.f32 1.442695, %v2190_v23 }
 0xf75   :  { %5242 = vpow2.f32 %v2191_v24 }
 0xf82   :  { %v5243_v25 = vpop.eup %5242 }
 0xf83   :  { %v2193_v27 = vmul.f32 %v5243_v25, %v5675_v51 }
 0xf85   :  { %v2195_v29 = vsel %vm1617_vm2, %v2193_v27, 0.0  ;;  %v2194_v26 = vadd.f32 1.6666667e-07, %v2193_v27 }
 0xf86   :  { %2196 = vadd.xlane.f32.xlu0 %v2195_v29 }
0x100f   :  { %v2197_v31 = vpop.xlane.xlu0 %2196 }
0x1010   :  { %v2198_v40 = vadd.f32 1e-06, %v2197_v31 }
0x1012   :  { %5244 = vrcp.f32 %v2198_v40 }
0x101f   :  { %v5245_v0 = vpop.eup %5244 }
0x1020   :  { %v2200_v41 = vmul.f32 %v5245_v0, %v2194_v26 }
0x1022   :  { %4960 = vmatmul.mubr.msk.f32.vlgmr.msra.gmra.mxu1 %vm1632_vm5, %v2200_v41 }
0x1023   :  { %4968 = vmatpush3.msra.mxu1 %v1252_v42  ;;  %4969 = vmatprep.mubr.msk.f32.mxu1 %vm5282_vm1, %v5280_v7 }
0x1024   :  { %4977 = vmatprep.subr.mxu1 %v5280_v7 }
0x1026   :  { %4970 = vmatmul.mubr.msk.f32.vlgmr.msra.gmra.mxu1 %vm478_vm9, %v1706_v5  ;;  %v1215_v5 = vld [vmem:[%s5569_s9 + $0x58] sm:$0xff] }
0x1027   :  { %4978 = vmatpush3.msk.msra.mxu1 %vm1636_vm0, %v2522_v45  ;;  %4979 = vmatprep.mubr.msk.f32.mxu1 %vm5282_vm1, %v5280_v7 }
0x1028   :  { %4987 = vmatprep.subr.mxu1 %v5280_v7 }
0x10e2   :  { %v2273_v49 = vpop.f32.mrf.mxu1 }
0x10e3   :  { %4965 = vmatmul.mubr.msk.f32.vlgmr.msra.gmra.mxu0 %vm478_vm9, %v2273_v49  ;;  %v1254_v49 = vld [vmem:[%s5718_s29 + $0x10] sm:$0xff] }
0x10e4   :  { %4973 = vmatpush3.xpose.msk.msra.mxu0 %vm478_vm9, %v2430_v8  ;;  %v4961_v38 = vpop.f32.mrf.mxu1  ;;  %4974 = vmatprep.mubr.msk.f32.mxu0 %vm5282_vm1, %v5280_v7 }
0x10e5   :  { %4982 = vmatprep.subr.mxu0 %v5280_v7 }
0x10e6   :  { %v5739_v52 = vpop.f32.mrf.mxu1 }
0x10e7   :  { %4975 = vmatmul.mubr.msk.f32.vlgmr.msra.gmra.mxu0 %vm478_vm9, %v2426_v53 }
0x10e8   :  { %v4971_v54 = vpop.f32.mrf.mxu1  ;;  %4983 = vmatpush3.msra.mxu0 %v1253_v30  ;;  %4984 = vmatprep.mubr.msk.f32.mxu0 %vm5282_vm1, %v5280_v7 }
0x10e9   :  { %4992 = vmatprep.subr.mxu0 %v1215_v5 }
0x11a3   :  { %v5745_v55 = vpop.f32.mrf.mxu0 }
0x11a5   :  { %v4966_v57 = vpop.f32.mrf.mxu0 }
0x11a7   :  { %v2501_v60 = vpop.f32.mrf.mxu0 }
0x11a8   :  { %v2505_v10 = vsel %vm1617_vm2, %v2501_v60, -inf }
0x11a9   :  { %2506 = vmax.xlane.f32.xlu0 %v2505_v10  ;;  %v4976_v34 = vpop.f32.mrf.mxu0 }
0x1232   :  { %v2507_v13 = vpop.xlane.xlu0 %2506 }
0x1233   :  { %v2508_v32 = vsub.f32 %v2501_v60, %v2507_v13 }
0x1235   :  { %v2509_v33 = vmul.f32 1.442695, %v2508_v32 }
0x1237   :  { %5246 = vpow2.f32 %v2509_v33 }
0x1244   :  { %v5247_v35 = vpop.eup %5246 }
0x1245   :  { %v2511_v61 = vmul.f32 %v5247_v35, %v5679_v9 }
0x1247   :  { %v2513_v36 = vsel %vm1617_vm2, %v2511_v61, 0.0  ;;  %v2512_v3 = vadd.f32 1.6666667e-07, %v2511_v61 }
0x1248   :  { %2514 = vadd.xlane.f32.xlu0 %v2513_v36 }
0x12d1   :  { %v2515_v28 = vpop.xlane.xlu0 %2514 }
0x12d2   :  { %v2516_v62 = vadd.f32 1e-06, %v2515_v28 }
0x12d4   :  { %5248 = vrcp.f32 %v2516_v62 }
0x12e1   :  { %v5249_v58 = vpop.eup %5248 }
0x12e2   :  { %v2518_v37 = vmul.f32 %v5249_v58, %v2512_v3 }
0x12e4   :  { %4980 = vmatmul.mubr.msk.f32.vlgmr.msra.gmra.mxu1 %vm1632_vm5, %v2518_v37 }
0x12e5   :  { %4988 = vmatpush3.msra.mxu1 %v1252_v42  ;;  %4989 = vmatprep.mubr.msk.f32.mxu1 %vm5282_vm1, %v5280_v7 }
0x12e6   :  { %5003 = vmatprep.subr.mxu1 %v1231_v1 }
0x12e8   :  { %4990 = vmatmul.mubr.msk.f32.vlgmr.msra.gmra.mxu1 %vm478_vm9, %v5703_v12  ;;  %v1214_v12 = vld [vmem:[%s5569_s9 + $0x50] sm:$0xff] }
0x12e9   :  { %5004 = vmatpush3.msra.mxu1 %v1231_v1  ;;  %5011 = vmatprep.mubr.msk.f32.mxu1 %vm173_vm3, %v5590_v56 }
0x12ea   :  { %5005 = vmatprep.subr.mxu1 %v1230_v2 }
0x12eb   :  { %5006 = vmatpush3.msra.mxu1 %v1230_v2 }
0x12ec   :  { %5007 = vmatprep.subr.mxu1 %v1229_v59 }
0x12ed   :  { %5008 = vmatpush3.msra.mxu1 %v1229_v59  ;;  %v1219_v59 = vld [vmem:[%s5569_s9 + $0x78] sm:$0xff] }
0x12ee   :  { %5009 = vmatprep.subr.mxu1 %v1228_v63 }
0x12ef   :  { %5010 = vmatpush3.msra.mxu1 %v1228_v63  ;;  %v2420_v63 = vadd.f32 %v5739_v52, %v5745_v55  ;;  %v1217_v52 = vld [vmem:[%s5569_s9 + $0x68] sm:$0xff]  ;;  %v1216_v55 = vld [vmem:[%s5569_s9 + $0x60] sm:$0xff] }
0x12f0   :  { %5012 = vmatmul.mubr.msk.f32.vlgmr.msra.gmra.mxu1 %vm173_vm3, %v5592_v11  ;;  %5025 = vmatprep.subr.mxu1 %v5280_v7 }
0x12f1   :  { %5027 = vmatprep.mubr.msk.f32.mxu1 %vm5282_vm1, %v5280_v7 }
0x13a4   :  { %v2594_v6 = vpop.f32.mrf.mxu1 }
0x13a5   :  { %4985 = vmatmul.mubr.msk.f32.vlgmr.msra.gmra.mxu0 %vm478_vm9, %v2594_v6 }
0x13a6   :  { %4993 = vmatpush3.msra.mxu0 %v1215_v5  ;;  %v4981_v4 = vpop.f32.mrf.mxu1  ;;  %5000 = vmatprep.mubr.msk.f32.mxu0 %vm173_vm3, %v5590_v56 }
0x13a7   :  { %4994 = vmatprep.subr.mxu0 %v1214_v12 }
0x13a8   :  { %4995 = vmatpush3.msra.mxu0 %v1214_v12  ;;  %v5772_v15 = vpop.f32.mrf.mxu1 }
0x13a9   :  { %4996 = vmatprep.subr.mxu0 %v1213_v14 }
0x13aa   :  { %4997 = vmatpush3.msra.mxu0 %v1213_v14  ;;  %v4991_v17 = vpop.f32.mrf.mxu1 }
0x13ab   :  { %4998 = vmatprep.subr.mxu0 %v1212_v16 }
0x13ac   :  { %4999 = vmatpush3.msra.mxu0 %v1212_v16 }
0x13ad   :  { %5001 = vmatmul.mubr.msk.f32.vlgmr.msra.gmra.mxu0 %vm173_vm3, %v5592_v11  ;;  %5014 = vmatprep.subr.mxu0 %v1247_v19 }
0x13ae   :  { %5015 = vmatpush3.msra.mxu0 %v1247_v19  ;;  %5022 = vmatprep.mubr.msk.f32.mxu0 %vm173_vm3, %v5590_v56 }
0x13af   :  { %5016 = vmatprep.subr.mxu0 %v1246_v18 }
0x13b0   :  { %v5013_v21 = vpop.f32.mrf.mxu1  ;;  %5017 = vmatpush3.msra.mxu0 %v1246_v18  ;;  %v1218_v18 = vld [vmem:[%s5569_s9 + $0x70] sm:$0xff]  ;;  %s4490_s9 = sld [smem:[%s5967_s0 + %s5315_s6]]  }
0x13b1   :  { %5018 = vmatprep.subr.mxu0 %v1245_v20  ;;  %v3215_v57 = vrot.slane %v5013_v21, 6  ;;  %v1250_v21 = vld [vmem:[%s5576_s14 + $0x70] sm:$0xff] }
0x13b2   :  { %v2885_v22 = vpop.f32.mrf.mxu1  ;;  %5019 = vmatpush3.msra.mxu0 %v1245_v20  ;;  %v1251_v20 = vld [vmem:[%s5576_s14 + $0x78] sm:$0xff] }
0x13b3   :  { %5020 = vmatprep.subr.mxu0 %v1244_v39  ;;  %5026 = vmatpush3.xpose.msk.msra.mxu1 %vm478_vm9, %v2885_v22  ;;  %v3214_v38 = vrot.slane %v2885_v22, 6  ;;  %v1248_v22 = vld [vmem:[%s5576_s14 + $0x60] sm:$0xff] }
0x13b4   :  { %5021 = vmatpush3.msra.mxu0 %v1244_v39  ;;  %5030 = vmatprep.subr.mxu1 %v5280_v7  ;;  %v1249_v39 = vld [vmem:[%s5576_s14 + $0x68] sm:$0xff] }
0x13b5   :  { %5023 = vmatmul.mubr.msk.f32.vlgmr.msra.gmra.mxu0 %vm173_vm3, %v5592_v11  ;;  %5035 = vmatprep.subr.mxu0 %v5280_v7  ;;  %v3216_v10 = vsel %vm1711_vm15, %v3214_v38, %v3215_v57 }
0x13b6   :  { %5037 = vmatprep.mubr.msk.f32.mxu0 %vm5282_vm1, %v5280_v7  ;;  %5036 = vmatpush3.msra.mxu0 %v1254_v49 }
0x13b7   :  { %5045 = vmatprep.subr.mxu0 %v5280_v7 }
0x1465   :  { %v5790_v23 = vpop.f32.mrf.mxu0 }
0x1467   :  { %v4986_v24 = vpop.f32.mrf.mxu0 }
0x1468   :  { %v1235_v24 = vld [vmem:[%s5611_s26 + $0x78] sm:$0xff] }
0x146d   :  { %v5002_v25 = vpop.f32.mrf.mxu0 }
0x146e   :  { %v3211_v29 = vrot.slane %v5002_v25, 6 }
0x146f   :  { %v2810_v27 = vpop.f32.mrf.mxu0 }
0x1470   :  { %v3210_v30 = vrot.slane %v2810_v27, 6  ;;  %5028 = vmatmul.mubr.msk.f32.vlgmr.msra.gmra.mxu1 %vm478_vm9, %v2810_v27  ;;  %v1234_v27 = vld [vmem:[%s5611_s26 + $0x70] sm:$0xff] }
0x1471   :  { %5032 = vmatprep.mubr.msk.f32.mxu1 %vm5282_vm1, %v5280_v7 }
0x1472   :  { %v3212_v31 = vsel %vm1711_vm15, %v3210_v30, %v3211_v29  ;;  %v1233_v30 = vld [vmem:[%s5611_s26 + $0x68] sm:$0xff] }
0x1475   :  { %v5024_v40 = vpop.f32.mrf.mxu0 }
0x1476   :  { %v3307_v13 = vrot.slane %v5024_v40, 6  ;;  %v2741_v40 = vadd.f32 %v5772_v15, %v5790_v23 }
0x1477   :  { %v2960_v26 = vpop.f32.mrf.mxu0 }
0x1478   :  { %5031 = vmatpush3.msk.msra.mxu1 %vm1636_vm0, %v2960_v26  ;;  %v3306_v34 = vrot.slane %v2960_v26, 6 }
0x1479   :  { %5040 = vmatprep.subr.mxu1 %v5280_v7 }
0x147a   :  { %v3308_v33 = vsel %vm1711_vm15, %v3306_v34, %v3307_v13 }
0x1530   :  { %v3041_v0 = vpop.f32.mrf.mxu1 }
0x1531   :  { %v3045_v41 = vsel %vm1617_vm2, %v3041_v0, -inf }
0x1532   :  { %3046 = vmax.xlane.f32.xlu0 %v3045_v41  ;;  %v5029_v42 = vpop.f32.mrf.mxu1 }
0x15bb   :  { %v3047_v43 = vpop.xlane.xlu0 %3046 }
0x15bc   :  { %v3048_v44 = vsub.f32 %v3041_v0, %v3047_v43 }
0x15be   :  { %v3049_v45 = vmul.f32 1.442695, %v3048_v44 }
0x15c0   :  { %5250 = vpow2.f32 %v3049_v45 }
0x15cd   :  { %v5251_v46 = vpop.eup %5250 }
0x15ce   :  { %v3051_v47 = vmul.f32 %v5251_v46, %v5675_v51 }
0x15d0   :  { %v3053_v48 = vsel %vm1617_vm2, %v3051_v47, 0.0  ;;  %v3052_v53 = vadd.f32 1.6666667e-07, %v3051_v47 }
0x15d1   :  { %3054 = vadd.xlane.f32.xlu0 %v3053_v48 }
0x165a   :  { %v3055_v8 = vpop.xlane.xlu0 %3054 }
0x165b   :  { %v3056_v50 = vadd.f32 1e-06, %v3055_v8 }
0x165d   :  { %5252 = vrcp.f32 %v3056_v50 }
0x166a   :  { %v5253_v54 = vpop.eup %5252 }
0x166b   :  { %v3058_v60 = vmul.f32 %v5253_v54, %v3052_v53  ;;  %v1255_v53 = vld [vmem:[%s5718_s29 + $0x18] sm:$0xff] }
0x166d   :  { %5033 = vmatmul.mubr.msk.f32.vlgmr.msra.gmra.mxu1 %vm1632_vm5, %v3058_v60 }
0x166e   :  { %5041 = vmatpush3.xpose.msk.msra.mxu1 %vm478_vm9, %v3216_v10  ;;  %5042 = vmatprep.mubr.msk.f32.mxu1 %vm5282_vm1, %v5280_v7 }
0x166f   :  { %5050 = vmatprep.subr.mxu1 %v5280_v7 }
0x1671   :  { %5043 = vmatmul.mubr.msk.f32.vlgmr.msra.gmra.mxu1 %vm478_vm9, %v3212_v31  ;;  %v1232_v31 = vld [vmem:[%s5611_s26 + $0x60] sm:$0xff] }
0x1672   :  { %5051 = vmatpush3.msra.mxu1 %v1254_v49  ;;  %5052 = vmatprep.mubr.msk.f32.mxu1 %vm5282_vm1, %v5280_v7 }
0x1673   :  { %5066 = vmatprep.subr.mxu1 %v1235_v24 }
0x172d   :  { %v3131_v32 = vpop.f32.mrf.mxu1 }
0x172e   :  { %5038 = vmatmul.mubr.msk.f32.vlgmr.msra.gmra.mxu0 %vm478_vm9, %v3131_v32 }
0x172f   :  { %5046 = vmatpush3.msk.msra.mxu0 %vm1636_vm0, %v3308_v33  ;;  %v5034_v35 = vpop.f32.mrf.mxu1  ;;  %5047 = vmatprep.mubr.msk.f32.mxu0 %vm5282_vm1, %v5280_v7 }
0x1730   :  { %5055 = vmatprep.subr.mxu0 %v1219_v59 }
0x1731   :  { %v3287_v61 = vpop.f32.mrf.mxu1 }
0x1732   :  { %v3291_v36 = vsel %vm1617_vm2, %v3287_v61, -inf }
0x1733   :  { %3292 = vmax.xlane.f32.xlu0 %v3291_v36  ;;  %v5044_v28 = vpop.f32.mrf.mxu1 }
0x17bc   :  { %v3293_v62 = vpop.xlane.xlu0 %3292 }
0x17bd   :  { %v3294_v3 = vsub.f32 %v3287_v61, %v3293_v62 }
0x17bf   :  { %v3295_v58 = vmul.f32 1.442695, %v3294_v3 }
0x17c1   :  { %5254 = vpow2.f32 %v3295_v58 }
0x17ce   :  { %v5255_v37 = vpop.eup %5254 }
0x17cf   :  { %v3297_v1 = vmul.f32 %v5255_v37, %v5679_v9 }
0x17d1   :  { %v3299_v2 = vsel %vm1617_vm2, %v3297_v1, 0.0  ;;  %v3298_v16 = vadd.f32 1.6666667e-07, %v3297_v1 }
0x17d2   :  { %3300 = vadd.xlane.f32.xlu0 %v3299_v2 }
0x17ee   :  { %v3204_v5 = vpop.f32.mrf.mxu0 }
0x17ef   :  { %v5823_v6 = vadd.f32 %v3204_v5, %v2420_v63 }
0x17f0   :  { %v5039_v12 = vpop.f32.mrf.mxu0 }
0x185b   :  { %v3301_v4 = vpop.xlane.xlu0 %3300 }
0x185c   :  { %v3302_v14 = vadd.f32 1e-06, %v3301_v4 }
0x185e   :  { %5256 = vrcp.f32 %v3302_v14 }
0x186b   :  { %v5257_v17 = vpop.eup %5256 }
0x186c   :  { %v3304_v19 = vmul.f32 %v5257_v17, %v3298_v16 }
0x186e   :  { %5048 = vmatmul.mubr.msk.f32.vlgmr.msra.gmra.mxu0 %vm1632_vm5, %v3304_v19 }
0x186f   :  { %5056 = vmatpush3.msra.mxu0 %v1219_v59  ;;  %5063 = vmatprep.mubr.msk.f32.mxu0 %vm173_vm3, %v5590_v56 }
0x1870   :  { %5057 = vmatprep.subr.mxu0 %v1218_v18 }
0x1871   :  { %5058 = vmatpush3.msra.mxu0 %v1218_v18 }
0x1872   :  { %5059 = vmatprep.subr.mxu0 %v1217_v52 }
0x1873   :  { %5060 = vmatpush3.msra.mxu0 %v1217_v52 }
0x1874   :  { %5061 = vmatprep.subr.mxu0 %v1216_v55 }
0x1875   :  { %5062 = vmatpush3.msra.mxu0 %v1216_v55 }
0x1876   :  { %5064 = vmatmul.mubr.msk.f32.vlgmr.msra.gmra.mxu0 %vm173_vm3, %v5592_v11  ;;  %5077 = vmatprep.subr.mxu0 %v1251_v20 }
0x1877   :  { %5078 = vmatpush3.msra.mxu0 %v1251_v20  ;;  %5085 = vmatprep.mubr.msk.f32.mxu0 %vm173_vm3, %v5590_v56 }
0x1878   :  { %5079 = vmatprep.subr.mxu0 %v1250_v21 }
0x1879   :  { %5080 = vmatpush3.msra.mxu0 %v1250_v21 }
0x187a   :  { %5081 = vmatprep.subr.mxu0 %v1249_v39 }
0x187b   :  { %5082 = vmatpush3.msra.mxu0 %v1249_v39 }
0x187c   :  { %5083 = vmatprep.subr.mxu0 %v1248_v22 }
0x187d   :  { %5084 = vmatpush3.msra.mxu0 %v1248_v22 }
0x187e   :  { %5086 = vmatmul.mubr.msk.f32.vlgmr.msra.gmra.mxu0 %vm173_vm3, %v5592_v11  ;;  %5098 = vmatprep.subr.mxu0 %v5280_v7 }
0x187f   :  { %5100 = vmatprep.mubr.msk.f32.mxu0 %vm5282_vm1, %v5280_v7  ;;  %5099 = vmatpush3.msra.mxu0 %v1255_v53 }
0x1880   :  { %5108 = vmatprep.subr.mxu0 %v5280_v7 }
0x192e   :  { %v3380_v25 = vpop.f32.mrf.mxu0 }
0x192f   :  { %5053 = vmatmul.mubr.msk.f32.vlgmr.msra.gmra.mxu1 %vm478_vm9, %v3380_v25  ;;  %v4589_v25 = vld [vmem:[%s4481_s3] ss:$0 sm:$0xff] }
0x1930   :  { %5067 = vmatpush3.msra.mxu1 %v1235_v24  ;;  %v5049_v29 = vpop.f32.mrf.mxu0  ;;  %5074 = vmatprep.mubr.msk.f32.mxu1 %vm173_vm3, %v5590_v56 }
0x1931   :  { %5068 = vmatprep.subr.mxu1 %v1234_v27  ;;  %v5278_v29 = vld [vmem:[%s5324_s5 + $0x8] sm:$0xf] }
0x1932   :  { %5069 = vmatpush3.msra.mxu1 %v1234_v27 }
0x1933   :  { %5070 = vmatprep.subr.mxu1 %v1233_v30 }
0x1934   :  { %5071 = vmatpush3.msra.mxu1 %v1233_v30 }
0x1935   :  { %5072 = vmatprep.subr.mxu1 %v1232_v31 }
0x1936   :  { %5073 = vmatpush3.msra.mxu1 %v1232_v31  ;;  %v5065_v41 = vpop.f32.mrf.mxu0  ;;  %v5279_v31 = vld [vmem:[%s5324_s5] sm:$0xff]  ;;  %s5307_s5 = smov 23  }
0x1937   :  { %5075 = vmatmul.mubr.msk.f32.vlgmr.msra.gmra.mxu1 %vm173_vm3, %v5592_v11  ;;  %5088 = vmatprep.subr.mxu1 %v5280_v7  ;;  %v3925_v35 = vrot.slane %v5065_v41, 6  ;;  %s4484_s7 = sld [smem:[%s5967_s0 + %s5307_s5]]  }
0x1938   :  { %5090 = vmatprep.mubr.msk.f32.mxu1 %vm5282_vm1, %v5280_v7  ;;  %v3524_v42 = vpop.f32.mrf.mxu0 }
0x1939   :  { %v3924_v33 = vrot.slane %v3524_v42, 6 }
0x193b   :  { %v3926_v61 = vsel %vm1711_vm15, %v3924_v33, %v3925_v35  ;;  %v4590_v35 = vld [vmem:[%s4482_s16] ss:$0 sm:$0xff] }
0x193e   :  { %v5087_v44 = vpop.f32.mrf.mxu0 }
0x193f   :  { %v4021_v28 = vrot.slane %v5087_v44, 6 }
0x1940   :  { %v3674_v11 = vpop.f32.mrf.mxu0 }
0x1941   :  { %v4020_v36 = vrot.slane %v3674_v11, 6 }
0x1943   :  { %v4022_v3 = vsel %vm1711_vm15, %v4020_v36, %v4021_v28 }
0x19ef   :  { %v3453_v56 = vpop.f32.mrf.mxu1 }
0x19f0   :  { %v5858_v26 = vadd.f32 %v3453_v56, %v2741_v40 }
0x19f1   :  { %v5054_v0 = vpop.f32.mrf.mxu1 }
0x19f7   :  { %v5076_v43 = vpop.f32.mrf.mxu1 }
0x19f8   :  { %v3929_v13 = vrot.slane %v5076_v43, 6 }
0x19f9   :  { %v3599_v45 = vpop.f32.mrf.mxu1 }
0x19fa   :  { %5089 = vmatpush3.xpose.msk.msra.mxu1 %vm478_vm9, %v3599_v45  ;;  %v3928_v60 = vrot.slane %v3599_v45, 6 }
0x19fb   :  { %5093 = vmatprep.subr.mxu1 %v5280_v7 }
0x19fd   :  { %5091 = vmatmul.mubr.msk.f32.vlgmr.msra.gmra.mxu1 %vm478_vm9, %v3524_v42 }
0x19fe   :  { %5094 = vmatpush3.msk.msra.mxu1 %vm1636_vm0, %v3674_v11  ;;  %5095 = vmatprep.mubr.msk.f32.mxu1 %vm5282_vm1, %v5280_v7 }
0x19ff   :  { %5103 = vmatprep.subr.mxu1 %v5280_v7 }
0x1abd   :  { %v3755_v15 = vpop.f32.mrf.mxu1 }
0x1abe   :  { %v3759_v23 = vsel %vm1617_vm2, %v3755_v15, -inf }
0x1abf   :  { %3760 = vmax.xlane.f32.xlu1 %v3759_v23  ;;  %v5092_v46 = vpop.f32.mrf.mxu1 }
0x1b48   :  { %v3761_v47 = vpop.xlane.xlu1 %3760 }
0x1b49   :  { %v3762_v48 = vsub.f32 %v3755_v15, %v3761_v47 }
0x1b4b   :  { %v3763_v49 = vmul.f32 1.442695, %v3762_v48 }
0x1b4d   :  { %5258 = vpow2.f32 %v3763_v49  ;;  %v1262_v49 = vld [vmem:[%s4484_s7 + $0x18] sm:$0xff] }
0x1b5a   :  { %v5259_v8 = vpop.eup %5258 }
0x1b5b   :  { %v3765_v50 = vmul.f32 %v5259_v8, %v5675_v51  ;;  %v3930_v51 = vsel %vm1711_vm15, %v3928_v60, %v3929_v13  ;;  %v1261_v8 = vld [vmem:[%s4484_s7 + $0x10] sm:$0xff] }
0x1b5d   :  { %v3767_v38 = vsel %vm1617_vm2, %v3765_v50, 0.0  ;;  %v3766_v10 = vadd.f32 1.6666667e-07, %v3765_v50  ;;  %v1260_v50 = vld [vmem:[%s4484_s7 + $0x8] sm:$0xff] }
0x1b5e   :  { %3768 = vadd.xlane.f32.xlu0 %v3767_v38  ;;  %v1259_v38 = vld [vmem:[%s4484_s7] sm:$0xff] }
0x1be7   :  { %v3769_v54 = vpop.xlane.xlu0 %3768 }
0x1be8   :  { %v3770_v57 = vadd.f32 1e-06, %v3769_v54  ;;  %v1278_v54 = vld [vmem:[%s5918_s11 + $0x70] sm:$0xff] }
0x1bea   :  { %5260 = vrcp.f32 %v3770_v57  ;;  %v1277_v57 = vld [vmem:[%s5918_s11 + $0x68] sm:$0xff] }
0x1bf7   :  { %v5261_v34 = vpop.eup %5260 }
0x1bf8   :  { %v3772_v32 = vmul.f32 %v5261_v34, %v3766_v10 }
0x1bfa   :  { %5096 = vmatmul.mubr.msk.f32.vlgmr.msra.gmra.mxu1 %vm1632_vm5, %v3772_v32 }
0x1bfb   :  { %5104 = vmatpush3.xpose.msk.msra.mxu1 %vm478_vm9, %v3930_v51  ;;  %5105 = vmatprep.mubr.msk.f32.mxu1 %vm5282_vm1, %v5280_v7 }
0x1bfc   :  { %5113 = vmatprep.subr.mxu1 %v5280_v7 }
0x1bfe   :  { %5106 = vmatmul.mubr.msk.f32.vlgmr.msra.gmra.mxu1 %vm478_vm9, %v3926_v61 }
0x1bff   :  { %5114 = vmatpush3.msra.mxu1 %v1255_v53  ;;  %5115 = vmatprep.mubr.msk.f32.mxu1 %vm5282_vm1, %v5280_v7  ;;  %v1279_v53 = vld [vmem:[%s5918_s11 + $0x78] sm:$0xff] }
0x1c00   :  { %5129 = vmatprep.subr.mxu1 %v1279_v53 }
0x1cba   :  { %v3845_v62 = vpop.f32.mrf.mxu1 }
0x1cbb   :  { %5101 = vmatmul.mubr.msk.f32.vlgmr.msra.gmra.mxu0 %vm478_vm9, %v3845_v62  ;;  %v4591_v62 = vld [vmem:[%s4483_s20] ss:$0 sm:$0xff] }
0x1cbc   :  { %5109 = vmatpush3.msk.msra.mxu0 %vm1636_vm0, %v4022_v3  ;;  %v5097_v58 = vpop.f32.mrf.mxu1  ;;  %5110 = vmatprep.mubr.msk.f32.mxu0 %vm5282_vm1, %v5280_v7 }
0x1cbd   :  { %5118 = vmatprep.subr.mxu0 %v1262_v49 }
0x1cbe   :  { %v4001_v37 = vpop.f32.mrf.mxu1 }
0x1cbf   :  { %v4005_v1 = vsel %vm1617_vm2, %v4001_v37, -inf }
0x1cc0   :  { %4006 = vmax.xlane.f32.xlu1 %v4005_v1  ;;  %v5107_v2 = vpop.f32.mrf.mxu1 }
0x1cc1   :  { %v1276_v2 = vld [vmem:[%s5918_s11 + $0x60] sm:$0xff] }
0x1d49   :  { %v4007_v59 = vpop.xlane.xlu1 %4006 }
0x1d4a   :  { %v4008_v63 = vsub.f32 %v4001_v37, %v4007_v59  ;;  %v1275_v59 = vld [vmem:[%s5918_s11 + $0x58] sm:$0xff] }
0x1d4c   :  { %v4009_v5 = vmul.f32 1.442695, %v4008_v63  ;;  %v1274_v63 = vld [vmem:[%s5918_s11 + $0x50] sm:$0xff] }
0x1d4e   :  { %5262 = vpow2.f32 %v4009_v5  ;;  %v1273_v5 = vld [vmem:[%s5918_s11 + $0x48] sm:$0xff] }
0x1d5b   :  { %v5263_v12 = vpop.eup %5262 }
0x1d5c   :  { %v4011_v4 = vmul.f32 %v5263_v12, %v5679_v9  ;;  %v1272_v12 = vld [vmem:[%s5918_s11 + $0x40] sm:$0xff] }
0x1d5e   :  { %v4013_v14 = vsel %vm1617_vm2, %v4011_v4, 0.0  ;;  %v4012_v52 = vadd.f32 1.6666667e-07, %v4011_v4  ;;  %v1271_v4 = vld [vmem:[%s5918_s11 + $0x38] sm:$0xff] }
0x1d5f   :  { %4014 = vadd.xlane.f32.xlu0 %v4013_v14  ;;  %v1270_v14 = vld [vmem:[%s5918_s11 + $0x30] sm:$0xff] }
0x1d7b   :  { %v3918_v16 = vpop.f32.mrf.mxu0 }
0x1d7c   :  { %v3922_v17 = vadd.f32 %v3918_v16, %v5823_v6  ;;  %v1269_v16 = vld [vmem:[%s5918_s11 + $0x28] sm:$0xff] }
0x1d7d   :  { %v5102_v19 = vpop.f32.mrf.mxu0 }
0x1d7e   :  { %v1267_v19 = vld [vmem:[%s5918_s11 + $0x18] sm:$0xff] }
0x1de8   :  { %v4015_v7 = vpop.xlane.xlu0 %4014 }
0x1de9   :  { %v4016_v18 = vadd.f32 1e-06, %v4015_v7  ;;  %v1266_v7 = vld [vmem:[%s5918_s11 + $0x10] sm:$0xff] }
0x1deb   :  { %5264 = vrcp.f32 %v4016_v18  ;;  %v1265_v18 = vld [vmem:[%s5918_s11 + $0x8] sm:$0xff] }
0x1df8   :  { %v5265_v55 = vpop.eup %5264 }
0x1df9   :  { %v4018_v20 = vmul.f32 %v5265_v55, %v4012_v52  ;;  %v1264_v52 = vld [vmem:[%s5918_s11] sm:$0xff] }
0x1dfa   :  { %v4592_v55 = vld [vmem:[%s4485_s24] ss:$0 sm:$0xff] }
0x1dfb   :  { %5111 = vmatmul.mubr.msk.f32.vlgmr.msra.gmra.mxu0 %vm1632_vm5, %v4018_v20 }
0x1dfc   :  { %5119 = vmatpush3.msra.mxu0 %v1262_v49 }
0x1dfd   :  { %5120 = vmatprep.subr.mxu0 %v1261_v8 }
0x1dfe   :  { %5121 = vmatpush3.msra.mxu0 %v1261_v8 }
0x1dff   :  { %5122 = vmatprep.subr.mxu0 %v1260_v50 }
0x1e00   :  { %5123 = vmatpush3.msra.mxu0 %v1260_v50 }
0x1e01   :  { %5124 = vmatprep.subr.mxu0 %v1259_v38 }
0x1e02   :  { %5125 = vmatpush3.msra.mxu0 %v1259_v38 }
0x1ebb   :  { %v4094_v21 = vpop.f32.mrf.mxu0 }
0x1ebc   :  { %5116 = vmatmul.mubr.msk.f32.vlgmr.msra.gmra.mxu1 %vm478_vm9, %v4094_v21 }
0x1ebd   :  { %v5112_v9 = vpop.f32.mrf.mxu0  ;;  %5130 = vmatpush3.msra.mxu1 %v1279_v53 }
0x1ebe   :  { %5131 = vmatprep.subr.mxu1 %v1278_v54 }
0x1ebf   :  { %5132 = vmatpush3.msra.mxu1 %v1278_v54 }
0x1ec0   :  { %5133 = vmatprep.subr.mxu1 %v1277_v57 }
0x1ec1   :  { %5134 = vmatpush3.msra.mxu1 %v1277_v57 }
0x1ec2   :  { %5135 = vmatprep.subr.mxu1 %v1276_v2 }
0x1ec3   :  { %5136 = vmatpush3.msra.mxu1 %v1276_v2 }
0x1ec4   :  { %5137 = vmatprep.subr.mxu1 %v1275_v59 }
0x1ec5   :  { %5138 = vmatpush3.msra.mxu1 %v1275_v59 }
0x1ec6   :  { %5139 = vmatprep.subr.mxu1 %v1274_v63 }
0x1ec7   :  { %5140 = vmatpush3.msra.mxu1 %v1274_v63 }
0x1ec8   :  { %5141 = vmatprep.subr.mxu1 %v1273_v5 }
0x1ec9   :  { %5142 = vmatpush3.msra.mxu1 %v1273_v5 }
0x1eca   :  { %5143 = vmatprep.subr.mxu1 %v1272_v12 }
0x1ecb   :  { %5144 = vmatpush3.msra.mxu1 %v1272_v12 }
0x1ecc   :  { %5145 = vmatprep.subr.mxu1 %v1271_v4 }
0x1ecd   :  { %5146 = vmatpush3.msra.mxu1 %v1271_v4 }
0x1ece   :  { %5147 = vmatprep.subr.mxu1 %v1270_v14 }
0x1ecf   :  { %5148 = vmatpush3.msra.mxu1 %v1270_v14 }
0x1ed0   :  { %5149 = vmatprep.subr.mxu1 %v1269_v16 }
0x1ed1   :  { %5150 = vmatpush3.msra.mxu1 %v1269_v16 }
0x1f7c   :  { %v4167_v6 = vpop.f32.mrf.mxu1 }
0x1f7d   :  { %v4171_v39 = vadd.f32 %v4167_v6, %v5858_v26 }
0x1f7e   :  { %v5117_v22 = vpop.f32.mrf.mxu1 }
0x1f7f   :  { %v4173_v24 = vrot.slane %v4171_v39, 2 }
0x1f81   :  { %v4175_v27 = vsel %vm1636_vm0, %v3922_v17, %v4173_v24  ;;  %v4177_v30 = vadd.f32 %v5278_v29, %v4173_v24  ;;  %v1268_v17 = vld [vmem:[%s5918_s11 + $0x20] sm:$0xff] }
0x1f82   :  { %v4176_v40 = vadd.f32 %v5279_v31, %v4175_v27  ;;  %5151 = vmatprep.subr.mxu1 %v1268_v17 }
0x1f83   :  { %v5900_v56 = vadd.f32 %v4589_v25, %v4177_v30  ;;  %5152 = vmatpush3.msra.mxu1 %v1268_v17 }
0x1f84   :  { %v5902_v0 = vadd.f32 %v4589_v25, %v4176_v40  ;;  %5153 = vmatprep.subr.mxu1 %v1267_v19 }
0x1f85   :  { %v4189_v41 = vsel %vm676_vm8, %v5900_v56, 0.0  ;;  %5154 = vmatpush3.msra.mxu1 %v1267_v19 }
0x1f86   :  { %4190 = vadd.xlane.f32.xlu0 %v4189_v41  ;;  %v4186_v26 = vsel %vm173_vm3, %v5902_v0, 0.0  ;;  %5155 = vmatprep.subr.mxu1 %v1266_v7 }
0x1f87   :  { %4187 = vadd.xlane.f32.xlu1 %v4186_v26  ;;  %5156 = vmatpush3.msra.mxu1 %v1266_v7  ;;  %v4595_v26 = vld [vmem:[%s4487_s27] ss:$0 sm:$0xff] }
0x1f88   :  { %5157 = vmatprep.subr.mxu1 %v1265_v18 }
0x1f89   :  { %5158 = vmatpush3.msra.mxu1 %v1265_v18 }
0x1f8a   :  { %5159 = vmatprep.subr.mxu1 %v1264_v52 }
0x1f8b   :  { %5160 = vmatpush3.msra.mxu1 %v1264_v52 }
0x200f   :  { %v4191_v42 = vpop.xlane.xlu0 %4190 }
0x2010   :  { %v4193_v43 = vmul.f32 0.03125, %v4191_v42  ;;  %v4188_v44 = vpop.xlane.xlu1 %4187 }
0x2011   :  { %v4192_v45 = vmul.f32 0.03125, %v4188_v44 }
0x2012   :  { %v4195_v11 = vsub.f32 %v5900_v56, %v4193_v43 }
0x2013   :  { %v4194_v15 = vsub.f32 %v5902_v0, %v4192_v45 }
0x2014   :  { %v4197_v23 = vmul.f32 %v4195_v11, %v4195_v11 }
0x2015   :  { %v4196_v46 = vmul.f32 %v4194_v15, %v4194_v15 }
0x2016   :  { %v4201_v47 = vsel %vm676_vm8, %v4197_v23, 0.0 }
0x2017   :  { %4202 = vadd.xlane.f32.xlu0 %v4201_v47  ;;  %v4198_v48 = vsel %vm173_vm3, %v4196_v46, 0.0 }
0x2018   :  { %4199 = vadd.xlane.f32.xlu1 %v4198_v48 }
0x20a0   :  { %v4203_v60 = vpop.xlane.xlu0 %4202 }
0x20a1   :  { %v4205_v10 = vmul.f32 0.03125, %v4203_v60  ;;  %v4200_v34 = vpop.xlane.xlu1 %4199 }
0x20a2   :  { %v4204_v13 = vmul.f32 0.03125, %v4200_v34 }
0x20a3   :  { %v4207_v32 = vadd.f32 1e-05, %v4205_v10 }
0x20a4   :  { %v4206_v33 = vadd.f32 1e-05, %v4204_v13 }
0x20a5   :  { %5266 = vrsqrt.f32 %v4207_v32 }
0x20a6   :  { %5268 = vrsqrt.f32 %v4206_v33 }
0x20b2   :  { %v5267_v51 = vpop.eup %5266 }
0x20b3   :  { %v5269_v61 = vpop.eup %5268  ;;  %v4211_v36 = vmul.f32 %v5267_v51, %v4195_v11  ;;  %v4596_v51 = vld [vmem:[%s4488_s1] ss:$0 sm:$0xff] }
0x20b4   :  { %v4210_v28 = vmul.f32 %v5269_v61, %v4194_v15 }
0x20b5   :  { %v4219_v3 = vmul.f32 %v4590_v35, %v4211_v36  ;;  %v4597_v36 = vld [vmem:[%s4489_s4] ss:$0 sm:$0xff] }
0x20b6   :  { %v4218_v58 = vmul.f32 %v4590_v35, %v4210_v28 }
0x20b7   :  { %v4227_v1 = vadd.f32 %v4591_v62, %v4219_v3 }
0x20b8   :  { %v4226_v37 = vadd.f32 %v4591_v62, %v4218_v58 }
0x20ba   :  { %5126 = vmatprep.mubr.msk.f32.mxu0 %vm173_vm3, %v4226_v37 }
0x20bb   :  { %5127 = vmatmul.mubr.msk.f32.vlgmr.msra.gmra.mxu0 %vm173_vm3, %v4227_v1 }
0x217b   :  { %v5128_v20 = vpop.f32.mrf.mxu0 }
0x217c   :  { %v4312_v21 = vadd.f32 %v5128_v20, %v4592_v55 }
0x217d   :  { %v4306_v9 = vpop.f32.mrf.mxu0 }
0x217e   :  { %v4318_v6 = vmul.f32 0.70710677, %v4312_v21  ;;  %v4307_v39 = vadd.f32 %v4592_v55, %v4306_v9  ;;  %v4316_v31 = vmul.f32 0.5, %v4312_v21 }
0x2180   :  { %5270 = verf.f32 %v4318_v6  ;;  %v4317_v22 = vmul.f32 0.70710677, %v4307_v39  ;;  %v4315_v29 = vmul.f32 0.5, %v4307_v39 }
0x2182   :  { %5272 = verf.f32 %v4317_v22 }
0x218d   :  { %v5271_v24 = vpop.eup %5270 }
0x218e   :  { %v4322_v27 = vadd.f32 1.0, %v5271_v24 }
0x218f   :  { %v5273_v25 = vpop.eup %5272 }
0x2190   :  { %v4321_v30 = vadd.f32 1.0, %v5273_v25  ;;  %v4324_v41 = vmul.f32 %v4322_v27, %v4316_v31 }
0x2192   :  { %v4323_v40 = vmul.f32 %v4321_v30, %v4315_v29 }
0x2194   :  { %5161 = vmatprep.mubr.f32.mxu1 %v4323_v40 }
0x2195   :  { %5162 = vmatmul.mubr.f32.vlgmr.msra.gmra.mxu1 %v4324_v41 }
0x2255   :  { %v5163_v42 = vpop.f32.mrf.mxu1 }
0x2256   :  { %v4403_v43 = vadd.f32 %v5163_v42, %v4595_v26 }
0x2257   :  { %v4397_v44 = vpop.f32.mrf.mxu1 }
0x2258   :  { %v4398_v45 = vadd.f32 %v4595_v26, %v4397_v44  ;;  %v4407_v11 = vadd.f32 %v4403_v43, %v5900_v56 }
0x225a   :  { %v4413_v15 = vsel %vm676_vm8, %v4407_v11, 0.0  ;;  %v4406_v23 = vadd.f32 %v4398_v45, %v5902_v0 }
0x225b   :  { %4414 = vadd.xlane.f32.xlu0 %v4413_v15 }
0x225c   :  { %v4410_v46 = vsel %vm173_vm3, %v4406_v23, 0.0 }
0x225d   :  { %4411 = vadd.xlane.f32.xlu1 %v4410_v46 }
0x22e4   :  { %v4415_v47 = vpop.xlane.xlu0 %4414 }
0x22e5   :  { %v4417_v48 = vmul.f32 0.03125, %v4415_v47 }
0x22e6   :  { %v4412_v49 = vpop.xlane.xlu1 %4411 }
0x22e7   :  { %v4419_v8 = vsub.f32 %v4407_v11, %v4417_v48  ;;  %v4416_v50 = vmul.f32 0.03125, %v4412_v49 }
0x22e9   :  { %v4418_v38 = vsub.f32 %v4406_v23, %v4416_v50  ;;  %v4421_v53 = vmul.f32 %v4419_v8, %v4419_v8 }
0x22eb   :  { %v4425_v54 = vsel %vm676_vm8, %v4421_v53, 0.0  ;;  %v4420_v57 = vmul.f32 %v4418_v38, %v4418_v38 }
0x22ec   :  { %4426 = vadd.xlane.f32.xlu0 %v4425_v54 }
0x22ed   :  { %v4422_v56 = vsel %vm173_vm3, %v4420_v57, 0.0 }
0x22ee   :  { %4423 = vadd.xlane.f32.xlu1 %v4422_v56 }
0x2375   :  { %v4427_v60 = vpop.xlane.xlu0 %4426 }
0x2376   :  { %v4429_v0 = vmul.f32 0.03125, %v4427_v60 }
0x2377   :  { %v4424_v10 = vpop.xlane.xlu1 %4423 }
0x2378   :  { %v4431_v34 = vadd.f32 1e-05, %v4429_v0  ;;  %v4428_v13 = vmul.f32 0.03125, %v4424_v10 }
0x237a   :  { %5274 = vrsqrt.f32 %v4431_v34  ;;  %v4430_v32 = vadd.f32 1e-05, %v4428_v13 }
0x237c   :  { %5276 = vrsqrt.f32 %v4430_v32 }
0x2387   :  { %v5275_v33 = vpop.eup %5274 }
0x2388   :  { %v4435_v35 = vmul.f32 %v5275_v33, %v4419_v8 }
0x2389   :  { %v5277_v61 = vpop.eup %5276 }
0x238a   :  { %v4443_v28 = vmul.f32 %v4596_v51, %v4435_v35  ;;  %v4434_v62 = vmul.f32 %v5277_v61, %v4418_v38 }
0x238c   :  { %v4451_v3 = vadd.f32 %v4597_v36, %v4443_v28  ;;  %v4442_v58 = vmul.f32 %v4596_v51, %v4434_v62 }
0x238e   :  { %4453 = vst.msk [vmem:[%s4490_s9 + $0x8] sm:$0xf] %vm676_vm8, %v4451_v3  ;;  %v4450_v37 = vadd.f32 %v4597_v36, %v4442_v58 }
0x2390   :  { %4452 = vst.msk [vmem:[%s4490_s9] sm:$0xff] %vm173_vm3, %v4450_v37 }

// kernel: vit_encoder_fsm_forward.5
= control target key start
LH: loop header
LB: loop body
LE: loop exit
PB: predicated region body
PF: predicated region fallthrough
CT: control target
= control target key end

     0   :  { %v194_v34 = vlaneseq  ;;  %vm202_vm0 = vcmask 1040384   ;;  %vm204_vm1 = vcmask 1044480   ;;  %vm206_vm2 = vcmask 1045504   ;;  %s9057_s1 = inlined_call_operand.vmem [shape: f32[256,32], index: 1, kind: input, shape index: {}]   ;;  %s9058_s0 = inlined_call_operand.vmem [shape: f32[8,256], index: 0, kind: input, shape index: {}]   ;;  %s9059_s5 = inlined_call_operand.vmem [shape: f32[5,32], index: 5, kind: input, shape index: {}]   ;;  %s9060_s2 = inlined_call_operand.vmem [shape: f32[1,32], index: 2, kind: input, shape index: {}]   ;;  %s9061_s3 = inlined_call_operand.vmem [shape: f32[1,32], index: 3, kind: input, shape index: {}]   ;;  %s9062_s4 = inlined_call_operand.vmem [shape: f32[1,32], index: 4, kind: input, shape index: {}]   ;;  %s9063_s9 = inlined_call_operand.vmem [shape: f32[2,4,32,8], index: 9, kind: input, shape index: {}]   ;;  %s9064_s8 = inlined_call_operand.vmem [shape: f32[2,4,32,8], index: 8, kind: input, shape index: {}]   ;;  %s9065_s10 = inlined_call_operand.vmem [shape: f32[2,4,32,8], index: 10, kind: input, shape index: {}]   ;;  %s9066_s6 = inlined_call_operand.vmem [shape: f32[2,1,32], index: 6, kind: input, shape index: {}]   ;;  %s9067_s7 = inlined_call_operand.vmem [shape: f32[2,1,32], index: 7, kind: input, shape index: {}]   ;;  %s9068_s11 = inlined_call_operand.vmem [shape: f32[2,4,8,32], index: 11, kind: input, shape index: {}]   ;;  %s9069_s12 = inlined_call_operand.vmem [shape: f32[2,1,32], index: 12, kind: input, shape index: {}]   ;;  %s9070_s15 = inlined_call_operand.vmem [shape: f32[2,32,128], index: 15, kind: input, shape index: {}]   ;;  %s9071_s17 = inlined_call_operand.vmem [shape: f32[2,128,32], index: 17, kind: input, shape index: {}]   ;;  %s9072_s13 = inlined_call_operand.vmem [shape: f32[2,1,32], index: 13, kind: input, shape index: {}]   ;;  %s9073_s14 = inlined_call_operand.vmem [shape: f32[2,1,32], index: 14, kind: input, shape index: {}]   ;;  %s9074_s16 = inlined_call_operand.vmem [shape: f32[2,1,128], index: 16, kind: input, shape index: {}]   ;;  %s9075_s18 = inlined_call_operand.vmem [shape: f32[2,1,32], index: 18, kind: input, shape index: {}]   ;;  %s9076_s19 = inlined_call_operand.vmem [shape: f32[12,32], index: 19, kind: output, shape index: {}]  }
   0x1   :  { %9079 = sst [smem:[#allocation2_spill]] %s9057_s1  ;;  %v174_v40 = vld [vmem:[%s9061_s3] sm:$0x1]  ;;  %vm208_vm3 = vcmask 1046528   ;;  %vm291_vm4 = vcmask 261120   ;;  %vm210_vm5 = vcmask 1042432  }
   0x2   :  { %9080 = sst [smem:[#allocation3_spill]] %s9058_s0  ;;  %v195_v37 = vshrl.u32 %v194_v34, 7  ;;  %v6621_v50 = vld [vmem:[%s9062_s4] ss:$0 sm:$0xff]  ;;  %vm295_vm6 = vcmask 257024   ;;  %v7856_v34 = vmov 0.0  }
   0x3   :  { %9081 = sst [smem:[#allocation4_spill]] %s9059_s5  ;;  %vm7857_vm7 = vmmov 0   ;;  %vm567_vm8 = vcmask 64512   ;;  %vm734_vm9 = vcmask 1041408   ;;  %vm644_vm10 = vcmask 46080  }
   0x4   :  { %9082 = sst [smem:[#allocation5_spill]] %s9060_s2  ;;  %v196_v46 = vsub.s32 0, %v195_v37  ;;  %vm656_vm11 = vcmask 48128  }
   0x5   :  { %s9083_s20 = sld [smem:[#allocation2_spill]] }
   0x6   :  { %s9084_s1 = sld [smem:[#allocation3_spill]] }
   0x7   :  { %s9085_s22 = sld [smem:[#allocation4_spill]] }
   0x8   :  { %s9086_s24 = sld [smem:[#allocation5_spill]] }
   0xb   :  { %v95_v0 = vld [vmem:[%s9083_s20 + $0xf8] sm:$0xff]  ;;  %v94_v2 = vld [vmem:[%s9083_s20 + $0xf0] sm:$0xff]  ;;  %v93_v4 = vld [vmem:[%s9083_s20 + $0xe8] sm:$0xff] }
   0xc   :  { %v79_v1 = vld [vmem:[%s9083_s20 + $0x78] sm:$0xff]  ;;  %6847 = vmatprep.subr.mxu0 %v95_v0  ;;  %v78_v3 = vld [vmem:[%s9083_s20 + $0x70] sm:$0xff]  ;;  %v77_v5 = vld [vmem:[%s9083_s20 + $0x68] sm:$0xff] }
   0xd   :  { %6848 = vmatpush3.msra.mxu0 %v79_v1  ;;  %v92_v6 = vld [vmem:[%s9083_s20 + $0xe0] sm:$0xff]  ;;  %v91_v8 = vld [vmem:[%s9083_s20 + $0xd8] sm:$0xff]  ;;  %v90_v10 = vld [vmem:[%s9083_s20 + $0xd0] sm:$0xff] }
   0xe   :  { %6849 = vmatprep.subr.mxu0 %v94_v2  ;;  %v76_v7 = vld [vmem:[%s9083_s20 + $0x60] sm:$0xff]  ;;  %v75_v9 = vld [vmem:[%s9083_s20 + $0x58] sm:$0xff]  ;;  %v74_v11 = vld [vmem:[%s9083_s20 + $0x50] sm:$0xff] }
   0xf   :  { %6850 = vmatpush3.msra.mxu0 %v78_v3  ;;  %v89_v12 = vld [vmem:[%s9083_s20 + $0xc8] sm:$0xff]  ;;  %v88_v15 = vld [vmem:[%s9083_s20 + $0xc0] sm:$0xff]  ;;  %v87_v17 = vld [vmem:[%s9083_s20 + $0xb8] sm:$0xff] }
  0x10   :  { %6851 = vmatprep.subr.mxu0 %v93_v4  ;;  %v63_v13 = vld [vmem:[%s9084_s1 + $0x8] sm:$0xff]  ;;  %v72_v16 = vld [vmem:[%s9083_s20 + $0x40] sm:$0xff]  ;;  %v71_v18 = vld [vmem:[%s9083_s20 + $0x38] sm:$0xff] }
  0x11   :  { %6852 = vmatpush3.msra.mxu0 %v77_v5  ;;  %v73_v14 = vld [vmem:[%s9083_s20 + $0x48] sm:$0xff]  ;;  %167 = vmatprep.mubr.f32.mxu0 %v63_v13  ;;  %v86_v19 = vld [vmem:[%s9083_s20 + $0xb0] sm:$0xff]  ;;  %v84_v23 = vld [vmem:[%s9083_s20 + $0xa0] sm:$0xff] }
  0x12   :  { %6853 = vmatprep.subr.mxu0 %v92_v6  ;;  %v70_v20 = vld [vmem:[%s9083_s20 + $0x30] sm:$0xff]  ;;  %v85_v21 = vld [vmem:[%s9083_s20 + $0xa8] sm:$0xff]  ;;  %v68_v24 = vld [vmem:[%s9083_s20 + $0x20] sm:$0xff] }
  0x13   :  { %6854 = vmatpush3.msra.mxu0 %v76_v7  ;;  %v69_v22 = vld [vmem:[%s9083_s20 + $0x28] sm:$0xff]  ;;  %v83_v25 = vld [vmem:[%s9083_s20 + $0x98] sm:$0xff]  ;;  %v82_v27 = vld [vmem:[%s9083_s20 + $0x90] sm:$0xff] }
  0x14   :  { %6855 = vmatprep.subr.mxu0 %v91_v8  ;;  %v67_v26 = vld [vmem:[%s9083_s20 + $0x18] sm:$0xff]  ;;  %v66_v28 = vld [vmem:[%s9083_s20 + $0x10] sm:$0xff]  ;;  %v81_v29 = vld [vmem:[%s9083_s20 + $0x88] sm:$0xff] }
  0x15   :  { %6856 = vmatpush3.msra.mxu0 %v75_v9  ;;  %v65_v30 = vld [vmem:[%s9083_s20 + $0x8] sm:$0xff]  ;;  %v80_v31 = vld [vmem:[%s9083_s20 + $0x80] sm:$0xff]  ;;  %v233_v6 = vld [vmem:[%s9063_s9 + $0x18] sm:$0xff] }
  0x16   :  { %6857 = vmatprep.subr.mxu0 %v90_v10  ;;  %v64_v32 = vld [vmem:[%s9083_s20] sm:$0xff]  ;;  %7181 = vmatprep.subr.mxu1 %v233_v6  ;;  %v217_v7 = vld [vmem:[%s9064_s8 + $0x18] sm:$0xff]  ;;  %v232_v8 = vld [vmem:[%s9063_s9 + $0x10] sm:$0xff] }
  0x17   :  { %6858 = vmatpush3.msra.mxu0 %v74_v11  ;;  %v62_v33 = vld [vmem:[%s9084_s1] sm:$0xff]  ;;  %7182 = vmatpush3.msra.mxu1 %v233_v6  ;;  %v216_v9 = vld [vmem:[%s9064_s8 + $0x10] sm:$0xff]  ;;  %v231_v10 = vld [vmem:[%s9063_s9 + $0x8] sm:$0xff] }
  0x18   :  { %6859 = vmatprep.subr.mxu0 %v89_v12  ;;  %v173_v36 = vld [vmem:[%s9085_s22] sm:$0x1f]  ;;  %7183 = vmatprep.subr.mxu1 %v232_v8  ;;  %v215_v11 = vld [vmem:[%s9064_s8 + $0x8] sm:$0xff] }
  0x19   :  { %6860 = vmatpush3.msra.mxu0 %v73_v14  ;;  %v6620_v38 = vld [vmem:[%s9086_s24] ss:$0 sm:$0xff]  ;;  %v178_v42 = vrot.slane %v173_v36, 1  ;;  %v181_v43 = vrot.slane %v173_v36, 5  ;;  %v175_v45 = vadd.f32 %v174_v40, %v173_v36  ;;  %7184 = vmatpush3.msra.mxu1 %v232_v8  ;;  %v249_v14 = vld [vmem:[%s9065_s10 + $0x18] sm:$0xff] }
  0x1a   :  { %6861 = vmatprep.subr.mxu0 %v88_v15  ;;  %7185 = vmatprep.subr.mxu1 %v231_v10  ;;  %v230_v12 = vld [vmem:[%s9063_s9] sm:$0xff] }
  0x1b   :  { %6862 = vmatpush3.msra.mxu0 %v72_v16  ;;  %v197_v51 = vrot.slane %v175_v45, %v196_v46  ;;  %7186 = vmatpush3.msra.mxu1 %v231_v10  ;;  %v214_v13 = vld [vmem:[%s9064_s8] sm:$0xff] }
  0x1c   :  { %6863 = vmatprep.subr.mxu0 %v87_v17  ;;  %7187 = vmatprep.subr.mxu1 %v230_v12 }
  0x1d   :  { %6864 = vmatpush3.msra.mxu0 %v71_v18  ;;  %7188 = vmatpush3.msra.mxu1 %v230_v12 }
  0x1e   :  { %6865 = vmatprep.subr.mxu0 %v86_v19  ;;  %7192 = vmatprep.subr.mxu1 %v249_v14 }
  0x1f   :  { %6866 = vmatpush3.msra.mxu0 %v70_v20 }
  0x20   :  { %6867 = vmatprep.subr.mxu0 %v85_v21 }
  0x21   :  { %6868 = vmatpush3.msra.mxu0 %v69_v22  ;;  %v6622_v22 = vld [vmem:[%s9066_s6] ss:$0 sm:$0xff] }
  0x22   :  { %6869 = vmatprep.subr.mxu0 %v84_v23 }
  0x23   :  { %6870 = vmatpush3.msra.mxu0 %v68_v24  ;;  %v6623_v24 = vld [vmem:[%s9067_s7] ss:$0 sm:$0xff] }
  0x24   :  { %6871 = vmatprep.subr.mxu0 %v83_v25 }
  0x25   :  { %6872 = vmatpush3.msra.mxu0 %v67_v26 }
  0x26   :  { %6873 = vmatprep.subr.mxu0 %v82_v27 }
  0x27   :  { %6874 = vmatpush3.msra.mxu0 %v66_v28 }
  0x28   :  { %6875 = vmatprep.subr.mxu0 %v81_v29 }
  0x29   :  { %6876 = vmatpush3.msra.mxu0 %v65_v30 }
  0x2a   :  { %6877 = vmatprep.subr.mxu0 %v80_v31  ;;  %v248_v31 = vld [vmem:[%s9065_s10 + $0x10] sm:$0xff] }
  0x2b   :  { %6878 = vmatpush3.msra.mxu0 %v64_v32  ;;  %v247_v32 = vld [vmem:[%s9065_s10 + $0x8] sm:$0xff] }
  0x2c   :  { %168 = vmatmul.mubr.f32.vlgmr.msra.gmra.mxu0 %v62_v33  ;;  %7170 = vmatprep.subr.mxu0 %v217_v7  ;;  %v246_v33 = vld [vmem:[%s9065_s10] sm:$0xff] }
  0x2d   :  { %7171 = vmatpush3.msra.mxu0 %v217_v7 }
  0x2e   :  { %7172 = vmatprep.subr.mxu0 %v216_v9 }
  0x2f   :  { %7173 = vmatpush3.msra.mxu0 %v216_v9 }
  0x30   :  { %7174 = vmatprep.subr.mxu0 %v215_v11 }
  0x31   :  { %7175 = vmatpush3.msra.mxu0 %v215_v11 }
  0x32   :  { %7176 = vmatprep.subr.mxu0 %v214_v13 }
  0x33   :  { %7177 = vmatpush3.msra.mxu0 %v214_v13 }
  0x34   :  { %7203 = vmatprep.subr.mxu0 %v7856_v34 }
  0xec   :  { %v6879_v35 = vpop.f32.mrf.mxu0 }
  0xee   :  { %v6880_v39 = vpop.f32.mrf.mxu0 }
  0xef   :  { %v6881_v41 = vadd.f32 %v6880_v39, %v6879_v35 }
  0xf1   :  { %v170_v44 = vadd.f32 %v6881_v41, %v6620_v38 }
  0xf3   :  { %v180_v47 = vadd.f32 %v178_v42, %v170_v44  ;;  %v183_v48 = vadd.f32 %v181_v43, %v170_v44  ;;  %v221_v43 = vld [vmem:[%s9064_s8 + $0x38] sm:$0xff] }
  0xf5   :  { %v185_v49 = vrot.slane %v180_v47, 7  ;;  %v200_v53 = vrot.slane %v183_v48, 5  ;;  %v220_v47 = vld [vmem:[%s9064_s8 + $0x30] sm:$0xff] }
  0xf7   :  { %v203_v52 = vsel %vm202_vm0, %v175_v45, %v185_v49  ;;  %v8077_v58 = vsel %vm210_vm5, %v200_v53, %v6621_v50  ;;  %v219_v49 = vld [vmem:[%s9064_s8 + $0x28] sm:$0xff] }
  0xf8   :  { %v205_v54 = vsel %vm204_vm1, %v203_v52, %v6621_v50  ;;  %v296_v59 = vsel %vm295_vm6, %v8077_v58, 0.0  ;;  %v218_v50 = vld [vmem:[%s9064_s8 + $0x20] sm:$0xff]  ;;  %v252_v52 = vld [vmem:[%s9065_s10 + $0x30] sm:$0xff] }
  0xf9   :  { %v207_v55 = vsel %vm206_vm2, %v205_v54, %v197_v51  ;;  %v253_v51 = vld [vmem:[%s9065_s10 + $0x38] sm:$0xff]  ;;  %v250_v54 = vld [vmem:[%s9065_s10 + $0x20] sm:$0xff] }
  0xfa   :  { %v8073_v56 = vsel %vm208_vm3, %v207_v55, %v200_v53  ;;  %v251_v53 = vld [vmem:[%s9065_s10 + $0x28] sm:$0xff] }
  0xfb   :  { %v292_v57 = vsel %vm291_vm4, %v8073_v56, 0.0 }
  0xfc   :  { %293 = vadd.xlane.f32.xlu0 %v292_v57 }
 0x100   :  { %297 = vadd.xlane.f32.xlu0 %v296_v59 }
 0x185   :  { %v294_v60 = vpop.xlane.xlu0 %293 }
 0x186   :  { %v300_v61 = vmul.f32 0.03125, %v294_v60 }
 0x188   :  { %v302_v62 = vsub.f32 %v8073_v56, %v300_v61 }
 0x189   :  { %v298_v63 = vpop.xlane.xlu0 %297 }
 0x18a   :  { %v301_v0 = vmul.f32 0.03125, %v298_v63  ;;  %v304_v1 = vmul.f32 %v302_v62, %v302_v62 }
 0x18c   :  { %v303_v2 = vsub.f32 %v8077_v58, %v301_v0  ;;  %v306_v3 = vsel %vm291_vm4, %v304_v1, 0.0 }
 0x18d   :  { %307 = vadd.xlane.f32.xlu1 %v306_v3 }
 0x18e   :  { %v305_v4 = vmul.f32 %v303_v2, %v303_v2 }
 0x190   :  { %v309_v5 = vsel %vm295_vm6, %v305_v4, 0.0 }
 0x191   :  { %310 = vadd.xlane.f32.xlu1 %v309_v5 }
 0x216   :  { %v308_v15 = vpop.xlane.xlu1 %307 }
 0x217   :  { %v312_v16 = vmul.f32 0.03125, %v308_v15  ;;  %v237_v15 = vld [vmem:[%s9063_s9 + $0x38] sm:$0xff] }
 0x219   :  { %v314_v17 = vadd.f32 1e-05, %v312_v16 }
 0x21a   :  { %v311_v18 = vpop.xlane.xlu1 %310 }
 0x21b   :  { %7768 = vrsqrt.f32 %v314_v17  ;;  %v313_v19 = vmul.f32 0.03125, %v311_v18 }
 0x21d   :  { %v315_v20 = vadd.f32 1e-05, %v313_v19  ;;  %v236_v19 = vld [vmem:[%s9063_s9 + $0x30] sm:$0xff] }
 0x21f   :  { %7770 = vrsqrt.f32 %v315_v20  ;;  %v235_v20 = vld [vmem:[%s9063_s9 + $0x28] sm:$0xff] }
 0x228   :  { %v7769_v21 = vpop.eup %7768 }
 0x229   :  { %v318_v23 = vmul.f32 %v7769_v21, %v302_v62  ;;  %v234_v21 = vld [vmem:[%s9063_s9 + $0x20] sm:$0xff] }
 0x22b   :  { %v326_v25 = vmul.f32 %v6622_v22, %v318_v23 }
 0x22c   :  { %v7771_v26 = vpop.eup %7770 }
 0x22d   :  { %v8118_v27 = vadd.f32 %v6623_v24, %v326_v25  ;;  %v319_v28 = vmul.f32 %v7771_v26, %v303_v2 }
 0x22f   :  { %v327_v29 = vmul.f32 %v6622_v22, %v319_v28  ;;  %7178 = vmatprep.mubr.msk.f32.mxu0 %vm291_vm4, %v8118_v27  ;;  %7189 = vmatprep.mubr.msk.f32.mxu1 %vm291_vm4, %v8118_v27 }
 0x231   :  { %v8124_v30 = vadd.f32 %v6623_v24, %v327_v29 }
 0x233   :  { %7179 = vmatmul.mubr.msk.f32.vlgmr.msra.gmra.mxu0 %vm291_vm4, %v8124_v30  ;;  %7190 = vmatmul.mubr.msk.f32.vlgmr.msra.gmra.mxu1 %vm291_vm4, %v8124_v30 }
 0x234   :  { %7193 = vmatpush3.msra.mxu1 %v249_v14  ;;  %7200 = vmatprep.mubr.msk.f32.mxu1 %vm291_vm4, %v8118_v27 }
 0x235   :  { %7194 = vmatprep.subr.mxu1 %v248_v31  ;;  %7205 = vmatprep.mubr.msk.f32.mxu0 %vm7857_vm7, %v7856_v34 }
 0x236   :  { %7195 = vmatpush3.msra.mxu1 %v248_v31 }
 0x237   :  { %7196 = vmatprep.subr.mxu1 %v247_v32 }
 0x238   :  { %7197 = vmatpush3.msra.mxu1 %v247_v32 }
 0x239   :  { %7198 = vmatprep.subr.mxu1 %v246_v33 }
 0x23a   :  { %7199 = vmatpush3.msra.mxu1 %v246_v33 }
 0x23b   :  { %7201 = vmatmul.mubr.msk.f32.vlgmr.msra.gmra.mxu1 %vm291_vm4, %v8124_v30  ;;  %7208 = vmatprep.subr.mxu1 %v7856_v34 }
 0x23c   :  { %7210 = vmatprep.mubr.msk.f32.mxu1 %vm7857_vm7, %v7856_v34 }
 0x2f3   :  { %v7180_v35 = vpop.f32.mrf.mxu0  ;;  %v7191_v36 = vpop.f32.mrf.mxu1 }
 0x2f4   :  { %v740_v39 = vrot.slane %v7191_v36, 6  ;;  %v736_v44 = vrot.slane %v7180_v35, 6 }
 0x2f5   :  { %v408_v37 = vpop.f32.mrf.mxu0  ;;  %v483_v38 = vpop.f32.mrf.mxu1 }
 0x2f6   :  { %v739_v40 = vrot.slane %v483_v38, 6  ;;  %7204 = vmatpush3.xpose.msk.msra.mxu0 %vm567_vm8, %v483_v38  ;;  %v735_v41 = vrot.slane %v408_v37, 6 }
 0x2f7   :  { %7213 = vmatprep.subr.mxu0 %v7856_v34 }
 0x2f8   :  { %v741_v42 = vsel %vm734_vm9, %v739_v40, %v740_v39  ;;  %v737_v46 = vsel %vm734_vm9, %v735_v41, %v736_v44 }
 0x2f9   :  { %7206 = vmatmul.mubr.msk.f32.vlgmr.msra.gmra.mxu0 %vm567_vm8, %v408_v37 }
 0x2fa   :  { %7214 = vmatpush3.xpose.msk.msra.mxu0 %vm567_vm8, %v741_v42  ;;  %7215 = vmatprep.mubr.msk.f32.mxu0 %vm7857_vm7, %v7856_v34 }
 0x2fb   :  { %v8159_v45 = vpop.f32.mrf.mxu1  ;;  %7223 = vmatprep.subr.mxu0 %v221_v43 }
 0x2fc   :  { %v829_v13 = vrot.slane %v8159_v45, 6 }
 0x2fd   :  { %v8165_v48 = vpop.f32.mrf.mxu1  ;;  %7216 = vmatmul.mubr.msk.f32.vlgmr.msra.gmra.mxu0 %vm567_vm8, %v737_v46 }
 0x2fe   :  { %7209 = vmatpush3.msk.msra.mxu1 %vm206_vm2, %v8165_v48  ;;  %7224 = vmatpush3.msra.mxu0 %v221_v43  ;;  %v828_v11 = vrot.slane %v8165_v48, 6  ;;  %v263_v43 = vld [vmem:[%s9068_s11 + $0x8] sm:$0xff] }
 0x2ff   :  { %7231 = vmatprep.mubr.msk.f32.mxu0 %vm291_vm4, %v8118_v27  ;;  %7225 = vmatprep.subr.mxu0 %v220_v47 }
 0x300   :  { %7226 = vmatpush3.msra.mxu0 %v220_v47  ;;  %7218 = vmatprep.subr.mxu1 %v7856_v34  ;;  %v830_v16 = vsel %vm734_vm9, %v828_v11, %v829_v13  ;;  %v262_v47 = vld [vmem:[%s9068_s11] sm:$0xff]  ;;  %v240_v13 = vld [vmem:[%s9063_s9 + $0x50] sm:$0xff] }
 0x301   :  { %7227 = vmatprep.subr.mxu0 %v219_v49 }
 0x302   :  { %7228 = vmatpush3.msra.mxu0 %v219_v49 }
 0x303   :  { %7229 = vmatprep.subr.mxu0 %v218_v50 }
 0x304   :  { %7230 = vmatpush3.msra.mxu0 %v218_v50 }
 0x305   :  { %7232 = vmatmul.mubr.msk.f32.vlgmr.msra.gmra.mxu0 %vm291_vm4, %v8124_v30  ;;  %7245 = vmatprep.subr.mxu0 %v253_v51 }
 0x306   :  { %7246 = vmatpush3.msra.mxu0 %v253_v51  ;;  %7253 = vmatprep.mubr.msk.f32.mxu0 %vm291_vm4, %v8118_v27 }
 0x307   :  { %7247 = vmatprep.subr.mxu0 %v252_v52 }
 0x308   :  { %7248 = vmatpush3.msra.mxu0 %v252_v52 }
 0x309   :  { %7249 = vmatprep.subr.mxu0 %v251_v53 }
 0x30a   :  { %7250 = vmatpush3.msra.mxu0 %v251_v53 }
 0x30b   :  { %7251 = vmatprep.subr.mxu0 %v250_v54 }
 0x30c   :  { %7252 = vmatpush3.msra.mxu0 %v250_v54 }
 0x30d   :  { %7254 = vmatmul.mubr.msk.f32.vlgmr.msra.gmra.mxu0 %vm291_vm4, %v8124_v30  ;;  %7266 = vmatprep.subr.mxu0 %v7856_v34 }
 0x30e   :  { %7268 = vmatprep.mubr.msk.f32.mxu0 %vm7857_vm7, %v7856_v34  ;;  %7267 = vmatpush3.msra.mxu0 %v263_v43 }
 0x30f   :  { %7276 = vmatprep.subr.mxu0 %v7856_v34 }
 0x3b9   :  { %v640_v55 = vpop.f32.mrf.mxu0 }
 0x3ba   :  { %v645_v57 = vsel %vm644_vm10, %v640_v55, -inf }
 0x3bb   :  { %646 = vmax.xlane.f32.xlu0 %v645_v57  ;;  %v7207_v59 = vpop.f32.mrf.mxu0 }
 0x3bd   :  { %v812_v60 = vpop.f32.mrf.mxu0 }
 0x3be   :  { %v816_v61 = vsel %vm644_vm10, %v812_v60, -inf }
 0x3bf   :  { %817 = vmax.xlane.f32.xlu1 %v816_v61  ;;  %v7217_v62 = vpop.f32.mrf.mxu0 }
 0x3c5   :  { %v7233_v26 = vpop.f32.mrf.mxu0 }
 0x3c6   :  { %v1442_v57 = vrot.slane %v7233_v26, 6  ;;  %v255_v26 = vld [vmem:[%s9065_s10 + $0x48] sm:$0xff] }
 0x3c7   :  { %v972_v28 = vpop.f32.mrf.mxu0 }
 0x3c8   :  { %v1441_v53 = vrot.slane %v972_v28, 6 }
 0x3ca   :  { %v1443_v61 = vsel %vm734_vm9, %v1441_v53, %v1442_v57 }
 0x3cd   :  { %v7255_v31 = vpop.f32.mrf.mxu0 }
 0x3ce   :  { %v1535_v49 = vrot.slane %v7255_v31, 6 }
 0x3cf   :  { %v1122_v33 = vpop.f32.mrf.mxu0 }
 0x3d0   :  { %v1534_v48 = vrot.slane %v1122_v33, 6 }
 0x3d2   :  { %v1536_v50 = vsel %vm734_vm9, %v1534_v48, %v1535_v49 }
 0x444   :  { %v647_v63 = vpop.xlane.xlu0 %646 }
 0x445   :  { %v648_v0 = vsub.f32 %v640_v55, %v647_v63 }
 0x447   :  { %v649_v1 = vmul.f32 1.442695, %v648_v0 }
 0x448   :  { %v818_v2 = vpop.xlane.xlu1 %817 }
 0x449   :  { %7772 = vpow2.f32 %v649_v1  ;;  %v819_v3 = vsub.f32 %v812_v60, %v818_v2 }
 0x44b   :  { %v820_v4 = vmul.f32 1.442695, %v819_v3 }
 0x44d   :  { %7774 = vpow2.f32 %v820_v4 }
 0x456   :  { %v7773_v5 = vpop.eup %7772 }
 0x457   :  { %v651_v6 = vsel %vm644_vm10, %v7773_v5, 0.0 }
 0x458   :  { %652 = vadd.xlane.f32.xlu0 %v651_v6 }
 0x45a   :  { %v7775_v7 = vpop.eup %7774 }
 0x45b   :  { %v822_v8 = vsel %vm644_vm10, %v7775_v7, 0.0 }
 0x45c   :  { %823 = vadd.xlane.f32.xlu1 %v822_v8 }
 0x4e1   :  { %v653_v9 = vpop.xlane.xlu0 %652 }
 0x4e2   :  { %7776 = vrcp.f32 %v653_v9 }
 0x4e5   :  { %v824_v10 = vpop.xlane.xlu1 %823 }
 0x4e6   :  { %7778 = vrcp.f32 %v824_v10 }
 0x4ef   :  { %v7777_v12 = vpop.eup %7776 }
 0x4f0   :  { %v655_v14 = vmul.f32 %v7777_v12, %v7773_v5  ;;  %v241_v12 = vld [vmem:[%s9063_s9 + $0x58] sm:$0xff] }
 0x4f2   :  { %7211 = vmatmul.mubr.msk.f32.vlgmr.msra.gmra.mxu1 %vm656_vm11, %v655_v14  ;;  %v239_v14 = vld [vmem:[%s9063_s9 + $0x48] sm:$0xff] }
 0x4f3   :  { %v7779_v17 = vpop.eup %7778  ;;  %7219 = vmatpush3.msk.msra.mxu1 %vm206_vm2, %v830_v16  ;;  %7220 = vmatprep.mubr.msk.f32.mxu1 %vm7857_vm7, %v7856_v34  ;;  %v225_v16 = vld [vmem:[%s9064_s8 + $0x58] sm:$0xff] }
 0x4f4   :  { %7234 = vmatprep.subr.mxu1 %v237_v15  ;;  %v826_v18 = vmul.f32 %v7779_v17, %v7775_v7 }
 0x4f6   :  { %7221 = vmatmul.mubr.msk.f32.vlgmr.msra.gmra.mxu1 %vm656_vm11, %v826_v18  ;;  %v224_v18 = vld [vmem:[%s9064_s8 + $0x50] sm:$0xff] }
 0x4f7   :  { %7235 = vmatpush3.msra.mxu1 %v237_v15  ;;  %7242 = vmatprep.mubr.msk.f32.mxu1 %vm291_vm4, %v8118_v27  ;;  %v238_v15 = vld [vmem:[%s9063_s9 + $0x40] sm:$0xff] }
 0x4f8   :  { %7236 = vmatprep.subr.mxu1 %v236_v19 }
 0x4f9   :  { %7237 = vmatpush3.msra.mxu1 %v236_v19 }
 0x4fa   :  { %7238 = vmatprep.subr.mxu1 %v235_v20 }
 0x4fb   :  { %7239 = vmatpush3.msra.mxu1 %v235_v20  ;;  %v223_v20 = vld [vmem:[%s9064_s8 + $0x48] sm:$0xff] }
 0x4fc   :  { %7240 = vmatprep.subr.mxu1 %v234_v21 }
 0x4fd   :  { %7241 = vmatpush3.msra.mxu1 %v234_v21 }
 0x4fe   :  { %7243 = vmatmul.mubr.msk.f32.vlgmr.msra.gmra.mxu1 %vm291_vm4, %v8124_v30  ;;  %7256 = vmatprep.subr.mxu1 %v7856_v34 }
 0x4ff   :  { %7258 = vmatprep.mubr.msk.f32.mxu1 %vm7857_vm7, %v7856_v34 }
 0x5b2   :  { %v729_v22 = vpop.f32.mrf.mxu1 }
 0x5b4   :  { %v7212_v23 = vpop.f32.mrf.mxu1 }
 0x5b6   :  { %v8231_v24 = vpop.f32.mrf.mxu1 }
 0x5b8   :  { %v7222_v25 = vpop.f32.mrf.mxu1 }
 0x5b9   :  { %v256_v25 = vld [vmem:[%s9065_s10 + $0x50] sm:$0xff] }
 0x5be   :  { %v7244_v29 = vpop.f32.mrf.mxu1 }
 0x5bf   :  { %v1446_v52 = vrot.slane %v7244_v29, 6  ;;  %v254_v29 = vld [vmem:[%s9065_s10 + $0x40] sm:$0xff] }
 0x5c0   :  { %v1047_v32 = vpop.f32.mrf.mxu1 }
 0x5c1   :  { %7257 = vmatpush3.xpose.msk.msra.mxu1 %vm567_vm8, %v1047_v32  ;;  %v1445_v51 = vrot.slane %v1047_v32, 6 }
 0x5c2   :  { %7261 = vmatprep.subr.mxu1 %v7856_v34 }
 0x5c3   :  { %v1447_v55 = vsel %vm734_vm9, %v1445_v51, %v1446_v52 }
 0x5c4   :  { %7259 = vmatmul.mubr.msk.f32.vlgmr.msra.gmra.mxu1 %vm567_vm8, %v972_v28 }
 0x5c5   :  { %7262 = vmatpush3.msk.msra.mxu1 %vm206_vm2, %v1122_v33  ;;  %7263 = vmatprep.mubr.msk.f32.mxu1 %vm7857_vm7, %v7856_v34 }
 0x5c6   :  { %7271 = vmatprep.subr.mxu1 %v7856_v34 }
 0x684   :  { %v1203_v35 = vpop.f32.mrf.mxu1 }
 0x685   :  { %v1207_v36 = vsel %vm644_vm10, %v1203_v35, -inf }
 0x686   :  { %1208 = vmax.xlane.f32.xlu0 %v1207_v36  ;;  %v7260_v37 = vpop.f32.mrf.mxu1 }
 0x70f   :  { %v1209_v38 = vpop.xlane.xlu0 %1208 }
 0x710   :  { %v1210_v39 = vsub.f32 %v1203_v35, %v1209_v38 }
 0x712   :  { %v1211_v40 = vmul.f32 1.442695, %v1210_v39 }
 0x714   :  { %7780 = vpow2.f32 %v1211_v40 }
 0x721   :  { %v7781_v41 = vpop.eup %7780 }
 0x722   :  { %v1213_v42 = vsel %vm644_vm10, %v7781_v41, 0.0 }
 0x723   :  { %1214 = vadd.xlane.f32.xlu1 %v1213_v42 }
 0x7ac   :  { %v1215_v44 = vpop.xlane.xlu1 %1214 }
 0x7ad   :  { %7782 = vrcp.f32 %v1215_v44 }
 0x7ba   :  { %v7783_v45 = vpop.eup %7782 }
 0x7bb   :  { %v1217_v46 = vmul.f32 %v7783_v45, %v7781_v41 }
 0x7bd   :  { %7264 = vmatmul.mubr.msk.f32.vlgmr.msra.gmra.mxu1 %vm656_vm11, %v1217_v46 }
 0x7be   :  { %7272 = vmatpush3.msra.mxu1 %v262_v47  ;;  %7273 = vmatprep.mubr.msk.f32.mxu1 %vm7857_vm7, %v7856_v34 }
 0x7bf   :  { %7281 = vmatprep.subr.mxu1 %v7856_v34 }
 0x7c1   :  { %7274 = vmatmul.mubr.msk.f32.vlgmr.msra.gmra.mxu1 %vm567_vm8, %v729_v22  ;;  %v222_v22 = vld [vmem:[%s9064_s8 + $0x40] sm:$0xff] }
 0x7c2   :  { %7282 = vmatpush3.msk.msra.mxu1 %vm206_vm2, %v1536_v50  ;;  %7283 = vmatprep.mubr.msk.f32.mxu1 %vm7857_vm7, %v7856_v34  ;;  %v264_v50 = vld [vmem:[%s9068_s11 + $0x10] sm:$0xff] }
 0x7c3   :  { %7291 = vmatprep.subr.mxu1 %v7856_v34 }
 0x87d   :  { %v1290_v54 = vpop.f32.mrf.mxu1 }
 0x87e   :  { %7269 = vmatmul.mubr.msk.f32.vlgmr.msra.gmra.mxu0 %vm567_vm8, %v1290_v54 }
 0x87f   :  { %7277 = vmatpush3.xpose.msk.msra.mxu0 %vm567_vm8, %v1447_v55  ;;  %v7265_v59 = vpop.f32.mrf.mxu1  ;;  %7278 = vmatprep.mubr.msk.f32.mxu0 %vm7857_vm7, %v7856_v34 }
 0x880   :  { %7286 = vmatprep.subr.mxu0 %v7856_v34 }
 0x881   :  { %v8265_v60 = vpop.f32.mrf.mxu1 }
 0x882   :  { %7279 = vmatmul.mubr.msk.f32.vlgmr.msra.gmra.mxu0 %vm567_vm8, %v1443_v61 }
 0x883   :  { %v7275_v62 = vpop.f32.mrf.mxu1  ;;  %7287 = vmatpush3.msra.mxu0 %v263_v43  ;;  %7288 = vmatprep.mubr.msk.f32.mxu0 %vm7857_vm7, %v7856_v34 }
 0x884   :  { %7296 = vmatprep.subr.mxu0 %v225_v16 }
 0x93e   :  { %v8271_v63 = vpop.f32.mrf.mxu0 }
 0x940   :  { %v7270_v0 = vpop.f32.mrf.mxu0 }
 0x942   :  { %v1518_v1 = vpop.f32.mrf.mxu0 }
 0x943   :  { %v1522_v2 = vsel %vm644_vm10, %v1518_v1, -inf }
 0x944   :  { %1523 = vmax.xlane.f32.xlu0 %v1522_v2  ;;  %v7280_v3 = vpop.f32.mrf.mxu0 }
 0x9cd   :  { %v1524_v4 = vpop.xlane.xlu0 %1523 }
 0x9ce   :  { %v1525_v5 = vsub.f32 %v1518_v1, %v1524_v4 }
 0x9d0   :  { %v1526_v6 = vmul.f32 1.442695, %v1525_v5 }
 0x9d2   :  { %7784 = vpow2.f32 %v1526_v6 }
 0x9df   :  { %v7785_v7 = vpop.eup %7784 }
 0x9e0   :  { %v1528_v8 = vsel %vm644_vm10, %v7785_v7, 0.0 }
 0x9e1   :  { %1529 = vadd.xlane.f32.xlu1 %v1528_v8 }
 0xa6a   :  { %v1530_v9 = vpop.xlane.xlu1 %1529 }
 0xa6b   :  { %7786 = vrcp.f32 %v1530_v9 }
 0xa78   :  { %v7787_v10 = vpop.eup %7786 }
 0xa79   :  { %v1532_v11 = vmul.f32 %v7787_v10, %v7785_v7  ;;  %v229_v10 = vld [vmem:[%s9064_s8 + $0x78] sm:$0xff] }
 0xa7b   :  { %7284 = vmatmul.mubr.msk.f32.vlgmr.msra.gmra.mxu1 %vm656_vm11, %v1532_v11  ;;  %v1437_v11 = vadd.f32 %v8265_v60, %v8271_v63  ;;  %v227_v60 = vld [vmem:[%s9064_s8 + $0x68] sm:$0xff]  ;;  %v226_v63 = vld [vmem:[%s9064_s8 + $0x60] sm:$0xff] }
 0xa7c   :  { %7292 = vmatpush3.msra.mxu1 %v262_v47  ;;  %7293 = vmatprep.mubr.msk.f32.mxu1 %vm7857_vm7, %v7856_v34 }
 0xa7d   :  { %7307 = vmatprep.subr.mxu1 %v241_v12 }
 0xa7f   :  { %7294 = vmatmul.mubr.msk.f32.vlgmr.msra.gmra.mxu1 %vm567_vm8, %v8231_v24  ;;  %v257_v24 = vld [vmem:[%s9065_s10 + $0x58] sm:$0xff] }
 0xa80   :  { %7308 = vmatpush3.msra.mxu1 %v241_v12  ;;  %7315 = vmatprep.mubr.msk.f32.mxu1 %vm291_vm4, %v8118_v27 }
 0xa81   :  { %7309 = vmatprep.subr.mxu1 %v240_v13 }
 0xa82   :  { %7310 = vmatpush3.msra.mxu1 %v240_v13 }
 0xa83   :  { %7311 = vmatprep.subr.mxu1 %v239_v14 }
 0xa84   :  { %7312 = vmatpush3.msra.mxu1 %v239_v14 }
 0xa85   :  { %7313 = vmatprep.subr.mxu1 %v238_v15 }
 0xa86   :  { %7314 = vmatpush3.msra.mxu1 %v238_v15 }
 0xa87   :  { %7316 = vmatmul.mubr.msk.f32.vlgmr.msra.gmra.mxu1 %vm291_vm4, %v8124_v30  ;;  %7329 = vmatprep.subr.mxu1 %v7856_v34 }
 0xa88   :  { %7331 = vmatprep.mubr.msk.f32.mxu1 %vm7857_vm7, %v7856_v34 }
 0xb3b   :  { %v1608_v17 = vpop.f32.mrf.mxu1 }
 0xb3c   :  { %7289 = vmatmul.mubr.msk.f32.vlgmr.msra.gmra.mxu0 %vm567_vm8, %v1608_v17 }
 0xb3d   :  { %7297 = vmatpush3.msra.mxu0 %v225_v16  ;;  %v7285_v19 = vpop.f32.mrf.mxu1  ;;  %7304 = vmatprep.mubr.msk.f32.mxu0 %vm291_vm4, %v8118_v27 }
 0xb3e   :  { %7298 = vmatprep.subr.mxu0 %v224_v18  ;;  %v261_v19 = vld [vmem:[%s9065_s10 + $0x78] sm:$0xff] }
 0xb3f   :  { %7299 = vmatpush3.msra.mxu0 %v224_v18  ;;  %v8311_v21 = vpop.f32.mrf.mxu1  ;;  %v228_v18 = vld [vmem:[%s9064_s8 + $0x70] sm:$0xff] }
 0xb40   :  { %7300 = vmatprep.subr.mxu0 %v223_v20 }
 0xb41   :  { %7301 = vmatpush3.msra.mxu0 %v223_v20  ;;  %v7295_v23 = vpop.f32.mrf.mxu1  ;;  %v260_v20 = vld [vmem:[%s9065_s10 + $0x70] sm:$0xff] }
 0xb42   :  { %7302 = vmatprep.subr.mxu0 %v222_v22  ;;  %v258_v23 = vld [vmem:[%s9065_s10 + $0x60] sm:$0xff] }
 0xb43   :  { %7303 = vmatpush3.msra.mxu0 %v222_v22  ;;  %v259_v22 = vld [vmem:[%s9065_s10 + $0x68] sm:$0xff] }
 0xb44   :  { %7305 = vmatmul.mubr.msk.f32.vlgmr.msra.gmra.mxu0 %vm291_vm4, %v8124_v30  ;;  %7318 = vmatprep.subr.mxu0 %v257_v24 }
 0xb45   :  { %7319 = vmatpush3.msra.mxu0 %v257_v24  ;;  %7326 = vmatprep.mubr.msk.f32.mxu0 %vm291_vm4, %v8118_v27  ;;  %v245_v24 = vld [vmem:[%s9063_s9 + $0x78] sm:$0xff] }
 0xb46   :  { %7320 = vmatprep.subr.mxu0 %v256_v25 }
 0xb47   :  { %v7317_v28 = vpop.f32.mrf.mxu1  ;;  %7321 = vmatpush3.msra.mxu0 %v256_v25 }
 0xb48   :  { %7322 = vmatprep.subr.mxu0 %v255_v26  ;;  %v2226_v54 = vrot.slane %v7317_v28, 6 }
 0xb49   :  { %v1899_v31 = vpop.f32.mrf.mxu1  ;;  %7323 = vmatpush3.msra.mxu0 %v255_v26  ;;  %v244_v26 = vld [vmem:[%s9063_s9 + $0x70] sm:$0xff] }
 0xb4a   :  { %7324 = vmatprep.subr.mxu0 %v254_v29  ;;  %7330 = vmatpush3.xpose.msk.msra.mxu1 %vm567_vm8, %v1899_v31  ;;  %v2225_v52 = vrot.slane %v1899_v31, 6  ;;  %v242_v31 = vld [vmem:[%s9063_s9 + $0x60] sm:$0xff] }
 0xb4b   :  { %7325 = vmatpush3.msra.mxu0 %v254_v29  ;;  %7334 = vmatprep.subr.mxu1 %v7856_v34  ;;  %v243_v29 = vld [vmem:[%s9063_s9 + $0x68] sm:$0xff] }
 0xb4c   :  { %7327 = vmatmul.mubr.msk.f32.vlgmr.msra.gmra.mxu0 %vm291_vm4, %v8124_v30  ;;  %7339 = vmatprep.subr.mxu0 %v7856_v34  ;;  %v2227_v57 = vsel %vm734_vm9, %v2225_v52, %v2226_v54 }
 0xb4d   :  { %7341 = vmatprep.mubr.msk.f32.mxu0 %vm7857_vm7, %v7856_v34  ;;  %7340 = vmatpush3.msra.mxu0 %v264_v50 }
 0xb4e   :  { %7349 = vmatprep.subr.mxu0 %v7856_v34 }
 0xbfc   :  { %v8339_v32 = vpop.f32.mrf.mxu0 }
 0xbfe   :  { %v7290_v33 = vpop.f32.mrf.mxu0 }
 0xc04   :  { %v7306_v35 = vpop.f32.mrf.mxu0 }
 0xc05   :  { %v2222_v37 = vrot.slane %v7306_v35, 6 }
 0xc06   :  { %v1824_v36 = vpop.f32.mrf.mxu0 }
 0xc07   :  { %v2221_v38 = vrot.slane %v1824_v36, 6  ;;  %7332 = vmatmul.mubr.msk.f32.vlgmr.msra.gmra.mxu1 %vm567_vm8, %v1824_v36 }
 0xc08   :  { %7336 = vmatprep.mubr.msk.f32.mxu1 %vm7857_vm7, %v7856_v34 }
 0xc09   :  { %v2223_v39 = vsel %vm734_vm9, %v2221_v38, %v2222_v37 }
 0xc0c   :  { %v7328_v40 = vpop.f32.mrf.mxu0 }
 0xc0d   :  { %v2315_v61 = vrot.slane %v7328_v40, 6 }
 0xc0e   :  { %v1974_v41 = vpop.f32.mrf.mxu0 }
 0xc0f   :  { %7335 = vmatpush3.msk.msra.mxu1 %vm206_vm2, %v1974_v41  ;;  %v2314_v59 = vrot.slane %v1974_v41, 6 }
 0xc10   :  { %7344 = vmatprep.subr.mxu1 %v7856_v34 }
 0xc11   :  { %v2316_v0 = vsel %vm734_vm9, %v2314_v59, %v2315_v61 }
 0xcc7   :  { %v2055_v42 = vpop.f32.mrf.mxu1 }
 0xcc8   :  { %v2059_v43 = vsel %vm644_vm10, %v2055_v42, -inf }
 0xcc9   :  { %2060 = vmax.xlane.f32.xlu0 %v2059_v43  ;;  %v7333_v44 = vpop.f32.mrf.mxu1 }
 0xd52   :  { %v2061_v45 = vpop.xlane.xlu0 %2060 }
 0xd53   :  { %v2062_v46 = vsub.f32 %v2055_v42, %v2061_v45 }
 0xd55   :  { %v2063_v47 = vmul.f32 1.442695, %v2062_v46 }
 0xd57   :  { %7788 = vpow2.f32 %v2063_v47 }
 0xd64   :  { %v7789_v48 = vpop.eup %7788 }
 0xd65   :  { %v2065_v49 = vsel %vm644_vm10, %v7789_v48, 0.0 }
 0xd66   :  { %2066 = vadd.xlane.f32.xlu1 %v2065_v49 }
 0xdef   :  { %v2067_v51 = vpop.xlane.xlu1 %2066 }
 0xdf0   :  { %7790 = vrcp.f32 %v2067_v51 }
 0xdfd   :  { %v7791_v53 = vpop.eup %7790 }
 0xdfe   :  { %v2069_v55 = vmul.f32 %v7791_v53, %v7789_v48  ;;  %v265_v48 = vld [vmem:[%s9068_s11 + $0x18] sm:$0xff] }
 0xe00   :  { %7337 = vmatmul.mubr.msk.f32.vlgmr.msra.gmra.mxu1 %vm656_vm11, %v2069_v55 }
 0xe01   :  { %7345 = vmatpush3.xpose.msk.msra.mxu1 %vm567_vm8, %v2227_v57  ;;  %7346 = vmatprep.mubr.msk.f32.mxu1 %vm7857_vm7, %v7856_v34 }
 0xe02   :  { %7354 = vmatprep.subr.mxu1 %v7856_v34 }
 0xe04   :  { %7347 = vmatmul.mubr.msk.f32.vlgmr.msra.gmra.mxu1 %vm567_vm8, %v2223_v39 }
 0xe05   :  { %7355 = vmatpush3.msra.mxu1 %v264_v50  ;;  %7356 = vmatprep.mubr.msk.f32.mxu1 %vm7857_vm7, %v7856_v34 }
 0xe06   :  { %7370 = vmatprep.subr.mxu1 %v245_v24 }
 0xec0   :  { %v2142_v62 = vpop.f32.mrf.mxu1 }
 0xec1   :  { %7342 = vmatmul.mubr.msk.f32.vlgmr.msra.gmra.mxu0 %vm567_vm8, %v2142_v62 }
 0xec2   :  { %7350 = vmatpush3.msk.msra.mxu0 %vm206_vm2, %v2316_v0  ;;  %v7338_v1 = vpop.f32.mrf.mxu1  ;;  %7351 = vmatprep.mubr.msk.f32.mxu0 %vm7857_vm7, %v7856_v34 }
 0xec3   :  { %7359 = vmatprep.subr.mxu0 %v229_v10 }
 0xec4   :  { %v2298_v2 = vpop.f32.mrf.mxu1 }
 0xec5   :  { %v2302_v3 = vsel %vm644_vm10, %v2298_v2, -inf }
 0xec6   :  { %2303 = vmax.xlane.f32.xlu0 %v2302_v3  ;;  %v7348_v4 = vpop.f32.mrf.mxu1 }
 0xf4f   :  { %v2304_v5 = vpop.xlane.xlu0 %2303 }
 0xf50   :  { %v2305_v6 = vsub.f32 %v2298_v2, %v2304_v5 }
 0xf52   :  { %v2306_v7 = vmul.f32 1.442695, %v2305_v6 }
 0xf54   :  { %7792 = vpow2.f32 %v2306_v7 }
 0xf61   :  { %v7793_v8 = vpop.eup %7792 }
 0xf62   :  { %v2308_v9 = vsel %vm644_vm10, %v7793_v8, 0.0 }
 0xf63   :  { %2309 = vadd.xlane.f32.xlu1 %v2308_v9 }
 0xf81   :  { %v2215_v12 = vpop.f32.mrf.mxu0 }
 0xf82   :  { %v8374_v13 = vadd.f32 %v2215_v12, %v1437_v11 }
 0xf83   :  { %v7343_v14 = vpop.f32.mrf.mxu0 }
 0xfec   :  { %v2310_v15 = vpop.xlane.xlu1 %2309 }
 0xfed   :  { %7794 = vrcp.f32 %v2310_v15 }
 0xffa   :  { %v7795_v16 = vpop.eup %7794 }
 0xffb   :  { %v2312_v17 = vmul.f32 %v7795_v16, %v7793_v8 }
 0xffd   :  { %7352 = vmatmul.mubr.msk.f32.vlgmr.msra.gmra.mxu0 %vm656_vm11, %v2312_v17 }
 0xffe   :  { %7360 = vmatpush3.msra.mxu0 %v229_v10  ;;  %7367 = vmatprep.mubr.msk.f32.mxu0 %vm291_vm4, %v8118_v27 }
 0xfff   :  { %7361 = vmatprep.subr.mxu0 %v228_v18 }
0x1000   :  { %7362 = vmatpush3.msra.mxu0 %v228_v18 }
0x1001   :  { %7363 = vmatprep.subr.mxu0 %v227_v60 }
0x1002   :  { %7364 = vmatpush3.msra.mxu0 %v227_v60 }
0x1003   :  { %7365 = vmatprep.subr.mxu0 %v226_v63 }
0x1004   :  { %7366 = vmatpush3.msra.mxu0 %v226_v63 }
0x1005   :  { %7368 = vmatmul.mubr.msk.f32.vlgmr.msra.gmra.mxu0 %vm291_vm4, %v8124_v30  ;;  %7381 = vmatprep.subr.mxu0 %v261_v19 }
0x1006   :  { %7382 = vmatpush3.msra.mxu0 %v261_v19  ;;  %7389 = vmatprep.mubr.msk.f32.mxu0 %vm291_vm4, %v8118_v27 }
0x1007   :  { %7383 = vmatprep.subr.mxu0 %v260_v20 }
0x1008   :  { %7384 = vmatpush3.msra.mxu0 %v260_v20 }
0x1009   :  { %7385 = vmatprep.subr.mxu0 %v259_v22 }
0x100a   :  { %7386 = vmatpush3.msra.mxu0 %v259_v22 }
0x100b   :  { %7387 = vmatprep.subr.mxu0 %v258_v23 }
0x100c   :  { %7388 = vmatpush3.msra.mxu0 %v258_v23 }
0x100d   :  { %7390 = vmatmul.mubr.msk.f32.vlgmr.msra.gmra.mxu0 %vm291_vm4, %v8124_v30  ;;  %7402 = vmatprep.subr.mxu0 %v7856_v34 }
0x100e   :  { %7404 = vmatprep.mubr.msk.f32.mxu0 %vm7857_vm7, %v7856_v34  ;;  %7403 = vmatpush3.msra.mxu0 %v265_v48 }
0x100f   :  { %7412 = vmatprep.subr.mxu0 %v7856_v34 }
0x10bd   :  { %v2388_v25 = vpop.f32.mrf.mxu0 }
0x10be   :  { %7357 = vmatmul.mubr.msk.f32.vlgmr.msra.gmra.mxu1 %vm567_vm8, %v2388_v25 }
0x10bf   :  { %7371 = vmatpush3.msra.mxu1 %v245_v24  ;;  %v7353_v28 = vpop.f32.mrf.mxu0  ;;  %7378 = vmatprep.mubr.msk.f32.mxu1 %vm291_vm4, %v8118_v27  ;;  %v1755_v27 = vadd.f32 %v8311_v21, %v8339_v32 }
0x10c0   :  { %7372 = vmatprep.subr.mxu1 %v244_v26 }
0x10c1   :  { %7373 = vmatpush3.msra.mxu1 %v244_v26 }
0x10c2   :  { %7374 = vmatprep.subr.mxu1 %v243_v29 }
0x10c3   :  { %7375 = vmatpush3.msra.mxu1 %v243_v29 }
0x10c4   :  { %7376 = vmatprep.subr.mxu1 %v242_v31 }
0x10c5   :  { %7377 = vmatpush3.msra.mxu1 %v242_v31  ;;  %v7369_v37 = vpop.f32.mrf.mxu0 }
0x10c6   :  { %7379 = vmatmul.mubr.msk.f32.vlgmr.msra.gmra.mxu1 %vm291_vm4, %v8124_v30  ;;  %7392 = vmatprep.subr.mxu1 %v7856_v34  ;;  %v2930_v57 = vrot.slane %v7369_v37, 6 }
0x10c7   :  { %7394 = vmatprep.mubr.msk.f32.mxu1 %vm7857_vm7, %v7856_v34  ;;  %v2532_v38 = vpop.f32.mrf.mxu0 }
0x10c8   :  { %v2929_v54 = vrot.slane %v2532_v38, 6 }
0x10ca   :  { %v2931_v59 = vsel %vm734_vm9, %v2929_v54, %v2930_v57  ;;  %v6690_v57 = vld [vmem:[%s9073_s14] ss:$0 sm:$0xff] }
0x10cd   :  { %v7391_v40 = vpop.f32.mrf.mxu0 }
0x10ce   :  { %v3023_v62 = vrot.slane %v7391_v40, 6 }
0x10cf   :  { %v2682_v30 = vpop.f32.mrf.mxu0 }
0x10d0   :  { %v3022_v61 = vrot.slane %v2682_v30, 6 }
0x10d2   :  { %v3024_v1 = vsel %vm734_vm9, %v3022_v61, %v3023_v62 }
0x117e   :  { %v2461_v33 = vpop.f32.mrf.mxu1 }
0x117f   :  { %v8431_v35 = vadd.f32 %v2461_v33, %v1755_v27 }
0x1180   :  { %v7358_v36 = vpop.f32.mrf.mxu1 }
0x1186   :  { %v7380_v39 = vpop.f32.mrf.mxu1 }
0x1187   :  { %v2934_v52 = vrot.slane %v7380_v39, 6 }
0x1188   :  { %v2607_v41 = vpop.f32.mrf.mxu1 }
0x1189   :  { %7393 = vmatpush3.xpose.msk.msra.mxu1 %vm567_vm8, %v2607_v41  ;;  %v2933_v50 = vrot.slane %v2607_v41, 6  ;;  %v272_v41 = vld [vmem:[%s9070_s15 + $0x18] sm:$0xff] }
0x118a   :  { %7397 = vmatprep.subr.mxu1 %v7856_v34 }
0x118b   :  { %v2935_v55 = vsel %vm734_vm9, %v2933_v50, %v2934_v52  ;;  %v6689_v52 = vld [vmem:[%s9072_s13] ss:$0 sm:$0xff] }
0x118c   :  { %7395 = vmatmul.mubr.msk.f32.vlgmr.msra.gmra.mxu1 %vm567_vm8, %v2532_v38 }
0x118d   :  { %7398 = vmatpush3.msk.msra.mxu1 %vm206_vm2, %v2682_v30  ;;  %7399 = vmatprep.mubr.msk.f32.mxu1 %vm7857_vm7, %v7856_v34  ;;  %v271_v30 = vld [vmem:[%s9070_s15 + $0x10] sm:$0xff] }
0x118e   :  { %7407 = vmatprep.subr.mxu1 %v7856_v34 }
0x124c   :  { %v2763_v21 = vpop.f32.mrf.mxu1 }
0x124d   :  { %v2767_v32 = vsel %vm644_vm10, %v2763_v21, -inf }
0x124e   :  { %2768 = vmax.xlane.f32.xlu0 %v2767_v32  ;;  %v7396_v42 = vpop.f32.mrf.mxu1  ;;  %v269_v32 = vld [vmem:[%s9070_s15] sm:$0xff] }
0x124f   :  { %v289_v42 = vld [vmem:[%s9071_s17 + $0x78] sm:$0xff] }
0x12d7   :  { %v2769_v43 = vpop.xlane.xlu0 %2768 }
0x12d8   :  { %v2770_v44 = vsub.f32 %v2763_v21, %v2769_v43  ;;  %v270_v21 = vld [vmem:[%s9070_s15 + $0x8] sm:$0xff]  ;;  %v288_v43 = vld [vmem:[%s9071_s17 + $0x70] sm:$0xff] }
0x12da   :  { %v2771_v45 = vmul.f32 1.442695, %v2770_v44  ;;  %v287_v44 = vld [vmem:[%s9071_s17 + $0x68] sm:$0xff] }
0x12dc   :  { %7796 = vpow2.f32 %v2771_v45 }
0x12e9   :  { %v7797_v46 = vpop.eup %7796 }
0x12ea   :  { %v2773_v47 = vsel %vm644_vm10, %v7797_v46, 0.0 }
0x12eb   :  { %2774 = vadd.xlane.f32.xlu1 %v2773_v47 }
0x1374   :  { %v2775_v49 = vpop.xlane.xlu1 %2774 }
0x1375   :  { %7798 = vrcp.f32 %v2775_v49 }
0x1382   :  { %v7799_v51 = vpop.eup %7798 }
0x1383   :  { %v2777_v53 = vmul.f32 %v7799_v51, %v7797_v46 }
0x1385   :  { %7400 = vmatmul.mubr.msk.f32.vlgmr.msra.gmra.mxu1 %vm656_vm11, %v2777_v53 }
0x1386   :  { %7408 = vmatpush3.xpose.msk.msra.mxu1 %vm567_vm8, %v2935_v55  ;;  %7409 = vmatprep.mubr.msk.f32.mxu1 %vm7857_vm7, %v7856_v34 }
0x1387   :  { %7417 = vmatprep.subr.mxu1 %v7856_v34 }
0x1389   :  { %7410 = vmatmul.mubr.msk.f32.vlgmr.msra.gmra.mxu1 %vm567_vm8, %v2931_v59 }
0x138a   :  { %7418 = vmatpush3.msra.mxu1 %v265_v48  ;;  %7419 = vmatprep.mubr.msk.f32.mxu1 %vm7857_vm7, %v7856_v34 }
0x138b   :  { %7433 = vmatprep.subr.mxu1 %v289_v42 }
0x1445   :  { %v2850_v0 = vpop.f32.mrf.mxu1 }
0x1446   :  { %7405 = vmatmul.mubr.msk.f32.vlgmr.msra.gmra.mxu0 %vm567_vm8, %v2850_v0 }
0x1447   :  { %7413 = vmatpush3.msk.msra.mxu0 %vm206_vm2, %v3024_v1  ;;  %v7401_v2 = vpop.f32.mrf.mxu1  ;;  %7414 = vmatprep.mubr.msk.f32.mxu0 %vm7857_vm7, %v7856_v34  ;;  %v286_v1 = vld [vmem:[%s9071_s17 + $0x60] sm:$0xff] }
0x1448   :  { %7422 = vmatprep.subr.mxu0 %v272_v41  ;;  %v285_v2 = vld [vmem:[%s9071_s17 + $0x58] sm:$0xff] }
0x1449   :  { %v3006_v3 = vpop.f32.mrf.mxu1 }
0x144a   :  { %v3010_v4 = vsel %vm644_vm10, %v3006_v3, -inf }
0x144b   :  { %3011 = vmax.xlane.f32.xlu0 %v3010_v4  ;;  %v7411_v5 = vpop.f32.mrf.mxu1  ;;  %v283_v4 = vld [vmem:[%s9071_s17 + $0x48] sm:$0xff] }
0x144c   :  { %v282_v5 = vld [vmem:[%s9071_s17 + $0x40] sm:$0xff] }
0x14d4   :  { %v3012_v6 = vpop.xlane.xlu0 %3011 }
0x14d5   :  { %v3013_v7 = vsub.f32 %v3006_v3, %v3012_v6  ;;  %v284_v3 = vld [vmem:[%s9071_s17 + $0x50] sm:$0xff]  ;;  %v281_v6 = vld [vmem:[%s9071_s17 + $0x38] sm:$0xff] }
0x14d7   :  { %v3014_v8 = vmul.f32 1.442695, %v3013_v7  ;;  %v280_v7 = vld [vmem:[%s9071_s17 + $0x30] sm:$0xff] }
0x14d9   :  { %7800 = vpow2.f32 %v3014_v8  ;;  %v279_v8 = vld [vmem:[%s9071_s17 + $0x28] sm:$0xff] }
0x14e6   :  { %v7801_v9 = vpop.eup %7800 }
0x14e7   :  { %v3016_v10 = vsel %vm644_vm10, %v7801_v9, 0.0 }
0x14e8   :  { %3017 = vadd.xlane.f32.xlu1 %v3016_v10  ;;  %v277_v10 = vld [vmem:[%s9071_s17 + $0x18] sm:$0xff] }
0x1506   :  { %v2923_v11 = vpop.f32.mrf.mxu0 }
0x1507   :  { %v2927_v12 = vadd.f32 %v2923_v11, %v8374_v13  ;;  %v6688_v13 = vld [vmem:[%s9069_s12] ss:$0 sm:$0xff]  ;;  %v276_v11 = vld [vmem:[%s9071_s17 + $0x10] sm:$0xff] }
0x1508   :  { %v7406_v14 = vpop.f32.mrf.mxu0 }
0x1509   :  { %v274_v14 = vld [vmem:[%s9071_s17] sm:$0xff] }
0x1571   :  { %v3018_v15 = vpop.xlane.xlu1 %3017 }
0x1572   :  { %7802 = vrcp.f32 %v3018_v15  ;;  %v6691_v15 = vld [vmem:[%s9074_s16] ss:$0 sm:$0xff] }
0x157f   :  { %v7803_v16 = vpop.eup %7802 }
0x1580   :  { %v3020_v17 = vmul.f32 %v7803_v16, %v7801_v9  ;;  %v278_v9 = vld [vmem:[%s9071_s17 + $0x20] sm:$0xff] }
0x1582   :  { %7415 = vmatmul.mubr.msk.f32.vlgmr.msra.gmra.mxu0 %vm656_vm11, %v3020_v17 }
0x1583   :  { %7423 = vmatpush3.msra.mxu0 %v272_v41 }
0x1584   :  { %7424 = vmatprep.subr.mxu0 %v271_v30 }
0x1585   :  { %7425 = vmatpush3.msra.mxu0 %v271_v30 }
0x1586   :  { %7426 = vmatprep.subr.mxu0 %v270_v21 }
0x1587   :  { %7427 = vmatpush3.msra.mxu0 %v270_v21 }
0x1588   :  { %7428 = vmatprep.subr.mxu0 %v269_v32 }
0x1589   :  { %7429 = vmatpush3.msra.mxu0 %v269_v32 }
0x1642   :  { %v3096_v18 = vpop.f32.mrf.mxu0 }
0x1643   :  { %7420 = vmatmul.mubr.msk.f32.vlgmr.msra.gmra.mxu1 %vm567_vm8, %v3096_v18 }
0x1644   :  { %v7416_v60 = vpop.f32.mrf.mxu0  ;;  %7434 = vmatpush3.msra.mxu1 %v289_v42 }
0x1645   :  { %7435 = vmatprep.subr.mxu1 %v288_v43 }
0x1646   :  { %7436 = vmatpush3.msra.mxu1 %v288_v43 }
0x1647   :  { %7437 = vmatprep.subr.mxu1 %v287_v44 }
0x1648   :  { %7438 = vmatpush3.msra.mxu1 %v287_v44 }
0x1649   :  { %7439 = vmatprep.subr.mxu1 %v286_v1 }
0x164a   :  { %7440 = vmatpush3.msra.mxu1 %v286_v1 }
0x164b   :  { %7441 = vmatprep.subr.mxu1 %v285_v2 }
0x164c   :  { %7442 = vmatpush3.msra.mxu1 %v285_v2  ;;  %v6775_v2 = vld [vmem:[%s9067_s7 + $0x1] ss:$0 sm:$0xff] }
0x164d   :  { %7443 = vmatprep.subr.mxu1 %v284_v3 }
0x164e   :  { %7444 = vmatpush3.msra.mxu1 %v284_v3 }
0x164f   :  { %7445 = vmatprep.subr.mxu1 %v283_v4 }
0x1650   :  { %7446 = vmatpush3.msra.mxu1 %v283_v4 }
0x1651   :  { %7447 = vmatprep.subr.mxu1 %v282_v5 }
0x1652   :  { %7448 = vmatpush3.msra.mxu1 %v282_v5 }
0x1653   :  { %7449 = vmatprep.subr.mxu1 %v281_v6 }
0x1654   :  { %7450 = vmatpush3.msra.mxu1 %v281_v6  ;;  %v6715_v6 = vld [vmem:[%s9063_s9 + $0x90] sm:$0xff] }
0x1655   :  { %7451 = vmatprep.subr.mxu1 %v280_v7 }
0x1656   :  { %7452 = vmatpush3.msra.mxu1 %v280_v7  ;;  %v6714_v7 = vld [vmem:[%s9063_s9 + $0x88] sm:$0xff] }
0x1657   :  { %7453 = vmatprep.subr.mxu1 %v279_v8 }
0x1658   :  { %7454 = vmatpush3.msra.mxu1 %v279_v8  ;;  %v6713_v8 = vld [vmem:[%s9063_s9 + $0x80] sm:$0xff] }
0x1659   :  { %7455 = vmatprep.subr.mxu1 %v278_v9 }
0x165a   :  { %7456 = vmatpush3.msra.mxu1 %v278_v9  ;;  %v6732_v9 = vld [vmem:[%s9065_s10 + $0x98] sm:$0xff] }
0x165b   :  { %7457 = vmatprep.subr.mxu1 %v277_v10 }
0x165c   :  { %7458 = vmatpush3.msra.mxu1 %v277_v10  ;;  %v6731_v10 = vld [vmem:[%s9065_s10 + $0x90] sm:$0xff] }
0x165d   :  { %7459 = vmatprep.subr.mxu1 %v276_v11 }
0x165e   :  { %7460 = vmatpush3.msra.mxu1 %v276_v11  ;;  %v6730_v11 = vld [vmem:[%s9065_s10 + $0x88] sm:$0xff] }
0x1703   :  { %v3169_v63 = vpop.f32.mrf.mxu1 }
0x1704   :  { %v3173_v19 = vadd.f32 %v3169_v63, %v8431_v35 }
0x1705   :  { %v7421_v20 = vpop.f32.mrf.mxu1 }
0x1706   :  { %v3175_v22 = vrot.slane %v3173_v19, 2 }
0x1708   :  { %v3177_v23 = vsel %vm206_vm2, %v2927_v12, %v3175_v22  ;;  %v3179_v24 = vadd.f32 %v3175_v22, %v8077_v58  ;;  %v275_v12 = vld [vmem:[%s9071_s17 + $0x8] sm:$0xff] }
0x1709   :  { %v3178_v25 = vadd.f32 %v3177_v23, %v8073_v56  ;;  %7461 = vmatprep.subr.mxu1 %v275_v12 }
0x170a   :  { %v8473_v26 = vadd.f32 %v6688_v13, %v3179_v24  ;;  %7462 = vmatpush3.msra.mxu1 %v275_v12  ;;  %v6729_v12 = vld [vmem:[%s9065_s10 + $0x80] sm:$0xff] }
0x170b   :  { %v8475_v28 = vadd.f32 %v6688_v13, %v3178_v25  ;;  %7463 = vmatprep.subr.mxu1 %v274_v14 }
0x170c   :  { %v3191_v29 = vsel %vm295_vm6, %v8473_v26, 0.0  ;;  %7464 = vmatpush3.msra.mxu1 %v274_v14 }
0x170d   :  { %3192 = vadd.xlane.f32.xlu1 %v3191_v29  ;;  %v3188_v31 = vsel %vm291_vm4, %v8475_v28, 0.0  ;;  %7506 = vmatprep.subr.mxu1 %v7856_v34 }
0x170e   :  { %3189 = vadd.xlane.f32.xlu0 %v3188_v31 }
0x1796   :  { %v3193_v27 = vpop.xlane.xlu1 %3192 }
0x1797   :  { %v3195_v33 = vmul.f32 0.03125, %v3193_v27  ;;  %v3190_v35 = vpop.xlane.xlu0 %3189  ;;  %v6694_v27 = vld [vmem:[%s9075_s18] ss:$0 sm:$0xff] }
0x1798   :  { %v3194_v36 = vmul.f32 0.03125, %v3190_v35 }
0x1799   :  { %v3197_v58 = vsub.f32 %v8473_v26, %v3195_v33 }
0x179a   :  { %v3196_v56 = vsub.f32 %v8475_v28, %v3194_v36 }
0x179b   :  { %v3199_v37 = vmul.f32 %v3197_v58, %v3197_v58 }
0x179c   :  { %v3198_v38 = vmul.f32 %v3196_v56, %v3196_v56 }
0x179d   :  { %v3203_v39 = vsel %vm295_vm6, %v3199_v37, 0.0 }
0x179e   :  { %3204 = vadd.xlane.f32.xlu1 %v3203_v39  ;;  %v3200_v40 = vsel %vm291_vm4, %v3198_v38, 0.0 }
0x179f   :  { %3201 = vadd.xlane.f32.xlu0 %v3200_v40 }
0x1827   :  { %v3205_v45 = vpop.xlane.xlu1 %3204 }
0x1828   :  { %v3207_v46 = vmul.f32 0.03125, %v3205_v45  ;;  %v3202_v47 = vpop.xlane.xlu0 %3201  ;;  %v6700_v45 = vld [vmem:[%s9064_s8 + $0x98] sm:$0xff] }
0x1829   :  { %v3206_v48 = vmul.f32 0.03125, %v3202_v47  ;;  %7468 = vmatprep.subr.mxu0 %v6700_v45  ;;  %v6698_v47 = vld [vmem:[%s9064_s8 + $0x88] sm:$0xff] }
0x182a   :  { %v3209_v49 = vadd.f32 1e-05, %v3207_v46  ;;  %v6699_v46 = vld [vmem:[%s9064_s8 + $0x90] sm:$0xff] }
0x182b   :  { %v3208_v50 = vadd.f32 1e-05, %v3206_v48  ;;  %v6697_v48 = vld [vmem:[%s9064_s8 + $0x80] sm:$0xff] }
0x182c   :  { %7804 = vrsqrt.f32 %v3209_v49  ;;  %v6716_v49 = vld [vmem:[%s9063_s9 + $0x98] sm:$0xff] }
0x182d   :  { %7806 = vrsqrt.f32 %v3208_v50 }
0x1839   :  { %v7805_v51 = vpop.eup %7804 }
0x183a   :  { %v7807_v53 = vpop.eup %7806  ;;  %v3213_v54 = vmul.f32 %v7805_v51, %v3197_v58 }
0x183b   :  { %v3212_v55 = vmul.f32 %v7807_v53, %v3196_v56 }
0x183c   :  { %v3221_v59 = vmul.f32 %v6689_v52, %v3213_v54 }
0x183d   :  { %v3220_v61 = vmul.f32 %v6689_v52, %v3212_v55 }
0x183e   :  { %v3229_v0 = vadd.f32 %v6690_v57, %v3221_v59  ;;  %v6774_v59 = vld [vmem:[%s9066_s6 + $0x1] ss:$0 sm:$0xff] }
0x183f   :  { %v3228_v62 = vadd.f32 %v6690_v57, %v3220_v61 }
0x1841   :  { %7430 = vmatprep.mubr.msk.f32.mxu0 %vm291_vm4, %v3228_v62 }
0x1842   :  { %7431 = vmatmul.mubr.msk.f32.vlgmr.msra.gmra.mxu0 %vm291_vm4, %v3229_v0 }
0x1843   :  { %7469 = vmatpush3.msra.mxu0 %v6700_v45 }
0x1844   :  { %7470 = vmatprep.subr.mxu0 %v6699_v46 }
0x1845   :  { %7471 = vmatpush3.msra.mxu0 %v6699_v46 }
0x1846   :  { %7472 = vmatprep.subr.mxu0 %v6698_v47 }
0x1847   :  { %7473 = vmatpush3.msra.mxu0 %v6698_v47 }
0x1848   :  { %7474 = vmatprep.subr.mxu0 %v6697_v48 }
0x1849   :  { %7475 = vmatpush3.msra.mxu0 %v6697_v48 }
0x184a   :  { %7479 = vmatprep.subr.mxu0 %v6716_v49 }
0x1902   :  { %v7432_v16 = vpop.f32.mrf.mxu0 }
0x1903   :  { %v3314_v17 = vadd.f32 %v7432_v16, %v6691_v15 }
0x1904   :  { %v3308_v18 = vpop.f32.mrf.mxu0 }
0x1905   :  { %v3320_v60 = vmul.f32 0.70710677, %v3314_v17  ;;  %v3309_v63 = vadd.f32 %v6691_v15, %v3308_v18  ;;  %v3318_v25 = vmul.f32 0.5, %v3314_v17 }
0x1907   :  { %7808 = verf.f32 %v3320_v60  ;;  %v3319_v19 = vmul.f32 0.70710677, %v3309_v63  ;;  %v3317_v23 = vmul.f32 0.5, %v3309_v63 }
0x1909   :  { %7810 = verf.f32 %v3319_v19 }
0x1914   :  { %v7809_v20 = vpop.eup %7808 }
0x1915   :  { %v3324_v13 = vadd.f32 1.0, %v7809_v20  ;;  %v6704_v20 = vld [vmem:[%s9064_s8 + $0xb8] sm:$0xff] }
0x1916   :  { %v7811_v22 = vpop.eup %7810 }
0x1917   :  { %v3323_v24 = vadd.f32 1.0, %v7811_v22  ;;  %v3326_v31 = vmul.f32 %v3324_v13, %v3318_v25 }
0x1919   :  { %v3325_v29 = vmul.f32 %v3323_v24, %v3317_v23  ;;  %v6703_v24 = vld [vmem:[%s9064_s8 + $0xb0] sm:$0xff] }
0x191b   :  { %7465 = vmatprep.mubr.f32.mxu1 %v3325_v29  ;;  %v6702_v29 = vld [vmem:[%s9064_s8 + $0xa8] sm:$0xff] }
0x191c   :  { %7466 = vmatmul.mubr.f32.vlgmr.msra.gmra.mxu1 %v3326_v31  ;;  %v6701_v31 = vld [vmem:[%s9064_s8 + $0xa0] sm:$0xff] }
0x191d   :  { %7508 = vmatprep.mubr.msk.f32.mxu1 %vm7857_vm7, %v7856_v34 }
0x19dc   :  { %v7467_v33 = vpop.f32.mrf.mxu1 }
0x19dd   :  { %v3405_v35 = vadd.f32 %v7467_v33, %v6694_v27  ;;  %v6735_v33 = vld [vmem:[%s9065_s10 + $0xb0] sm:$0xff] }
0x19de   :  { %v3399_v36 = vpop.f32.mrf.mxu1 }
0x19df   :  { %v8563_v58 = vadd.f32 %v3405_v35, %v8473_v26  ;;  %v3400_v56 = vadd.f32 %v6694_v27, %v3399_v36  ;;  %v6736_v27 = vld [vmem:[%s9065_s10 + $0xb8] sm:$0xff]  ;;  %v6734_v35 = vld [vmem:[%s9065_s10 + $0xa8] sm:$0xff]  ;;  %v6733_v36 = vld [vmem:[%s9065_s10 + $0xa0] sm:$0xff] }
0x19e1   :  { %v8566_v37 = vadd.f32 %v3400_v56, %v8475_v28  ;;  %v3505_v38 = vsel %vm295_vm6, %v8563_v58, 0.0 }
0x19e2   :  { %3506 = vadd.xlane.f32.xlu1 %v3505_v38 }
0x19e3   :  { %v3502_v39 = vsel %vm291_vm4, %v8566_v37, 0.0 }
0x19e4   :  { %3503 = vadd.xlane.f32.xlu0 %v3502_v39 }
0x1a6b   :  { %v3507_v40 = vpop.xlane.xlu1 %3506 }
0x1a6c   :  { %v3509_v41 = vmul.f32 0.03125, %v3507_v40 }
0x1a6d   :  { %v3504_v30 = vpop.xlane.xlu0 %3503 }
0x1a6e   :  { %v3511_v21 = vsub.f32 %v8563_v58, %v3509_v41  ;;  %v3508_v32 = vmul.f32 0.03125, %v3504_v30 }
0x1a70   :  { %v3510_v26 = vsub.f32 %v8566_v37, %v3508_v32  ;;  %v3513_v42 = vmul.f32 %v3511_v21, %v3511_v21 }
0x1a72   :  { %v3517_v28 = vsel %vm295_vm6, %v3513_v42, 0.0  ;;  %v3512_v43 = vmul.f32 %v3510_v26, %v3510_v26 }
0x1a73   :  { %3518 = vadd.xlane.f32.xlu1 %v3517_v28 }
0x1a74   :  { %v3514_v44 = vsel %vm291_vm4, %v3512_v43, 0.0 }
0x1a75   :  { %3515 = vadd.xlane.f32.xlu0 %v3514_v44 }
0x1afc   :  { %v3519_v50 = vpop.xlane.xlu1 %3518 }
0x1afd   :  { %v3521_v51 = vmul.f32 0.03125, %v3519_v50 }
0x1afe   :  { %v3516_v52 = vpop.xlane.xlu0 %3515 }
0x1aff   :  { %v3523_v53 = vadd.f32 1e-05, %v3521_v51  ;;  %v3520_v54 = vmul.f32 0.03125, %v3516_v52 }
0x1b01   :  { %7812 = vrsqrt.f32 %v3523_v53  ;;  %v3522_v55 = vadd.f32 1e-05, %v3520_v54  ;;  %v6720_v54 = vld [vmem:[%s9063_s9 + $0xb8] sm:$0xff] }
0x1b03   :  { %7814 = vrsqrt.f32 %v3522_v55 }
0x1b0e   :  { %v7813_v57 = vpop.eup %7812 }
0x1b0f   :  { %v3527_v61 = vmul.f32 %v7813_v57, %v3511_v21 }
0x1b10   :  { %v7815_v62 = vpop.eup %7814 }
0x1b11   :  { %v3526_v0 = vmul.f32 %v7815_v62, %v3510_v26  ;;  %v3535_v1 = vmul.f32 %v6774_v59, %v3527_v61  ;;  %v6719_v61 = vld [vmem:[%s9063_s9 + $0xb0] sm:$0xff]  ;;  %v6718_v62 = vld [vmem:[%s9063_s9 + $0xa8] sm:$0xff] }
0x1b13   :  { %v3534_v3 = vmul.f32 %v6774_v59, %v3526_v0  ;;  %v8599_v5 = vadd.f32 %v6775_v2, %v3535_v1  ;;  %v6717_v0 = vld [vmem:[%s9063_s9 + $0xa0] sm:$0xff] }
0x1b15   :  { %v8597_v4 = vadd.f32 %v6775_v2, %v3534_v3 }
0x1b17   :  { %7476 = vmatprep.mubr.msk.f32.mxu0 %vm291_vm4, %v8597_v4 }
0x1b18   :  { %7477 = vmatmul.mubr.msk.f32.vlgmr.msra.gmra.mxu0 %vm291_vm4, %v8599_v5 }
0x1b19   :  { %7480 = vmatpush3.msra.mxu0 %v6716_v49  ;;  %7487 = vmatprep.mubr.msk.f32.mxu0 %vm291_vm4, %v8597_v4 }
0x1b1a   :  { %7481 = vmatprep.subr.mxu0 %v6715_v6 }
0x1b1b   :  { %7482 = vmatpush3.msra.mxu0 %v6715_v6 }
0x1b1c   :  { %7483 = vmatprep.subr.mxu0 %v6714_v7 }
0x1b1d   :  { %7484 = vmatpush3.msra.mxu0 %v6714_v7 }
0x1b1e   :  { %7485 = vmatprep.subr.mxu0 %v6713_v8 }
0x1b1f   :  { %7486 = vmatpush3.msra.mxu0 %v6713_v8 }
0x1b20   :  { %7488 = vmatmul.mubr.msk.f32.vlgmr.msra.gmra.mxu0 %vm291_vm4, %v8599_v5  ;;  %7490 = vmatprep.subr.mxu0 %v6732_v9 }
0x1b21   :  { %7491 = vmatpush3.msra.mxu0 %v6732_v9  ;;  %7498 = vmatprep.mubr.msk.f32.mxu0 %vm291_vm4, %v8597_v4 }
0x1b22   :  { %7492 = vmatprep.subr.mxu0 %v6731_v10 }
0x1b23   :  { %7493 = vmatpush3.msra.mxu0 %v6731_v10 }
0x1b24   :  { %7494 = vmatprep.subr.mxu0 %v6730_v11 }
0x1b25   :  { %7495 = vmatpush3.msra.mxu0 %v6730_v11 }
0x1b26   :  { %7496 = vmatprep.subr.mxu0 %v6729_v12 }
0x1b27   :  { %7497 = vmatpush3.msra.mxu0 %v6729_v12 }
0x1b28   :  { %7499 = vmatmul.mubr.msk.f32.vlgmr.msra.gmra.mxu0 %vm291_vm4, %v8599_v5  ;;  %7501 = vmatprep.subr.mxu0 %v7856_v34 }
0x1b29   :  { %7503 = vmatprep.mubr.msk.f32.mxu0 %vm7857_vm7, %v7856_v34 }
0x1bd8   :  { %v7478_v14 = vpop.f32.mrf.mxu0 }
0x1bd9   :  { %v3940_v22 = vrot.slane %v7478_v14, 6 }
0x1bda   :  { %v3616_v15 = vpop.f32.mrf.mxu0 }
0x1bdb   :  { %v3939_v63 = vrot.slane %v3616_v15, 6 }
0x1bdd   :  { %v3941_v23 = vsel %vm734_vm9, %v3939_v63, %v3940_v22 }
0x1be0   :  { %v7489_v16 = vpop.f32.mrf.mxu0 }
0x1be1   :  { %v3944_v18 = vrot.slane %v7489_v16, 6 }
0x1be2   :  { %v3691_v17 = vpop.f32.mrf.mxu0 }
0x1be3   :  { %v3943_v60 = vrot.slane %v3691_v17, 6  ;;  %7502 = vmatpush3.xpose.msk.msra.mxu0 %vm567_vm8, %v3691_v17 }
0x1be4   :  { %7511 = vmatprep.subr.mxu0 %v7856_v34 }
0x1be5   :  { %v3945_v19 = vsel %vm734_vm9, %v3943_v60, %v3944_v18 }
0x1be6   :  { %7504 = vmatmul.mubr.msk.f32.vlgmr.msra.gmra.mxu0 %vm567_vm8, %v3616_v15 }
0x1be7   :  { %7512 = vmatpush3.xpose.msk.msra.mxu0 %vm567_vm8, %v3945_v19  ;;  %7513 = vmatprep.mubr.msk.f32.mxu0 %vm7857_vm7, %v7856_v34 }
0x1be8   :  { %v8647_v13 = vpop.f32.mrf.mxu0  ;;  %7521 = vmatprep.subr.mxu0 %v6704_v20 }
0x1be9   :  { %v4033_v52 = vrot.slane %v8647_v13, 6 }
0x1bea   :  { %v8653_v25 = vpop.f32.mrf.mxu0  ;;  %7514 = vmatmul.mubr.msk.f32.vlgmr.msra.gmra.mxu0 %vm567_vm8, %v3941_v23 }
0x1beb   :  { %7507 = vmatpush3.msk.msra.mxu1 %vm206_vm2, %v8653_v25  ;;  %7522 = vmatpush3.msra.mxu0 %v6704_v20  ;;  %v4032_v50 = vrot.slane %v8653_v25, 6  ;;  %v6746_v20 = vld [vmem:[%s9068_s11 + $0x28] sm:$0xff] }
0x1bec   :  { %7529 = vmatprep.mubr.msk.f32.mxu0 %vm291_vm4, %v8597_v4  ;;  %7523 = vmatprep.subr.mxu0 %v6703_v24 }
0x1bed   :  { %7524 = vmatpush3.msra.mxu0 %v6703_v24  ;;  %7516 = vmatprep.subr.mxu1 %v7856_v34  ;;  %v4034_v55 = vsel %vm734_vm9, %v4032_v50, %v4033_v52  ;;  %v6745_v24 = vld [vmem:[%s9068_s11 + $0x20] sm:$0xff]  ;;  %v6723_v52 = vld [vmem:[%s9063_s9 + $0xd0] sm:$0xff] }
0x1bee   :  { %7525 = vmatprep.subr.mxu0 %v6702_v29 }
0x1bef   :  { %7526 = vmatpush3.msra.mxu0 %v6702_v29 }
0x1bf0   :  { %7527 = vmatprep.subr.mxu0 %v6701_v31 }
0x1bf1   :  { %7528 = vmatpush3.msra.mxu0 %v6701_v31 }
0x1bf2   :  { %7530 = vmatmul.mubr.msk.f32.vlgmr.msra.gmra.mxu0 %vm291_vm4, %v8599_v5  ;;  %7543 = vmatprep.subr.mxu0 %v6736_v27 }
0x1bf3   :  { %7544 = vmatpush3.msra.mxu0 %v6736_v27  ;;  %7551 = vmatprep.mubr.msk.f32.mxu0 %vm291_vm4, %v8597_v4 }
0x1bf4   :  { %7545 = vmatprep.subr.mxu0 %v6735_v33 }
0x1bf5   :  { %7546 = vmatpush3.msra.mxu0 %v6735_v33 }
0x1bf6   :  { %7547 = vmatprep.subr.mxu0 %v6734_v35 }
0x1bf7   :  { %7548 = vmatpush3.msra.mxu0 %v6734_v35 }
0x1bf8   :  { %7549 = vmatprep.subr.mxu0 %v6733_v36 }
0x1bf9   :  { %7550 = vmatpush3.msra.mxu0 %v6733_v36 }
0x1bfa   :  { %7552 = vmatmul.mubr.msk.f32.vlgmr.msra.gmra.mxu0 %vm291_vm4, %v8599_v5  ;;  %7564 = vmatprep.subr.mxu0 %v7856_v34 }
0x1bfb   :  { %7566 = vmatprep.mubr.msk.f32.mxu0 %vm7857_vm7, %v7856_v34  ;;  %7565 = vmatpush3.msra.mxu0 %v6746_v20 }
0x1bfc   :  { %7574 = vmatprep.subr.mxu0 %v7856_v34 }
0x1ca6   :  { %v3847_v56 = vpop.f32.mrf.mxu0 }
0x1ca7   :  { %v3851_v38 = vsel %vm644_vm10, %v3847_v56, -inf }
0x1ca8   :  { %3852 = vmax.xlane.f32.xlu0 %v3851_v38  ;;  %v7505_v39 = vpop.f32.mrf.mxu0 }
0x1caa   :  { %v4016_v40 = vpop.f32.mrf.mxu0 }
0x1cab   :  { %v4020_v41 = vsel %vm644_vm10, %v4016_v40, -inf }
0x1cac   :  { %4021 = vmax.xlane.f32.xlu1 %v4020_v41  ;;  %v7515_v30 = vpop.f32.mrf.mxu0 }
0x1cb2   :  { %v7531_v7 = vpop.f32.mrf.mxu0 }
0x1cb3   :  { %v4646_v38 = vrot.slane %v7531_v7, 6  ;;  %v6738_v7 = vld [vmem:[%s9065_s10 + $0xc8] sm:$0xff] }
0x1cb4   :  { %v4176_v8 = vpop.f32.mrf.mxu0 }
0x1cb5   :  { %v4645_v35 = vrot.slane %v4176_v8, 6 }
0x1cb7   :  { %v4647_v41 = vsel %vm734_vm9, %v4645_v35, %v4646_v38 }
0x1cba   :  { %v7553_v10 = vpop.f32.mrf.mxu0 }
0x1cbb   :  { %v4739_v29 = vrot.slane %v7553_v10, 6 }
0x1cbc   :  { %v4326_v12 = vpop.f32.mrf.mxu0 }
0x1cbd   :  { %v4738_v25 = vrot.slane %v4326_v12, 6 }
0x1cbf   :  { %v4740_v31 = vsel %vm734_vm9, %v4738_v25, %v4739_v29 }
0x1d31   :  { %v3853_v21 = vpop.xlane.xlu0 %3852 }
0x1d32   :  { %v3854_v32 = vsub.f32 %v3847_v56, %v3853_v21 }
0x1d34   :  { %v3855_v26 = vmul.f32 1.442695, %v3854_v32 }
0x1d35   :  { %v4022_v42 = vpop.xlane.xlu1 %4021 }
0x1d36   :  { %7816 = vpow2.f32 %v3855_v26  ;;  %v4023_v28 = vsub.f32 %v4016_v40, %v4022_v42 }
0x1d38   :  { %v4024_v43 = vmul.f32 1.442695, %v4023_v28 }
0x1d3a   :  { %7818 = vpow2.f32 %v4024_v43 }
0x1d43   :  { %v7817_v44 = vpop.eup %7816 }
0x1d44   :  { %v3857_v45 = vsel %vm644_vm10, %v7817_v44, 0.0 }
0x1d45   :  { %3858 = vadd.xlane.f32.xlu0 %v3857_v45 }
0x1d47   :  { %v7819_v46 = vpop.eup %7818 }
0x1d48   :  { %v4026_v47 = vsel %vm644_vm10, %v7819_v46, 0.0 }
0x1d49   :  { %4027 = vadd.xlane.f32.xlu1 %v4026_v47 }
0x1dce   :  { %v3859_v48 = vpop.xlane.xlu0 %3858 }
0x1dcf   :  { %7820 = vrcp.f32 %v3859_v48 }
0x1dd2   :  { %v4028_v49 = vpop.xlane.xlu1 %4027 }
0x1dd3   :  { %7822 = vrcp.f32 %v4028_v49 }
0x1ddc   :  { %v7821_v51 = vpop.eup %7820 }
0x1ddd   :  { %v3861_v53 = vmul.f32 %v7821_v51, %v7817_v44  ;;  %v6724_v51 = vld [vmem:[%s9063_s9 + $0xd8] sm:$0xff] }
0x1ddf   :  { %7509 = vmatmul.mubr.msk.f32.vlgmr.msra.gmra.mxu1 %vm656_vm11, %v3861_v53  ;;  %v6722_v53 = vld [vmem:[%s9063_s9 + $0xc8] sm:$0xff] }
0x1de0   :  { %v7823_v57 = vpop.eup %7822  ;;  %7517 = vmatpush3.msk.msra.mxu1 %vm206_vm2, %v4034_v55  ;;  %7518 = vmatprep.mubr.msk.f32.mxu1 %vm7857_vm7, %v7856_v34  ;;  %v6708_v55 = vld [vmem:[%s9064_s8 + $0xd8] sm:$0xff] }
0x1de1   :  { %7532 = vmatprep.subr.mxu1 %v6720_v54  ;;  %v4030_v59 = vmul.f32 %v7823_v57, %v7819_v46 }
0x1de3   :  { %7519 = vmatmul.mubr.msk.f32.vlgmr.msra.gmra.mxu1 %vm656_vm11, %v4030_v59  ;;  %v6707_v59 = vld [vmem:[%s9064_s8 + $0xd0] sm:$0xff] }
0x1de4   :  { %7533 = vmatpush3.msra.mxu1 %v6720_v54  ;;  %7540 = vmatprep.mubr.msk.f32.mxu1 %vm291_vm4, %v8597_v4  ;;  %v6721_v54 = vld [vmem:[%s9063_s9 + $0xc0] sm:$0xff] }
0x1de5   :  { %7534 = vmatprep.subr.mxu1 %v6719_v61 }
0x1de6   :  { %7535 = vmatpush3.msra.mxu1 %v6719_v61 }
0x1de7   :  { %7536 = vmatprep.subr.mxu1 %v6718_v62 }
0x1de8   :  { %7537 = vmatpush3.msra.mxu1 %v6718_v62  ;;  %v6706_v62 = vld [vmem:[%s9064_s8 + $0xc8] sm:$0xff] }
0x1de9   :  { %7538 = vmatprep.subr.mxu1 %v6717_v0 }
0x1dea   :  { %7539 = vmatpush3.msra.mxu1 %v6717_v0 }
0x1deb   :  { %7541 = vmatmul.mubr.msk.f32.vlgmr.msra.gmra.mxu1 %vm291_vm4, %v8599_v5  ;;  %7554 = vmatprep.subr.mxu1 %v7856_v34 }
0x1dec   :  { %7556 = vmatprep.mubr.msk.f32.mxu1 %vm7857_vm7, %v7856_v34 }
0x1e9f   :  { %v3934_v1 = vpop.f32.mrf.mxu1 }
0x1ea1   :  { %v7510_v2 = vpop.f32.mrf.mxu1 }
0x1ea3   :  { %v8719_v3 = vpop.f32.mrf.mxu1 }
0x1ea5   :  { %v7520_v6 = vpop.f32.mrf.mxu1 }
0x1ea6   :  { %v6739_v6 = vld [vmem:[%s9065_s10 + $0xd0] sm:$0xff] }
0x1eab   :  { %v7542_v9 = vpop.f32.mrf.mxu1 }
0x1eac   :  { %v4650_v33 = vrot.slane %v7542_v9, 6  ;;  %v6737_v9 = vld [vmem:[%s9065_s10 + $0xc0] sm:$0xff] }
0x1ead   :  { %v4251_v11 = vpop.f32.mrf.mxu1 }
0x1eae   :  { %7555 = vmatpush3.xpose.msk.msra.mxu1 %vm567_vm8, %v4251_v11  ;;  %v4649_v27 = vrot.slane %v4251_v11, 6 }
0x1eaf   :  { %7559 = vmatprep.subr.mxu1 %v7856_v34 }
0x1eb0   :  { %v4651_v56 = vsel %vm734_vm9, %v4649_v27, %v4650_v33 }
0x1eb1   :  { %7557 = vmatmul.mubr.msk.f32.vlgmr.msra.gmra.mxu1 %vm567_vm8, %v4176_v8 }
0x1eb2   :  { %7560 = vmatpush3.msk.msra.mxu1 %vm206_vm2, %v4326_v12  ;;  %7561 = vmatprep.mubr.msk.f32.mxu1 %vm7857_vm7, %v7856_v34 }
0x1eb3   :  { %7569 = vmatprep.subr.mxu1 %v7856_v34 }
0x1f71   :  { %v4407_v14 = vpop.f32.mrf.mxu1 }
0x1f72   :  { %v4411_v15 = vsel %vm644_vm10, %v4407_v14, -inf }
0x1f73   :  { %4412 = vmax.xlane.f32.xlu0 %v4411_v15  ;;  %v7558_v16 = vpop.f32.mrf.mxu1 }
0x1ffc   :  { %v4413_v17 = vpop.xlane.xlu0 %4412 }
0x1ffd   :  { %v4414_v18 = vsub.f32 %v4407_v14, %v4413_v17 }
0x1fff   :  { %v4415_v60 = vmul.f32 1.442695, %v4414_v18 }
0x2001   :  { %7824 = vpow2.f32 %v4415_v60 }
0x200e   :  { %v7825_v63 = vpop.eup %7824 }
0x200f   :  { %v4417_v19 = vsel %vm644_vm10, %v7825_v63, 0.0 }
0x2010   :  { %4418 = vadd.xlane.f32.xlu1 %v4417_v19 }
0x2099   :  { %v4419_v22 = vpop.xlane.xlu1 %4418 }
0x209a   :  { %7826 = vrcp.f32 %v4419_v22 }
0x20a7   :  { %v7827_v13 = vpop.eup %7826 }
0x20a8   :  { %v4421_v23 = vmul.f32 %v7827_v13, %v7825_v63 }
0x20aa   :  { %7562 = vmatmul.mubr.msk.f32.vlgmr.msra.gmra.mxu1 %vm656_vm11, %v4421_v23 }
0x20ab   :  { %7570 = vmatpush3.msra.mxu1 %v6745_v24  ;;  %7571 = vmatprep.mubr.msk.f32.mxu1 %vm7857_vm7, %v7856_v34 }
0x20ac   :  { %7579 = vmatprep.subr.mxu1 %v7856_v34 }
0x20ae   :  { %7572 = vmatmul.mubr.msk.f32.vlgmr.msra.gmra.mxu1 %vm567_vm8, %v3934_v1  ;;  %v6705_v1 = vld [vmem:[%s9064_s8 + $0xc0] sm:$0xff] }
0x20af   :  { %7580 = vmatpush3.msk.msra.mxu1 %vm206_vm2, %v4740_v31  ;;  %7581 = vmatprep.mubr.msk.f32.mxu1 %vm7857_vm7, %v7856_v34  ;;  %v6747_v31 = vld [vmem:[%s9068_s11 + $0x30] sm:$0xff] }
0x20b0   :  { %7589 = vmatprep.subr.mxu1 %v7856_v34 }
0x216a   :  { %v4494_v36 = vpop.f32.mrf.mxu1 }
0x216b   :  { %7567 = vmatmul.mubr.msk.f32.vlgmr.msra.gmra.mxu0 %vm567_vm8, %v4494_v36 }
0x216c   :  { %7575 = vmatpush3.xpose.msk.msra.mxu0 %vm567_vm8, %v4651_v56  ;;  %v7563_v39 = vpop.f32.mrf.mxu1  ;;  %7576 = vmatprep.mubr.msk.f32.mxu0 %vm7857_vm7, %v7856_v34 }
0x216d   :  { %7584 = vmatprep.subr.mxu0 %v7856_v34 }
0x216e   :  { %v8753_v40 = vpop.f32.mrf.mxu1 }
0x216f   :  { %7577 = vmatmul.mubr.msk.f32.vlgmr.msra.gmra.mxu0 %vm567_vm8, %v4647_v41 }
0x2170   :  { %v7573_v30 = vpop.f32.mrf.mxu1  ;;  %7585 = vmatpush3.msra.mxu0 %v6746_v20  ;;  %7586 = vmatprep.mubr.msk.f32.mxu0 %vm7857_vm7, %v7856_v34 }
0x2171   :  { %7594 = vmatprep.subr.mxu0 %v6708_v55 }
0x222b   :  { %v8759_v21 = vpop.f32.mrf.mxu0 }
0x222d   :  { %v7568_v32 = vpop.f32.mrf.mxu0 }
0x222f   :  { %v4722_v26 = vpop.f32.mrf.mxu0 }
0x2230   :  { %v4726_v42 = vsel %vm644_vm10, %v4722_v26, -inf }
0x2231   :  { %4727 = vmax.xlane.f32.xlu0 %v4726_v42  ;;  %v7578_v28 = vpop.f32.mrf.mxu0 }
0x22ba   :  { %v4728_v43 = vpop.xlane.xlu0 %4727 }
0x22bb   :  { %v4729_v44 = vsub.f32 %v4722_v26, %v4728_v43 }
0x22bd   :  { %v4730_v45 = vmul.f32 1.442695, %v4729_v44 }
0x22bf   :  { %7828 = vpow2.f32 %v4730_v45 }
0x22cc   :  { %v7829_v46 = vpop.eup %7828 }
0x22cd   :  { %v4732_v47 = vsel %vm644_vm10, %v7829_v46, 0.0 }
0x22ce   :  { %4733 = vadd.xlane.f32.xlu1 %v4732_v47 }
0x2357   :  { %v4734_v48 = vpop.xlane.xlu1 %4733 }
0x2358   :  { %7830 = vrcp.f32 %v4734_v48 }
0x2365   :  { %v7831_v49 = vpop.eup %7830 }
0x2366   :  { %v4736_v50 = vmul.f32 %v7831_v49, %v7829_v46  ;;  %v6712_v49 = vld [vmem:[%s9064_s8 + $0xf8] sm:$0xff] }
0x2368   :  { %7582 = vmatmul.mubr.msk.f32.vlgmr.msra.gmra.mxu1 %vm656_vm11, %v4736_v50  ;;  %v4641_v50 = vadd.f32 %v8753_v40, %v8759_v21  ;;  %v6710_v40 = vld [vmem:[%s9064_s8 + $0xe8] sm:$0xff]  ;;  %v6709_v21 = vld [vmem:[%s9064_s8 + $0xe0] sm:$0xff] }
0x2369   :  { %7590 = vmatpush3.msra.mxu1 %v6745_v24  ;;  %7591 = vmatprep.mubr.msk.f32.mxu1 %vm7857_vm7, %v7856_v34 }
0x236a   :  { %7605 = vmatprep.subr.mxu1 %v6724_v51 }
0x236c   :  { %7592 = vmatmul.mubr.msk.f32.vlgmr.msra.gmra.mxu1 %vm567_vm8, %v8719_v3  ;;  %v6740_v3 = vld [vmem:[%s9065_s10 + $0xd8] sm:$0xff] }
0x236d   :  { %7606 = vmatpush3.msra.mxu1 %v6724_v51  ;;  %7613 = vmatprep.mubr.msk.f32.mxu1 %vm291_vm4, %v8597_v4 }
0x236e   :  { %7607 = vmatprep.subr.mxu1 %v6723_v52 }
0x236f   :  { %7608 = vmatpush3.msra.mxu1 %v6723_v52 }
0x2370   :  { %7609 = vmatprep.subr.mxu1 %v6722_v53 }
0x2371   :  { %7610 = vmatpush3.msra.mxu1 %v6722_v53 }
0x2372   :  { %7611 = vmatprep.subr.mxu1 %v6721_v54 }
0x2373   :  { %7612 = vmatpush3.msra.mxu1 %v6721_v54 }
0x2374   :  { %7614 = vmatmul.mubr.msk.f32.vlgmr.msra.gmra.mxu1 %vm291_vm4, %v8599_v5  ;;  %7627 = vmatprep.subr.mxu1 %v7856_v34 }
0x2375   :  { %7629 = vmatprep.mubr.msk.f32.mxu1 %vm7857_vm7, %v7856_v34 }
0x2428   :  { %v4812_v57 = vpop.f32.mrf.mxu1 }
0x2429   :  { %7587 = vmatmul.mubr.msk.f32.vlgmr.msra.gmra.mxu0 %vm567_vm8, %v4812_v57 }
0x242a   :  { %7595 = vmatpush3.msra.mxu0 %v6708_v55  ;;  %v7583_v61 = vpop.f32.mrf.mxu1  ;;  %7602 = vmatprep.mubr.msk.f32.mxu0 %vm291_vm4, %v8597_v4 }
0x242b   :  { %7596 = vmatprep.subr.mxu0 %v6707_v59  ;;  %v6744_v61 = vld [vmem:[%s9065_s10 + $0xf8] sm:$0xff] }
0x242c   :  { %7597 = vmatpush3.msra.mxu0 %v6707_v59  ;;  %v8799_v0 = vpop.f32.mrf.mxu1  ;;  %v6711_v59 = vld [vmem:[%s9064_s8 + $0xf0] sm:$0xff] }
0x242d   :  { %7598 = vmatprep.subr.mxu0 %v6706_v62 }
0x242e   :  { %7599 = vmatpush3.msra.mxu0 %v6706_v62  ;;  %v7593_v2 = vpop.f32.mrf.mxu1  ;;  %v6743_v62 = vld [vmem:[%s9065_s10 + $0xf0] sm:$0xff] }
0x242f   :  { %7600 = vmatprep.subr.mxu0 %v6705_v1  ;;  %v6741_v2 = vld [vmem:[%s9065_s10 + $0xe0] sm:$0xff] }
0x2430   :  { %7601 = vmatpush3.msra.mxu0 %v6705_v1  ;;  %v6742_v1 = vld [vmem:[%s9065_s10 + $0xe8] sm:$0xff] }
0x2431   :  { %7603 = vmatmul.mubr.msk.f32.vlgmr.msra.gmra.mxu0 %vm291_vm4, %v8599_v5  ;;  %7616 = vmatprep.subr.mxu0 %v6740_v3 }
0x2432   :  { %7617 = vmatpush3.msra.mxu0 %v6740_v3  ;;  %7624 = vmatprep.mubr.msk.f32.mxu0 %vm291_vm4, %v8597_v4  ;;  %v6728_v3 = vld [vmem:[%s9063_s9 + $0xf8] sm:$0xff] }
0x2433   :  { %7618 = vmatprep.subr.mxu0 %v6739_v6 }
0x2434   :  { %v7615_v8 = vpop.f32.mrf.mxu1  ;;  %7619 = vmatpush3.msra.mxu0 %v6739_v6 }
0x2435   :  { %7620 = vmatprep.subr.mxu0 %v6738_v7  ;;  %v5430_v36 = vrot.slane %v7615_v8, 6 }
0x2436   :  { %v5103_v10 = vpop.f32.mrf.mxu1  ;;  %7621 = vmatpush3.msra.mxu0 %v6738_v7  ;;  %v6727_v7 = vld [vmem:[%s9063_s9 + $0xf0] sm:$0xff] }
0x2437   :  { %7622 = vmatprep.subr.mxu0 %v6737_v9  ;;  %7628 = vmatpush3.xpose.msk.msra.mxu1 %vm567_vm8, %v5103_v10  ;;  %v5429_v33 = vrot.slane %v5103_v10, 6  ;;  %v6725_v10 = vld [vmem:[%s9063_s9 + $0xe0] sm:$0xff] }
0x2438   :  { %7623 = vmatpush3.msra.mxu0 %v6737_v9  ;;  %7632 = vmatprep.subr.mxu1 %v7856_v34  ;;  %v6726_v9 = vld [vmem:[%s9063_s9 + $0xe8] sm:$0xff] }
0x2439   :  { %7625 = vmatmul.mubr.msk.f32.vlgmr.msra.gmra.mxu0 %vm291_vm4, %v8599_v5  ;;  %7637 = vmatprep.subr.mxu0 %v7856_v34  ;;  %v5431_v38 = vsel %vm734_vm9, %v5429_v33, %v5430_v36 }
0x243a   :  { %7639 = vmatprep.mubr.msk.f32.mxu0 %vm7857_vm7, %v7856_v34  ;;  %7638 = vmatpush3.msra.mxu0 %v6747_v31 }
0x243b   :  { %7647 = vmatprep.subr.mxu0 %v7856_v34 }
0x24e9   :  { %v8827_v11 = vpop.f32.mrf.mxu0 }
0x24eb   :  { %v7588_v12 = vpop.f32.mrf.mxu0 }
0x24f1   :  { %v7604_v14 = vpop.f32.mrf.mxu0 }
0x24f2   :  { %v5426_v16 = vrot.slane %v7604_v14, 6 }
0x24f3   :  { %v5028_v15 = vpop.f32.mrf.mxu0 }
0x24f4   :  { %v5425_v17 = vrot.slane %v5028_v15, 6  ;;  %7630 = vmatmul.mubr.msk.f32.vlgmr.msra.gmra.mxu1 %vm567_vm8, %v5028_v15 }
0x24f5   :  { %7634 = vmatprep.mubr.msk.f32.mxu1 %vm7857_vm7, %v7856_v34 }
0x24f6   :  { %v5427_v18 = vsel %vm734_vm9, %v5425_v17, %v5426_v16 }
0x24f9   :  { %v7626_v60 = vpop.f32.mrf.mxu0 }
0x24fa   :  { %v5519_v41 = vrot.slane %v7626_v60, 6 }
0x24fb   :  { %v5178_v63 = vpop.f32.mrf.mxu0 }
0x24fc   :  { %7633 = vmatpush3.msk.msra.mxu1 %vm206_vm2, %v5178_v63  ;;  %v5518_v39 = vrot.slane %v5178_v63, 6 }
0x24fd   :  { %7642 = vmatprep.subr.mxu1 %v7856_v34 }
0x24fe   :  { %v5520_v32 = vsel %vm734_vm9, %v5518_v39, %v5519_v41 }
0x25b4   :  { %v5259_v19 = vpop.f32.mrf.mxu1 }
0x25b5   :  { %v5263_v20 = vsel %vm644_vm10, %v5259_v19, -inf }
0x25b6   :  { %5264 = vmax.xlane.f32.xlu0 %v5263_v20  ;;  %v7631_v22 = vpop.f32.mrf.mxu1 }
0x263f   :  { %v5265_v13 = vpop.xlane.xlu0 %5264 }
0x2640   :  { %v5266_v23 = vsub.f32 %v5259_v19, %v5265_v13 }
0x2642   :  { %v5267_v24 = vmul.f32 1.442695, %v5266_v23 }
0x2644   :  { %7832 = vpow2.f32 %v5267_v24 }
0x2651   :  { %v7833_v25 = vpop.eup %7832 }
0x2652   :  { %v5269_v29 = vsel %vm644_vm10, %v7833_v25, 0.0 }
0x2653   :  { %5270 = vadd.xlane.f32.xlu1 %v5269_v29 }
0x26dc   :  { %v5271_v27 = vpop.xlane.xlu1 %5270 }
0x26dd   :  { %7834 = vrcp.f32 %v5271_v27 }
0x26ea   :  { %v7835_v35 = vpop.eup %7834 }
0x26eb   :  { %v5273_v56 = vmul.f32 %v7835_v35, %v7833_v25  ;;  %v6748_v25 = vld [vmem:[%s9068_s11 + $0x38] sm:$0xff] }
0x26ed   :  { %7635 = vmatmul.mubr.msk.f32.vlgmr.msra.gmra.mxu1 %vm656_vm11, %v5273_v56 }
0x26ee   :  { %7643 = vmatpush3.xpose.msk.msra.mxu1 %vm567_vm8, %v5431_v38  ;;  %7644 = vmatprep.mubr.msk.f32.mxu1 %vm7857_vm7, %v7856_v34 }
0x26ef   :  { %7652 = vmatprep.subr.mxu1 %v7856_v34 }
0x26f1   :  { %7645 = vmatmul.mubr.msk.f32.vlgmr.msra.gmra.mxu1 %vm567_vm8, %v5427_v18 }
0x26f2   :  { %7653 = vmatpush3.msra.mxu1 %v6747_v31  ;;  %7654 = vmatprep.mubr.msk.f32.mxu1 %vm7857_vm7, %v7856_v34 }
0x26f3   :  { %7668 = vmatprep.subr.mxu1 %v6728_v3 }
0x27ad   :  { %v5346_v30 = vpop.f32.mrf.mxu1 }
0x27ae   :  { %7640 = vmatmul.mubr.msk.f32.vlgmr.msra.gmra.mxu0 %vm567_vm8, %v5346_v30 }
0x27af   :  { %7648 = vmatpush3.msk.msra.mxu0 %vm206_vm2, %v5520_v32  ;;  %v7636_v26 = vpop.f32.mrf.mxu1  ;;  %7649 = vmatprep.mubr.msk.f32.mxu0 %vm7857_vm7, %v7856_v34 }
0x27b0   :  { %7657 = vmatprep.subr.mxu0 %v6712_v49 }
0x27b1   :  { %v5502_v42 = vpop.f32.mrf.mxu1 }
0x27b2   :  { %v5506_v28 = vsel %vm644_vm10, %v5502_v42, -inf }
0x27b3   :  { %5507 = vmax.xlane.f32.xlu0 %v5506_v28  ;;  %v7646_v43 = vpop.f32.mrf.mxu1 }
0x283c   :  { %v5508_v44 = vpop.xlane.xlu0 %5507 }
0x283d   :  { %v5509_v45 = vsub.f32 %v5502_v42, %v5508_v44 }
0x283f   :  { %v5510_v46 = vmul.f32 1.442695, %v5509_v45 }
0x2841   :  { %7836 = vpow2.f32 %v5510_v46 }
0x284e   :  { %v7837_v47 = vpop.eup %7836 }
0x284f   :  { %v5512_v48 = vsel %vm644_vm10, %v7837_v47, 0.0 }
0x2850   :  { %5513 = vadd.xlane.f32.xlu1 %v5512_v48 }
0x286e   :  { %v5419_v51 = vpop.f32.mrf.mxu0 }
0x286f   :  { %v8862_v52 = vadd.f32 %v5419_v51, %v4641_v50 }
0x2870   :  { %v7641_v53 = vpop.f32.mrf.mxu0 }
0x28d9   :  { %v5514_v54 = vpop.xlane.xlu1 %5513 }
0x28da   :  { %7838 = vrcp.f32 %v5514_v54 }
0x28e7   :  { %v7839_v55 = vpop.eup %7838 }
0x28e8   :  { %v5516_v57 = vmul.f32 %v7839_v55, %v7837_v47 }
0x28ea   :  { %7650 = vmatmul.mubr.msk.f32.vlgmr.msra.gmra.mxu0 %vm656_vm11, %v5516_v57 }
0x28eb   :  { %7658 = vmatpush3.msra.mxu0 %v6712_v49  ;;  %7665 = vmatprep.mubr.msk.f32.mxu0 %vm291_vm4, %v8597_v4 }
0x28ec   :  { %7659 = vmatprep.subr.mxu0 %v6711_v59 }
0x28ed   :  { %7660 = vmatpush3.msra.mxu0 %v6711_v59 }
0x28ee   :  { %7661 = vmatprep.subr.mxu0 %v6710_v40 }
0x28ef   :  { %7662 = vmatpush3.msra.mxu0 %v6710_v40 }
0x28f0   :  { %7663 = vmatprep.subr.mxu0 %v6709_v21 }
0x28f1   :  { %7664 = vmatpush3.msra.mxu0 %v6709_v21 }
0x28f2   :  { %7666 = vmatmul.mubr.msk.f32.vlgmr.msra.gmra.mxu0 %vm291_vm4, %v8599_v5  ;;  %7679 = vmatprep.subr.mxu0 %v6744_v61 }
0x28f3   :  { %7680 = vmatpush3.msra.mxu0 %v6744_v61  ;;  %7687 = vmatprep.mubr.msk.f32.mxu0 %vm291_vm4, %v8597_v4 }
0x28f4   :  { %7681 = vmatprep.subr.mxu0 %v6743_v62 }
0x28f5   :  { %7682 = vmatpush3.msra.mxu0 %v6743_v62 }
0x28f6   :  { %7683 = vmatprep.subr.mxu0 %v6742_v1 }
0x28f7   :  { %7684 = vmatpush3.msra.mxu0 %v6742_v1 }
0x28f8   :  { %7685 = vmatprep.subr.mxu0 %v6741_v2 }
0x28f9   :  { %7686 = vmatpush3.msra.mxu0 %v6741_v2 }
0x28fa   :  { %7688 = vmatmul.mubr.msk.f32.vlgmr.msra.gmra.mxu0 %vm291_vm4, %v8599_v5  ;;  %7700 = vmatprep.subr.mxu0 %v7856_v34 }
0x28fb   :  { %7702 = vmatprep.mubr.msk.f32.mxu0 %vm7857_vm7, %v7856_v34  ;;  %7701 = vmatpush3.msra.mxu0 %v6748_v25 }
0x28fc   :  { %7710 = vmatprep.subr.mxu0 %v7856_v34 }
0x29aa   :  { %v5592_v6 = vpop.f32.mrf.mxu0 }
0x29ab   :  { %7655 = vmatmul.mubr.msk.f32.vlgmr.msra.gmra.mxu1 %vm567_vm8, %v5592_v6 }
0x29ac   :  { %7669 = vmatpush3.msra.mxu1 %v6728_v3  ;;  %v7651_v8 = vpop.f32.mrf.mxu0  ;;  %7676 = vmatprep.mubr.msk.f32.mxu1 %vm291_vm4, %v8597_v4  ;;  %v4959_v4 = vadd.f32 %v8799_v0, %v8827_v11 }
0x29ad   :  { %7670 = vmatprep.subr.mxu1 %v6727_v7 }
0x29ae   :  { %7671 = vmatpush3.msra.mxu1 %v6727_v7 }
0x29af   :  { %7672 = vmatprep.subr.mxu1 %v6726_v9 }
0x29b0   :  { %7673 = vmatpush3.msra.mxu1 %v6726_v9 }
0x29b1   :  { %7674 = vmatprep.subr.mxu1 %v6725_v10 }
0x29b2   :  { %7675 = vmatpush3.msra.mxu1 %v6725_v10  ;;  %v7667_v16 = vpop.f32.mrf.mxu0 }
0x29b3   :  { %7677 = vmatmul.mubr.msk.f32.vlgmr.msra.gmra.mxu1 %vm291_vm4, %v8599_v5  ;;  %7690 = vmatprep.subr.mxu1 %v7856_v34  ;;  %v6134_v38 = vrot.slane %v7667_v16, 6 }
0x29b4   :  { %7692 = vmatprep.mubr.msk.f32.mxu1 %vm7857_vm7, %v7856_v34  ;;  %v5736_v17 = vpop.f32.mrf.mxu0 }
0x29b5   :  { %v6133_v36 = vrot.slane %v5736_v17, 6 }
0x29b7   :  { %v6135_v39 = vsel %vm734_vm9, %v6133_v36, %v6134_v38 }
0x29ba   :  { %v7689_v60 = vpop.f32.mrf.mxu0 }
0x29bb   :  { %v6227_v30 = vrot.slane %v7689_v60, 6  ;;  %v6755_v60 = vld [vmem:[%s9070_s15 + $0x38] sm:$0xff] }
0x29bc   :  { %v5886_v5 = vpop.f32.mrf.mxu0 }
0x29bd   :  { %v6226_v41 = vrot.slane %v5886_v5, 6 }
0x29bf   :  { %v6228_v26 = vsel %vm734_vm9, %v6226_v41, %v6227_v30 }
0x2a6b   :  { %v5665_v12 = vpop.f32.mrf.mxu1 }
0x2a6c   :  { %v8919_v14 = vadd.f32 %v5665_v12, %v4959_v4 }
0x2a6d   :  { %v7656_v15 = vpop.f32.mrf.mxu1 }
0x2a73   :  { %v7678_v18 = vpop.f32.mrf.mxu1 }
0x2a74   :  { %v6138_v33 = vrot.slane %v7678_v18, 6 }
0x2a75   :  { %v5811_v63 = vpop.f32.mrf.mxu1 }
0x2a76   :  { %7691 = vmatpush3.xpose.msk.msra.mxu1 %vm567_vm8, %v5811_v63  ;;  %v6137_v31 = vrot.slane %v5811_v63, 6  ;;  %v6754_v63 = vld [vmem:[%s9070_s15 + $0x30] sm:$0xff] }
0x2a77   :  { %7695 = vmatprep.subr.mxu1 %v7856_v34 }
0x2a78   :  { %v6139_v56 = vsel %vm734_vm9, %v6137_v31, %v6138_v33 }
0x2a79   :  { %7693 = vmatmul.mubr.msk.f32.vlgmr.msra.gmra.mxu1 %vm567_vm8, %v5736_v17 }
0x2a7a   :  { %7696 = vmatpush3.msk.msra.mxu1 %vm206_vm2, %v5886_v5  ;;  %7697 = vmatprep.mubr.msk.f32.mxu1 %vm7857_vm7, %v7856_v34  ;;  %v6753_v5 = vld [vmem:[%s9070_s15 + $0x28] sm:$0xff] }
0x2a7b   :  { %7705 = vmatprep.subr.mxu1 %v7856_v34 }
0x2b39   :  { %v5967_v0 = vpop.f32.mrf.mxu1 }
0x2b3a   :  { %v5971_v11 = vsel %vm644_vm10, %v5967_v0, -inf }
0x2b3b   :  { %5972 = vmax.xlane.f32.xlu0 %v5971_v11  ;;  %v7694_v19 = vpop.f32.mrf.mxu1  ;;  %v6772_v11 = vld [vmem:[%s9071_s17 + $0xf8] sm:$0xff] }
0x2b3c   :  { %v6771_v19 = vld [vmem:[%s9071_s17 + $0xf0] sm:$0xff] }
0x2bc4   :  { %v5973_v20 = vpop.xlane.xlu0 %5972 }
0x2bc5   :  { %v5974_v22 = vsub.f32 %v5967_v0, %v5973_v20  ;;  %v6752_v0 = vld [vmem:[%s9070_s15 + $0x20] sm:$0xff]  ;;  %v6770_v20 = vld [vmem:[%s9071_s17 + $0xe8] sm:$0xff] }
0x2bc7   :  { %v5975_v13 = vmul.f32 1.442695, %v5974_v22 }
0x2bc9   :  { %7840 = vpow2.f32 %v5975_v13 }
0x2bd6   :  { %v7841_v23 = vpop.eup %7840 }
0x2bd7   :  { %v5977_v24 = vsel %vm644_vm10, %v7841_v23, 0.0 }
0x2bd8   :  { %5978 = vadd.xlane.f32.xlu1 %v5977_v24 }
0x2c61   :  { %v5979_v29 = vpop.xlane.xlu1 %5978 }
0x2c62   :  { %7842 = vrcp.f32 %v5979_v29 }
0x2c6f   :  { %v7843_v27 = vpop.eup %7842 }
0x2c70   :  { %v5981_v35 = vmul.f32 %v7843_v27, %v7841_v23  ;;  %v6841_v27 = vld [vmem:[%s9072_s13 + $0x1] ss:$0 sm:$0xff] }
0x2c72   :  { %7698 = vmatmul.mubr.msk.f32.vlgmr.msra.gmra.mxu1 %vm656_vm11, %v5981_v35 }
0x2c73   :  { %7706 = vmatpush3.xpose.msk.msra.mxu1 %vm567_vm8, %v6139_v56  ;;  %7707 = vmatprep.mubr.msk.f32.mxu1 %vm7857_vm7, %v7856_v34  ;;  %v6842_v56 = vld [vmem:[%s9073_s14 + $0x1] ss:$0 sm:$0xff] }
0x2c74   :  { %7715 = vmatprep.subr.mxu1 %v7856_v34 }
0x2c76   :  { %7708 = vmatmul.mubr.msk.f32.vlgmr.msra.gmra.mxu1 %vm567_vm8, %v6135_v39 }
0x2c77   :  { %7716 = vmatpush3.msra.mxu1 %v6748_v25  ;;  %7717 = vmatprep.mubr.msk.f32.mxu1 %vm7857_vm7, %v7856_v34 }
0x2c78   :  { %7731 = vmatprep.subr.mxu1 %v6772_v11 }
0x2d32   :  { %v6054_v32 = vpop.f32.mrf.mxu1 }
0x2d33   :  { %7703 = vmatmul.mubr.msk.f32.vlgmr.msra.gmra.mxu0 %vm567_vm8, %v6054_v32  ;;  %v6769_v32 = vld [vmem:[%s9071_s17 + $0xe0] sm:$0xff] }
0x2d34   :  { %7711 = vmatpush3.msk.msra.mxu0 %vm206_vm2, %v6228_v26  ;;  %v7699_v42 = vpop.f32.mrf.mxu1  ;;  %7712 = vmatprep.mubr.msk.f32.mxu0 %vm7857_vm7, %v7856_v34  ;;  %v6768_v26 = vld [vmem:[%s9071_s17 + $0xd8] sm:$0xff] }
0x2d35   :  { %7720 = vmatprep.subr.mxu0 %v6755_v60  ;;  %v6767_v42 = vld [vmem:[%s9071_s17 + $0xd0] sm:$0xff] }
0x2d36   :  { %v6210_v28 = vpop.f32.mrf.mxu1 }
0x2d37   :  { %v6214_v43 = vsel %vm644_vm10, %v6210_v28, -inf }
0x2d38   :  { %6215 = vmax.xlane.f32.xlu0 %v6214_v43  ;;  %v7709_v44 = vpop.f32.mrf.mxu1  ;;  %v6765_v43 = vld [vmem:[%s9071_s17 + $0xc0] sm:$0xff] }
0x2d39   :  { %v6764_v44 = vld [vmem:[%s9071_s17 + $0xb8] sm:$0xff] }
0x2dc1   :  { %v6216_v45 = vpop.xlane.xlu0 %6215 }
0x2dc2   :  { %v6217_v46 = vsub.f32 %v6210_v28, %v6216_v45  ;;  %v6766_v28 = vld [vmem:[%s9071_s17 + $0xc8] sm:$0xff]  ;;  %v6763_v45 = vld [vmem:[%s9071_s17 + $0xb0] sm:$0xff] }
0x2dc4   :  { %v6218_v47 = vmul.f32 1.442695, %v6217_v46  ;;  %v6762_v46 = vld [vmem:[%s9071_s17 + $0xa8] sm:$0xff] }
0x2dc6   :  { %7844 = vpow2.f32 %v6218_v47  ;;  %v6761_v47 = vld [vmem:[%s9071_s17 + $0xa0] sm:$0xff] }
0x2dd3   :  { %v7845_v48 = vpop.eup %7844 }
0x2dd4   :  { %v6220_v49 = vsel %vm644_vm10, %v7845_v48, 0.0 }
0x2dd5   :  { %6221 = vadd.xlane.f32.xlu1 %v6220_v49  ;;  %v6759_v49 = vld [vmem:[%s9071_s17 + $0x90] sm:$0xff] }
0x2df3   :  { %v6127_v50 = vpop.f32.mrf.mxu0 }
0x2df4   :  { %v6131_v51 = vadd.f32 %v6127_v50, %v8862_v52  ;;  %v6840_v52 = vld [vmem:[%s9069_s12 + $0x1] ss:$0 sm:$0xff]  ;;  %v6758_v50 = vld [vmem:[%s9071_s17 + $0x88] sm:$0xff] }
0x2df5   :  { %v7704_v53 = vpop.f32.mrf.mxu0 }
0x2df6   :  { %v6843_v53 = vld [vmem:[%s9074_s16 + $0x1] ss:$0 sm:$0xff] }
0x2e5e   :  { %v6222_v54 = vpop.xlane.xlu1 %6221 }
0x2e5f   :  { %7846 = vrcp.f32 %v6222_v54 }
0x2e6c   :  { %v7847_v34 = vpop.eup %7846 }
0x2e6d   :  { %v6224_v55 = vmul.f32 %v7847_v34, %v7845_v48  ;;  %v6760_v48 = vld [vmem:[%s9071_s17 + $0x98] sm:$0xff] }
0x2e6f   :  { %7713 = vmatmul.mubr.msk.f32.vlgmr.msra.gmra.mxu0 %vm656_vm11, %v6224_v55 }
0x2e70   :  { %7721 = vmatpush3.msra.mxu0 %v6755_v60 }
0x2e71   :  { %7722 = vmatprep.subr.mxu0 %v6754_v63 }
0x2e72   :  { %7723 = vmatpush3.msra.mxu0 %v6754_v63 }
0x2e73   :  { %7724 = vmatprep.subr.mxu0 %v6753_v5 }
0x2e74   :  { %7725 = vmatpush3.msra.mxu0 %v6753_v5 }
0x2e75   :  { %7726 = vmatprep.subr.mxu0 %v6752_v0 }
0x2e76   :  { %7727 = vmatpush3.msra.mxu0 %v6752_v0 }
0x2f2f   :  { %v6300_v57 = vpop.f32.mrf.mxu0 }
0x2f30   :  { %7718 = vmatmul.mubr.msk.f32.vlgmr.msra.gmra.mxu1 %vm567_vm8, %v6300_v57 }
0x2f31   :  { %v7714_v59 = vpop.f32.mrf.mxu0  ;;  %7732 = vmatpush3.msra.mxu1 %v6772_v11 }
0x2f32   :  { %7733 = vmatprep.subr.mxu1 %v6771_v19 }
0x2f33   :  { %7734 = vmatpush3.msra.mxu1 %v6771_v19 }
0x2f34   :  { %7735 = vmatprep.subr.mxu1 %v6770_v20 }
0x2f35   :  { %7736 = vmatpush3.msra.mxu1 %v6770_v20 }
0x2f36   :  { %7737 = vmatprep.subr.mxu1 %v6769_v32 }
0x2f37   :  { %7738 = vmatpush3.msra.mxu1 %v6769_v32 }
0x2f38   :  { %7739 = vmatprep.subr.mxu1 %v6768_v26 }
0x2f39   :  { %7740 = vmatpush3.msra.mxu1 %v6768_v26 }
0x2f3a   :  { %7741 = vmatprep.subr.mxu1 %v6767_v42 }
0x2f3b   :  { %7742 = vmatpush3.msra.mxu1 %v6767_v42 }
0x2f3c   :  { %7743 = vmatprep.subr.mxu1 %v6766_v28 }
0x2f3d   :  { %7744 = vmatpush3.msra.mxu1 %v6766_v28 }
0x2f3e   :  { %7745 = vmatprep.subr.mxu1 %v6765_v43 }
0x2f3f   :  { %7746 = vmatpush3.msra.mxu1 %v6765_v43 }
0x2f40   :  { %7747 = vmatprep.subr.mxu1 %v6764_v44 }
0x2f41   :  { %7748 = vmatpush3.msra.mxu1 %v6764_v44 }
0x2f42   :  { %7749 = vmatprep.subr.mxu1 %v6763_v45 }
0x2f43   :  { %7750 = vmatpush3.msra.mxu1 %v6763_v45 }
0x2f44   :  { %7751 = vmatprep.subr.mxu1 %v6762_v46 }
0x2f45   :  { %7752 = vmatpush3.msra.mxu1 %v6762_v46 }
0x2f46   :  { %7753 = vmatprep.subr.mxu1 %v6761_v47 }
0x2f47   :  { %7754 = vmatpush3.msra.mxu1 %v6761_v47 }
0x2f48   :  { %7755 = vmatprep.subr.mxu1 %v6760_v48 }
0x2f49   :  { %7756 = vmatpush3.msra.mxu1 %v6760_v48 }
0x2f4a   :  { %7757 = vmatprep.subr.mxu1 %v6759_v49 }
0x2f4b   :  { %7758 = vmatpush3.msra.mxu1 %v6759_v49 }
0x2f4c   :  { %7759 = vmatprep.subr.mxu1 %v6758_v50 }
0x2f4d   :  { %7760 = vmatpush3.msra.mxu1 %v6758_v50 }
0x2ff0   :  { %v6373_v40 = vpop.f32.mrf.mxu1 }
0x2ff1   :  { %v6377_v21 = vadd.f32 %v6373_v40, %v8919_v14 }
0x2ff2   :  { %v7719_v61 = vpop.f32.mrf.mxu1 }
0x2ff3   :  { %v6379_v62 = vrot.slane %v6377_v21, 2 }
0x2ff5   :  { %v6381_v1 = vsel %vm206_vm2, %v6131_v51, %v6379_v62  ;;  %v6383_v2 = vadd.f32 %v6379_v62, %v8563_v58  ;;  %v6757_v51 = vld [vmem:[%s9071_s17 + $0x80] sm:$0xff] }
0x2ff6   :  { %v6382_v3 = vadd.f32 %v6381_v1, %v8566_v37  ;;  %7761 = vmatprep.subr.mxu1 %v6757_v51 }
0x2ff7   :  { %v8961_v6 = vadd.f32 %v6840_v52, %v6383_v2  ;;  %7762 = vmatpush3.msra.mxu1 %v6757_v51 }
0x2ff8   :  { %v8963_v7 = vadd.f32 %v6840_v52, %v6382_v3 }
0x2ff9   :  { %v6395_v8 = vsel %vm295_vm6, %v8961_v6, 0.0 }
0x2ffa   :  { %6396 = vadd.xlane.f32.xlu1 %v6395_v8  ;;  %v6392_v9 = vsel %vm291_vm4, %v8963_v7, 0.0 }
0x2ffb   :  { %6393 = vadd.xlane.f32.xlu0 %v6392_v9  ;;  %v6846_v9 = vld [vmem:[%s9075_s18 + $0x1] ss:$0 sm:$0xff] }
0x3083   :  { %v6397_v10 = vpop.xlane.xlu1 %6396 }
0x3084   :  { %v6399_v4 = vmul.f32 0.03125, %v6397_v10  ;;  %v6394_v12 = vpop.xlane.xlu0 %6393 }
0x3085   :  { %v6398_v14 = vmul.f32 0.03125, %v6394_v12 }
0x3086   :  { %v6401_v58 = vsub.f32 %v8961_v6, %v6399_v4 }
0x3087   :  { %v6400_v37 = vsub.f32 %v8963_v7, %v6398_v14 }
0x3088   :  { %v6403_v15 = vmul.f32 %v6401_v58, %v6401_v58 }
0x3089   :  { %v6402_v16 = vmul.f32 %v6400_v37, %v6400_v37 }
0x308a   :  { %v6407_v17 = vsel %vm295_vm6, %v6403_v15, 0.0 }
0x308b   :  { %6408 = vadd.xlane.f32.xlu1 %v6407_v17  ;;  %v6404_v18 = vsel %vm291_vm4, %v6402_v16, 0.0 }
0x308c   :  { %6405 = vadd.xlane.f32.xlu0 %v6404_v18 }
0x3114   :  { %v6409_v22 = vpop.xlane.xlu1 %6408 }
0x3115   :  { %v6411_v13 = vmul.f32 0.03125, %v6409_v22  ;;  %v6406_v23 = vpop.xlane.xlu0 %6405 }
0x3116   :  { %v6410_v24 = vmul.f32 0.03125, %v6406_v23 }
0x3117   :  { %v6413_v25 = vadd.f32 1e-05, %v6411_v13 }
0x3118   :  { %v6412_v29 = vadd.f32 1e-05, %v6410_v24 }
0x3119   :  { %7848 = vrsqrt.f32 %v6413_v25 }
0x311a   :  { %7850 = vrsqrt.f32 %v6412_v29 }
0x3126   :  { %v7849_v31 = vpop.eup %7848 }
0x3127   :  { %v7851_v33 = vpop.eup %7850  ;;  %v6417_v35 = vmul.f32 %v7849_v31, %v6401_v58 }
0x3128   :  { %v6416_v36 = vmul.f32 %v7851_v33, %v6400_v37 }
0x3129   :  { %v6425_v38 = vmul.f32 %v6841_v27, %v6417_v35 }
0x312a   :  { %v6424_v39 = vmul.f32 %v6841_v27, %v6416_v36 }
0x312b   :  { %v6433_v30 = vadd.f32 %v6842_v56, %v6425_v38 }
0x312c   :  { %v6432_v41 = vadd.f32 %v6842_v56, %v6424_v39 }
0x312e   :  { %7728 = vmatprep.mubr.msk.f32.mxu0 %vm291_vm4, %v6432_v41 }
0x312f   :  { %7729 = vmatmul.mubr.msk.f32.vlgmr.msra.gmra.mxu0 %vm291_vm4, %v6433_v30 }
0x31ef   :  { %v7730_v54 = vpop.f32.mrf.mxu0 }
0x31f0   :  { %v6518_v34 = vadd.f32 %v7730_v54, %v6843_v53 }
0x31f1   :  { %v6512_v55 = vpop.f32.mrf.mxu0 }
0x31f2   :  { %v6524_v57 = vmul.f32 0.70710677, %v6518_v34  ;;  %v6513_v59 = vadd.f32 %v6843_v53, %v6512_v55  ;;  %v6522_v2 = vmul.f32 0.5, %v6518_v34 }
0x31f4   :  { %7852 = verf.f32 %v6524_v57  ;;  %v6523_v40 = vmul.f32 0.70710677, %v6513_v59  ;;  %v6521_v52 = vmul.f32 0.5, %v6513_v59 }
0x31f6   :  { %7854 = verf.f32 %v6523_v40 }
0x3201   :  { %v7853_v21 = vpop.eup %7852 }
0x3202   :  { %v6528_v62 = vadd.f32 1.0, %v7853_v21 }
0x3203   :  { %v7855_v61 = vpop.eup %7854 }
0x3204   :  { %v6527_v1 = vadd.f32 1.0, %v7855_v61  ;;  %v6530_v8 = vmul.f32 %v6528_v62, %v6522_v2 }
0x3206   :  { %v6529_v3 = vmul.f32 %v6527_v1, %v6521_v52 }
0x3208   :  { %7763 = vmatprep.mubr.f32.mxu1 %v6529_v3 }
0x3209   :  { %7764 = vmatmul.mubr.f32.vlgmr.msra.gmra.mxu1 %v6530_v8 }
0x32c9   :  { %v7765_v10 = vpop.f32.mrf.mxu1 }
0x32ca   :  { %v6609_v4 = vadd.f32 %v7765_v10, %v6846_v9 }
0x32cb   :  { %v6603_v12 = vpop.f32.mrf.mxu1 }
0x32cc   :  { %v6613_v14 = vadd.f32 %v6609_v4, %v8961_v6  ;;  %v6604_v58 = vadd.f32 %v6846_v9, %v6603_v12 }
0x32ce   :  { %6615 = vst.msk [vmem:[%s9076_s19 + $0x8] sm:$0xf] %vm295_vm6, %v6613_v14  ;;  %v6612_v37 = vadd.f32 %v6604_v58, %v8963_v7 }
0x32d0   :  { %6614 = vst.msk [vmem:[%s9076_s19] sm:$0xff] %vm291_vm4, %v6612_v37 }

</bundles_post_ra>
